<compile_context>
chip_gen: v7x
topology: tpu7x:2x2x1
jax: 0.10.0
libtpu: 0.0.40
codegen_flags: <defaults>
</compile_context>

<pallas_src>
import functools
import numpy as np
import jax
import jax.numpy as jnp
from jax.experimental import pallas as pl
from jax.experimental.pallas import tpu as pltpu

EPS = 0.0003      # nn.BatchNorm2d(depth, momentum=0.0003): 2nd positional arg is eps
PAD = 18          # single shared spatial halo = max dilation
DILATIONS = (6, 12, 18)


def _round_up(v, m):
    return (v + m - 1) // m * m


# --------------------------------------------------------------------------- #
# Stage 1: branch pre-activations (aspp1..4), global-pool branch, per-sample
#          BN statistics (sum / sumsq).
# --------------------------------------------------------------------------- #
def _stage1_kernel(H, W, HW, Cp, Dp,
                   xp_ref, w1_ref, wt_ref, w5_ref,
                   y_ref, y5_ref, st_ref, tap_ref):
    def emit(i, y):                       # y: (HW, Dp) f32 pre-activation
        y_ref[0, :, i * Dp:(i + 1) * Dp] = y.astype(y_ref.dtype)
        st_ref[0, 0:1, i * Dp:(i + 1) * Dp] = jnp.sum(y, axis=0, keepdims=True)
        st_ref[0, 1:2, i * Dp:(i + 1) * Dp] = jnp.sum(y * y, axis=0,
                                                      keepdims=True)

    # branch 1: 1x1 conv on the un-padded center window
    xc = xp_ref[0, PAD:PAD + H, PAD:PAD + W, :].reshape(HW, Cp)       # bf16
    emit(0, jnp.dot(xc, w1_ref[...], preferred_element_type=jnp.float32))

    # branches 2-4: dilated 3x3 convs; 9 taps packed along K -> one matmul each
    for bi, d in enumerate(DILATIONS):
        for t in range(9):
            ky, kx = t // 3, t % 3
            r0 = PAD + (ky - 1) * d
            c0 = PAD + (kx - 1) * d
            tap_ref[:, t * Cp:(t + 1) * Cp] = (
                xp_ref[0, r0:r0 + H, c0:c0 + W, :].reshape(HW, Cp))
        emit(bi + 1, jnp.dot(tap_ref[...], wt_ref[bi],
                             preferred_element_type=jnp.float32))

    # branch 5: global avg pool -> 1x1 conv -> ReLU
    # (bilinear upsample of a 1x1 map with align_corners=True == broadcast,
    #  applied in stage 2 as a per-sample row add)
    xm = (jnp.sum(xc.astype(jnp.float32), axis=0, keepdims=True)
          * (1.0 / HW)).astype(jnp.bfloat16)                          # (1, Cp)
    y5_ref[0] = jnp.maximum(
        jnp.dot(xm, w5_ref[...], preferred_element_type=jnp.float32), 0.0)


# --------------------------------------------------------------------------- #
# Stage 2: BN+ReLU for branches 1..4 (precomputed scale/shift), fused concat +
#          1x1 conv2, branch-5 broadcast add, per-sample conv2 statistics.
# --------------------------------------------------------------------------- #
def _stage2_kernel(y_ref, y5_ref, ss_ref, w14_ref, w5c_ref, z_ref, zst_ref):
    scale = ss_ref[0:1, :]                                            # (1, 4*Dp)
    shift = ss_ref[1:2, :]
    yhat = jnp.maximum(y_ref[0].astype(jnp.float32) * scale + shift, 0.0)

    # concat(x1..x4) followed by 1x1 conv2 == single matmul with K = 4*Dp
    z = jnp.dot(yhat.astype(jnp.bfloat16), w14_ref[...],
                preferred_element_type=jnp.float32)                   # (HW, Dp)
    # branch-5 contribution: per-sample (1, Dp) row, broadcast over spatial rows
    y5 = y5_ref[0].astype(jnp.bfloat16)                               # (1, Dp)
    z = z + jnp.dot(y5, w5c_ref[...], preferred_element_type=jnp.float32)

    z_ref[0] = z.astype(z_ref.dtype)
    zst_ref[0, 0:1, :] = jnp.sum(z, axis=0, keepdims=True)
    zst_ref[0, 1:2, :] = jnp.sum(z * z, axis=0, keepdims=True)


# --------------------------------------------------------------------------- #
# Stage 3: bn2 + ReLU + conv3 (lane-dense padded output)
# --------------------------------------------------------------------------- #
def _stage3_kernel(z_ref, ss_ref, w3_ref, b3_ref, o_ref):
    zhat = jnp.maximum(z_ref[0].astype(jnp.float32) * ss_ref[0:1, :]
                       + ss_ref[1:2, :], 0.0)
    o = jnp.dot(zhat.astype(jnp.bfloat16), w3_ref[...],
                preferred_element_type=jnp.float32) + b3_ref[...]
    o_ref[0] = o.astype(o_ref.dtype)


# --------------------------------------------------------------------------- #
# Wrapper
# --------------------------------------------------------------------------- #
def aspp_forward(x_nchw, params, depth, num_classes):
    N, C, H, W = x_nchw.shape
    D, NC = depth, num_classes
    HW = H * W
    P = N * HW
    Cp = _round_up(C, 128)
    Dp = _round_up(D, 128)
    NCp = _round_up(NC, 128)
    Hp, Wp = H + 2 * PAD, W + 2 * PAD
    f32, bf16 = jnp.float32, jnp.bfloat16

    # --- host-side layout prep: pad channels to lane width, cast to bf16 ---
    x_nhwc = jnp.transpose(x_nchw, (0, 2, 3, 1)).astype(f32)
    xp = jnp.pad(x_nhwc, ((0, 0), (PAD, PAD), (PAD, PAD), (0, Cp - C))).astype(bf16)

    def pad2(w, r, c):
        return jnp.pad(w, ((0, r - w.shape[0]), (0, c - w.shape[1])))

    w1p = pad2(params['w1'], Cp, Dp).astype(bf16)
    w5p = pad2(params['w5'], Cp, Dp).astype(bf16)
    wtp = jnp.pad(params['wt'].reshape(3, 9, C, D),
                  ((0, 0), (0, 0), (0, Cp - C), (0, Dp - D))
                  ).reshape(3, 9 * Cp, Dp).astype(bf16)
    g = jnp.pad(params['gamma'], ((0, 0), (0, Dp - D))).astype(f32)    # (5, Dp)
    b = jnp.pad(params['beta'], ((0, 0), (0, Dp - D))).astype(f32)
    wc2_14 = jnp.pad(params['wc2'][:4 * D].reshape(4, D, D),
                     ((0, 0), (0, Dp - D), (0, Dp - D))
                     ).reshape(4 * Dp, Dp).astype(bf16)
    wc2_5 = pad2(params['wc2'][4 * D:], Dp, Dp).astype(bf16)
    wc3p = pad2(params['wc3'], Dp, NCp).astype(bf16)
    bc3p = pad2(params['bc3'], 1, NCp).astype(f32)

    # ---------------- stage 1 ----------------
    y_slab, y5, st14 = pl.pallas_call(
        functools.partial(_stage1_kernel, H, W, HW, Cp, Dp),
        grid=(N,),
        in_specs=[
            pl.BlockSpec((1, Hp, Wp, Cp), lambda n: (n, 0, 0, 0)),
            pl.BlockSpec((Cp, Dp), lambda n: (0, 0)),
            pl.BlockSpec((3, 9 * Cp, Dp), lambda n: (0, 0, 0)),
            pl.BlockSpec((Cp, Dp), lambda n: (0, 0)),
        ],
        out_specs=(
            pl.BlockSpec((1, HW, 4 * Dp), lambda n: (n, 0, 0)),
            pl.BlockSpec((1, 1, Dp), lambda n: (n, 0, 0)),
            pl.BlockSpec((1, 2, 4 * Dp), lambda n: (n, 0, 0)),
        ),
        out_shape=(
            jax.ShapeDtypeStruct((N, HW, 4 * Dp), bf16),
            jax.ShapeDtypeStruct((N, 1, Dp), f32),
            jax.ShapeDtypeStruct((N, 2, 4 * Dp), f32),
        ),
        scratch_shapes=[pltpu.VMEM((HW, 9 * Cp), bf16)],
        compiler_params=pltpu.CompilerParams(
            dimension_semantics=("parallel",)),
    )(xp, w1p, wtp, w5p)

    # BN scale/shift (training-mode: global batch stats, biased var) computed
    # once in the wrapper from the reduced per-sample statistics.
    def bn_scale_shift(stats, gamma, beta):
        mean = stats[0] * (1.0 / P)
        var = stats[1] * (1.0 / P) - mean * mean
        scale = jax.lax.rsqrt(var + EPS) * gamma
        return jnp.stack([scale, beta - mean * scale])

    ss14 = bn_scale_shift(jnp.sum(st14, axis=0),
                          g[:4].reshape(-1), b[:4].reshape(-1))        # (2, 4*Dp)

    # ---------------- stage 2 ----------------
    z_slab, zst = pl.pallas_call(
        _stage2_kernel,
        grid=(N,),
        in_specs=[
            pl.BlockSpec((1, HW, 4 * Dp), lambda n: (n, 0, 0)),
            pl.BlockSpec((1, 1, Dp), lambda n: (n, 0, 0)),
            pl.BlockSpec((2, 4 * Dp), lambda n: (0, 0)),
            pl.BlockSpec((4 * Dp, Dp), lambda n: (0, 0)),
            pl.BlockSpec((Dp, Dp), lambda n: (0, 0)),
        ],
        out_specs=(
            pl.BlockSpec((1, HW, Dp), lambda n: (n, 0, 0)),
            pl.BlockSpec((1, 2, Dp), lambda n: (n, 0, 0)),
        ),
        out_shape=(
            jax.ShapeDtypeStruct((N, HW, Dp), bf16),
            jax.ShapeDtypeStruct((N, 2, Dp), f32),
        ),
        compiler_params=pltpu.CompilerParams(
            dimension_semantics=("parallel",)),
    )(y_slab, y5, ss14, wc2_14, wc2_5)

    ss2 = bn_scale_shift(jnp.sum(zst, axis=0), g[4], b[4])             # (2, Dp)

    # ---------------- stage 3 ----------------
    out = pl.pallas_call(
        _stage3_kernel,
        grid=(N,),
        in_specs=[
            pl.BlockSpec((1, HW, Dp), lambda n: (n, 0, 0)),
            pl.BlockSpec((2, Dp), lambda n: (0, 0)),
            pl.BlockSpec((Dp, NCp), lambda n: (0, 0)),
            pl.BlockSpec((1, NCp), lambda n: (0, 0)),
        ],
        out_specs=pl.BlockSpec((1, HW, NCp), lambda n: (n, 0, 0)),
        out_shape=jax.ShapeDtypeStruct((N, HW, NCp), f32),
        compiler_params=pltpu.CompilerParams(
            dimension_semantics=("parallel",)),
    )(z_slab, ss2, wc3p, bc3p)

    out = out.reshape(N, H, W, NCp)[..., :NC]
    return jnp.transpose(out, (0, 3, 1, 2))


# --------------------------------------------------------------------------- #
# Params / pure-JAX reference (f32) for validation
# --------------------------------------------------------------------------- #
def init_params(key, C, D, NC):
    ks = jax.random.split(key, 8)
    s = 0.1
    return dict(
        w1=s * jax.random.normal(ks[0], (C, D), jnp.float32),       # aspp1 (1x1)
        wt=s * jax.random.normal(ks[1], (27, C, D), jnp.float32),   # aspp2/3/4 taps
        w5=s * jax.random.normal(ks[2], (C, D), jnp.float32),       # aspp5 (1x1)
        gamma=1.0 + 0.1 * jax.random.normal(ks[3], (5, D), jnp.float32),
        beta=0.1 * jax.random.normal(ks[4], (5, D), jnp.float32),
        wc2=s * jax.random.normal(ks[5], (5 * D, D), jnp.float32),  # conv2 (1x1)
        wc3=s * jax.random.normal(ks[6], (D, NC), jnp.float32),     # conv3 (1x1)
        bc3=0.1 * jax.random.normal(ks[7], (1, NC), jnp.float32),   # conv3 bias
    )


def aspp_reference(x_nchw, params, depth, num_classes):
    N, C, H, W = x_nchw.shape
    D, NC = depth, num_classes
    p = params

    def conv1x1(x, w):  # w: (Cin, Cout)
        k = jnp.transpose(w)[:, :, None, None]
        return jax.lax.conv_general_dilated(
            x, k, (1, 1), 'VALID', dimension_numbers=('NCHW', 'OIHW', 'NCHW'))

    def conv3x3(x, wt9, d):  # wt9: (9, Cin, Cout)
        k = jnp.transpose(wt9.reshape(3, 3, C, D), (3, 2, 0, 1))
        return jax.lax.conv_general_dilated(
            x, k, (1, 1), [(d, d), (d, d)], rhs_dilation=(d, d),
            dimension_numbers=('NCHW', 'OIHW', 'NCHW'))

    def bn_relu(y, g, b):
        mean = jnp.mean(y, axis=(0, 2, 3), keepdims=True)
        var = jnp.mean((y - mean) ** 2, axis=(0, 2, 3), keepdims=True)
        return jnp.maximum((y - mean) * jax.lax.rsqrt(var + EPS)
                           * g[None, :, None, None] + b[None, :, None, None], 0.0)

    x1 = bn_relu(conv1x1(x_nchw, p['w1']), p['gamma'][0], p['beta'][0])
    x2 = bn_relu(conv3x3(x_nchw, p['wt'][0:9], 6), p['gamma'][1], p['beta'][1])
    x3 = bn_relu(conv3x3(x_nchw, p['wt'][9:18], 12), p['gamma'][2], p['beta'][2])
    x4 = bn_relu(conv3x3(x_nchw, p['wt'][18:27], 18), p['gamma'][3], p['beta'][3])
    xm = jnp.mean(x_nchw, axis=(2, 3), keepdims=True)
    x5 = jnp.maximum(conv1x1(xm, p['w5']), 0.0)
    x5 = jnp.broadcast_to(x5, (N, D, H, W))
    cat = jnp.concatenate([x1, x2, x3, x4, x5], axis=1)
    z = bn_relu(conv1x1(cat, p['wc2']), p['gamma'][4], p['beta'][4])
    return conv1x1(z, p['wc3']) + p['bc3'].reshape(1, NC, 1, 1)


if __name__ == "__main__":
    key = jax.random.PRNGKey(0)
    kx, kp = jax.random.split(key)
    N, C, H, W = 2, 4, 16, 16
    depth, num_classes = 8, 3

    x = jax.random.normal(kx, (N, C, H, W), jnp.float32)
    params = init_params(kp, C, depth, num_classes)

    out = jax.block_until_ready(aspp_forward(x, params, depth, num_classes))
    assert out.shape == (N, num_classes, H, W)

    ref = jax.block_until_ready(aspp_reference(x, params, depth, num_classes))
    # bf16 matmul operands / bf16 inter-stage slabs (f32 stats & accumulation)
    # -> slightly relaxed tolerance.
    np.testing.assert_allclose(np.asarray(out), np.asarray(ref),
                               rtol=5e-2, atol=5e-2)
    print("KERNEL_OK")
</pallas_src>

<mosaic_0001>
module attributes {stable_mosaic.version = 11 : i64} {
  func.func @_stage1_kernel(%arg0: i32, %arg1: memref<1x52x52x128xbf16, #tpu.memory_space<vmem>>, %arg2: memref<128x128xbf16, #tpu.memory_space<vmem>>, %arg3: memref<3x1152x128xbf16, #tpu.memory_space<vmem>>, %arg4: memref<128x128xbf16, #tpu.memory_space<vmem>>, %arg5: memref<1x256x512xbf16, #tpu.memory_space<vmem>>, %arg6: memref<1x1x128xf32, #tpu.memory_space<vmem>>, %arg7: memref<1x2x512xf32, #tpu.memory_space<vmem>>, %arg8: memref<256x1152xbf16, #tpu.memory_space<vmem>>) attributes {dimension_semantics = [#tpu.dimension_semantics<parallel>], iteration_bounds = array<i64: 2>, scalar_prefetch = 0 : i64, scratch_operands = 1 : i64, tpu.core_type = #tpu.core_type<tc>, window_params = [{transform_indices = @transform_0, window_bounds = array<i64: 1, 52, 52, 128>}, {pipeline_mode = #tpu.pipeline_mode<synchronous>, transform_indices = @transform_1, window_bounds = array<i64: 128, 128>}, {pipeline_mode = #tpu.pipeline_mode<synchronous>, transform_indices = @transform_2, window_bounds = array<i64: 3, 1152, 128>}, {pipeline_mode = #tpu.pipeline_mode<synchronous>, transform_indices = @transform_3, window_bounds = array<i64: 128, 128>}, {transform_indices = @transform_4, window_bounds = array<i64: 1, 256, 512>}, {transform_indices = @transform_5, window_bounds = array<i64: 1, 1, 128>}, {transform_indices = @transform_6, window_bounds = array<i64: 1, 2, 512>}]} {
    %c0 = arith.constant 0 : index
    %c18 = arith.constant 18 : index
    %c18_0 = arith.constant 18 : index
    %c0_1 = arith.constant 0 : index
    %0 = vector.load %arg1[%c0, %c18, %c18_0, %c0_1] : memref<1x52x52x128xbf16, #tpu.memory_space<vmem>>, vector<1x16x16x128xbf16>
    %1 = vector.shape_cast %0 : vector<1x16x16x128xbf16> to vector<16x16x128xbf16>
    %2 = vector.shape_cast %1 : vector<16x16x128xbf16> to vector<256x128xbf16>
    %c0_2 = arith.constant 0 : index
    %c0_3 = arith.constant 0 : index
    %3 = vector.load %arg2[%c0_2, %c0_3] : memref<128x128xbf16, #tpu.memory_space<vmem>>, vector<128x128xbf16>
    %cst = arith.constant dense<0.000000e+00> : vector<256x128xf32>
    %4 = tpu.matmul %2, %3, %cst {dimension_numbers = #tpu.dot_dimension_numbers<[1], [0], [0], [1], [0, 0, 1, 1], [], []>} : vector<256x128xbf16>, vector<128x128xbf16>, vector<256x128xf32> -> vector<256x128xf32>
    %5 = arith.truncf %4 : vector<256x128xf32> to vector<256x128xbf16>
    %c0_4 = arith.constant 0 : index
    %c0_5 = arith.constant 0 : index
    %c0_6 = arith.constant 0 : index
    %6 = vector.load %arg5[%c0_4, %c0_5, %c0_6] : memref<1x256x512xbf16, #tpu.memory_space<vmem>>, vector<1x256x128xbf16>
    %7 = vector.shape_cast %6 : vector<1x256x128xbf16> to vector<256x128xbf16>
    %8 = vector.shape_cast %5 : vector<256x128xbf16> to vector<1x256x128xbf16>
    tpu.vector_store %arg5[%c0_4, %c0_5, %c0_6], %8 {strides = array<i32>} : memref<1x256x512xbf16, #tpu.memory_space<vmem>>, vector<1x256x128xbf16>,
    %cst_7 = arith.constant dense<0.000000e+00> : vector<128xf32>
    %9 = vector.multi_reduction <add>, %4, %cst_7 [0] : vector<256x128xf32> to vector<128xf32>
    %10 = vector.shape_cast %9 : vector<128xf32> to vector<1x128xf32>
    %c0_8 = arith.constant 0 : index
    %c0_9 = arith.constant 0 : index
    %c0_10 = arith.constant 0 : index
    %11 = vector.load %arg7[%c0_8, %c0_9, %c0_10] : memref<1x2x512xf32, #tpu.memory_space<vmem>>, vector<1x1x128xf32>
    %12 = vector.shape_cast %11 : vector<1x1x128xf32> to vector<1x128xf32>
    %13 = vector.shape_cast %10 : vector<1x128xf32> to vector<1x1x128xf32>
    tpu.vector_store %arg7[%c0_8, %c0_9, %c0_10], %13 {strides = array<i32>} : memref<1x2x512xf32, #tpu.memory_space<vmem>>, vector<1x1x128xf32>,
    %14 = arith.mulf %4, %4 : vector<256x128xf32>
    %cst_11 = arith.constant dense<0.000000e+00> : vector<128xf32>
    %15 = vector.multi_reduction <add>, %14, %cst_11 [0] : vector<256x128xf32> to vector<128xf32>
    %16 = vector.shape_cast %15 : vector<128xf32> to vector<1x128xf32>
    %c0_12 = arith.constant 0 : index
    %c1 = arith.constant 1 : index
    %c0_13 = arith.constant 0 : index
    %17 = vector.load %arg7[%c0_12, %c1, %c0_13] : memref<1x2x512xf32, #tpu.memory_space<vmem>>, vector<1x1x128xf32>
    %18 = vector.shape_cast %17 : vector<1x1x128xf32> to vector<1x128xf32>
    %19 = vector.shape_cast %16 : vector<1x128xf32> to vector<1x1x128xf32>
    tpu.vector_store %arg7[%c0_12, %c1, %c0_13], %19 {strides = array<i32>} : memref<1x2x512xf32, #tpu.memory_space<vmem>>, vector<1x1x128xf32>,
    %c0_14 = arith.constant 0 : index
    %c12 = arith.constant 12 : index
    %c12_15 = arith.constant 12 : index
    %c0_16 = arith.constant 0 : index
    %20 = vector.load %arg1[%c0_14, %c12, %c12_15, %c0_16] : memref<1x52x52x128xbf16, #tpu.memory_space<vmem>>, vector<1x16x16x128xbf16>
    %21 = vector.shape_cast %20 : vector<1x16x16x128xbf16> to vector<16x16x128xbf16>
    %22 = vector.shape_cast %21 : vector<16x16x128xbf16> to vector<256x128xbf16>
    %c0_17 = arith.constant 0 : index
    %c0_18 = arith.constant 0 : index
    %23 = vector.load %arg8[%c0_17, %c0_18] : memref<256x1152xbf16, #tpu.memory_space<vmem>>, vector<256x128xbf16>
    tpu.vector_store %arg8[%c0_17, %c0_18], %22 {strides = array<i32>} : memref<256x1152xbf16, #tpu.memory_space<vmem>>, vector<256x128xbf16>,
    %c0_19 = arith.constant 0 : index
    %c12_20 = arith.constant 12 : index
    %c18_21 = arith.constant 18 : index
    %c0_22 = arith.constant 0 : index
    %24 = vector.load %arg1[%c0_19, %c12_20, %c18_21, %c0_22] : memref<1x52x52x128xbf16, #tpu.memory_space<vmem>>, vector<1x16x16x128xbf16>
    %25 = vector.shape_cast %24 : vector<1x16x16x128xbf16> to vector<16x16x128xbf16>
    %26 = vector.shape_cast %25 : vector<16x16x128xbf16> to vector<256x128xbf16>
    %c0_23 = arith.constant 0 : index
    %c128 = arith.constant 128 : index
    %27 = vector.load %arg8[%c0_23, %c128] : memref<256x1152xbf16, #tpu.memory_space<vmem>>, vector<256x128xbf16>
    tpu.vector_store %arg8[%c0_23, %c128], %26 {strides = array<i32>} : memref<256x1152xbf16, #tpu.memory_space<vmem>>, vector<256x128xbf16>,
    %c0_24 = arith.constant 0 : index
    %c12_25 = arith.constant 12 : index
    %c24 = arith.constant 24 : index
    %c0_26 = arith.constant 0 : index
    %28 = vector.load %arg1[%c0_24, %c12_25, %c24, %c0_26] : memref<1x52x52x128xbf16, #tpu.memory_space<vmem>>, vector<1x16x16x128xbf16>
    %29 = vector.shape_cast %28 : vector<1x16x16x128xbf16> to vector<16x16x128xbf16>
    %30 = vector.shape_cast %29 : vector<16x16x128xbf16> to vector<256x128xbf16>
    %c0_27 = arith.constant 0 : index
    %c256 = arith.constant 256 : index
    %31 = vector.load %arg8[%c0_27, %c256] : memref<256x1152xbf16, #tpu.memory_space<vmem>>, vector<256x128xbf16>
    tpu.vector_store %arg8[%c0_27, %c256], %30 {strides = array<i32>} : memref<256x1152xbf16, #tpu.memory_space<vmem>>, vector<256x128xbf16>,
    %c0_28 = arith.constant 0 : index
    %c18_29 = arith.constant 18 : index
    %c12_30 = arith.constant 12 : index
    %c0_31 = arith.constant 0 : index
    %32 = vector.load %arg1[%c0_28, %c18_29, %c12_30, %c0_31] : memref<1x52x52x128xbf16, #tpu.memory_space<vmem>>, vector<1x16x16x128xbf16>
    %33 = vector.shape_cast %32 : vector<1x16x16x128xbf16> to vector<16x16x128xbf16>
    %34 = vector.shape_cast %33 : vector<16x16x128xbf16> to vector<256x128xbf16>
    %c0_32 = arith.constant 0 : index
    %c384 = arith.constant 384 : index
    %35 = vector.load %arg8[%c0_32, %c384] : memref<256x1152xbf16, #tpu.memory_space<vmem>>, vector<256x128xbf16>
    tpu.vector_store %arg8[%c0_32, %c384], %34 {strides = array<i32>} : memref<256x1152xbf16, #tpu.memory_space<vmem>>, vector<256x128xbf16>,
    %c0_33 = arith.constant 0 : index
    %c18_34 = arith.constant 18 : index
    %c18_35 = arith.constant 18 : index
    %c0_36 = arith.constant 0 : index
    %36 = vector.load %arg1[%c0_33, %c18_34, %c18_35, %c0_36] : memref<1x52x52x128xbf16, #tpu.memory_space<vmem>>, vector<1x16x16x128xbf16>
    %37 = vector.shape_cast %36 : vector<1x16x16x128xbf16> to vector<16x16x128xbf16>
    %38 = vector.shape_cast %37 : vector<16x16x128xbf16> to vector<256x128xbf16>
    %c0_37 = arith.constant 0 : index
    %c512 = arith.constant 512 : index
    %39 = vector.load %arg8[%c0_37, %c512] : memref<256x1152xbf16, #tpu.memory_space<vmem>>, vector<256x128xbf16>
    tpu.vector_store %arg8[%c0_37, %c512], %38 {strides = array<i32>} : memref<256x1152xbf16, #tpu.memory_space<vmem>>, vector<256x128xbf16>,
    %c0_38 = arith.constant 0 : index
    %c18_39 = arith.constant 18 : index
    %c24_40 = arith.constant 24 : index
    %c0_41 = arith.constant 0 : index
    %40 = vector.load %arg1[%c0_38, %c18_39, %c24_40, %c0_41] : memref<1x52x52x128xbf16, #tpu.memory_space<vmem>>, vector<1x16x16x128xbf16>
    %41 = vector.shape_cast %40 : vector<1x16x16x128xbf16> to vector<16x16x128xbf16>
    %42 = vector.shape_cast %41 : vector<16x16x128xbf16> to vector<256x128xbf16>
    %c0_42 = arith.constant 0 : index
    %c640 = arith.constant 640 : index
    %43 = vector.load %arg8[%c0_42, %c640] : memref<256x1152xbf16, #tpu.memory_space<vmem>>, vector<256x128xbf16>
    tpu.vector_store %arg8[%c0_42, %c640], %42 {strides = array<i32>} : memref<256x1152xbf16, #tpu.memory_space<vmem>>, vector<256x128xbf16>,
    %c0_43 = arith.constant 0 : index
    %c24_44 = arith.constant 24 : index
    %c12_45 = arith.constant 12 : index
    %c0_46 = arith.constant 0 : index
    %44 = vector.load %arg1[%c0_43, %c24_44, %c12_45, %c0_46] : memref<1x52x52x128xbf16, #tpu.memory_space<vmem>>, vector<1x16x16x128xbf16>
    %45 = vector.shape_cast %44 : vector<1x16x16x128xbf16> to vector<16x16x128xbf16>
    %46 = vector.shape_cast %45 : vector<16x16x128xbf16> to vector<256x128xbf16>
    %c0_47 = arith.constant 0 : index
    %c768 = arith.constant 768 : index
    %47 = vector.load %arg8[%c0_47, %c768] : memref<256x1152xbf16, #tpu.memory_space<vmem>>, vector<256x128xbf16>
    tpu.vector_store %arg8[%c0_47, %c768], %46 {strides = array<i32>} : memref<256x1152xbf16, #tpu.memory_space<vmem>>, vector<256x128xbf16>,
    %c0_48 = arith.constant 0 : index
    %c24_49 = arith.constant 24 : index
    %c18_50 = arith.constant 18 : index
    %c0_51 = arith.constant 0 : index
    %48 = vector.load %arg1[%c0_48, %c24_49, %c18_50, %c0_51] : memref<1x52x52x128xbf16, #tpu.memory_space<vmem>>, vector<1x16x16x128xbf16>
    %49 = vector.shape_cast %48 : vector<1x16x16x128xbf16> to vector<16x16x128xbf16>
    %50 = vector.shape_cast %49 : vector<16x16x128xbf16> to vector<256x128xbf16>
    %c0_52 = arith.constant 0 : index
    %c896 = arith.constant 896 : index
    %51 = vector.load %arg8[%c0_52, %c896] : memref<256x1152xbf16, #tpu.memory_space<vmem>>, vector<256x128xbf16>
    tpu.vector_store %arg8[%c0_52, %c896], %50 {strides = array<i32>} : memref<256x1152xbf16, #tpu.memory_space<vmem>>, vector<256x128xbf16>,
    %c0_53 = arith.constant 0 : index
    %c24_54 = arith.constant 24 : index
    %c24_55 = arith.constant 24 : index
    %c0_56 = arith.constant 0 : index
    %52 = vector.load %arg1[%c0_53, %c24_54, %c24_55, %c0_56] : memref<1x52x52x128xbf16, #tpu.memory_space<vmem>>, vector<1x16x16x128xbf16>
    %53 = vector.shape_cast %52 : vector<1x16x16x128xbf16> to vector<16x16x128xbf16>
    %54 = vector.shape_cast %53 : vector<16x16x128xbf16> to vector<256x128xbf16>
    %c0_57 = arith.constant 0 : index
    %c1024 = arith.constant 1024 : index
    %55 = vector.load %arg8[%c0_57, %c1024] : memref<256x1152xbf16, #tpu.memory_space<vmem>>, vector<256x128xbf16>
    tpu.vector_store %arg8[%c0_57, %c1024], %54 {strides = array<i32>} : memref<256x1152xbf16, #tpu.memory_space<vmem>>, vector<256x128xbf16>,
    %c0_58 = arith.constant 0 : index
    %c0_59 = arith.constant 0 : index
    %56 = vector.load %arg8[%c0_58, %c0_59] : memref<256x1152xbf16, #tpu.memory_space<vmem>>, vector<256x1152xbf16>
    %c0_60 = arith.constant 0 : index
    %c0_61 = arith.constant 0 : index
    %c0_62 = arith.constant 0 : index
    %57 = vector.load %arg3[%c0_60, %c0_61, %c0_62] : memref<3x1152x128xbf16, #tpu.memory_space<vmem>>, vector<1x1152x128xbf16>
    %58 = vector.shape_cast %57 : vector<1x1152x128xbf16> to vector<1152x128xbf16>
    %cst_63 = arith.constant dense<0.000000e+00> : vector<256x128xf32>
    %59 = tpu.matmul %56, %58, %cst_63 {dimension_numbers = #tpu.dot_dimension_numbers<[1], [0], [0], [1], [0, 0, 1, 1], [], []>} : vector<256x1152xbf16>, vector<1152x128xbf16>, vector<256x128xf32> -> vector<256x128xf32>
    %60 = arith.truncf %59 : vector<256x128xf32> to vector<256x128xbf16>
    %c0_64 = arith.constant 0 : index
    %c0_65 = arith.constant 0 : index
    %c128_66 = arith.constant 128 : index
    %61 = vector.load %arg5[%c0_64, %c0_65, %c128_66] : memref<1x256x512xbf16, #tpu.memory_space<vmem>>, vector<1x256x128xbf16>
    %62 = vector.shape_cast %61 : vector<1x256x128xbf16> to vector<256x128xbf16>
    %63 = vector.shape_cast %60 : vector<256x128xbf16> to vector<1x256x128xbf16>
    tpu.vector_store %arg5[%c0_64, %c0_65, %c128_66], %63 {strides = array<i32>} : memref<1x256x512xbf16, #tpu.memory_space<vmem>>, vector<1x256x128xbf16>,
    %cst_67 = arith.constant dense<0.000000e+00> : vector<128xf32>
    %64 = vector.multi_reduction <add>, %59, %cst_67 [0] : vector<256x128xf32> to vector<128xf32>
    %65 = vector.shape_cast %64 : vector<128xf32> to vector<1x128xf32>
    %c0_68 = arith.constant 0 : index
    %c0_69 = arith.constant 0 : index
    %c128_70 = arith.constant 128 : index
    %66 = vector.load %arg7[%c0_68, %c0_69, %c128_70] : memref<1x2x512xf32, #tpu.memory_space<vmem>>, vector<1x1x128xf32>
    %67 = vector.shape_cast %66 : vector<1x1x128xf32> to vector<1x128xf32>
    %68 = vector.shape_cast %65 : vector<1x128xf32> to vector<1x1x128xf32>
    tpu.vector_store %arg7[%c0_68, %c0_69, %c128_70], %68 {strides = array<i32>} : memref<1x2x512xf32, #tpu.memory_space<vmem>>, vector<1x1x128xf32>,
    %69 = arith.mulf %59, %59 : vector<256x128xf32>
    %cst_71 = arith.constant dense<0.000000e+00> : vector<128xf32>
    %70 = vector.multi_reduction <add>, %69, %cst_71 [0] : vector<256x128xf32> to vector<128xf32>
    %71 = vector.shape_cast %70 : vector<128xf32> to vector<1x128xf32>
    %c0_72 = arith.constant 0 : index
    %c1_73 = arith.constant 1 : index
    %c128_74 = arith.constant 128 : index
    %72 = vector.load %arg7[%c0_72, %c1_73, %c128_74] : memref<1x2x512xf32, #tpu.memory_space<vmem>>, vector<1x1x128xf32>
    %73 = vector.shape_cast %72 : vector<1x1x128xf32> to vector<1x128xf32>
    %74 = vector.shape_cast %71 : vector<1x128xf32> to vector<1x1x128xf32>
    tpu.vector_store %arg7[%c0_72, %c1_73, %c128_74], %74 {strides = array<i32>} : memref<1x2x512xf32, #tpu.memory_space<vmem>>, vector<1x1x128xf32>,
    %c0_75 = arith.constant 0 : index
    %c6 = arith.constant 6 : index
    %c6_76 = arith.constant 6 : index
    %c0_77 = arith.constant 0 : index
    %75 = vector.load %arg1[%c0_75, %c6, %c6_76, %c0_77] : memref<1x52x52x128xbf16, #tpu.memory_space<vmem>>, vector<1x16x16x128xbf16>
    %76 = vector.shape_cast %75 : vector<1x16x16x128xbf16> to vector<16x16x128xbf16>
    %77 = vector.shape_cast %76 : vector<16x16x128xbf16> to vector<256x128xbf16>
    %c0_78 = arith.constant 0 : index
    %c0_79 = arith.constant 0 : index
    %78 = vector.load %arg8[%c0_78, %c0_79] : memref<256x1152xbf16, #tpu.memory_space<vmem>>, vector<256x128xbf16>
    tpu.vector_store %arg8[%c0_78, %c0_79], %77 {strides = array<i32>} : memref<256x1152xbf16, #tpu.memory_space<vmem>>, vector<256x128xbf16>,
    %c0_80 = arith.constant 0 : index
    %c6_81 = arith.constant 6 : index
    %c18_82 = arith.constant 18 : index
    %c0_83 = arith.constant 0 : index
    %79 = vector.load %arg1[%c0_80, %c6_81, %c18_82, %c0_83] : memref<1x52x52x128xbf16, #tpu.memory_space<vmem>>, vector<1x16x16x128xbf16>
    %80 = vector.shape_cast %79 : vector<1x16x16x128xbf16> to vector<16x16x128xbf16>
    %81 = vector.shape_cast %80 : vector<16x16x128xbf16> to vector<256x128xbf16>
    %c0_84 = arith.constant 0 : index
    %c128_85 = arith.constant 128 : index
    %82 = vector.load %arg8[%c0_84, %c128_85] : memref<256x1152xbf16, #tpu.memory_space<vmem>>, vector<256x128xbf16>
    tpu.vector_store %arg8[%c0_84, %c128_85], %81 {strides = array<i32>} : memref<256x1152xbf16, #tpu.memory_space<vmem>>, vector<256x128xbf16>,
    %c0_86 = arith.constant 0 : index
    %c6_87 = arith.constant 6 : index
    %c30 = arith.constant 30 : index
    %c0_88 = arith.constant 0 : index
    %83 = vector.load %arg1[%c0_86, %c6_87, %c30, %c0_88] : memref<1x52x52x128xbf16, #tpu.memory_space<vmem>>, vector<1x16x16x128xbf16>
    %84 = vector.shape_cast %83 : vector<1x16x16x128xbf16> to vector<16x16x128xbf16>
    %85 = vector.shape_cast %84 : vector<16x16x128xbf16> to vector<256x128xbf16>
    %c0_89 = arith.constant 0 : index
    %c256_90 = arith.constant 256 : index
    %86 = vector.load %arg8[%c0_89, %c256_90] : memref<256x1152xbf16, #tpu.memory_space<vmem>>, vector<256x128xbf16>
    tpu.vector_store %arg8[%c0_89, %c256_90], %85 {strides = array<i32>} : memref<256x1152xbf16, #tpu.memory_space<vmem>>, vector<256x128xbf16>,
    %c0_91 = arith.constant 0 : index
    %c18_92 = arith.constant 18 : index
    %c6_93 = arith.constant 6 : index
    %c0_94 = arith.constant 0 : index
    %87 = vector.load %arg1[%c0_91, %c18_92, %c6_93, %c0_94] : memref<1x52x52x128xbf16, #tpu.memory_space<vmem>>, vector<1x16x16x128xbf16>
    %88 = vector.shape_cast %87 : vector<1x16x16x128xbf16> to vector<16x16x128xbf16>
    %89 = vector.shape_cast %88 : vector<16x16x128xbf16> to vector<256x128xbf16>
    %c0_95 = arith.constant 0 : index
    %c384_96 = arith.constant 384 : index
    %90 = vector.load %arg8[%c0_95, %c384_96] : memref<256x1152xbf16, #tpu.memory_space<vmem>>, vector<256x128xbf16>
    tpu.vector_store %arg8[%c0_95, %c384_96], %89 {strides = array<i32>} : memref<256x1152xbf16, #tpu.memory_space<vmem>>, vector<256x128xbf16>,
    %c0_97 = arith.constant 0 : index
    %c18_98 = arith.constant 18 : index
    %c18_99 = arith.constant 18 : index
    %c0_100 = arith.constant 0 : index
    %91 = vector.load %arg1[%c0_97, %c18_98, %c18_99, %c0_100] : memref<1x52x52x128xbf16, #tpu.memory_space<vmem>>, vector<1x16x16x128xbf16>
    %92 = vector.shape_cast %91 : vector<1x16x16x128xbf16> to vector<16x16x128xbf16>
    %93 = vector.shape_cast %92 : vector<16x16x128xbf16> to vector<256x128xbf16>
    %c0_101 = arith.constant 0 : index
    %c512_102 = arith.constant 512 : index
    %94 = vector.load %arg8[%c0_101, %c512_102] : memref<256x1152xbf16, #tpu.memory_space<vmem>>, vector<256x128xbf16>
    tpu.vector_store %arg8[%c0_101, %c512_102], %93 {strides = array<i32>} : memref<256x1152xbf16, #tpu.memory_space<vmem>>, vector<256x128xbf16>,
    %c0_103 = arith.constant 0 : index
    %c18_104 = arith.constant 18 : index
    %c30_105 = arith.constant 30 : index
    %c0_106 = arith.constant 0 : index
    %95 = vector.load %arg1[%c0_103, %c18_104, %c30_105, %c0_106] : memref<1x52x52x128xbf16, #tpu.memory_space<vmem>>, vector<1x16x16x128xbf16>
    %96 = vector.shape_cast %95 : vector<1x16x16x128xbf16> to vector<16x16x128xbf16>
    %97 = vector.shape_cast %96 : vector<16x16x128xbf16> to vector<256x128xbf16>
    %c0_107 = arith.constant 0 : index
    %c640_108 = arith.constant 640 : index
    %98 = vector.load %arg8[%c0_107, %c640_108] : memref<256x1152xbf16, #tpu.memory_space<vmem>>, vector<256x128xbf16>
    tpu.vector_store %arg8[%c0_107, %c640_108], %97 {strides = array<i32>} : memref<256x1152xbf16, #tpu.memory_space<vmem>>, vector<256x128xbf16>,
    %c0_109 = arith.constant 0 : index
    %c30_110 = arith.constant 30 : index
    %c6_111 = arith.constant 6 : index
    %c0_112 = arith.constant 0 : index
    %99 = vector.load %arg1[%c0_109, %c30_110, %c6_111, %c0_112] : memref<1x52x52x128xbf16, #tpu.memory_space<vmem>>, vector<1x16x16x128xbf16>
    %100 = vector.shape_cast %99 : vector<1x16x16x128xbf16> to vector<16x16x128xbf16>
    %101 = vector.shape_cast %100 : vector<16x16x128xbf16> to vector<256x128xbf16>
    %c0_113 = arith.constant 0 : index
    %c768_114 = arith.constant 768 : index
    %102 = vector.load %arg8[%c0_113, %c768_114] : memref<256x1152xbf16, #tpu.memory_space<vmem>>, vector<256x128xbf16>
    tpu.vector_store %arg8[%c0_113, %c768_114], %101 {strides = array<i32>} : memref<256x1152xbf16, #tpu.memory_space<vmem>>, vector<256x128xbf16>,
    %c0_115 = arith.constant 0 : index
    %c30_116 = arith.constant 30 : index
    %c18_117 = arith.constant 18 : index
    %c0_118 = arith.constant 0 : index
    %103 = vector.load %arg1[%c0_115, %c30_116, %c18_117, %c0_118] : memref<1x52x52x128xbf16, #tpu.memory_space<vmem>>, vector<1x16x16x128xbf16>
    %104 = vector.shape_cast %103 : vector<1x16x16x128xbf16> to vector<16x16x128xbf16>
    %105 = vector.shape_cast %104 : vector<16x16x128xbf16> to vector<256x128xbf16>
    %c0_119 = arith.constant 0 : index
    %c896_120 = arith.constant 896 : index
    %106 = vector.load %arg8[%c0_119, %c896_120] : memref<256x1152xbf16, #tpu.memory_space<vmem>>, vector<256x128xbf16>
    tpu.vector_store %arg8[%c0_119, %c896_120], %105 {strides = array<i32>} : memref<256x1152xbf16, #tpu.memory_space<vmem>>, vector<256x128xbf16>,
    %c0_121 = arith.constant 0 : index
    %c30_122 = arith.constant 30 : index
    %c30_123 = arith.constant 30 : index
    %c0_124 = arith.constant 0 : index
    %107 = vector.load %arg1[%c0_121, %c30_122, %c30_123, %c0_124] : memref<1x52x52x128xbf16, #tpu.memory_space<vmem>>, vector<1x16x16x128xbf16>
    %108 = vector.shape_cast %107 : vector<1x16x16x128xbf16> to vector<16x16x128xbf16>
    %109 = vector.shape_cast %108 : vector<16x16x128xbf16> to vector<256x128xbf16>
    %c0_125 = arith.constant 0 : index
    %c1024_126 = arith.constant 1024 : index
    %110 = vector.load %arg8[%c0_125, %c1024_126] : memref<256x1152xbf16, #tpu.memory_space<vmem>>, vector<256x128xbf16>
    tpu.vector_store %arg8[%c0_125, %c1024_126], %109 {strides = array<i32>} : memref<256x1152xbf16, #tpu.memory_space<vmem>>, vector<256x128xbf16>,
    %c0_127 = arith.constant 0 : index
    %c0_128 = arith.constant 0 : index
    %111 = vector.load %arg8[%c0_127, %c0_128] : memref<256x1152xbf16, #tpu.memory_space<vmem>>, vector<256x1152xbf16>
    %c1_129 = arith.constant 1 : index
    %c0_130 = arith.constant 0 : index
    %c0_131 = arith.constant 0 : index
    %112 = vector.load %arg3[%c1_129, %c0_130, %c0_131] : memref<3x1152x128xbf16, #tpu.memory_space<vmem>>, vector<1x1152x128xbf16>
    %113 = vector.shape_cast %112 : vector<1x1152x128xbf16> to vector<1152x128xbf16>
    %cst_132 = arith.constant dense<0.000000e+00> : vector<256x128xf32>
    %114 = tpu.matmul %111, %113, %cst_132 {dimension_numbers = #tpu.dot_dimension_numbers<[1], [0], [0], [1], [0, 0, 1, 1], [], []>} : vector<256x1152xbf16>, vector<1152x128xbf16>, vector<256x128xf32> -> vector<256x128xf32>
    %115 = arith.truncf %114 : vector<256x128xf32> to vector<256x128xbf16>
    %c0_133 = arith.constant 0 : index
    %c0_134 = arith.constant 0 : index
    %c256_135 = arith.constant 256 : index
    %116 = vector.load %arg5[%c0_133, %c0_134, %c256_135] : memref<1x256x512xbf16, #tpu.memory_space<vmem>>, vector<1x256x128xbf16>
    %117 = vector.shape_cast %116 : vector<1x256x128xbf16> to vector<256x128xbf16>
    %118 = vector.shape_cast %115 : vector<256x128xbf16> to vector<1x256x128xbf16>
    tpu.vector_store %arg5[%c0_133, %c0_134, %c256_135], %118 {strides = array<i32>} : memref<1x256x512xbf16, #tpu.memory_space<vmem>>, vector<1x256x128xbf16>,
    %cst_136 = arith.constant dense<0.000000e+00> : vector<128xf32>
    %119 = vector.multi_reduction <add>, %114, %cst_136 [0] : vector<256x128xf32> to vector<128xf32>
    %120 = vector.shape_cast %119 : vector<128xf32> to vector<1x128xf32>
    %c0_137 = arith.constant 0 : index
    %c0_138 = arith.constant 0 : index
    %c256_139 = arith.constant 256 : index
    %121 = vector.load %arg7[%c0_137, %c0_138, %c256_139] : memref<1x2x512xf32, #tpu.memory_space<vmem>>, vector<1x1x128xf32>
    %122 = vector.shape_cast %121 : vector<1x1x128xf32> to vector<1x128xf32>
    %123 = vector.shape_cast %120 : vector<1x128xf32> to vector<1x1x128xf32>
    tpu.vector_store %arg7[%c0_137, %c0_138, %c256_139], %123 {strides = array<i32>} : memref<1x2x512xf32, #tpu.memory_space<vmem>>, vector<1x1x128xf32>,
    %124 = arith.mulf %114, %114 : vector<256x128xf32>
    %cst_140 = arith.constant dense<0.000000e+00> : vector<128xf32>
    %125 = vector.multi_reduction <add>, %124, %cst_140 [0] : vector<256x128xf32> to vector<128xf32>
    %126 = vector.shape_cast %125 : vector<128xf32> to vector<1x128xf32>
    %c0_141 = arith.constant 0 : index
    %c1_142 = arith.constant 1 : index
    %c256_143 = arith.constant 256 : index
    %127 = vector.load %arg7[%c0_141, %c1_142, %c256_143] : memref<1x2x512xf32, #tpu.memory_space<vmem>>, vector<1x1x128xf32>
    %128 = vector.shape_cast %127 : vector<1x1x128xf32> to vector<1x128xf32>
    %129 = vector.shape_cast %126 : vector<1x128xf32> to vector<1x1x128xf32>
    tpu.vector_store %arg7[%c0_141, %c1_142, %c256_143], %129 {strides = array<i32>} : memref<1x2x512xf32, #tpu.memory_space<vmem>>, vector<1x1x128xf32>,
    %c0_144 = arith.constant 0 : index
    %c0_145 = arith.constant 0 : index
    %c0_146 = arith.constant 0 : index
    %c0_147 = arith.constant 0 : index
    %130 = vector.load %arg1[%c0_144, %c0_145, %c0_146, %c0_147] : memref<1x52x52x128xbf16, #tpu.memory_space<vmem>>, vector<1x16x16x128xbf16>
    %131 = vector.shape_cast %130 : vector<1x16x16x128xbf16> to vector<16x16x128xbf16>
    %132 = vector.shape_cast %131 : vector<16x16x128xbf16> to vector<256x128xbf16>
    %c0_148 = arith.constant 0 : index
    %c0_149 = arith.constant 0 : index
    %133 = vector.load %arg8[%c0_148, %c0_149] : memref<256x1152xbf16, #tpu.memory_space<vmem>>, vector<256x128xbf16>
    tpu.vector_store %arg8[%c0_148, %c0_149], %132 {strides = array<i32>} : memref<256x1152xbf16, #tpu.memory_space<vmem>>, vector<256x128xbf16>,
    %c0_150 = arith.constant 0 : index
    %c0_151 = arith.constant 0 : index
    %c18_152 = arith.constant 18 : index
    %c0_153 = arith.constant 0 : index
    %134 = vector.load %arg1[%c0_150, %c0_151, %c18_152, %c0_153] : memref<1x52x52x128xbf16, #tpu.memory_space<vmem>>, vector<1x16x16x128xbf16>
    %135 = vector.shape_cast %134 : vector<1x16x16x128xbf16> to vector<16x16x128xbf16>
    %136 = vector.shape_cast %135 : vector<16x16x128xbf16> to vector<256x128xbf16>
    %c0_154 = arith.constant 0 : index
    %c128_155 = arith.constant 128 : index
    %137 = vector.load %arg8[%c0_154, %c128_155] : memref<256x1152xbf16, #tpu.memory_space<vmem>>, vector<256x128xbf16>
    tpu.vector_store %arg8[%c0_154, %c128_155], %136 {strides = array<i32>} : memref<256x1152xbf16, #tpu.memory_space<vmem>>, vector<256x128xbf16>,
    %c0_156 = arith.constant 0 : index
    %c0_157 = arith.constant 0 : index
    %c36 = arith.constant 36 : index
    %c0_158 = arith.constant 0 : index
    %138 = vector.load %arg1[%c0_156, %c0_157, %c36, %c0_158] : memref<1x52x52x128xbf16, #tpu.memory_space<vmem>>, vector<1x16x16x128xbf16>
    %139 = vector.shape_cast %138 : vector<1x16x16x128xbf16> to vector<16x16x128xbf16>
    %140 = vector.shape_cast %139 : vector<16x16x128xbf16> to vector<256x128xbf16>
    %c0_159 = arith.constant 0 : index
    %c256_160 = arith.constant 256 : index
    %141 = vector.load %arg8[%c0_159, %c256_160] : memref<256x1152xbf16, #tpu.memory_space<vmem>>, vector<256x128xbf16>
    tpu.vector_store %arg8[%c0_159, %c256_160], %140 {strides = array<i32>} : memref<256x1152xbf16, #tpu.memory_space<vmem>>, vector<256x128xbf16>,
    %c0_161 = arith.constant 0 : index
    %c18_162 = arith.constant 18 : index
    %c0_163 = arith.constant 0 : index
    %c0_164 = arith.constant 0 : index
    %142 = vector.load %arg1[%c0_161, %c18_162, %c0_163, %c0_164] : memref<1x52x52x128xbf16, #tpu.memory_space<vmem>>, vector<1x16x16x128xbf16>
    %143 = vector.shape_cast %142 : vector<1x16x16x128xbf16> to vector<16x16x128xbf16>
    %144 = vector.shape_cast %143 : vector<16x16x128xbf16> to vector<256x128xbf16>
    %c0_165 = arith.constant 0 : index
    %c384_166 = arith.constant 384 : index
    %145 = vector.load %arg8[%c0_165, %c384_166] : memref<256x1152xbf16, #tpu.memory_space<vmem>>, vector<256x128xbf16>
    tpu.vector_store %arg8[%c0_165, %c384_166], %144 {strides = array<i32>} : memref<256x1152xbf16, #tpu.memory_space<vmem>>, vector<256x128xbf16>,
    %c0_167 = arith.constant 0 : index
    %c18_168 = arith.constant 18 : index
    %c18_169 = arith.constant 18 : index
    %c0_170 = arith.constant 0 : index
    %146 = vector.load %arg1[%c0_167, %c18_168, %c18_169, %c0_170] : memref<1x52x52x128xbf16, #tpu.memory_space<vmem>>, vector<1x16x16x128xbf16>
    %147 = vector.shape_cast %146 : vector<1x16x16x128xbf16> to vector<16x16x128xbf16>
    %148 = vector.shape_cast %147 : vector<16x16x128xbf16> to vector<256x128xbf16>
    %c0_171 = arith.constant 0 : index
    %c512_172 = arith.constant 512 : index
    %149 = vector.load %arg8[%c0_171, %c512_172] : memref<256x1152xbf16, #tpu.memory_space<vmem>>, vector<256x128xbf16>
    tpu.vector_store %arg8[%c0_171, %c512_172], %148 {strides = array<i32>} : memref<256x1152xbf16, #tpu.memory_space<vmem>>, vector<256x128xbf16>,
    %c0_173 = arith.constant 0 : index
    %c18_174 = arith.constant 18 : index
    %c36_175 = arith.constant 36 : index
    %c0_176 = arith.constant 0 : index
    %150 = vector.load %arg1[%c0_173, %c18_174, %c36_175, %c0_176] : memref<1x52x52x128xbf16, #tpu.memory_space<vmem>>, vector<1x16x16x128xbf16>
    %151 = vector.shape_cast %150 : vector<1x16x16x128xbf16> to vector<16x16x128xbf16>
    %152 = vector.shape_cast %151 : vector<16x16x128xbf16> to vector<256x128xbf16>
    %c0_177 = arith.constant 0 : index
    %c640_178 = arith.constant 640 : index
    %153 = vector.load %arg8[%c0_177, %c640_178] : memref<256x1152xbf16, #tpu.memory_space<vmem>>, vector<256x128xbf16>
    tpu.vector_store %arg8[%c0_177, %c640_178], %152 {strides = array<i32>} : memref<256x1152xbf16, #tpu.memory_space<vmem>>, vector<256x128xbf16>,
    %c0_179 = arith.constant 0 : index
    %c36_180 = arith.constant 36 : index
    %c0_181 = arith.constant 0 : index
    %c0_182 = arith.constant 0 : index
    %154 = vector.load %arg1[%c0_179, %c36_180, %c0_181, %c0_182] : memref<1x52x52x128xbf16, #tpu.memory_space<vmem>>, vector<1x16x16x128xbf16>
    %155 = vector.shape_cast %154 : vector<1x16x16x128xbf16> to vector<16x16x128xbf16>
    %156 = vector.shape_cast %155 : vector<16x16x128xbf16> to vector<256x128xbf16>
    %c0_183 = arith.constant 0 : index
    %c768_184 = arith.constant 768 : index
    %157 = vector.load %arg8[%c0_183, %c768_184] : memref<256x1152xbf16, #tpu.memory_space<vmem>>, vector<256x128xbf16>
    tpu.vector_store %arg8[%c0_183, %c768_184], %156 {strides = array<i32>} : memref<256x1152xbf16, #tpu.memory_space<vmem>>, vector<256x128xbf16>,
    %c0_185 = arith.constant 0 : index
    %c36_186 = arith.constant 36 : index
    %c18_187 = arith.constant 18 : index
    %c0_188 = arith.constant 0 : index
    %158 = vector.load %arg1[%c0_185, %c36_186, %c18_187, %c0_188] : memref<1x52x52x128xbf16, #tpu.memory_space<vmem>>, vector<1x16x16x128xbf16>
    %159 = vector.shape_cast %158 : vector<1x16x16x128xbf16> to vector<16x16x128xbf16>
    %160 = vector.shape_cast %159 : vector<16x16x128xbf16> to vector<256x128xbf16>
    %c0_189 = arith.constant 0 : index
    %c896_190 = arith.constant 896 : index
    %161 = vector.load %arg8[%c0_189, %c896_190] : memref<256x1152xbf16, #tpu.memory_space<vmem>>, vector<256x128xbf16>
    tpu.vector_store %arg8[%c0_189, %c896_190], %160 {strides = array<i32>} : memref<256x1152xbf16, #tpu.memory_space<vmem>>, vector<256x128xbf16>,
    %c0_191 = arith.constant 0 : index
    %c36_192 = arith.constant 36 : index
    %c36_193 = arith.constant 36 : index
    %c0_194 = arith.constant 0 : index
    %162 = vector.load %arg1[%c0_191, %c36_192, %c36_193, %c0_194] : memref<1x52x52x128xbf16, #tpu.memory_space<vmem>>, vector<1x16x16x128xbf16>
    %163 = vector.shape_cast %162 : vector<1x16x16x128xbf16> to vector<16x16x128xbf16>
    %164 = vector.shape_cast %163 : vector<16x16x128xbf16> to vector<256x128xbf16>
    %c0_195 = arith.constant 0 : index
    %c1024_196 = arith.constant 1024 : index
    %165 = vector.load %arg8[%c0_195, %c1024_196] : memref<256x1152xbf16, #tpu.memory_space<vmem>>, vector<256x128xbf16>
    tpu.vector_store %arg8[%c0_195, %c1024_196], %164 {strides = array<i32>} : memref<256x1152xbf16, #tpu.memory_space<vmem>>, vector<256x128xbf16>,
    %c0_197 = arith.constant 0 : index
    %c0_198 = arith.constant 0 : index
    %166 = vector.load %arg8[%c0_197, %c0_198] : memref<256x1152xbf16, #tpu.memory_space<vmem>>, vector<256x1152xbf16>
    %c2 = arith.constant 2 : index
    %c0_199 = arith.constant 0 : index
    %c0_200 = arith.constant 0 : index
    %167 = vector.load %arg3[%c2, %c0_199, %c0_200] : memref<3x1152x128xbf16, #tpu.memory_space<vmem>>, vector<1x1152x128xbf16>
    %168 = vector.shape_cast %167 : vector<1x1152x128xbf16> to vector<1152x128xbf16>
    %cst_201 = arith.constant dense<0.000000e+00> : vector<256x128xf32>
    %169 = tpu.matmul %166, %168, %cst_201 {dimension_numbers = #tpu.dot_dimension_numbers<[1], [0], [0], [1], [0, 0, 1, 1], [], []>} : vector<256x1152xbf16>, vector<1152x128xbf16>, vector<256x128xf32> -> vector<256x128xf32>
    %170 = arith.truncf %169 : vector<256x128xf32> to vector<256x128xbf16>
    %c0_202 = arith.constant 0 : index
    %c0_203 = arith.constant 0 : index
    %c384_204 = arith.constant 384 : index
    %171 = vector.load %arg5[%c0_202, %c0_203, %c384_204] : memref<1x256x512xbf16, #tpu.memory_space<vmem>>, vector<1x256x128xbf16>
    %172 = vector.shape_cast %171 : vector<1x256x128xbf16> to vector<256x128xbf16>
    %173 = vector.shape_cast %170 : vector<256x128xbf16> to vector<1x256x128xbf16>
    tpu.vector_store %arg5[%c0_202, %c0_203, %c384_204], %173 {strides = array<i32>} : memref<1x256x512xbf16, #tpu.memory_space<vmem>>, vector<1x256x128xbf16>,
    %cst_205 = arith.constant dense<0.000000e+00> : vector<128xf32>
    %174 = vector.multi_reduction <add>, %169, %cst_205 [0] : vector<256x128xf32> to vector<128xf32>
    %175 = vector.shape_cast %174 : vector<128xf32> to vector<1x128xf32>
    %c0_206 = arith.constant 0 : index
    %c0_207 = arith.constant 0 : index
    %c384_208 = arith.constant 384 : index
    %176 = vector.load %arg7[%c0_206, %c0_207, %c384_208] : memref<1x2x512xf32, #tpu.memory_space<vmem>>, vector<1x1x128xf32>
    %177 = vector.shape_cast %176 : vector<1x1x128xf32> to vector<1x128xf32>
    %178 = vector.shape_cast %175 : vector<1x128xf32> to vector<1x1x128xf32>
    tpu.vector_store %arg7[%c0_206, %c0_207, %c384_208], %178 {strides = array<i32>} : memref<1x2x512xf32, #tpu.memory_space<vmem>>, vector<1x1x128xf32>,
    %179 = arith.mulf %169, %169 : vector<256x128xf32>
    %cst_209 = arith.constant dense<0.000000e+00> : vector<128xf32>
    %180 = vector.multi_reduction <add>, %179, %cst_209 [0] : vector<256x128xf32> to vector<128xf32>
    %181 = vector.shape_cast %180 : vector<128xf32> to vector<1x128xf32>
    %c0_210 = arith.constant 0 : index
    %c1_211 = arith.constant 1 : index
    %c384_212 = arith.constant 384 : index
    %182 = vector.load %arg7[%c0_210, %c1_211, %c384_212] : memref<1x2x512xf32, #tpu.memory_space<vmem>>, vector<1x1x128xf32>
    %183 = vector.shape_cast %182 : vector<1x1x128xf32> to vector<1x128xf32>
    %184 = vector.shape_cast %181 : vector<1x128xf32> to vector<1x1x128xf32>
    tpu.vector_store %arg7[%c0_210, %c1_211, %c384_212], %184 {strides = array<i32>} : memref<1x2x512xf32, #tpu.memory_space<vmem>>, vector<1x1x128xf32>,
    %185 = arith.extf %2 : vector<256x128xbf16> to vector<256x128xf32>
    %cst_213 = arith.constant dense<0.000000e+00> : vector<128xf32>
    %186 = vector.multi_reduction <add>, %185, %cst_213 [0] : vector<256x128xf32> to vector<128xf32>
    %187 = vector.shape_cast %186 : vector<128xf32> to vector<1x128xf32>
    %cst_214 = arith.constant 3.906250e-03 : f32
    %188 = vector.broadcast %cst_214 : f32 to vector<1x128xf32>
    %189 = arith.mulf %187, %188 : vector<1x128xf32>
    %190 = arith.truncf %189 : vector<1x128xf32> to vector<1x128xbf16>
    %c0_215 = arith.constant 0 : index
    %c0_216 = arith.constant 0 : index
    %191 = vector.load %arg4[%c0_215, %c0_216] : memref<128x128xbf16, #tpu.memory_space<vmem>>, vector<128x128xbf16>
    %cst_217 = arith.constant dense<0.000000e+00> : vector<1x128xf32>
    %192 = tpu.matmul %190, %191, %cst_217 {dimension_numbers = #tpu.dot_dimension_numbers<[1], [0], [0], [1], [0, 0, 1, 1], [], []>} : vector<1x128xbf16>, vector<128x128xbf16>, vector<1x128xf32> -> vector<1x128xf32>
    %cst_218 = arith.constant 0.000000e+00 : f32
    %193 = vector.broadcast %cst_218 : f32 to vector<1x128xf32>
    %194 = arith.maximumf %192, %193 : vector<1x128xf32>
    %c0_219 = arith.constant 0 : index
    %c0_220 = arith.constant 0 : index
    %c0_221 = arith.constant 0 : index
    %195 = vector.load %arg6[%c0_219, %c0_220, %c0_221] : memref<1x1x128xf32, #tpu.memory_space<vmem>>, vector<1x1x128xf32>
    %196 = vector.shape_cast %195 : vector<1x1x128xf32> to vector<1x128xf32>
    %197 = vector.shape_cast %194 : vector<1x128xf32> to vector<1x1x128xf32>
    tpu.vector_store %arg6[%c0_219, %c0_220, %c0_221], %197 {strides = array<i32>} : memref<1x1x128xf32, #tpu.memory_space<vmem>>, vector<1x1x128xf32>,
    return
  }
  func.func @transform_0(%arg0: i32) -> (i32, i32, i32, i32) {
    %c0_i32 = arith.constant 0 : i32
    %c0_i32_0 = arith.constant 0 : i32
    %c0_i32_1 = arith.constant 0 : i32
    %c0_i32_2 = arith.constant 0 : i32
    return %arg0, %c0_i32, %c0_i32_0, %c0_i32_1 : i32, i32, i32, i32
  }
  func.func @transform_1(%arg0: i32) -> (i32, i32) {
    %c0_i32 = arith.constant 0 : i32
    %c0_i32_0 = arith.constant 0 : i32
    %c0_i32_1 = arith.constant 0 : i32
    return %c0_i32, %c0_i32_0 : i32, i32
  }
  func.func @transform_2(%arg0: i32) -> (i32, i32, i32) {
    %c0_i32 = arith.constant 0 : i32
    %c0_i32_0 = arith.constant 0 : i32
    %c0_i32_1 = arith.constant 0 : i32
    %c0_i32_2 = arith.constant 0 : i32
    return %c0_i32, %c0_i32_0, %c0_i32_1 : i32, i32, i32
  }
  func.func @transform_3(%arg0: i32) -> (i32, i32) {
    %c0_i32 = arith.constant 0 : i32
    %c0_i32_0 = arith.constant 0 : i32
    %c0_i32_1 = arith.constant 0 : i32
    return %c0_i32, %c0_i32_0 : i32, i32
  }
  func.func @transform_4(%arg0: i32) -> (i32, i32, i32) {
    %c0_i32 = arith.constant 0 : i32
    %c0_i32_0 = arith.constant 0 : i32
    %c0_i32_1 = arith.constant 0 : i32
    return %arg0, %c0_i32, %c0_i32_0 : i32, i32, i32
  }
  func.func @transform_5(%arg0: i32) -> (i32, i32, i32) {
    %c0_i32 = arith.constant 0 : i32
    %c0_i32_0 = arith.constant 0 : i32
    %c0_i32_1 = arith.constant 0 : i32
    return %arg0, %c0_i32, %c0_i32_0 : i32, i32, i32
  }
  func.func @transform_6(%arg0: i32) -> (i32, i32, i32) {
    %c0_i32 = arith.constant 0 : i32
    %c0_i32_0 = arith.constant 0 : i32
    %c0_i32_1 = arith.constant 0 : i32
    return %arg0, %c0_i32, %c0_i32_0 : i32, i32, i32
  }
}

</mosaic_0001>

<bundles_post_ra>
// kernel: tpu_custom_call.1
= control target key start
LH: loop header
LB: loop body
LE: loop exit
PB: predicated region body
PF: predicated region fallthrough
CT: control target
= control target key end

     0   :  { %12 = vsyncpa [#allocation4], 0  ;;  %s25091_s0 = inlined_call_operand.vmem [shape: bf16[2,52,52,128], index: 0, kind: input, shape index: {}]   ;;  %s25092_s1 = inlined_call_operand.vmem [shape: bf16[128,128], index: 1, kind: input, shape index: {}]   ;;  %s25093_s2 = inlined_call_operand.vmem [shape: bf16[3,1152,128], index: 2, kind: input, shape index: {}]   ;;  %s25094_s3 = inlined_call_operand.vmem [shape: bf16[128,128], index: 3, kind: input, shape index: {}]   ;;  %s25095_s4 = inlined_call_operand.hbm [shape: bf16[2,256,512], index: 4, kind: output, shape index: {0}]   ;;  %s25096_s5 = inlined_call_operand.hbm [shape: f32[2,1,128], index: 5, kind: output, shape index: {1}]   ;;  %s25097_s6 = inlined_call_operand.hbm [shape: f32[2,2,512], index: 6, kind: output, shape index: {2}]  }
   0x1   :  { %14 = vsyncpa [#allocation4 + $0x1], 0 }
   0x2   :  { %15 = vsyncpa [#allocation6], 0 }
   0x3   :  { %17 = vsyncpa [#allocation6 + $0x1], 0  ;;  %s18643_s21 = smov 0   ;;  %s18645_s22 = smov 0  }
   0x4   :  { %s18647_s23 = smov 0   ;;  %s18649_s24 = smov 0  }
   0x5 LB: > { %s18664_s25 = sadd.s32 4294967295, %s18599_s24   ;;  %s25106_s26 = sadd.s32 4294967294, %s18599_s24   ;;  %s18599_s24 = sphi %s18649_s24, %s25250_s24   ;;  %s18595_s23 = sphi %s18647_s23, %s25249_s23   ;;  %s18591_s22 = sphi %s18645_s22, %s25248_s22   ;;  %s18587_s21 = sphi %s18643_s21, %s25247_s21  }
   0x6   : > { %s18668_s27 = sadd.s32 1, %s18599_s24   ;;  %s119_s28 = sadd.s32 1, %s18595_s23 }
   0x7   : > { %s116_s29 = ssub.s32 %s18599_s24, %s18668_s27  ;;  %p129_p0 = scmp.ne.s32.totalorder %s18595_s23, %s18591_s22 }
   0x8   : > { %p117_p1 = scmp.eq.s32.totalorder %s116_s29, 0  ;;  %p130_p2 = scmp.eq.s32.totalorder %s18664_s25, 1 }
   0x9   : > { %p135_p3 = scmp.ne.s32.totalorder %s18591_s22, %s18587_s21  ;;  %p136_p4 = scmp.eq.s32.totalorder %s25106_s26, 1 }
   0xa   : > { %s18681_s30 = scalar_select %p117_p1, %s18595_s23, %s119_s28  }
   0xb   : > { %p18683_p5 = por %p130_p2, %p129_p0  ;;  %p18687_p6 = por %p136_p4, %p135_p3 }
   0xc   : > { %p13722_p7 = scmp.ge.s32.totalorder %s18599_s24, 1  ;;  %p223_p8 = scmp.lt.s32.totalorder %s18599_s24, 3 }
   0xe   : > { %p224_p9 = pnand %p13722_p7, %p223_p8 }
  0x10   : > { %227 = sbr.rel (%p224_p9) target bundleno = 1316 (0x524), region = 36 }
  0x17   : > { %v18148_v0 = vld [vmem:[%s25092_s1] sm:$0xff]   ;;  %v18151_v3 = vld [vmem:[%s25092_s1 + $0x8] sm:$0xff]   ;;  %v18154_v6 = vld [vmem:[%s25092_s1 + $0x10] sm:$0xff]   ;;  %p262_p10 = scmp.lt.s32.totalorder %s18664_s25, 1  ;;  %vm365_vm0 = vcmask 1042432   ;;  %vm366_vm1 = vcmask 1046532  }
  0x18   : > { %v18149_v1 = vld [vmem:[%s25093_s2 + $0x40] sm:$0xff]   ;;  %17882 = vmatprep.subr.bf16.mxu0 %v18148_v0  ;;  %v18152_v4 = vld [vmem:[%s25093_s2 + $0x48] sm:$0xff]   ;;  %v18155_v7 = vld [vmem:[%s25093_s2 + $0x50] sm:$0xff]   ;;  %vm1166_vm2 = vcmask 1041408   ;;  %vm1167_vm3 = vcmask 1045508   ;;  %v25111_v56 = vmov 0 }
  0x19   : > { %v18150_v2 = vld [vmem:[%s25093_s2] sm:$0xff]   ;;  %16457 = vmatprep.subr.bf16.mxu1 %v18149_v1  ;;  %17883 = vmatpush3.bf16.msra.mxu0 %v18148_v0  ;;  %v18153_v5 = vld [vmem:[%s25093_s2 + $0x8] sm:$0xff]   ;;  %v18156_v8 = vld [vmem:[%s25093_s2 + $0x10] sm:$0xff]   ;;  %s263_s9 = scalar_select %p262_p10, %s18664_s25, 1  ;;  %vm5124_vm6 = vcmask 1040384   ;;  %vm5125_vm7 = vcmask 1044484  }
  0x1a   : > { %16458 = vmatpush3.bf16.msra.mxu1 %v18150_v2  ;;  %17884 = vmatprep.subr.bf16.mxu0 %v18151_v3  ;;  %v18157_v9 = vld [vmem:[%s25092_s1 + $0x18] sm:$0xff]   ;;  %v18160_v12 = vld [vmem:[%s25092_s1 + $0x20] sm:$0xff]   ;;  %v18163_v15 = vld [vmem:[%s25092_s1 + $0x28] sm:$0xff]   ;;  %s19655_s19 = sand.u32 1, %s18591_s22   ;;  %vm18602_vm9 = vmmov 0   ;;  %s16298_s10 = sshll.u32 %s18664_s25, 4 }
  0x1b   : > { %16459 = vmatprep.subr.bf16.mxu1 %v18152_v4  ;;  %v18158_v10 = vld [vmem:[%s25093_s2 + $0x58] sm:$0xff]   ;;  %v18161_v13 = vld [vmem:[%s25093_s2 + $0x60] sm:$0xff]   ;;  %v18164_v16 = vld [vmem:[%s25093_s2 + $0x68] sm:$0xff]   ;;  %s18094_s16 = smul.u32 1456, %s263_s9  ;;  %s13723_s29 = sshll.u32 %s19655_s19, 9 }
  0x1c   : > { %v18159_v11 = vld [vmem:[%s25093_s2 + $0x18] sm:$0xff]   ;;  %v18162_v14 = vld [vmem:[%s25093_s2 + $0x20] sm:$0xff]   ;;  %v18165_v17 = vld [vmem:[%s25093_s2 + $0x28] sm:$0xff]   ;;  %s19793_s18 = scalar_lea.vmem [#allocation3], %s13723_s29  ;;  %s13724_s15 = sshll.u32 %s19655_s19, 3 }
  0x1d   : > { %17885 = vmatpush3.bf16.msra.mxu0 %v18151_v3  ;;  %v18166_v18 = vld [vmem:[%s25092_s1 + $0x30] sm:$0xff]   ;;  %s18758_s9 = scalar_lea.vmem %s25091_s0, %s18094_s16  ;;  %v18169_v21 = vld [vmem:[%s25092_s1 + $0x38] sm:$0xff]   ;;  %vm18773_vm4 = vmor %vm365_vm0, %vm366_vm1  ;;  %s21193_s16 = scalar_lea.vmem [#allocation7], %s13724_s15 }
  0x1e   : > { %16460 = vmatpush3.bf16.msra.mxu1 %v18153_v5  ;;  %17886 = vmatprep.subr.bf16.mxu0 %v18154_v6  ;;  %v18167_v19 = vld [vmem:[%s25093_s2 + $0x70] sm:$0xff]   ;;  %v13726_v22 = vld [vmem:[%s18758_s9 + $0x200] sm:$0xe]  ;;  %v13727_v23 = vld [vmem:[%s18758_s9 + $0x204] sm:$0xf]  ;;  %s254_s11 = scalar_lea.vmem [#allocation5], %s19655_s19  ;;  %s24977_s20 = scalar_lea.hbm %s25096_s5, %s16298_s10 }
  0x1f   : > { %16461 = vmatprep.subr.bf16.mxu1 %v18155_v7  ;;  %v18168_v20 = vld [vmem:[%s25093_s2 + $0x30] sm:$0xff]   ;;  %v13728_v24 = vld [vmem:[%s18758_s9 + $0x208] sm:$0x1]  ;;  %v18170_v25 = vld [vmem:[%s25093_s2 + $0x78] sm:$0xff]   ;;  %v13774_v27 = vrot.slane %v13726_v22, 9  ;;  %v370_v28 = vrot.slane %v13727_v23, 5 }
  0x20   : > { %v373_v29 = vrot.slane %v13728_v24, 5  ;;  %v13926_v30 = vld [vmem:[%s18758_s9 + $0x158] sm:$0xe]  ;;  %v13927_v32 = vld [vmem:[%s18758_s9 + $0x15c] sm:$0xf]  ;;  %v18172_v40 = vld [vmem:[%s25093_s2 + $0xc0] sm:$0xff]  }
  0x21   : > { %17887 = vmatpush3.bf16.msra.mxu0 %v18154_v6  ;;  %v18171_v31 = vld [vmem:[%s25093_s2 + $0x38] sm:$0xff]   ;;  %v13928_v33 = vld [vmem:[%s18758_s9 + $0x160] sm:$0x1]  ;;  %v13974_v34 = vrot.slane %v13926_v30, 9  ;;  %v371_v35 = vsel %vm18773_vm4, %v13774_v27, %v370_v28  ;;  %v372_v36 = vrot.slane %v370_v28, 4  ;;  %v1459_v37 = vrot.slane %v13927_v32, 5  ;;  %vm18803_vm5 = vmor %vm1166_vm2, %vm1167_vm3 }
  0x22   : > { %16462 = vmatpush3.bf16.msra.mxu1 %v18156_v8  ;;  %17888 = vmatprep.subr.bf16.mxu0 %v18157_v9  ;;  %v1462_v38 = vrot.slane %v13928_v33, 5  ;;  %v13729_v39 = vld [vmem:[%s18758_s9 + $0x21c] sm:$0xe]  ;;  %v13373_v41 = vunpack.c.l.bf16 %v371_v35  ;;  %v13730_v42 = vld [vmem:[%s18758_s9 + $0x220] sm:$0xf]  ;;  %v25112_v56 = vsel %vm18803_vm5, 4294967295, %v25111_v56  ;;  %vm20664_vm8 = vmor %vm5124_vm6, %vm5125_vm7 }
  0x23   : > { %16463 = vmatprep.subr.bf16.mxu1 %v18158_v10  ;;  %v13731_v43 = vld [vmem:[%s18758_s9 + $0x224] sm:$0x1]  ;;  %v13775_v44 = vrot.slane %v13729_v39, 9  ;;  %v374_v46 = vsel %vm18773_vm4, %v372_v36, %v373_v29  ;;  %v1460_v47 = vsel %vm18773_vm4, %v13974_v34, %v1459_v37  ;;  %v1461_v48 = vrot.slane %v1459_v37, 4  ;;  %v13846_v50 = vld [vmem:[%s18758_s9 + $0x154] sm:$0xc] }
  0x24   : > { %v18173_v45 = vld [vmem:[%s25093_s2 + $0x140] sm:$0xff]   ;;  %v377_v49 = vrot.slane %v13730_v42, 5  ;;  %v13847_v51 = vld [vmem:[%s18758_s9 + $0x158] sm:$0xf]  ;;  %v13790_v52 = vcombine.low %v371_v35, %v374_v46  ;;  %v13374_v53 = vunpack.c.l.bf16 %v374_v46  ;;  %v380_v54 = vrot.slane %v13731_v43, 5  ;;  %25113 = vst [vmem:[#allocation10_spill] sm:$0xff] %v25112_v56 }
  0x25   : > { %17889 = vmatpush3.bf16.msra.mxu0 %v18157_v9  ;;  %v13848_v55 = vld [vmem:[%s18758_s9 + $0x15c] sm:$0x3]  ;;  %v13894_v57 = vrot.slane %v13846_v50, 10  ;;  %v1463_v58 = vsel %vm18773_vm4, %v1461_v48, %v1462_v38  ;;  %v1171_v61 = vrot.slane %v13847_v51, 6  ;;  %v18174_v2 = vld [vmem:[%s25093_s2 + $0x80] sm:$0xff]   ;;  %v18176_v7 = vld [vmem:[%s25093_s2 + $0xc8] sm:$0xff]  }
  0x26   : > { %16464 = vmatpush3.bf16.msra.mxu1 %v18159_v11  ;;  %17890 = vmatprep.subr.bf16.mxu0 %v18160_v12  ;;  %v378_v59 = vsel %vm18773_vm4, %v13775_v44, %v377_v49  ;;  %v379_v60 = vrot.slane %v377_v49, 4  ;;  %v13405_v62 = vadd.f32 %v13374_v53, %v13373_v41  ;;  %v13990_v63 = vcombine.low %v1460_v47, %v1463_v58  ;;  %v18175_v6 = vld [vmem:[%s25093_s2 + $0x100] sm:$0xff]   ;;  %v13732_v11 = vld [vmem:[%s18758_s9 + $0x238] sm:$0xe]  ;;  %v13931_v22 = vld [vmem:[%s18758_s9 + $0x17c] sm:$0x1] }
  0x27   : > { %16465 = vmatprep.subr.bf16.mxu1 %v18161_v13  ;;  %17898 = vmatprep.mubr.bf16.mxu0 %v13790_v52  ;;  %v13375_v0 = vunpack.c.l.bf16 %v378_v59  ;;  %v1174_v1 = vrot.slane %v13848_v55, 6  ;;  %v1172_v4 = vsel %vm18803_vm5, %v13894_v57, %v1171_v61  ;;  %v1173_v5 = vrot.slane %v1171_v61, 4  ;;  %v13735_v29 = vld [vmem:[%s18758_s9 + $0x254] sm:$0xe]  ;;  %v18177_v30 = vld [vmem:[%s25093_s2 + $0x88] sm:$0xff]   ;;  %s13589_s12 = sshll.u32 %s254_s11, 4  ;;  %s24979_s12 = int_to_ptr.vmem [resolvable:$true] %s13589_s12 }
  0x28   : > { %v381_v3 = vsel %vm18773_vm4, %v379_v60, %v380_v54  ;;  %3986 = vmatprep.mubr.bf16.mxu1 %v13990_v63  ;;  %v1469_v28 = vrot.slane %v13931_v22, 5  ;;  %v13736_v32 = vld [vmem:[%s18758_s9 + $0x258] sm:$0xf]  ;;  %v13737_v33 = vld [vmem:[%s18758_s9 + $0x25c] sm:$0x1]  ;;  %v13777_v34 = vrot.slane %v13735_v29, 9 }
  0x29   : > { %17891 = vmatpush3.bf16.msra.mxu0 %v18160_v12  ;;  %v13791_v8 = vcombine.low %v378_v59, %v381_v3  ;;  %v13376_v9 = vunpack.c.l.bf16 %v381_v3  ;;  %v13406_v10 = vadd.f32 %v13405_v62, %v13375_v0  ;;  %v13733_v12 = vld [vmem:[%s18758_s9 + $0x23c] sm:$0xf]  ;;  %v1175_v13 = vsel %vm18803_vm5, %v1173_v5, %v1174_v1  ;;  %v18178_v35 = vld [vmem:[%s25093_s2 + $0xd0] sm:$0xff]   ;;  %v13851_v46 = vld [vmem:[%s18758_s9 + $0x178] sm:$0x3]  ;;  %s16431_s13 = sshll.u32 %s18664_s25, 13 }
  0x2a   : > { %16466 = vmatpush3.bf16.msra.mxu1 %v18162_v14  ;;  %17892 = vmatprep.subr.bf16.mxu0 %v18163_v15  ;;  %v13734_v14 = vld [vmem:[%s18758_s9 + $0x240] sm:$0x1]  ;;  %v391_v39 = vrot.slane %v13736_v32, 5  ;;  %v13850_v41 = vld [vmem:[%s18758_s9 + $0x174] sm:$0xf]  ;;  %v18179_v47 = vld [vmem:[%s25093_s2 + $0x148] sm:$0xff]   ;;  %s24985_s26 = scalar_lea.hbm %s25095_s4, %s16431_s13 }
  0x2b   : > { %16467 = vmatprep.subr.bf16.mxu1 %v18164_v16  ;;  %v384_v16 = vrot.slane %v13733_v12, 5  ;;  %v1178_v55 = vrot.slane %v13850_v41, 6  ;;  %v13738_v57 = vld [vmem:[%s18758_s9 + $0x270] sm:$0xe]  ;;  %v1181_v60 = vrot.slane %v13851_v46, 6  ;;  %v18181_v29 = vld [vmem:[%s25093_s2 + $0x108] sm:$0xff]  }
  0x2c   : > { %v392_v49 = vsel %vm18773_vm4, %v13777_v34, %v391_v39  ;;  %v393_v50 = vrot.slane %v391_v39, 4  ;;  %v18180_v58 = vld [vmem:[%s25093_s2 + $0x90] sm:$0xff]   ;;  %v13740_v62 = vld [vmem:[%s18758_s9 + $0x278] sm:$0x1]  ;;  %v13778_v63 = vrot.slane %v13738_v57, 9  ;;  %s13573_s14 = sshll.u32 %s19793_s18, 4  ;;  %s24987_s14 = int_to_ptr.vmem [resolvable:$true] %s13573_s14 }
  0x2d   : > { %17893 = vmatpush3.bf16.msra.mxu0 %v18163_v15  ;;  %v13776_v15 = vrot.slane %v13732_v11, 9  ;;  %v13379_v54 = vunpack.c.l.bf16 %v392_v49  ;;  %v13739_v61 = vld [vmem:[%s18758_s9 + $0x274] sm:$0xf]  ;;  %v13741_v11 = vld [vmem:[%s18758_s9 + $0x28c] sm:$0xe]  ;;  %v18182_v34 = vld [vmem:[%s25093_s2 + $0xd8] sm:$0xff]  }
  0x2e   : > { %16468 = vmatpush3.bf16.msra.mxu1 %v18165_v17  ;;  %17894 = vmatprep.subr.bf16.mxu0 %v18166_v18  ;;  %v13929_v17 = vld [vmem:[%s18758_s9 + $0x174] sm:$0xe]  ;;  %v13853_v22 = vld [vmem:[%s18758_s9 + $0x190] sm:$0xf]  ;;  %v13744_v46 = vld [vmem:[%s18758_s9 + $0x2a8] sm:$0xe] }
  0x2f   : > { %16469 = vmatprep.subr.bf16.mxu1 %v18167_v19  ;;  %v13910_v19 = vcombine.low %v1172_v4, %v1175_v13  ;;  %v13975_v23 = vrot.slane %v13929_v17, 9  ;;  %v385_v24 = vsel %vm18773_vm4, %v13776_v15, %v384_v16  ;;  %v13932_v4 = vld [vmem:[%s18758_s9 + $0x190] sm:$0xe]  ;;  %v13933_v5 = vld [vmem:[%s18758_s9 + $0x194] sm:$0xf]  ;;  %s18477_s15 = scalar_lea.vmem %s24979_s12, 16 }
  0x30   : > { %v1473_v13 = vrot.slane %v13933_v5, 5  ;;  %v13742_v15 = vld [vmem:[%s18758_s9 + $0x290] sm:$0xf]  ;;  %p18478_p11 = scmp.ne.s32.totalorder %s24979_s12, %s18477_s15  ;;  %s18603_s13 = smov [#allocation5]  }
  0x31   : > { %17895 = vmatpush3.bf16.msra.mxu0 %v18166_v18  ;;  %v13407_v18 = vadd.f32 %v13406_v10, %v13376_v9  ;;  %v401_v9 = vrot.slane %v13740_v62, 5  ;;  %v13976_v10 = vrot.slane %v13932_v4, 9  ;;  %s18481_s17 = sshll.u32 %s18603_s13, 4  ;;  %s18482_s17 = int_to_ptr.vmem [resolvable:$false] %s18481_s17 }
  0x32   : > { %16470 = vmatpush3.bf16.msra.mxu1 %v18168_v20  ;;  %17896 = vmatprep.subr.bf16.mxu0 %v18169_v21  ;;  %v387_v20 = vrot.slane %v13734_v14, 5  ;;  %p18479_p12 = pnand %p18478_p11, %p18683_p5  ;;  %s18483_s28 = scalar_lea.vmem %s18482_s17, 32 }
  0x33   : > { %16471 = vmatprep.subr.bf16.mxu1 %v18170_v25  ;;  %v386_v25 = vrot.slane %v384_v16, 4  ;;  %v13743_v16 = vld [vmem:[%s18758_s9 + $0x294] sm:$0x1]  ;;  %p18484_p0 = scmp.lt.s32.totalorder %s24979_s12, %s18482_s17  ;;  %p18485_p1 = scmp.lt.s32.totalorder %s18483_s28, %s18477_s15 }
  0x34   : > { %v408_v32 = vrot.slane %v13743_v16, 5  ;;  %v13855_v16 = vld [vmem:[%s18758_s9 + $0x1a8] sm:$0xc]  ;;  %p18480_p13 = pneg %p18479_p12 }
  0x35   : > { %17897 = vmatpush3.bf16.msra.mxu0 %v18169_v21  ;;  %v13930_v21 = vld [vmem:[%s18758_s9 + $0x178] sm:$0xf]  ;;  %v388_v36 = vsel %vm18773_vm4, %v386_v25, %v387_v20  ;;  %v13779_v20 = vrot.slane %v13741_v11, 9  ;;  %v1474_v25 = vsel %vm18773_vm4, %v13976_v10, %v1473_v13  ;;  %v18186_v10 = vld [vmem:[%s25093_s2 + $0xa0] sm:$0xff]   ;;  %p18486_p2 = por %p18485_p1, %p18484_p0 }
  0x36   : > { %16472 = vmatpush3.bf16.msra.mxu1 %v18171_v31  ;;  %16569 = vmatprep.subr.bf16.mxu0 %v18172_v40  ;;  %v1466_v27 = vrot.slane %v13930_v21, 5  ;;  %v13377_v31 = vunpack.c.l.bf16 %v385_v24  ;;  %v13849_v40 = vld [vmem:[%s18758_s9 + $0x170] sm:$0xc]  ;;  %v13792_v42 = vcombine.low %v385_v24, %v388_v36  ;;  %v13378_v43 = vunpack.c.l.bf16 %v388_v36  ;;  %v13852_v21 = vld [vmem:[%s18758_s9 + $0x18c] sm:$0xc] }
  0x37   : > { %16681 = vmatprep.subr.bf16.mxu1 %v18173_v45  ;;  %v394_v45 = vrot.slane %v13737_v33, 5  ;;  %v13895_v51 = vrot.slane %v13849_v40, 10  ;;  %v13896_v33 = vrot.slane %v13852_v21, 10  ;;  %v13856_v21 = vld [vmem:[%s18758_s9 + $0x1ac] sm:$0xf]  ;;  %p18487_p3 = pnand %p18486_p2, %p18480_p13 }
  0x38   : > { %17899 = vmatmul.mubr.bf16.vlgmr.msra.gmra.mrb[0].mxu0 %v13791_v8  ;;  %v1467_v37 = vsel %vm18773_vm4, %v13975_v23, %v1466_v27  ;;  %v1468_v38 = vrot.slane %v1466_v27, 4  ;;  %v13408_v44 = vadd.f32 %v13407_v18, %v13377_v31  ;;  %v398_v8 = vrot.slane %v13739_v61, 5  ;;  %v18184_v61 = vld [vmem:[%s25093_s2 + $0xe0] sm:$0xff]  }
  0x39   : > { %16570 = vmatpush3.bf16.msra.mxu0 %v18174_v2  ;;  %3987 = vmatmul.mubr.bf16.vlgmr.msra.gmra.mrb[0].mxu1 %v13910_v19  ;;  %v395_v59 = vsel %vm18773_vm4, %v393_v50, %v394_v45  ;;  %v1179_v3 = vsel %vm18803_vm5, %v13895_v51, %v1178_v55  ;;  %v1475_v27 = vrot.slane %v1473_v13, 4  ;;  %v405_v31 = vrot.slane %v13742_v15, 5  ;;  %v13745_v51 = vld [vmem:[%s18758_s9 + $0x2ac] sm:$0xf] }
  0x3a   : > { %16571 = vmatprep.subr.bf16.mxu0 %v18176_v7  ;;  %16682 = vmatpush3.bf16.msra.mxu1 %v18175_v6  ;;  %v1470_v48 = vsel %vm18773_vm4, %v1468_v38, %v1469_v28  ;;  %v13409_v52 = vadd.f32 %v13408_v44, %v13378_v43  ;;  %v13793_v0 = vcombine.low %v392_v49, %v395_v59  ;;  %v13380_v1 = vunpack.c.l.bf16 %v395_v59  ;;  %v13934_v6 = vld [vmem:[%s18758_s9 + $0x198] sm:$0x1]  ;;  %v13854_v28 = vld [vmem:[%s18758_s9 + $0x194] sm:$0x3]  ;;  %v13935_v59 = vld [vmem:[%s18758_s9 + $0x1ac] sm:$0xe] }
  0x3b   : > { %17902 = vmatprep.mubr.bf16.mxu0 %v13792_v42  ;;  %v13991_v53 = vcombine.low %v1467_v37, %v1470_v48  ;;  %16683 = vmatprep.subr.bf16.mxu1 %v18179_v47  ;;  %v1180_v7 = vrot.slane %v1178_v55, 4  ;;  %v1476_v14 = vrot.slane %v13934_v6, 5  ;;  %v399_v18 = vsel %vm18773_vm4, %v13778_v63, %v398_v8  ;;  %v18183_v47 = vld [vmem:[%s25093_s2 + $0x98] sm:$0xff]   ;;  %v13749_v15 = vld [vmem:[%s18758_s9 + $0x2cc] sm:$0x1] }
  0x3c   : > { %v13410_v2 = vadd.f32 %v13409_v52, %v13379_v54  ;;  %v400_v19 = vrot.slane %v398_v8, 4  ;;  %v13381_v24 = vunpack.c.l.bf16 %v399_v18  ;;  %v406_v40 = vsel %vm18773_vm4, %v13779_v20, %v405_v31  ;;  %v13746_v52 = vld [vmem:[%s18758_s9 + $0x2b0] sm:$0x1]  ;;  %v13747_v8 = vld [vmem:[%s18758_s9 + $0x2c4] sm:$0xe] }
  0x3d   : > { %16572 = vmatpush3.bf16.msra.mxu0 %v18177_v30  ;;  %3994 = vmatprep.mubr.bf16.mxu1 %v13991_v53  ;;  %v1182_v17 = vsel %vm18803_vm5, %v1180_v7, %v1181_v60  ;;  %v1477_v38 = vsel %vm18773_vm4, %v1475_v27, %v1476_v14  ;;  %v407_v41 = vrot.slane %v405_v31, 4  ;;  %v1185_v42 = vrot.slane %v13853_v22, 6  ;;  %v13936_v60 = vld [vmem:[%s18758_s9 + $0x1b0] sm:$0xf] }
  0x3e   : > { %16573 = vmatprep.subr.bf16.mxu0 %v18178_v35  ;;  %v13411_v12 = vadd.f32 %v13410_v2, %v13380_v1  ;;  %v13911_v23 = vcombine.low %v1179_v3, %v1182_v17  ;;  %v402_v30 = vsel %vm18773_vm4, %v400_v19, %v401_v9  ;;  %v13992_v39 = vcombine.low %v1474_v25, %v1477_v38  ;;  %v18185_v3 = vld [vmem:[%s25093_s2 + $0x150] sm:$0xff]   ;;  %v13748_v9 = vld [vmem:[%s18758_s9 + $0x2c8] sm:$0xf]  ;;  %v13751_v38 = vld [vmem:[%s18758_s9 + $0x2e4] sm:$0xf] }
  0x3f   : > { %v13794_v35 = vcombine.low %v399_v18, %v402_v30  ;;  %v13382_v36 = vunpack.c.l.bf16 %v402_v30  ;;  %16684 = vmatpush3.bf16.msra.mxu1 %v18181_v29  ;;  %v13383_v44 = vunpack.c.l.bf16 %v406_v40  ;;  %v1188_v45 = vrot.slane %v13854_v28, 6  ;;  %v18187_v22 = vld [vmem:[%s25093_s2 + $0x110] sm:$0xff]  }
  0x40   : > { %17903 = vmatmul.mubr.bf16.gmra.mrb[4].mxu0 %v13793_v0  ;;  %v13412_v37 = vadd.f32 %v13411_v12, %v13381_v24  ;;  %v409_v48 = vsel %vm18773_vm4, %v407_v41, %v408_v32  ;;  %v1186_v49 = vsel %vm18803_vm5, %v13896_v33, %v1185_v42  ;;  %v1187_v50 = vrot.slane %v1185_v42, 4  ;;  %v13937_v0 = vld [vmem:[%s18758_s9 + $0x1b4] sm:$0x1]  ;;  %16685 = vmatprep.subr.bf16.mxu1 %v18185_v3  ;;  %v13857_v28 = vld [vmem:[%s18758_s9 + $0x1b0] sm:$0x3] }
  0x41   : > { %16574 = vmatpush3.bf16.msra.mxu0 %v18180_v58  ;;  %3995 = vmatmul.mubr.bf16.gmra.mrb[4].mxu1 %v13911_v23  ;;  %v13780_v53 = vrot.slane %v13744_v46, 9  ;;  %v13795_v54 = vcombine.low %v406_v40, %v409_v48  ;;  %v13384_v55 = vunpack.c.l.bf16 %v409_v48  ;;  %v412_v58 = vrot.slane %v13745_v51, 5  ;;  %v13752_v40 = vld [vmem:[%s18758_s9 + $0x2e8] sm:$0x1]  ;;  %v13939_v48 = vld [vmem:[%s18758_s9 + $0x1cc] sm:$0xf] }
  0x42   : > { %16575 = vmatprep.subr.bf16.mxu0 %v18182_v34  ;;  %17906 = vmatprep.mubr.bf16.mxu0 %v13794_v35  ;;  %v13413_v43 = vadd.f32 %v13412_v37, %v13382_v36  ;;  %v1189_v62 = vsel %vm18803_vm5, %v1187_v50, %v1188_v45  ;;  %v415_v63 = vrot.slane %v13746_v52, 5  ;;  %v13977_v1 = vrot.slane %v13935_v59, 9  ;;  %v13750_v37 = vld [vmem:[%s18758_s9 + $0x2e0] sm:$0xe]  ;;  %v13753_v50 = vld [vmem:[%s18758_s9 + $0x2fc] sm:$0xe] }
  0x43   : > { %4002 = vmatprep.mubr.bf16.mxu1 %v13992_v39  ;;  %v1480_v2 = vrot.slane %v13936_v60, 5  ;;  %v13912_v5 = vcombine.low %v1186_v49, %v1189_v62  ;;  %v413_v6 = vsel %vm18773_vm4, %v13780_v53, %v412_v58  ;;  %v414_v7 = vrot.slane %v412_v58, 4  ;;  %16686 = vmatpush3.bf16.msra.mxu1 %v18187_v22  ;;  %v13940_v49 = vld [vmem:[%s18758_s9 + $0x1d0] sm:$0x1]  ;;  %v13755_v62 = vld [vmem:[%s18758_s9 + $0x304] sm:$0x1] }
  0x44   : > { %v13414_v57 = vadd.f32 %v13413_v43, %v13383_v44  ;;  %v13385_v11 = vunpack.c.l.bf16 %v413_v6  ;;  %v1483_v14 = vrot.slane %v13937_v0, 5  ;;  %v13781_v18 = vrot.slane %v13747_v8, 9  ;;  %v13938_v43 = vld [vmem:[%s18758_s9 + $0x1c8] sm:$0xe] }
  0x45   : > { %16576 = vmatpush3.bf16.msra.mxu0 %v18183_v47  ;;  %v1481_v12 = vsel %vm18773_vm4, %v13977_v1, %v1480_v2  ;;  %v1482_v13 = vrot.slane %v1480_v2, 4  ;;  %v416_v17 = vsel %vm18773_vm4, %v414_v7, %v415_v63  ;;  %v419_v19 = vrot.slane %v13748_v9, 5  ;;  %v13858_v63 = vld [vmem:[%s18758_s9 + $0x1c4] sm:$0xc] }
  0x46   : > { %v13415_v4 = vadd.f32 %v13414_v57, %v13384_v55  ;;  %16577 = vmatprep.subr.bf16.mxu0 %v18184_v61  ;;  %v422_v20 = vrot.slane %v13749_v15, 5  ;;  %v13796_v23 = vcombine.low %v413_v6, %v416_v17  ;;  %v13386_v24 = vunpack.c.l.bf16 %v416_v17  ;;  %v13754_v55 = vld [vmem:[%s18758_s9 + $0x300] sm:$0xf]  ;;  %v18188_v57 = vld [vmem:[%s25093_s2 + $0xe8] sm:$0xff]  }
  0x47   : > { %v1484_v27 = vsel %vm18773_vm4, %v1482_v13, %v1483_v14  ;;  %v420_v30 = vsel %vm18773_vm4, %v13781_v18, %v419_v19  ;;  %v421_v31 = vrot.slane %v419_v19, 4  ;;  %v13897_v32 = vrot.slane %v13855_v16, 10  ;;  %v18189_v14 = vld [vmem:[%s25093_s2 + $0xa8] sm:$0xff]   ;;  %v18190_v19 = vld [vmem:[%s25093_s2 + $0xf0] sm:$0xff]  }
  0x48   : > { %17907 = vmatmul.mubr.bf16.gmra.mrb[8].mxu0 %v13795_v54  ;;  %v13416_v25 = vadd.f32 %v13415_v4, %v13385_v11  ;;  %v13993_v29 = vcombine.low %v1481_v12, %v1484_v27  ;;  %v13387_v34 = vunpack.c.l.bf16 %v420_v30  ;;  %v1192_v35 = vrot.slane %v13856_v21, 6  ;;  %v13859_v4 = vld [vmem:[%s18758_s9 + $0x1c8] sm:$0xf] }
  0x49   : > { %4003 = vmatmul.mubr.bf16.gmra.mrb[8].mxu1 %v13912_v5  ;;  %16578 = vmatpush3.bf16.msra.mxu0 %v18186_v10  ;;  %v1195_v36 = vrot.slane %v13857_v28, 6  ;;  %v423_v39 = vsel %vm18773_vm4, %v421_v31, %v422_v20  ;;  %v13782_v41 = vrot.slane %v13750_v37, 9  ;;  %v426_v42 = vrot.slane %v13751_v38, 5  ;;  %v13860_v5 = vld [vmem:[%s18758_s9 + $0x1cc] sm:$0x3] }
  0x4a   : > { %17910 = vmatprep.mubr.bf16.mxu0 %v13796_v23  ;;  %v13417_v33 = vadd.f32 %v13416_v25, %v13386_v24  ;;  %4010 = vmatprep.mubr.bf16.mxu1 %v13993_v29  ;;  %v13797_v44 = vcombine.low %v420_v30, %v423_v39  ;;  %v13388_v45 = vunpack.c.l.bf16 %v423_v39  ;;  %v1193_v47 = vsel %vm18803_vm5, %v13897_v32, %v1192_v35  ;;  %v18191_v23 = vld [vmem:[%s25093_s2 + $0x158] sm:$0xff]   ;;  %v18192_v30 = vld [vmem:[%s25093_s2 + $0xb0] sm:$0xff]  }
  0x4b   : > { %v1194_v51 = vrot.slane %v1192_v35, 4  ;;  %v427_v52 = vsel %vm18773_vm4, %v13782_v41, %v426_v42  ;;  %v428_v53 = vrot.slane %v426_v42, 4  ;;  %v429_v54 = vrot.slane %v13752_v40, 5  ;;  %16579 = vmatprep.subr.bf16.mxu0 %v18188_v57  ;;  %v13756_v29 = vld [vmem:[%s18758_s9 + $0x318] sm:$0xe]  ;;  %16687 = vmatprep.subr.bf16.mxu1 %v18191_v23 }
  0x4c   : > { %v13418_v46 = vadd.f32 %v13417_v33, %v13387_v34  ;;  %v13389_v59 = vunpack.c.l.bf16 %v427_v52  ;;  %v13978_v60 = vrot.slane %v13938_v43, 9  ;;  %v1487_v61 = vrot.slane %v13939_v48, 5  ;;  %v13757_v32 = vld [vmem:[%s18758_s9 + $0x31c] sm:$0xf]  ;;  %v13758_v33 = vld [vmem:[%s18758_s9 + $0x320] sm:$0x1] }
  0x4d   : > { %v1196_v0 = vsel %vm18803_vm5, %v1194_v51, %v1195_v36  ;;  %v430_v1 = vsel %vm18773_vm4, %v428_v53, %v429_v54  ;;  %v1490_v2 = vrot.slane %v13940_v49, 5  ;;  %v13783_v3 = vrot.slane %v13753_v50, 9  ;;  %16580 = vmatpush3.bf16.msra.mxu0 %v18189_v14  ;;  %v18193_v35 = vld [vmem:[%s25093_s2 + $0x118] sm:$0xff]   ;;  %v13941_v40 = vld [vmem:[%s18758_s9 + $0x1e4] sm:$0xe] }
  0x4e   : > { %v13419_v58 = vadd.f32 %v13418_v46, %v13388_v45  ;;  %v13913_v6 = vcombine.low %v1193_v47, %v1196_v0  ;;  %v13798_v7 = vcombine.low %v427_v52, %v430_v1  ;;  %v13390_v8 = vunpack.c.l.bf16 %v430_v1  ;;  %16581 = vmatprep.subr.bf16.mxu0 %v18190_v19  ;;  %v13942_v41 = vld [vmem:[%s18758_s9 + $0x1e8] sm:$0xf]  ;;  %v13943_v42 = vld [vmem:[%s18758_s9 + $0x1ec] sm:$0x1]  ;;  %v13759_v47 = vld [vmem:[%s18758_s9 + $0x334] sm:$0xe]  ;;  %16688 = vmatpush3.bf16.msra.mxu1 %v18193_v35 }
  0x4f   : > { %v1488_v10 = vsel %vm18773_vm4, %v13978_v60, %v1487_v61  ;;  %v1489_v11 = vrot.slane %v1487_v61, 4  ;;  %v433_v12 = vrot.slane %v13754_v55, 5  ;;  %v436_v13 = vrot.slane %v13755_v62, 5  ;;  %v18194_v48 = vld [vmem:[%s25093_s2 + $0xf8] sm:$0xff]   ;;  %v13862_v1 = vld [vmem:[%s18758_s9 + $0x1e4] sm:$0xf] }
  0x50   : > { %17911 = vmatmul.mubr.bf16.gmra.mrb[12].mxu0 %v13797_v44  ;;  %v13420_v9 = vadd.f32 %v13419_v58, %v13389_v59  ;;  %v13898_v16 = vrot.slane %v13858_v63, 10  ;;  %v1199_v17 = vrot.slane %v13859_v4, 6  ;;  %v1202_v18 = vrot.slane %v13860_v5, 6  ;;  %v13760_v52 = vld [vmem:[%s18758_s9 + $0x338] sm:$0xf] }
  0x51   : > { %4011 = vmatmul.mubr.bf16.gmra.mrb[12].mxu1 %v13913_v6  ;;  %17914 = vmatprep.mubr.bf16.mxu0 %v13798_v7  ;;  %v1491_v20 = vsel %vm18773_vm4, %v1489_v11, %v1490_v2  ;;  %v434_v21 = vsel %vm18773_vm4, %v13783_v3, %v433_v12  ;;  %v435_v22 = vrot.slane %v433_v12, 4  ;;  %v13784_v34 = vrot.slane %v13756_v29, 9  ;;  %v13761_v53 = vld [vmem:[%s18758_s9 + $0x33c] sm:$0x1]  ;;  %v13861_v59 = vld [vmem:[%s18758_s9 + $0x1e0] sm:$0xc] }
  0x52   : > { %v13421_v15 = vadd.f32 %v13420_v9, %v13390_v8  ;;  %v13994_v24 = vcombine.low %v1488_v10, %v1491_v20  ;;  %v13391_v25 = vunpack.c.l.bf16 %v434_v21  ;;  %v1200_v27 = vsel %vm18803_vm5, %v13898_v16, %v1199_v17  ;;  %16582 = vmatpush3.bf16.msra.mxu0 %v18192_v30  ;;  %v18195_v60 = vld [vmem:[%s25093_s2 + $0xb8] sm:$0xff]   ;;  %v13863_v2 = vld [vmem:[%s18758_s9 + $0x1e8] sm:$0x3]  ;;  %v13762_v11 = vld [vmem:[%s18758_s9 + $0x350] sm:$0xe] }
  0x53   : > { %v1201_v28 = vrot.slane %v1199_v17, 4  ;;  %v437_v31 = vsel %vm18773_vm4, %v435_v22, %v436_v13  ;;  %v440_v44 = vrot.slane %v13757_v32, 5  ;;  %v443_v45 = vrot.slane %v13758_v33, 5  ;;  %16583 = vmatprep.subr.bf16.mxu0 %v18194_v48  ;;  %v13763_v16 = vld [vmem:[%s18758_s9 + $0x354] sm:$0xf] }
  0x54   : > { %4018 = vmatprep.mubr.bf16.mxu1 %v13994_v24  ;;  %v13799_v36 = vcombine.low %v434_v21, %v437_v31  ;;  %v13392_v37 = vunpack.c.l.bf16 %v437_v31  ;;  %v13422_v38 = vadd.f32 %v13421_v15, %v13391_v25  ;;  %v13979_v46 = vrot.slane %v13941_v40, 9  ;;  %v13764_v17 = vld [vmem:[%s18758_s9 + $0x358] sm:$0x1]  ;;  %v13944_v22 = vld [vmem:[%s18758_s9 + $0x200] sm:$0xe] }
  0x55   : > { %v1203_v39 = vsel %vm18803_vm5, %v1201_v28, %v1202_v18  ;;  %v1494_v50 = vrot.slane %v13942_v41, 5  ;;  %v1497_v51 = vrot.slane %v13943_v42, 5  ;;  %v441_v54 = vsel %vm18773_vm4, %v13784_v34, %v440_v44  ;;  %v13945_v23 = vld [vmem:[%s18758_s9 + $0x204] sm:$0xf]  ;;  %v13946_v30 = vld [vmem:[%s18758_s9 + $0x208] sm:$0x1] }
  0x56   : > { %v13914_v43 = vcombine.low %v1200_v27, %v1203_v39  ;;  %v13423_v49 = vadd.f32 %v13422_v38, %v13392_v37  ;;  %v442_v55 = vrot.slane %v440_v44, 4  ;;  %v13785_v57 = vrot.slane %v13759_v47, 9  ;;  %16584 = vmatpush3.bf16.msra.mxu0 %v18195_v60  ;;  %v18197_v24 = vld [vmem:[%s25093_s2 + $0x160] sm:$0xff]   ;;  %v13766_v42 = vld [vmem:[%s18758_s9 + $0x370] sm:$0xf] }
  0x57   : > { %v447_v58 = vrot.slane %v13760_v52, 5  ;;  %v13393_v61 = vunpack.c.l.bf16 %v441_v54  ;;  %v1495_v62 = vsel %vm18773_vm4, %v13979_v46, %v1494_v50  ;;  %v1496_v63 = vrot.slane %v1494_v50, 4  ;;  %v18198_v31 = vld [vmem:[%s25093_s2 + $0x1c0] sm:$0xff]   ;;  %16689 = vmatprep.subr.bf16.mxu1 %v18197_v24  ;;  %v13864_v48 = vld [vmem:[%s18758_s9 + $0x1fc] sm:$0xc] }
  0x58   : > { %17915 = vmatmul.mubr.bf16.gmra.mrb[16].mxu0 %v13799_v36  ;;  %v450_v0 = vrot.slane %v13761_v53, 5  ;;  %v444_v3 = vsel %vm18773_vm4, %v442_v55, %v443_v45  ;;  %v13899_v6 = vrot.slane %v13861_v59, 10  ;;  %v1206_v15 = vrot.slane %v13862_v1, 6  ;;  %v13765_v36 = vld [vmem:[%s18758_s9 + $0x36c] sm:$0xe]  ;;  %v18199_v37 = vld [vmem:[%s25093_s2 + $0x120] sm:$0xff]   ;;  %16793 = vmatprep.subr.bf16.mxu0 %v18198_v31 }
  0x59   : > { %4019 = vmatmul.mubr.bf16.gmra.mrb[16].mxu1 %v13914_v43  ;;  %v448_v4 = vsel %vm18773_vm4, %v13785_v57, %v447_v58  ;;  %v449_v5 = vrot.slane %v447_v58, 4  ;;  %v13800_v7 = vcombine.low %v441_v54, %v444_v3  ;;  %v13394_v8 = vunpack.c.l.bf16 %v444_v3  ;;  %v13767_v43 = vld [vmem:[%s18758_s9 + $0x374] sm:$0x1]  ;;  %v13866_v50 = vld [vmem:[%s18758_s9 + $0x204] sm:$0x3] }
  0x5a   : > { %v13424_v9 = vadd.f32 %v13423_v49, %v13393_v61  ;;  %v1498_v10 = vsel %vm18773_vm4, %v1496_v63, %v1497_v51  ;;  %v13395_v14 = vunpack.c.l.bf16 %v448_v4  ;;  %v1209_v21 = vrot.slane %v13863_v2, 6  ;;  %v13865_v49 = vld [vmem:[%s18758_s9 + $0x200] sm:$0xf]  ;;  %16690 = vmatpush3.bf16.msra.mxu1 %v18199_v37  ;;  %v13771_v24 = vld [vmem:[%s18758_s9 + $0x3a4] sm:$0xe] }
  0x5b   : > { %v13995_v12 = vcombine.low %v1495_v62, %v1498_v10  ;;  %v451_v13 = vsel %vm18773_vm4, %v449_v5, %v450_v0  ;;  %17918 = vmatprep.mubr.bf16.mxu0 %v13800_v7  ;;  %v1207_v25 = vsel %vm18803_vm5, %v13899_v6, %v1206_v15  ;;  %v1208_v27 = vrot.slane %v1206_v15, 4  ;;  %v13768_v6 = vld [vmem:[%s18758_s9 + $0x388] sm:$0xe]  ;;  %v13773_v31 = vld [vmem:[%s18758_s9 + $0x3ac] sm:$0x1] }
  0x5c   : > { %v13425_v18 = vadd.f32 %v13424_v9, %v13394_v8  ;;  %v13801_v19 = vcombine.low %v448_v4, %v451_v13  ;;  %v13396_v20 = vunpack.c.l.bf16 %v451_v13  ;;  %v13786_v28 = vrot.slane %v13762_v11, 9  ;;  %v18203_v7 = vld [vmem:[%s25093_s2 + $0x168] sm:$0xff]   ;;  %v13770_v13 = vld [vmem:[%s18758_s9 + $0x390] sm:$0x1]  ;;  %v13868_v37 = vld [vmem:[%s18758_s9 + $0x21c] sm:$0xf] }
  0x5d   : > { %4026 = vmatprep.mubr.bf16.mxu1 %v13995_v12  ;;  %v454_v29 = vrot.slane %v13763_v16, 5  ;;  %v457_v33 = vrot.slane %v13764_v17, 5  ;;  %v13980_v34 = vrot.slane %v13944_v22, 9  ;;  %v1501_v35 = vrot.slane %v13945_v23, 5  ;;  %v13769_v12 = vld [vmem:[%s18758_s9 + $0x38c] sm:$0xf]  ;;  %16691 = vmatprep.subr.bf16.mxu1 %v18203_v7 }
  0x5e   : > { %v13426_v32 = vadd.f32 %v13425_v18, %v13395_v14  ;;  %v1210_v38 = vsel %vm18803_vm5, %v1208_v27, %v1209_v21  ;;  %v1504_v41 = vrot.slane %v13946_v30, 5  ;;  %v13787_v53 = vrot.slane %v13765_v36, 9  ;;  %v13947_v14 = vld [vmem:[%s18758_s9 + $0x21c] sm:$0xe]  ;;  %v13949_v21 = vld [vmem:[%s18758_s9 + $0x224] sm:$0x1] }
  0x5f   : > { %v455_v39 = vsel %vm18773_vm4, %v13786_v28, %v454_v29  ;;  %v456_v40 = vrot.slane %v454_v29, 4  ;;  %v13915_v45 = vcombine.low %v1207_v25, %v1210_v38  ;;  %v1502_v47 = vsel %vm18773_vm4, %v13980_v34, %v1501_v35  ;;  %v13772_v30 = vld [vmem:[%s18758_s9 + $0x3a8] sm:$0xf]  ;;  %v13867_v36 = vld [vmem:[%s18758_s9 + $0x218] sm:$0xc] }
  0x60   : > { %17919 = vmatmul.mubr.bf16.gmra.mrb[20].mxu0 %v13801_v19  ;;  %v13427_v44 = vadd.f32 %v13426_v32, %v13396_v20  ;;  %v13397_v46 = vunpack.c.l.bf16 %v455_v39  ;;  %v1503_v52 = vrot.slane %v1501_v35, 4  ;;  %v461_v54 = vrot.slane %v13766_v42, 5  ;;  %v13948_v19 = vld [vmem:[%s18758_s9 + $0x220] sm:$0xf]  ;;  %v13870_v7 = vld [vmem:[%s18758_s9 + $0x234] sm:$0xc] }
  0x61   : > { %v458_v51 = vsel %vm18773_vm4, %v456_v40, %v457_v33  ;;  %4027 = vmatmul.mubr.bf16.gmra.mrb[20].mxu1 %v13915_v45  ;;  %v464_v59 = vrot.slane %v13767_v43, 5  ;;  %v13900_v63 = vrot.slane %v13864_v48, 10  ;;  %v1213_v3 = vrot.slane %v13865_v49, 6  ;;  %v13869_v42 = vld [vmem:[%s18758_s9 + $0x220] sm:$0x3]  ;;  %v18205_v43 = vld [vmem:[%s25093_s2 + $0x128] sm:$0xff]  }
  0x62   : > { %v13802_v55 = vcombine.low %v455_v39, %v458_v51  ;;  %v13398_v57 = vunpack.c.l.bf16 %v458_v51  ;;  %v13428_v58 = vadd.f32 %v13427_v44, %v13397_v46  ;;  %v1505_v60 = vsel %vm18773_vm4, %v1503_v52, %v1504_v41  ;;  %v13950_v52 = vld [vmem:[%s18758_s9 + $0x238] sm:$0xe]  ;;  %16692 = vmatpush3.bf16.msra.mxu1 %v18205_v43  ;;  %v14058_v43 = vld [vmem:[%s18758_s9 + $0x21c] sm:$0xf] }
  0x63   : > { %v462_v61 = vsel %vm18773_vm4, %v13787_v53, %v461_v54  ;;  %v463_v62 = vrot.slane %v461_v54, 4  ;;  %v13996_v1 = vcombine.low %v1502_v47, %v1505_v60  ;;  %v1216_v5 = vrot.slane %v13866_v50, 6 }
  0x64   : > { %17922 = vmatprep.mubr.bf16.mxu0 %v13802_v55  ;;  %v13429_v0 = vadd.f32 %v13428_v58, %v13398_v57  ;;  %v13399_v2 = vunpack.c.l.bf16 %v462_v61  ;;  %v1214_v11 = vsel %vm18803_vm5, %v13900_v63, %v1213_v3  ;;  %v1215_v15 = vrot.slane %v1213_v3, 4  ;;  %v13951_v58 = vld [vmem:[%s18758_s9 + $0x23c] sm:$0xf] }
  0x65   : > { %v465_v4 = vsel %vm18773_vm4, %v463_v62, %v464_v59  ;;  %4034 = vmatprep.mubr.bf16.mxu1 %v13996_v1  ;;  %v13788_v16 = vrot.slane %v13768_v6, 9  ;;  %v468_v17 = vrot.slane %v13769_v12, 5  ;;  %v471_v18 = vrot.slane %v13770_v13, 5  ;;  %v13952_v59 = vld [vmem:[%s18758_s9 + $0x240] sm:$0x1] }
  0x66   : > { %v13803_v8 = vcombine.low %v462_v61, %v465_v4  ;;  %v13400_v9 = vunpack.c.l.bf16 %v465_v4  ;;  %v13430_v10 = vadd.f32 %v13429_v0, %v13399_v2  ;;  %v13981_v22 = vrot.slane %v13947_v14, 9  ;;  %v14054_v0 = vld [vmem:[%s18758_s9 + $0x1fc] sm:$0xc]  ;;  %v14056_v6 = vld [vmem:[%s18758_s9 + $0x204] sm:$0x3] }
  0x67   : > { %v1508_v23 = vrot.slane %v13948_v19, 5  ;;  %v1217_v25 = vsel %vm18803_vm5, %v1215_v15, %v1216_v5  ;;  %v469_v27 = vsel %vm18773_vm4, %v13788_v16, %v468_v17  ;;  %v470_v28 = vrot.slane %v468_v17, 4  ;;  %v14055_v5 = vld [vmem:[%s18758_s9 + $0x200] sm:$0xf]  ;;  %v13871_v12 = vld [vmem:[%s18758_s9 + $0x238] sm:$0xf] }
  0x68   : > { %17923 = vmatmul.mubr.bf16.gmra.mrb[24].mxu0 %v13803_v8  ;;  %v13431_v20 = vadd.f32 %v13430_v10, %v13400_v9  ;;  %v1511_v29 = vrot.slane %v13949_v21, 5  ;;  %v13916_v32 = vcombine.low %v1214_v11, %v1217_v25  ;;  %v13401_v33 = vunpack.c.l.bf16 %v469_v27  ;;  %v13872_v16 = vld [vmem:[%s18758_s9 + $0x23c] sm:$0x3] }
  0x69   : > { %v1509_v34 = vsel %vm18773_vm4, %v13981_v22, %v1508_v23  ;;  %v1510_v35 = vrot.slane %v1508_v23, 4  ;;  %v472_v38 = vsel %vm18773_vm4, %v470_v28, %v471_v18  ;;  %v13789_v39 = vrot.slane %v13771_v24, 9  ;;  %v18209_v24 = vld [vmem:[%s25093_s2 + $0x170] sm:$0xff]  }
  0x6a   : > { %v475_v40 = vrot.slane %v13772_v30, 5  ;;  %v478_v41 = vrot.slane %v13773_v31, 5  ;;  %4035 = vmatmul.mubr.bf16.gmra.mrb[24].mxu1 %v13916_v32  ;;  %v13804_v44 = vcombine.low %v469_v27, %v472_v38  ;;  %v13402_v45 = vunpack.c.l.bf16 %v472_v38  ;;  %v18200_v30 = vld [vmem:[%s25093_s2 + $0x180] sm:$0xff]   ;;  %16693 = vmatprep.subr.bf16.mxu1 %v18209_v24  ;;  %v13877_v24 = vld [vmem:[%s18758_s9 + $0x270] sm:$0xf] }
  0x6b   : > { %v13432_v46 = vadd.f32 %v13431_v20, %v13401_v33  ;;  %v1512_v47 = vsel %vm18773_vm4, %v1510_v35, %v1511_v29  ;;  %v13901_v51 = vrot.slane %v13867_v36, 10  ;;  %v1220_v55 = vrot.slane %v13868_v37, 6  ;;  %v18196_v29 = vld [vmem:[%s18758_s9 + $0x15c] sm:$0xff]   ;;  %v13954_v35 = vld [vmem:[%s18758_s9 + $0x258] sm:$0xf] }
  0x6c   : > { %v13997_v48 = vcombine.low %v1509_v34, %v1512_v47  ;;  %v476_v49 = vsel %vm18773_vm4, %v13789_v39, %v475_v40  ;;  %v477_v50 = vrot.slane %v475_v40, 4  ;;  %17926 = vmatprep.mubr.bf16.mxu0 %v13804_v44  ;;  %v1223_v57 = vrot.slane %v13869_v42, 6  ;;  %v13953_v34 = vld [vmem:[%s18758_s9 + $0x254] sm:$0xe]  ;;  %v13955_v37 = vld [vmem:[%s18758_s9 + $0x25c] sm:$0x1] }
  0x6d   : > { %v13433_v53 = vadd.f32 %v13432_v46, %v13402_v45  ;;  %v13403_v54 = vunpack.c.l.bf16 %v476_v49  ;;  %v13982_v61 = vrot.slane %v13950_v52, 9  ;;  %v1515_v62 = vrot.slane %v13951_v58, 5  ;;  %v14057_v39 = vld [vmem:[%s18758_s9 + $0x218] sm:$0xc]  ;;  %v18204_v40 = vld [vmem:[%s25093_s2 + $0x1c8] sm:$0xff]  }
  0x6e   : > { %4042 = vmatprep.mubr.bf16.mxu1 %v13997_v48  ;;  %v479_v60 = vsel %vm18773_vm4, %v477_v50, %v478_v41  ;;  %v1518_v63 = vrot.slane %v13952_v59, 5  ;;  %v1221_v4 = vsel %vm18803_vm5, %v13901_v51, %v1220_v55  ;;  %v1222_v8 = vrot.slane %v1220_v55, 4  ;;  %v14059_v44 = vld [vmem:[%s18758_s9 + $0x220] sm:$0x3]  ;;  %v13874_v52 = vld [vmem:[%s18758_s9 + $0x254] sm:$0xf] }
  0x6f   : > { %v13805_v1 = vcombine.low %v476_v49, %v479_v60  ;;  %v13404_v2 = vunpack.c.l.bf16 %v479_v60  ;;  %v13434_v3 = vadd.f32 %v13433_v53, %v13403_v54  ;;  %v1516_v9 = vsel %vm18773_vm4, %v13982_v61, %v1515_v62  ;;  %v13873_v49 = vld [vmem:[%s18758_s9 + $0x250] sm:$0xc]  ;;  %v13875_v53 = vld [vmem:[%s18758_s9 + $0x258] sm:$0x3]  ;;  %v18206_v59 = vld [vmem:[%s25093_s2 + $0x188] sm:$0xff]  }
  0x70   : > { %v1517_v10 = vrot.slane %v1515_v62, 4  ;;  %v14102_v11 = vrot.slane %v14054_v0, 10  ;;  %v1891_v14 = vrot.slane %v14055_v5, 6  ;;  %v1894_v15 = vrot.slane %v14056_v6, 6  ;;  %v18211_v60 = vld [vmem:[%s25093_s2 + $0x130] sm:$0xff]  }
  0x71   : > { %17927 = vmatmul.mubr.bf16.gmra.mrb[28].mxu0 %v13805_v1  ;;  %v19102_v13 = vadd.f32 %v13434_v3, %v13404_v2  ;;  %v13902_v17 = vrot.slane %v13870_v7, 10  ;;  %v1224_v18 = vsel %vm18803_vm5, %v1222_v8, %v1223_v57  ;;  %v1227_v20 = vrot.slane %v13871_v12, 6  ;;  %v18210_v0 = vld [vmem:[%s25093_s2 + $0x1d0] sm:$0xff]   ;;  %v13958_v5 = vld [vmem:[%s18758_s9 + $0x278] sm:$0x1]  ;;  %16694 = vmatpush3.bf16.msra.mxu1 %v18211_v60 }
  0x72   : > { %v1519_v19 = vsel %vm18773_vm4, %v1517_v10, %v1518_v63  ;;  %v1230_v21 = vrot.slane %v13872_v16, 6  ;;  %v13917_v22 = vcombine.low %v1221_v4, %v1224_v18  ;;  %v1892_v25 = vsel %vm18803_vm5, %v14102_v11, %v1891_v14  ;;  %v13956_v63 = vld [vmem:[%s18758_s9 + $0x270] sm:$0xe]  ;;  %v13957_v4 = vld [vmem:[%s18758_s9 + $0x274] sm:$0xf] }
  0x73   : > { %25114 = vst [vmem:[#allocation11_spill] sm:$0xff] %v19102_v13  ;;  %v13998_v23 = vcombine.low %v1516_v9, %v1519_v19  ;;  %v1893_v27 = vrot.slane %v1891_v14, 4  ;;  %v1229_v28 = vrot.slane %v1227_v20, 4  ;;  %v1228_v32 = vsel %vm18803_vm5, %v13902_v17, %v1227_v20  ;;  %v14060_v6 = vld [vmem:[%s18758_s9 + $0x234] sm:$0xc]  ;;  %v18201_v9 = vld [vmem:[%s18758_s9 + $0x178] sm:$0xff]  }
  0x74   : > { %4043 = vmatmul.mubr.bf16.gmra.mrb[28].mxu1 %v13917_v22  ;;  %v13983_v38 = vrot.slane %v13953_v34, 9  ;;  %v1522_v41 = vrot.slane %v13954_v35, 5  ;;  %v1525_v42 = vrot.slane %v13955_v37, 5  ;;  %v14103_v46 = vrot.slane %v14057_v39, 10  ;;  %v14061_v12 = vld [vmem:[%s18758_s9 + $0x238] sm:$0xf] }
  0x75   : > { %4050 = vmatprep.mubr.bf16.mxu1 %v13998_v23  ;;  %v1895_v31 = vsel %vm18803_vm5, %v1893_v27, %v1894_v15  ;;  %v1231_v33 = vsel %vm18803_vm5, %v1229_v28, %v1230_v21  ;;  %v1898_v47 = vrot.slane %v14058_v43, 6  ;;  %v1901_v48 = vrot.slane %v14059_v44, 6  ;;  %v14062_v15 = vld [vmem:[%s18758_s9 + $0x23c] sm:$0x3]  ;;  %v18212_v18 = vld [vmem:[%s25093_s2 + $0x190] sm:$0xff]  }
  0x76   : > { %v14118_v36 = vcombine.low %v1892_v25, %v1895_v31  ;;  %v13918_v45 = vcombine.low %v1228_v32, %v1231_v33  ;;  %v1523_v50 = vsel %vm18773_vm4, %v13983_v38, %v1522_v41  ;;  %v1524_v51 = vrot.slane %v1522_v41, 4  ;;  %v13876_v23 = vld [vmem:[%s18758_s9 + $0x26c] sm:$0xc]  ;;  %v18215_v34 = vld [vmem:[%s25093_s2 + $0x178] sm:$0xff]   ;;  %v13960_v44 = vld [vmem:[%s18758_s9 + $0x290] sm:$0xf] }
  0x77   : > { %v13903_v54 = vrot.slane %v13873_v49, 10  ;;  %v1899_v55 = vsel %vm18803_vm5, %v14103_v46, %v1898_v47  ;;  %v1900_v57 = vrot.slane %v1898_v47, 4  ;;  %v1234_v58 = vrot.slane %v13874_v52, 6  ;;  %v18202_v39 = vld [vmem:[%s18758_s9 + $0x194] sm:$0xff]   ;;  %16695 = vmatprep.subr.bf16.mxu1 %v18215_v34  ;;  %v13959_v43 = vld [vmem:[%s18758_s9 + $0x28c] sm:$0xe] }
  0x78   : > { %4147 = vmatprep.mubr.bf16.mxu0 %v14118_v36  ;;  %v1526_v61 = vsel %vm18773_vm4, %v1524_v51, %v1525_v42  ;;  %v1237_v62 = vrot.slane %v13875_v53, 6  ;;  %v13984_v10 = vrot.slane %v13956_v63, 9  ;;  %v1529_v11 = vrot.slane %v13957_v4, 5  ;;  %v14063_v49 = vld [vmem:[%s18758_s9 + $0x250] sm:$0xc] }
  0x79   : > { %4148 = vmatmul.mubr.bf16.vlgmr.msra.gmra.mrb[32].mxu0 %v18196_v29  ;;  %v13999_v1 = vcombine.low %v1523_v50, %v1526_v61  ;;  %v1902_v2 = vsel %vm18803_vm5, %v1900_v57, %v1901_v48  ;;  %v1235_v3 = vsel %vm18803_vm5, %v13903_v54, %v1234_v58  ;;  %v1236_v8 = vrot.slane %v1234_v58, 4  ;;  %v13878_v29 = vld [vmem:[%s18758_s9 + $0x274] sm:$0x3]  ;;  %v18217_v50 = vld [vmem:[%s25093_s2 + $0x138] sm:$0xff]   ;;  %v13879_v61 = vld [vmem:[%s18758_s9 + $0x288] sm:$0xc] }
  0x7a   : > { %16794 = vmatpush3.bf16.msra.mxu0 %v18200_v30  ;;  %v14119_v7 = vcombine.low %v1899_v55, %v1902_v2  ;;  %v1532_v14 = vrot.slane %v13958_v5, 5  ;;  %v14104_v16 = vrot.slane %v14060_v6, 10  ;;  %v1905_v17 = vrot.slane %v14061_v12, 6  ;;  %v14064_v52 = vld [vmem:[%s18758_s9 + $0x254] sm:$0xf]  ;;  %v18218_v55 = vld [vmem:[%s25093_s2 + $0x198] sm:$0xff]   ;;  %16696 = vmatpush3.bf16.msra.mxu1 %v18217_v50 }
  0x7b   : > { %16795 = vmatprep.subr.bf16.mxu0 %v18204_v40  ;;  %v1238_v19 = vsel %vm18803_vm5, %v1236_v8, %v1237_v62  ;;  %v1530_v20 = vsel %vm18773_vm4, %v13984_v10, %v1529_v11  ;;  %v1531_v21 = vrot.slane %v1529_v11, 4  ;;  %v1908_v22 = vrot.slane %v14062_v15, 6  ;;  %v18216_v40 = vld [vmem:[%s25093_s2 + $0x1d8] sm:$0xff]   ;;  %v13880_v62 = vld [vmem:[%s18758_s9 + $0x28c] sm:$0xf] }
  0x7c   : > { %4051 = vmatmul.mubr.bf16.gmra.mrb[32].mxu1 %v13918_v45  ;;  %4155 = vmatprep.mubr.bf16.mxu0 %v14119_v7  ;;  %v13919_v25 = vcombine.low %v1235_v3, %v1238_v19  ;;  %v1906_v27 = vsel %vm18803_vm5, %v14104_v16, %v1905_v17  ;;  %v1907_v28 = vrot.slane %v1905_v17, 4  ;;  %v13904_v31 = vrot.slane %v13876_v23, 10  ;;  %v13961_v45 = vld [vmem:[%s18758_s9 + $0x294] sm:$0x1]  ;;  %v14065_v53 = vld [vmem:[%s18758_s9 + $0x258] sm:$0x3] }
  0x7d   : > { %4058 = vmatprep.mubr.bf16.mxu1 %v13999_v1  ;;  %v1533_v30 = vsel %vm18773_vm4, %v1531_v21, %v1532_v14  ;;  %v1241_v32 = vrot.slane %v13877_v24, 6  ;;  %v1244_v33 = vrot.slane %v13878_v29, 6  ;;  %v13985_v46 = vrot.slane %v13959_v43, 9  ;;  %v13881_v63 = vld [vmem:[%s18758_s9 + $0x290] sm:$0x3] }
  0x7e   : > { %16796 = vmatpush3.bf16.msra.mxu0 %v18206_v59  ;;  %v14000_v35 = vcombine.low %v1530_v20, %v1533_v30  ;;  %v1909_v36 = vsel %vm18803_vm5, %v1907_v28, %v1908_v22  ;;  %v1536_v47 = vrot.slane %v13960_v44, 5  ;;  %v1539_v48 = vrot.slane %v13961_v45, 5  ;;  %v18207_v7 = vld [vmem:[%s18758_s9 + $0x1b0] sm:$0xff]   ;;  %v13962_v8 = vld [vmem:[%s18758_s9 + $0x2a8] sm:$0xe]  ;;  %v18222_v28 = vld [vmem:[%s25093_s2 + $0x1e0] sm:$0xff]  }
  0x7f   : > { %16797 = vmatprep.subr.bf16.mxu0 %v18210_v0  ;;  %v14120_v37 = vcombine.low %v1906_v27, %v1909_v36  ;;  %v1243_v38 = vrot.slane %v1241_v32, 4  ;;  %v1242_v41 = vsel %vm18803_vm5, %v13904_v31, %v1241_v32  ;;  %v14105_v54 = vrot.slane %v14063_v49, 10  ;;  %v13964_v14 = vld [vmem:[%s18758_s9 + $0x2b0] sm:$0x1]  ;;  %v14066_v16 = vld [vmem:[%s18758_s9 + $0x26c] sm:$0xc] }
  0x80   : > { %v1537_v57 = vsel %vm18773_vm4, %v13985_v46, %v1536_v47  ;;  %v1538_v58 = vrot.slane %v1536_v47, 4  ;;  %v1912_v59 = vrot.slane %v14064_v52, 6  ;;  %v1915_v60 = vrot.slane %v14065_v53, 6  ;;  %v14067_v20 = vld [vmem:[%s18758_s9 + $0x270] sm:$0xf]  ;;  %v18224_v44 = vld [vmem:[%s25093_s2 + $0x1a0] sm:$0xff]  }
  0x81   : > { %4156 = vmatmul.mubr.bf16.gmra.mrb[36].mxu0 %v18201_v9  ;;  %v1245_v42 = vsel %vm18803_vm5, %v1243_v38, %v1244_v33  ;;  %v13905_v0 = vrot.slane %v13879_v61, 10  ;;  %v1248_v4 = vrot.slane %v13880_v62, 6  ;;  %v1251_v6 = vrot.slane %v13881_v63, 6  ;;  %v13963_v9 = vld [vmem:[%s18758_s9 + $0x2ac] sm:$0xf] }
  0x82   : > { %16798 = vmatpush3.bf16.msra.mxu0 %v18212_v18  ;;  %4163 = vmatprep.mubr.bf16.mxu0 %v14120_v37  ;;  %v13920_v51 = vcombine.low %v1242_v41, %v1245_v42  ;;  %v1540_v1 = vsel %vm18773_vm4, %v1538_v58, %v1539_v48  ;;  %v1913_v2 = vsel %vm18803_vm5, %v14105_v54, %v1912_v59  ;;  %v1914_v3 = vrot.slane %v1912_v59, 4  ;;  %v14068_v21 = vld [vmem:[%s18758_s9 + $0x274] sm:$0x3]  ;;  %v13882_v27 = vld [vmem:[%s18758_s9 + $0x2a4] sm:$0xc]  ;;  %v18208_v46 = vld [vmem:[%s18758_s9 + $0x1cc] sm:$0xff]  }
  0x83   : > { %16799 = vmatprep.subr.bf16.mxu0 %v18216_v40  ;;  %v14001_v5 = vcombine.low %v1537_v57, %v1540_v1  ;;  %v1249_v11 = vsel %vm18803_vm5, %v13905_v0, %v1248_v4  ;;  %v1250_v12 = vrot.slane %v1248_v4, 4  ;;  %v13986_v15 = vrot.slane %v13962_v8, 9  ;;  %v13883_v32 = vld [vmem:[%s18758_s9 + $0x2a8] sm:$0xf]  ;;  %v13884_v33 = vld [vmem:[%s18758_s9 + $0x2ac] sm:$0x3] }
  0x84   : > { %4059 = vmatmul.mubr.bf16.gmra.mrb[36].mxu1 %v13919_v25  ;;  %v1916_v10 = vsel %vm18803_vm5, %v1914_v3, %v1915_v60  ;;  %v1543_v18 = vrot.slane %v13963_v9, 5  ;;  %v1546_v19 = vrot.slane %v13964_v14, 5  ;;  %v14106_v23 = vrot.slane %v14066_v16, 10  ;;  %v13965_v47 = vld [vmem:[%s18758_s9 + $0x2c4] sm:$0xe] }
  0x85   : > { %4066 = vmatprep.mubr.bf16.mxu1 %v14000_v35  ;;  %v14121_v17 = vcombine.low %v1913_v2, %v1916_v10  ;;  %v1252_v22 = vsel %vm18803_vm5, %v1250_v12, %v1251_v6  ;;  %v1919_v24 = vrot.slane %v14067_v20, 6  ;;  %v1922_v25 = vrot.slane %v14068_v21, 6  ;;  %v13966_v48 = vld [vmem:[%s18758_s9 + $0x2c8] sm:$0xf]  ;;  %v14070_v57 = vld [vmem:[%s18758_s9 + $0x28c] sm:$0xf] }
  0x86   : > { %16800 = vmatpush3.bf16.msra.mxu0 %v18218_v55  ;;  %v13921_v29 = vcombine.low %v1249_v11, %v1252_v22  ;;  %v1544_v30 = vsel %vm18773_vm4, %v13986_v15, %v1543_v18  ;;  %v1545_v31 = vrot.slane %v1543_v18, 4  ;;  %v13906_v34 = vrot.slane %v13882_v27, 10  ;;  %v14069_v54 = vld [vmem:[%s18758_s9 + $0x288] sm:$0xc]  ;;  %v14071_v58 = vld [vmem:[%s18758_s9 + $0x290] sm:$0x3] }
  0x87   : > { %v1920_v35 = vsel %vm18803_vm5, %v14106_v23, %v1919_v24  ;;  %v1921_v36 = vrot.slane %v1919_v24, 4  ;;  %v1255_v37 = vrot.slane %v13883_v32, 6  ;;  %v1258_v38 = vrot.slane %v13884_v33, 6  ;;  %16801 = vmatprep.subr.bf16.mxu0 %v18222_v28  ;;  %v13885_v0 = vld [vmem:[%s18758_s9 + $0x2c0] sm:$0xc]  ;;  %v18213_v27 = vld [vmem:[%s18758_s9 + $0x1e8] sm:$0xff]  }
  0x88   : > { %v1547_v40 = vsel %vm18773_vm4, %v1545_v31, %v1546_v19  ;;  %v13987_v52 = vrot.slane %v13965_v47, 9  ;;  %v1550_v53 = vrot.slane %v13966_v48, 5  ;;  %v14107_v59 = vrot.slane %v14069_v54, 10  ;;  %v13886_v2 = vld [vmem:[%s18758_s9 + $0x2c4] sm:$0xf] }
  0x89   : > { %4164 = vmatmul.mubr.bf16.gmra.mrb[40].mxu0 %v18202_v39  ;;  %v19236_v39 = vld [vmem:[%s25093_s2 + $0x200] sm:$0xff]   ;;  %v14002_v41 = vcombine.low %v1544_v30, %v1547_v40  ;;  %v1923_v42 = vsel %vm18803_vm5, %v1921_v36, %v1922_v25  ;;  %v1257_v43 = vrot.slane %v1255_v37, 4  ;;  %v1256_v49 = vsel %vm18803_vm5, %v13906_v34, %v1255_v37  ;;  %v13887_v3 = vld [vmem:[%s18758_s9 + $0x2c8] sm:$0x3]  ;;  %v14074_v24 = vld [vmem:[%s18758_s9 + $0x2ac] sm:$0x3] }
  0x8a   : > { %4171 = vmatprep.mubr.bf16.mxu0 %v14121_v17  ;;  %17930 = vmatprep.subr.bf16.mxu1 %v19236_v39  ;;  %v14122_v45 = vcombine.low %v1920_v35, %v1923_v42  ;;  %v1551_v60 = vsel %vm18773_vm4, %v13987_v52, %v1550_v53  ;;  %v1552_v61 = vrot.slane %v1550_v53, 4  ;;  %v1926_v62 = vrot.slane %v14070_v57, 6  ;;  %v13968_v11 = vld [vmem:[%s18758_s9 + $0x2e0] sm:$0xe]  ;;  %v13969_v12 = vld [vmem:[%s18758_s9 + $0x2e4] sm:$0xf] }
  0x8b   : > { %16802 = vmatpush3.bf16.msra.mxu0 %v18224_v44  ;;  %v1259_v50 = vsel %vm18803_vm5, %v1257_v43, %v1258_v38  ;;  %v1929_v63 = vrot.slane %v14071_v58, 6  ;;  %v13907_v4 = vrot.slane %v13885_v0, 10  ;;  %v1262_v8 = vrot.slane %v13886_v2, 6  ;;  %v13970_v16 = vld [vmem:[%s18758_s9 + $0x2e8] sm:$0x1] }
  0x8c   : > { %4067 = vmatmul.mubr.bf16.gmra.mrb[40].mxu1 %v13920_v51  ;;  %v13967_v51 = vld [vmem:[%s18758_s9 + $0x2cc] sm:$0x1]  ;;  %v13922_v1 = vcombine.low %v1256_v49, %v1259_v50  ;;  %v1927_v6 = vsel %vm18803_vm5, %v14107_v59, %v1926_v62  ;;  %v1265_v10 = vrot.slane %v13887_v3, 6  ;;  %v13988_v17 = vrot.slane %v13968_v11, 9  ;;  %v14072_v18 = vld [vmem:[%s18758_s9 + $0x2a4] sm:$0xc] }
  0x8d   : > { %4074 = vmatprep.mubr.bf16.mxu1 %v14001_v5  ;;  %v1553_v55 = vrot.slane %v13967_v51, 5  ;;  %v1264_v15 = vrot.slane %v1262_v8, 4  ;;  %v1263_v20 = vsel %vm18803_vm5, %v13907_v4, %v1262_v8  ;;  %v1557_v21 = vrot.slane %v13969_v12, 5  ;;  %v14073_v23 = vld [vmem:[%s18758_s9 + $0x2a8] sm:$0xf] }
  0x8e   : > { %v1560_v22 = vrot.slane %v13970_v16, 5  ;;  %v14108_v28 = vrot.slane %v14072_v18, 10  ;;  %v1936_v30 = vrot.slane %v14074_v24, 6  ;;  %v13888_v31 = vld [vmem:[%s18758_s9 + $0x2dc] sm:$0xc]  ;;  %v18229_v42 = vld [vmem:[%s25093_s2 + $0x1e8] sm:$0xff]  }
  0x8f   : > { %v1554_v5 = vsel %vm18773_vm4, %v1552_v61, %v1553_v55  ;;  %v1266_v25 = vsel %vm18803_vm5, %v1264_v15, %v1265_v10  ;;  %v1558_v32 = vsel %vm18773_vm4, %v13988_v17, %v1557_v21  ;;  %v1559_v33 = vrot.slane %v1557_v21, 4  ;;  %v13889_v34 = vld [vmem:[%s18758_s9 + $0x2e0] sm:$0xf]  ;;  %v13890_v35 = vld [vmem:[%s18758_s9 + $0x2e4] sm:$0x3]  ;;  %16803 = vmatprep.subr.bf16.mxu0 %v18229_v42  ;;  %v18231_v4 = vld [vmem:[%s25093_s2 + $0x1a8] sm:$0xff]  }
  0x90   : > { %v14003_v9 = vcombine.low %v1551_v60, %v1554_v5  ;;  %v13908_v36 = vrot.slane %v13888_v31, 10  ;;  %v1269_v40 = vrot.slane %v13889_v34, 6  ;;  %v13923_v43 = vcombine.low %v1263_v20, %v1266_v25  ;;  %v18214_v49 = vld [vmem:[%s18758_s9 + $0x204] sm:$0xff]   ;;  %v13971_v50 = vld [vmem:[%s18758_s9 + $0x2fc] sm:$0xe]  ;;  %16804 = vmatpush3.bf16.msra.mxu0 %v18231_v4 }
  0x91   : > { %4172 = vmatmul.mubr.bf16.gmra.mrb[44].mxu0 %v18207_v7  ;;  %v1928_v7 = vrot.slane %v1926_v62, 4  ;;  %v1561_v44 = vsel %vm18773_vm4, %v1559_v33, %v1560_v22  ;;  %v13972_v51 = vld [vmem:[%s18758_s9 + $0x300] sm:$0xf]  ;;  %v13973_v54 = vld [vmem:[%s18758_s9 + $0x304] sm:$0x1]  ;;  %v13989_v55 = vrot.slane %v13971_v50, 9 }
  0x92   : > { %4179 = vmatprep.mubr.bf16.mxu0 %v14122_v45  ;;  %v14004_v45 = vcombine.low %v1558_v32, %v1561_v44  ;;  %v1271_v47 = vrot.slane %v1269_v40, 4  ;;  %v1270_v52 = vsel %vm18803_vm5, %v13908_v36, %v1269_v40  ;;  %v1564_v57 = vrot.slane %v13972_v51, 5  ;;  %v14075_v58 = vld [vmem:[%s18758_s9 + $0x2c0] sm:$0xc]  ;;  %v14076_v60 = vld [vmem:[%s18758_s9 + $0x2c4] sm:$0xf] }
  0x93   : > { %v1930_v14 = vsel %vm18803_vm5, %v1928_v7, %v1929_v63  ;;  %v1567_v59 = vrot.slane %v13973_v54, 5  ;;  %v14077_v61 = vld [vmem:[%s18758_s9 + $0x2c8] sm:$0x3]  ;;  %v14109_v62 = vrot.slane %v14075_v58, 10  ;;  %v13891_v3 = vld [vmem:[%s18758_s9 + $0x2f8] sm:$0xc] }
  0x94   : > { %4075 = vmatmul.mubr.bf16.gmra.mrb[44].mxu1 %v13921_v29  ;;  %v14123_v19 = vcombine.low %v1927_v6, %v1930_v14  ;;  %v1933_v29 = vrot.slane %v14073_v23, 6  ;;  %v1565_v63 = vsel %vm18773_vm4, %v13989_v55, %v1564_v57  ;;  %v1566_v0 = vrot.slane %v1564_v57, 4  ;;  %v13892_v6 = vld [vmem:[%s18758_s9 + $0x2fc] sm:$0xf]  ;;  %v13893_v7 = vld [vmem:[%s18758_s9 + $0x300] sm:$0x3] }
  0x95   : > { %4082 = vmatprep.mubr.bf16.mxu1 %v14002_v41  ;;  %v1272_v41 = vrot.slane %v13890_v35, 6  ;;  %v1943_v2 = vrot.slane %v14077_v61, 6  ;;  %v1276_v11 = vrot.slane %v13892_v6, 6  ;;  %v13909_v14 = vrot.slane %v13891_v3, 10  ;;  %v14078_v16 = vld [vmem:[%s18758_s9 + $0x2dc] sm:$0xc] }
  0x96   : > { %v1934_v37 = vsel %vm18803_vm5, %v14108_v28, %v1933_v29  ;;  %v1935_v38 = vrot.slane %v1933_v29, 4  ;;  %v1568_v8 = vsel %vm18773_vm4, %v1566_v0, %v1567_v59  ;;  %v1279_v15 = vrot.slane %v13893_v7, 6  ;;  %v14079_v17 = vld [vmem:[%s18758_s9 + $0x2e0] sm:$0xf]  ;;  %v14080_v20 = vld [vmem:[%s18758_s9 + $0x2e4] sm:$0x3] }
  0x97   : > { %v1273_v53 = vsel %vm18803_vm5, %v1271_v47, %v1272_v41  ;;  %v14005_v12 = vcombine.low %v1565_v63, %v1568_v8  ;;  %v14110_v21 = vrot.slane %v14078_v16, 10  ;;  %v1947_v23 = vrot.slane %v14079_v17, 6  ;;  %v14134_v25 = vld [vmem:[%s18758_s9 + $0x200] sm:$0xe]  ;;  %v14136_v33 = vld [vmem:[%s18758_s9 + $0x208] sm:$0x1] }
  0x98   : > { %v13924_v5 = vcombine.low %v1270_v52, %v1273_v53  ;;  %v1950_v24 = vrot.slane %v14080_v20, 6  ;;  %v1277_v28 = vsel %vm18803_vm5, %v13909_v14, %v1276_v11  ;;  %v14182_v34 = vrot.slane %v14134_v25, 9  ;;  %v14082_v44 = vld [vmem:[%s18758_s9 + $0x2fc] sm:$0xf]  ;;  %v18236_v51 = vld [vmem:[%s25093_s2 + $0x1f0] sm:$0xff]  }
  0x99   : > { %4180 = vmatmul.mubr.bf16.gmra.mrb[48].mxu0 %v18208_v46  ;;  %v1937_v46 = vsel %vm18803_vm5, %v1935_v38, %v1936_v30  ;;  %v18219_v30 = vld [vmem:[%s18758_s9 + $0x220] sm:$0xff]   ;;  %v1948_v31 = vsel %vm18803_vm5, %v14110_v21, %v1947_v23  ;;  %v1949_v32 = vrot.slane %v1947_v23, 4  ;;  %v2182_v42 = vrot.slane %v14136_v33, 5  ;;  %v14137_v52 = vld [vmem:[%s18758_s9 + $0x21c] sm:$0xe]  ;;  %16805 = vmatprep.subr.bf16.mxu0 %v18236_v51  ;;  %v18238_v7 = vld [vmem:[%s25093_s2 + $0x1b0] sm:$0xff]  }
  0x9a   : > { %4187 = vmatprep.mubr.bf16.mxu0 %v14123_v19  ;;  %v14124_v48 = vcombine.low %v1934_v37, %v1937_v46  ;;  %v1278_v19 = vrot.slane %v1276_v11, 4  ;;  %v18220_v37 = vld [vmem:[%s18758_s9 + $0x204] sm:$0xff]   ;;  %v1954_v47 = vrot.slane %v14082_v44, 6  ;;  %v14138_v53 = vld [vmem:[%s18758_s9 + $0x220] sm:$0xf]  ;;  %v14183_v8 = vrot.slane %v14137_v52, 9  ;;  %16806 = vmatpush3.bf16.msra.mxu0 %v18238_v7 }
  0x9b   : > { %v1951_v36 = vsel %vm18803_vm5, %v1949_v32, %v1950_v24  ;;  %v14139_v54 = vld [vmem:[%s18758_s9 + $0x224] sm:$0x1]  ;;  %v18221_v55 = vld [vmem:[%s18758_s9 + $0x23c] sm:$0xff]   ;;  %v14084_v61 = vld [vmem:[%s18758_s9 + $0x314] sm:$0xc] }
  0x9c   : > { %4083 = vmatmul.mubr.bf16.gmra.mrb[48].mxu1 %v13922_v1  ;;  %v1940_v1 = vrot.slane %v14076_v60, 6  ;;  %v1280_v29 = vsel %vm18803_vm5, %v1278_v19, %v1279_v15  ;;  %v14126_v40 = vcombine.low %v1948_v31, %v1951_v36  ;;  %v1956_v50 = vrot.slane %v1954_v47, 4  ;;  %v14086_v0 = vld [vmem:[%s18758_s9 + $0x31c] sm:$0x3]  ;;  %v14140_v14 = vld [vmem:[%s18758_s9 + $0x238] sm:$0xe] }
  0x9d   : > { %4090 = vmatprep.mubr.bf16.mxu1 %v14003_v9  ;;  %v13925_v38 = vcombine.low %v1277_v28, %v1280_v29  ;;  %v2186_v60 = vrot.slane %v14138_v53, 5  ;;  %v1964_v3 = vrot.slane %v14086_v0, 6  ;;  %v14141_v11 = vld [vmem:[%s18758_s9 + $0x23c] sm:$0xf]  ;;  %v14087_v19 = vld [vmem:[%s18758_s9 + $0x330] sm:$0xc] }
  0x9e   : > { %v1941_v9 = vsel %vm18803_vm5, %v14109_v62, %v1940_v1  ;;  %v1942_v10 = vrot.slane %v1940_v1, 4  ;;  %v14085_v62 = vld [vmem:[%s18758_s9 + $0x318] sm:$0xf]  ;;  %v18237_v20 = vld [vmem:[%s25093_s2 + $0x210] sm:$0xff]   ;;  %v14142_v23 = vld [vmem:[%s18758_s9 + $0x240] sm:$0x1] }
  0x9f   : > { %v1961_v1 = vrot.slane %v14085_v62, 6  ;;  %v18226_v15 = vld [vmem:[%s18758_s9 + $0x258] sm:$0xff]   ;;  %v2187_v21 = vsel %vm18773_vm4, %v14183_v8, %v2186_v60  ;;  %v14088_v24 = vld [vmem:[%s18758_s9 + $0x334] sm:$0xf]  ;;  %v14184_v28 = vrot.slane %v14140_v14, 9 }
  0xa0   : > { %v1944_v18 = vsel %vm18803_vm5, %v1942_v10, %v1943_v2  ;;  %v14112_v2 = vrot.slane %v14084_v61, 10  ;;  %v2189_v10 = vrot.slane %v14139_v54, 5  ;;  %v14089_v25 = vld [vmem:[%s18758_s9 + $0x338] sm:$0x3]  ;;  %v1968_v29 = vrot.slane %v14088_v24, 6  ;;  %v18227_v32 = vld [vmem:[%s18758_s9 + $0x23c] sm:$0xff]  }
  0xa1   : > { %4188 = vmatmul.mubr.bf16.gmra.mrb[52].mxu0 %v18213_v27  ;;  %v14125_v22 = vcombine.low %v1941_v9, %v1944_v18  ;;  %v14135_v27 = vld [vmem:[%s18758_s9 + $0x204] sm:$0xf]  ;;  %v1963_v6 = vrot.slane %v1961_v1, 4  ;;  %v2188_v9 = vrot.slane %v2186_v60, 4  ;;  %v2193_v18 = vrot.slane %v14141_v11, 5  ;;  %v18243_v53 = vld [vmem:[%s25093_s2 + $0x1f8] sm:$0xff]  }
  0xa2   : > { %4195 = vmatprep.mubr.bf16.mxu0 %v14124_v48  ;;  %v2179_v35 = vrot.slane %v14135_v27, 5  ;;  %v1962_v16 = vsel %vm18803_vm5, %v14112_v2, %v1961_v1  ;;  %v14143_v36 = vld [vmem:[%s18758_s9 + $0x254] sm:$0xe]  ;;  %16807 = vmatprep.subr.bf16.mxu0 %v18243_v53  ;;  %v14146_v61 = vld [vmem:[%s18758_s9 + $0x270] sm:$0xe]  ;;  %v18244_v0 = vld [vmem:[%s25093_s2 + $0x218] sm:$0xff]  }
  0xa3   : > { %v1965_v17 = vsel %vm18803_vm5, %v1963_v6, %v1964_v3  ;;  %v2195_v33 = vrot.slane %v2193_v18, 4  ;;  %v14147_v62 = vld [vmem:[%s18758_s9 + $0x274] sm:$0xf]  ;;  %v14093_v1 = vld [vmem:[%s18758_s9 + $0x368] sm:$0xc]  ;;  %v18245_v3 = vld [vmem:[%s25093_s2 + $0x1b8] sm:$0xff]  }
  0xa4   : > { %4091 = vmatmul.mubr.bf16.gmra.mrb[52].mxu1 %v13923_v43  ;;  %v2181_v41 = vrot.slane %v2179_v35, 4  ;;  %v14081_v43 = vld [vmem:[%s18758_s9 + $0x2f8] sm:$0xc]  ;;  %v2180_v57 = vsel %vm18773_vm4, %v14182_v34, %v2179_v35  ;;  %v14128_v27 = vcombine.low %v1962_v16, %v1965_v17  ;;  %v2196_v34 = vrot.slane %v14142_v23, 5  ;;  %v14094_v2 = vld [vmem:[%s18758_s9 + $0x36c] sm:$0xf]  ;;  %16808 = vmatpush3.bf16.msra.mxu0 %v18245_v3 }
  0xa5   : > { %4098 = vmatprep.mubr.bf16.mxu1 %v14004_v45  ;;  %v14083_v45 = vld [vmem:[%s18758_s9 + $0x300] sm:$0x3]  ;;  %v14111_v46 = vrot.slane %v14081_v43, 10  ;;  %v1970_v35 = vrot.slane %v1968_v29, 4  ;;  %v14095_v7 = vld [vmem:[%s18758_s9 + $0x370] sm:$0x3] }
  0xa6   : > { %v1957_v48 = vrot.slane %v14083_v45, 6  ;;  %v2183_v58 = vsel %vm18773_vm4, %v2181_v41, %v2182_v42  ;;  %v14090_v41 = vld [vmem:[%s18758_s9 + $0x34c] sm:$0xc]  ;;  %v14092_v45 = vld [vmem:[%s18758_s9 + $0x354] sm:$0x3]  ;;  %v14186_v11 = vrot.slane %v14146_v61, 9 }
  0xa7   : > { %v14198_v4 = vcombine.low %v2180_v57, %v2183_v58  ;;  %v14114_v52 = vrot.slane %v14090_v41, 10  ;;  %v1978_v57 = vrot.slane %v14092_v45, 6  ;;  %v18232_v58 = vld [vmem:[%s18758_s9 + $0x258] sm:$0xff]   ;;  %v14149_v23 = vld [vmem:[%s18758_s9 + $0x28c] sm:$0xe] }
  0xa8   : > { %v1958_v59 = vsel %vm18803_vm5, %v1956_v50, %v1957_v48  ;;  %v18228_v48 = vld [vmem:[%s18758_s9 + $0x274] sm:$0xff]   ;;  %v14185_v50 = vrot.slane %v14143_v36, 9  ;;  %v14100_v41 = vld [vmem:[%s18758_s9 + $0x3a4] sm:$0xf]  ;;  %v14101_v53 = vld [vmem:[%s18758_s9 + $0x3a8] sm:$0x3] }
  0xa9   : > { %4196 = vmatmul.mubr.bf16.gmra.mrb[56].mxu0 %v18214_v49  ;;  %v1955_v49 = vsel %vm18803_vm5, %v14111_v46, %v1954_v47  ;;  %v2194_v46 = vsel %vm18773_vm4, %v14184_v28, %v2193_v18  ;;  %v1985_v18 = vrot.slane %v14095_v7, 6  ;;  %v14151_v24 = vld [vmem:[%s18758_s9 + $0x294] sm:$0x1]  ;;  %v14096_v28 = vld [vmem:[%s18758_s9 + $0x384] sm:$0xc] }
  0xaa   : > { %4203 = vmatprep.mubr.bf16.mxu0 %v14125_v22  ;;  %v14127_v63 = vcombine.low %v1955_v49, %v1958_v59  ;;  %v2190_v22 = vsel %vm18773_vm4, %v2188_v9, %v2189_v10  ;;  %v2197_v49 = vsel %vm18773_vm4, %v2195_v33, %v2196_v34  ;;  %v18233_v10 = vld [vmem:[%s18758_s9 + $0x290] sm:$0xff]   ;;  %v14187_v33 = vrot.slane %v14149_v23, 9  ;;  %v19464_v3 = vld [vmem:[%s18758_s9 + $0x2c4] sm:$0xe] }
  0xab   : > { %v14199_v31 = vcombine.low %v2187_v21, %v2190_v22  ;;  %v14200_v59 = vcombine.low %v2194_v46, %v2197_v49  ;;  %v14097_v21 = vld [vmem:[%s18758_s9 + $0x388] sm:$0xf]  ;;  %v2217_v34 = vrot.slane %v14151_v24, 5  ;;  %v18239_v46 = vld [vmem:[%s18758_s9 + $0x290] sm:$0xff]   ;;  %v18250_v7 = vld [vmem:[%s25093_s2 + $0x280] sm:$0xff]  }
  0xac   : > { %4099 = vmatmul.mubr.bf16.gmra.mrb[56].mxu1 %v13924_v5  ;;  %v18225_v5 = vld [vmem:[%s18758_s9 + $0x220] sm:$0xff]   ;;  %v14154_v49 = vld [vmem:[%s18758_s9 + $0x2b0] sm:$0x1]  ;;  %16929 = vmatprep.subr.bf16.mxu0 %v18250_v7 }
  0xad   : > { %4106 = vmatprep.mubr.bf16.mxu1 %v14005_v12  ;;  %v18230_v12 = vld [vmem:[%s25093_s2 + $0x208] sm:$0xff]  }
  0xb1   : > { %4204 = vmatmul.mubr.bf16.gmra.mrb[60].mxu0 %v18219_v30  ;;  %v1971_v30 = vrot.slane %v14089_v25, 6 }
  0xb2   : > { %4211 = vmatprep.mubr.bf16.mxu0 %v14126_v40  ;;  %v14091_v40 = vld [vmem:[%s18758_s9 + $0x350] sm:$0xf] }
  0xb3   : > { %v1975_v42 = vrot.slane %v14091_v40, 6  ;;  %v1972_v44 = vsel %vm18803_vm5, %v1970_v35, %v1971_v30  ;;  %v14116_v35 = vrot.slane %v14096_v28, 10  ;;  %v19439_v40 = vld [vmem:[%s18758_s9 + $0x2ac] sm:$0xf]  ;;  %v19497_v28 = vld [vmem:[%s18758_s9 + $0x2a8] sm:$0xf] }
  0xb4   : > { %4107 = vmatmul.mubr.bf16.gmra.mrb[60].mxu1 %v13925_v38  ;;  %v14145_v38 = vld [vmem:[%s18758_s9 + $0x25c] sm:$0x1] }
  0xb5   : > { %4308 = vmatprep.mubr.bf16.mxu1 %v18220_v37  ;;  %v14144_v37 = vld [vmem:[%s18758_s9 + $0x258] sm:$0xf]  ;;  %v2203_v51 = vrot.slane %v14145_v38, 5 }
  0xb6   : > { %v2200_v47 = vrot.slane %v14144_v37, 5 }
  0xb8   : > { %v2202_v60 = vrot.slane %v2200_v47, 4  ;;  %v2201_v8 = vsel %vm18773_vm4, %v14185_v50, %v2200_v47  ;;  %v14152_v47 = vld [vmem:[%s18758_s9 + $0x2a8] sm:$0xe]  ;;  %v2221_v50 = vrot.slane %v19439_v40, 5  ;;  %v2612_v40 = vrot.slane %v19497_v28, 6 }
  0xb9   : > { %4212 = vmatmul.mubr.bf16.gmra.mrb[64].mxu0 %v18221_v55  ;;  %v1977_v55 = vrot.slane %v1975_v42, 4 }
  0xba   : > { %4219 = vmatprep.mubr.bf16.mxu0 %v14127_v63  ;;  %v14148_v63 = vld [vmem:[%s18758_s9 + $0x278] sm:$0x1]  ;;  %v2204_v9 = vsel %vm18773_vm4, %v2202_v60, %v2203_v51  ;;  %v14099_v51 = vld [vmem:[%s18758_s9 + $0x3a0] sm:$0xc]  ;;  %v18240_v60 = vld [vmem:[%s18758_s9 + $0x2c8] sm:$0xff]   ;;  %v2223_v61 = vrot.slane %v2221_v50, 4 }
  0xbb   : > { %v1979_v6 = vsel %vm18803_vm5, %v1977_v55, %v1978_v57  ;;  %v2210_v14 = vrot.slane %v14148_v63, 5  ;;  %v14201_v22 = vcombine.low %v2201_v8, %v2204_v9  ;;  %v14342_v9 = vld [vmem:[%s18758_s9 + $0x2a8] sm:$0xe] }
  0xbc   : > { %4309 = vmatmul.mubr.bf16.vlgmr.msra.gmra.mrb[64].mxu1 %v14198_v4  ;;  %v1982_v4 = vrot.slane %v14094_v2, 6 }
  0xbd   : > { %17931 = vmatpush3.bf16.msra.mxu1 %v19236_v39  ;;  %4316 = vmatprep.mubr.bf16.mxu1 %v18225_v5  ;;  %v14113_v39 = vrot.slane %v14087_v19, 10  ;;  %v1976_v5 = vsel %vm18803_vm5, %v14114_v52, %v1975_v42  ;;  %v14150_v19 = vld [vmem:[%s18758_s9 + $0x290] sm:$0xf]  ;;  %v18249_v42 = vld [vmem:[%s25093_s2 + $0x220] sm:$0xff]   ;;  %v1996_v52 = vrot.slane %v14100_v41, 6 }
  0xbe   : > { %17932 = vmatprep.subr.bf16.mxu1 %v18230_v12  ;;  %v14130_v16 = vcombine.low %v1976_v5, %v1979_v6  ;;  %v1984_v17 = vrot.slane %v1982_v4, 4  ;;  %v14343_v6 = vld [vmem:[%s18758_s9 + $0x2ac] sm:$0xf]  ;;  %v14345_v41 = vld [vmem:[%s18758_s9 + $0x2c4] sm:$0xe] }
  0xbf   : > { %v1969_v43 = vsel %vm18803_vm5, %v14113_v39, %v1968_v29  ;;  %v14098_v29 = vld [vmem:[%s18758_s9 + $0x38c] sm:$0x3]  ;;  %v1989_v39 = vrot.slane %v14097_v21, 6  ;;  %v1998_v63 = vrot.slane %v1996_v52, 4 }
  0xc0   : > { %v14129_v54 = vcombine.low %v1969_v43, %v1972_v44  ;;  %v1992_v45 = vrot.slane %v14098_v29, 6 }
  0xc1   : > { %4220 = vmatmul.mubr.bf16.gmra.mrb[68].mxu0 %v18226_v15  ;;  %17933 = vmatpush3.bf16.msra.mxu1 %v18230_v12  ;;  %v2207_v12 = vrot.slane %v14147_v62, 5  ;;  %v14115_v15 = vrot.slane %v14093_v1, 10  ;;  %v1991_v44 = vrot.slane %v1989_v39, 4  ;;  %v1990_v55 = vsel %vm18803_vm5, %v14116_v35, %v1989_v39 }
  0xc2   : > { %4227 = vmatprep.mubr.bf16.mxu0 %v14128_v27  ;;  %17934 = vmatprep.subr.bf16.mxu1 %v18237_v20  ;;  %v2214_v27 = vrot.slane %v14150_v19, 5  ;;  %v14117_v62 = vrot.slane %v14099_v51, 10 }
  0xc3   : > { %v2209_v25 = vrot.slane %v2207_v12, 4  ;;  %v1983_v30 = vsel %vm18803_vm5, %v14115_v15, %v1982_v4  ;;  %v2208_v36 = vsel %vm18773_vm4, %v14186_v11, %v2207_v12  ;;  %v1993_v57 = vsel %vm18803_vm5, %v1991_v44, %v1992_v45  ;;  %v19467_v4 = vld [vmem:[%s18758_s9 + $0x2cc] sm:$0x1]  ;;  %v19477_v11 = vld [vmem:[%s18758_s9 + $0x2e4] sm:$0xf] }
  0xc4   : > { %4317 = vmatmul.mubr.bf16.gmra.mrb[68].mxu1 %v14199_v31  ;;  %v1986_v31 = vsel %vm18803_vm5, %v1984_v17, %v1985_v18  ;;  %v2216_v38 = vrot.slane %v2214_v27, 4  ;;  %v2215_v1 = vsel %vm18773_vm4, %v14187_v33, %v2214_v27  ;;  %v14132_v8 = vcombine.low %v1990_v55, %v1993_v57  ;;  %v18241_v12 = vld [vmem:[%s18758_s9 + $0x2ac] sm:$0xff]   ;;  %v19484_v15 = vld [vmem:[%s18758_s9 + $0x2e8] sm:$0x1] }
  0xc5   : > { %4324 = vmatprep.mubr.bf16.mxu1 %v18227_v32  ;;  %17935 = vmatpush3.bf16.msra.mxu1 %v18237_v20  ;;  %v18234_v20 = vld [vmem:[%s18758_s9 + $0x274] sm:$0xff]   ;;  %v18235_v32 = vld [vmem:[%s18758_s9 + $0x2ac] sm:$0xff]   ;;  %v2211_v37 = vsel %vm18773_vm4, %v2209_v25, %v2210_v14  ;;  %v14131_v43 = vcombine.low %v1983_v30, %v1986_v31  ;;  %v19481_v14 = vld [vmem:[%s18758_s9 + $0x2e0] sm:$0xe]  ;;  %v2900_v17 = vrot.slane %v14343_v6, 5  ;;  %v2235_v18 = vrot.slane %v19477_v11, 5 }
  0xc6   : > { %17936 = vmatprep.subr.bf16.mxu1 %v18244_v0  ;;  %v2218_v2 = vsel %vm18773_vm4, %v2216_v38, %v2217_v34  ;;  %v1997_v19 = vsel %vm18803_vm5, %v14117_v62, %v1996_v52  ;;  %v2231_v21 = vrot.slane %v19467_v4, 5  ;;  %v14390_v25 = vrot.slane %v14342_v9, 9  ;;  %v14262_v30 = vld [vmem:[%s18758_s9 + $0x2a4] sm:$0xc]  ;;  %v19503_v31 = vld [vmem:[%s18758_s9 + $0x2c8] sm:$0xf] }
  0xc7   : > { %v14190_v29 = vrot.slane %v19481_v14, 9  ;;  %v2238_v39 = vrot.slane %v19484_v15, 5  ;;  %v2902_v34 = vrot.slane %v2900_v17, 4  ;;  %v2237_v35 = vrot.slane %v2235_v18, 4  ;;  %v18246_v44 = vld [vmem:[%s18758_s9 + $0x2c8] sm:$0xff]  }
  0xc8   : > { %v14310_v45 = vrot.slane %v14262_v30, 10  ;;  %v19533_v52 = vld [vmem:[%s18758_s9 + $0x2c0] sm:$0xc]  ;;  %v19539_v55 = vld [vmem:[%s18758_s9 + $0x2c8] sm:$0x3]  ;;  %v2901_v57 = vsel %vm18773_vm4, %v14390_v25, %v2900_v17 }
  0xc9   : > { %4228 = vmatmul.mubr.bf16.gmra.mrb[72].mxu0 %v18228_v48  ;;  %17937 = vmatpush3.bf16.msra.mxu1 %v18244_v0  ;;  %v14202_v48 = vcombine.low %v2208_v36, %v2211_v37  ;;  %v1999_v0 = vrot.slane %v14101_v53, 6  ;;  %v14264_v36 = vld [vmem:[%s18758_s9 + $0x2ac] sm:$0x3]  ;;  %v19513_v37 = vld [vmem:[%s18758_s9 + $0x300] sm:$0xf]  ;;  %v14311_v6 = vrot.slane %v19533_v52, 10 }
  0xca   : > { %4235 = vmatprep.mubr.bf16.mxu0 %v14129_v54  ;;  %17938 = vmatprep.subr.bf16.mxu1 %v18249_v42  ;;  %v19452_v54 = vld [vmem:[%s18758_s9 + $0x2c8] sm:$0xf]  ;;  %v2242_v51 = vrot.slane %v19513_v37, 5  ;;  %v19536_v53 = vld [vmem:[%s18758_s9 + $0x2c4] sm:$0xf] }
  0xcb   : > { %v2228_v5 = vrot.slane %v19452_v54, 5  ;;  %v2000_v23 = vsel %vm18803_vm5, %v1998_v63, %v1999_v0  ;;  %v19549_v62 = vld [vmem:[%s18758_s9 + $0x31c] sm:$0xf]  ;;  %v18247_v63 = vld [vmem:[%s18758_s9 + $0x300] sm:$0xff]   ;;  %v2619_v7 = vrot.slane %v19536_v53, 6 }
  0xcc   : > { %4325 = vmatmul.mubr.bf16.gmra.mrb[72].mxu1 %v14200_v59  ;;  %v2224_v59 = vrot.slane %v14154_v49, 5  ;;  %v14133_v38 = vcombine.low %v1997_v19, %v2000_v23  ;;  %v19526_v49 = vld [vmem:[%s18758_s9 + $0x2fc] sm:$0xe]  ;;  %v2244_v4 = vrot.slane %v2242_v51, 4  ;;  %v19561_v9 = vld [vmem:[%s18758_s9 + $0x2e0] sm:$0xe] }
  0xcd   : > { %4332 = vmatprep.mubr.bf16.mxu1 %v18232_v58  ;;  %17939 = vmatpush3.bf16.msra.mxu1 %v18249_v42  ;;  %v14188_v58 = vrot.slane %v14152_v47, 9  ;;  %v2230_v24 = vrot.slane %v2228_v5, 4  ;;  %v19518_v42 = vld [vmem:[%s18758_s9 + $0x2cc] sm:$0x1]  ;;  %v19570_v14 = vld [vmem:[%s18758_s9 + $0x2e8] sm:$0x1] }
  0xce   : > { %v2225_v33 = vsel %vm18773_vm4, %v2223_v61, %v2224_v59  ;;  %v2614_v59 = vrot.slane %v2612_v40, 4  ;;  %v19546_v61 = vld [vmem:[%s18758_s9 + $0x2e4] sm:$0xf]  ;;  %v19577_v17 = vld [vmem:[%s18758_s9 + $0x320] sm:$0x1]  ;;  %v2249_v19 = vrot.slane %v19549_v62, 5 }
  0xcf   : > { %v2914_v15 = vrot.slane %v19546_v61, 5  ;;  %v18248_v54 = vld [vmem:[%s18758_s9 + $0x2e4] sm:$0xff]   ;;  %v19582_v23 = vld [vmem:[%s18758_s9 + $0x2dc] sm:$0xc]  ;;  %v19597_v25 = vld [vmem:[%s18758_s9 + $0x2e0] sm:$0xf] }
  0xd0   : > { %v2621_v28 = vrot.slane %v2619_v7, 4  ;;  %v19639_v52 = vld [vmem:[%s18758_s9 + $0x33c] sm:$0x1]  ;;  %v14271_v61 = vld [vmem:[%s18758_s9 + $0x2f8] sm:$0xc] }
  0xd1   : > { %4236 = vmatmul.mubr.bf16.gmra.mrb[76].mxu0 %v18233_v10  ;;  %v14344_v10 = vld [vmem:[%s18758_s9 + $0x2b0] sm:$0x1]  ;;  %v2916_v30 = vrot.slane %v2914_v15, 4  ;;  %v19642_v53 = vld [vmem:[%s18758_s9 + $0x2fc] sm:$0xf] }
  0xd2   : > { %4243 = vmatprep.mubr.bf16.mxu0 %v14130_v16  ;;  %v14203_v16 = vcombine.low %v2215_v1, %v2218_v2  ;;  %v2903_v27 = vrot.slane %v14344_v10, 5  ;;  %v2910_v1 = vrot.slane %v19518_v42, 5  ;;  %v14191_v2 = vrot.slane %v19526_v49, 9  ;;  %v18251_v42 = vld [vmem:[%s25093_s2 + $0x240] sm:$0xff]   ;;  %v18255_v49 = vld [vmem:[%s25093_s2 + $0x288] sm:$0xff]  }
  0xd3   : > { %v14273_v62 = vld [vmem:[%s18758_s9 + $0x300] sm:$0x3] }
  0xd4   : > { %4333 = vmatmul.mubr.bf16.gmra.mrb[76].mxu1 %v14201_v22  ;;  %v18242_v22 = vld [vmem:[%s18758_s9 + $0x2e4] sm:$0xff]  }
  0xd5   : > { %4340 = vmatprep.mubr.bf16.mxu1 %v18234_v20  ;;  %v14189_v20 = vrot.slane %v19464_v3, 9 }
  0xd7   : > { %v2229_v10 = vsel %vm18773_vm4, %v14189_v20, %v2228_v5  ;;  %v19588_v20 = vsel %vm18773_vm4, %v14190_v29, %v2235_v18  ;;  %v14392_v18 = vrot.slane %v19561_v9, 9  ;;  %v19605_v29 = vld [vmem:[%s18758_s9 + $0x2e4] sm:$0x3] }
  0xd9   : > { %4244 = vmatmul.mubr.bf16.gmra.mrb[80].mxu0 %v18235_v32  ;;  %v2222_v32 = vsel %vm18773_vm4, %v14188_v58, %v2221_v50  ;;  %v19529_v50 = vld [vmem:[%s18758_s9 + $0x304] sm:$0x1]  ;;  %v2904_v58 = vsel %vm18773_vm4, %v2902_v34, %v2903_v27 }
  0xda   : > { %4251 = vmatprep.mubr.bf16.mxu0 %v14131_v43  ;;  %v18254_v43 = vld [vmem:[%s25093_s2 + $0x228] sm:$0xff]   ;;  %v14204_v47 = vcombine.low %v2222_v32, %v2225_v33  ;;  %v2245_v3 = vrot.slane %v19529_v50, 5  ;;  %v2252_v33 = vrot.slane %v19577_v17, 5  ;;  %v19636_v50 = vld [vmem:[%s18758_s9 + $0x334] sm:$0xe]  ;;  %v14313_v17 = vrot.slane %v14271_v61, 10 }
  0xdb   : > { %17940 = vmatprep.subr.bf16.mxu1 %v18254_v43 }
  0xdc   : > { %4341 = vmatmul.mubr.bf16.gmra.mrb[80].mxu1 %v14202_v48  ;;  %v2615_v48 = vrot.slane %v14264_v36, 6  ;;  %v14312_v36 = vrot.slane %v19582_v23, 10 }
  0xdd   : > { %4348 = vmatprep.mubr.bf16.mxu1 %v18239_v46  ;;  %v2907_v46 = vrot.slane %v19503_v31, 5  ;;  %17941 = vmatpush3.bf16.msra.mxu1 %v18254_v43  ;;  %v2917_v31 = vrot.slane %v19570_v14, 5  ;;  %v2629_v43 = vrot.slane %v19605_v29, 6  ;;  %v19692_v14 = vld [vmem:[%s18758_s9 + $0x354] sm:$0xf] }
  0xde   : > { %v2616_v27 = vsel %vm18803_vm5, %v2614_v59, %v2615_v48  ;;  %v19730_v29 = vld [vmem:[%s18758_s9 + $0x314] sm:$0xc] }
  0xdf   : > { %v2909_v0 = vrot.slane %v2907_v46, 4 }
  0xe1   : > { %4252 = vmatmul.mubr.bf16.gmra.mrb[84].mxu0 %v18240_v60  ;;  %v14391_v60 = vrot.slane %v14345_v41, 9  ;;  %v2911_v34 = vsel %vm18773_vm4, %v2909_v0, %v2910_v1  ;;  %v18259_v41 = vld [vmem:[%s25093_s2 + $0x230] sm:$0xff]   ;;  %v19671_v0 = vsel %vm18773_vm4, %v14392_v18, %v2914_v15  ;;  %v2263_v18 = vrot.slane %v19692_v14, 5 }
  0xe2   : > { %4259 = vmatprep.mubr.bf16.mxu0 %v14132_v8  ;;  %v2622_v8 = vrot.slane %v19539_v55, 6  ;;  %17942 = vmatprep.subr.bf16.mxu1 %v18259_v41 }
  0xe3   : > { %v2908_v11 = vsel %vm18773_vm4, %v14391_v60, %v2907_v46  ;;  %17943 = vmatpush3.bf16.msra.mxu1 %v18259_v41  ;;  %v19660_v60 = vsel %vm18803_vm5, %v14311_v6, %v2619_v7  ;;  %v18252_v6 = vld [vmem:[%s18758_s9 + $0x300] sm:$0xff]   ;;  %v2918_v7 = vsel %vm18773_vm4, %v2916_v30, %v2917_v31  ;;  %v18261_v30 = vld [vmem:[%s25093_s2 + $0x250] sm:$0xff]   ;;  %v18264_v31 = vld [vmem:[%s25093_s2 + $0x238] sm:$0xff]  }
  0xe4   : > { %4349 = vmatmul.mubr.bf16.gmra.mrb[84].mxu1 %v14203_v16  ;;  %v19574_v16 = vld [vmem:[%s18758_s9 + $0x318] sm:$0xe]  ;;  %v14407_v55 = vcombine.low %v2908_v11, %v2911_v34  ;;  %v19664_v37 = vsel %vm18803_vm5, %v2621_v28, %v2622_v8  ;;  %v19726_v28 = vld [vmem:[%s18758_s9 + $0x358] sm:$0x1]  ;;  %v14408_v34 = vcombine.low %v19671_v0, %v2918_v7  ;;  %17944 = vmatprep.subr.bf16.mxu1 %v18264_v31 }
  0xe5   : > { %4356 = vmatprep.mubr.bf16.mxu1 %v18241_v12  ;;  %v2232_v12 = vsel %vm18773_vm4, %v2230_v24, %v2231_v21  ;;  %v19592_v21 = vsel %vm18773_vm4, %v2237_v35, %v2238_v39  ;;  %v2613_v24 = vsel %vm18803_vm5, %v14310_v45, %v2612_v40  ;;  %v19608_v39 = vld [vmem:[%s18758_s9 + $0x300] sm:$0xf]  ;;  %v14192_v32 = vrot.slane %v19574_v16, 9  ;;  %v19618_v40 = vld [vmem:[%s18758_s9 + $0x338] sm:$0xf] }
  0xe6   : > { %v14205_v5 = vcombine.low %v2229_v10, %v2232_v12  ;;  %v2251_v35 = vrot.slane %v2249_v19, 4  ;;  %v14353_v45 = vld [vmem:[%s18758_s9 + $0x304] sm:$0x1]  ;;  %v2921_v46 = vrot.slane %v19608_v39, 5  ;;  %v14326_v48 = vcombine.low %v2613_v24, %v2616_v27  ;;  %v18256_v10 = vld [vmem:[%s25093_s2 + $0x248] sm:$0xff]  }
  0xe7   : > { %v2256_v59 = vrot.slane %v19618_v40, 5  ;;  %v19681_v8 = vsel %vm18773_vm4, %v14192_v32, %v2249_v19  ;;  %v14193_v12 = vrot.slane %v19636_v50, 9  ;;  %v2259_v16 = vrot.slane %v19639_v52, 5  ;;  %v19733_v39 = vld [vmem:[%s18758_s9 + $0x318] sm:$0xf]  ;;  %17945 = vmatpush3.bf16.msra.mxu1 %v18264_v31  ;;  %v18253_v52 = vld [vmem:[%s18758_s9 + $0x31c] sm:$0xff]  }
  0xe8   : > { %v19685_v9 = vsel %vm18773_vm4, %v2251_v35, %v2252_v33  ;;  %v2636_v19 = vrot.slane %v14273_v62, 6  ;;  %v14327_v33 = vcombine.low %v19660_v60, %v19664_v37  ;;  %v19755_v40 = vld [vmem:[%s18758_s9 + $0x31c] sm:$0x3]  ;;  %v2265_v62 = vrot.slane %v2263_v18, 4  ;;  %v19789_v0 = vld [vmem:[%s18758_s9 + $0x338] sm:$0xf] }
  0xe9   : > { %4260 = vmatmul.mubr.bf16.gmra.mrb[88].mxu0 %v18242_v22  ;;  %v14406_v22 = vcombine.low %v2901_v57, %v2904_v58  ;;  %v19648_v57 = vsel %vm18773_vm4, %v14191_v2, %v2242_v51  ;;  %v19652_v58 = vsel %vm18773_vm4, %v2244_v4, %v2245_v3  ;;  %v2923_v2 = vrot.slane %v2921_v46, 4  ;;  %v19674_v4 = vld [vmem:[%s18758_s9 + $0x31c] sm:$0xf] }
  0xea   : > { %4267 = vmatprep.mubr.bf16.mxu0 %v14133_v38  ;;  %v2626_v38 = vrot.slane %v19597_v25, 6  ;;  %v2924_v3 = vrot.slane %v14353_v45, 5  ;;  %v2258_v15 = vrot.slane %v2256_v59, 4  ;;  %v2928_v24 = vrot.slane %v19674_v4, 5  ;;  %v19715_v25 = vld [vmem:[%s18758_s9 + $0x350] sm:$0xe] }
  0xeb   : > { %v14207_v32 = vcombine.low %v19648_v57, %v19652_v58  ;;  %v14208_v35 = vcombine.low %v19681_v8, %v19685_v9  ;;  %v18265_v45 = vld [vmem:[%s25093_s2 + $0x298] sm:$0xff]   ;;  %v14194_v50 = vrot.slane %v19715_v25, 9  ;;  %v2266_v58 = vrot.slane %v19726_v28, 5 }
  0xec   : > { %4357 = vmatmul.mubr.bf16.gmra.mrb[88].mxu1 %v14204_v47  ;;  %v14206_v47 = vcombine.low %v19588_v20, %v19592_v21  ;;  %v2628_v51 = vrot.slane %v2626_v38, 4  ;;  %v19708_v20 = vld [vmem:[%s18758_s9 + $0x318] sm:$0xe]  ;;  %v19711_v21 = vld [vmem:[%s18758_s9 + $0x320] sm:$0x1]  ;;  %v19723_v11 = vsel %vm18773_vm4, %v2923_v2, %v2924_v3  ;;  %v2930_v57 = vrot.slane %v2928_v24, 4 }
  0xed   : > { %4364 = vmatprep.mubr.bf16.mxu1 %v18246_v44  ;;  %v14351_v44 = vld [vmem:[%s18758_s9 + $0x2fc] sm:$0xe]  ;;  %v2935_v31 = vrot.slane %v19789_v0, 5 }
  0xee   : > { %v14393_v1 = vrot.slane %v14351_v44, 9  ;;  %v19705_v23 = vsel %vm18803_vm5, %v2628_v51, %v2629_v43  ;;  %v2640_v44 = vrot.slane %v19733_v39, 6 }
  0xef   : > { %v2937_v0 = vrot.slane %v2935_v31, 4 }
  0xf0   : > { %v19719_v27 = vsel %vm18773_vm4, %v14393_v1, %v2921_v46 }
  0xf1   : > { %4268 = vmatmul.mubr.bf16.gmra.mrb[92].mxu0 %v18247_v63  ;;  %v2633_v63 = vrot.slane %v19642_v53, 6  ;;  %v14409_v41 = vcombine.low %v19719_v27, %v19723_v11 }
  0xf2   : > { %4469 = vmatprep.mubr.bf16.mxu0 %v14406_v22  ;;  %v18260_v22 = vld [vmem:[%s25093_s2 + $0x290] sm:$0xff]  }
  0xf3   : > { %v19765_v43 = vsel %vm18803_vm5, %v14313_v17, %v2633_v63 }
  0xf4   : > { %4365 = vmatmul.mubr.bf16.gmra.mrb[92].mxu1 %v14205_v5  ;;  %v2635_v5 = vrot.slane %v2633_v63, 4  ;;  %v2643_v63 = vrot.slane %v19755_v40, 6 }
  0xf5   : > { %4372 = vmatprep.mubr.bf16.mxu1 %v18248_v54  ;;  %v19701_v54 = vsel %vm18803_vm5, %v14312_v36, %v2626_v38  ;;  %v19752_v38 = vsel %vm18773_vm4, %v14193_v12, %v2256_v59  ;;  %v14314_v59 = vrot.slane %v19730_v29, 10  ;;  %v19801_v12 = vld [vmem:[%s18758_s9 + $0x370] sm:$0xf] }
  0xf6   : > { %v14328_v36 = vcombine.low %v19701_v54, %v19705_v23 }
  0xf9   : > { %4470 = vmatmul.mubr.bf16.vlgmr.msra.gmra.mrb[96].mxu0 %v14326_v48  ;;  %v14394_v48 = vrot.slane %v19708_v20, 9  ;;  %v14357_v20 = vld [vmem:[%s18758_s9 + $0x334] sm:$0xe] }
  0xfa   : > { %16930 = vmatpush3.bf16.msra.mxu0 %v18251_v42  ;;  %4477 = vmatprep.mubr.bf16.mxu0 %v14407_v55  ;;  %v19761_v42 = vsel %vm18773_vm4, %v2258_v15, %v2259_v16  ;;  %v18266_v15 = vld [vmem:[%s25093_s2 + $0x258] sm:$0xff]  }
  0xfb   : > { %16931 = vmatprep.subr.bf16.mxu0 %v18255_v49  ;;  %v2931_v49 = vrot.slane %v19711_v21, 5  ;;  %v14209_v61 = vcombine.low %v19752_v38, %v19761_v42  ;;  %v14359_v21 = vld [vmem:[%s18758_s9 + $0x33c] sm:$0x1]  ;;  %v19816_v29 = vsel %vm18773_vm4, %v14394_v48, %v2928_v24  ;;  %v2270_v24 = vrot.slane %v19801_v12, 5  ;;  %v19947_v12 = vld [vmem:[%s18758_s9 + $0x34c] sm:$0xc] }
  0xfc   : > { %4373 = vmatmul.mubr.bf16.gmra.mrb[96].mxu1 %v14206_v47  ;;  %v19773_v47 = vsel %vm18803_vm5, %v2635_v5, %v2636_v19  ;;  %v19837_v48 = vsel %vm18773_vm4, %v14194_v50, %v2263_v18  ;;  %v19852_v50 = vld [vmem:[%s18758_s9 + $0x354] sm:$0xf]  ;;  %v14316_v42 = vrot.slane %v19947_v12, 10  ;;  %v20023_v12 = vld [vmem:[%s18758_s9 + $0x36c] sm:$0xf] }
  0xfd   : > { %4380 = vmatprep.mubr.bf16.mxu1 %v18252_v6  ;;  %v14329_v7 = vcombine.low %v19765_v43, %v19773_v47  ;;  %v2272_v39 = vrot.slane %v2270_v24, 4  ;;  %v2942_v11 = vrot.slane %v19852_v50, 5 }
  0xfe   : > { %16932 = vmatpush3.bf16.msra.mxu0 %v18256_v10  ;;  %v2642_v10 = vrot.slane %v2640_v44, 4 }
  0xff   : > { %16933 = vmatprep.subr.bf16.mxu0 %v18260_v22 }
 0x100   : > { %v19888_v27 = vsel %vm18803_vm5, %v2642_v10, %v2643_v63 }
 0x101   : > { %4478 = vmatmul.mubr.bf16.gmra.mrb[100].mxu0 %v14327_v33 }
 0x102   : > { %4485 = vmatprep.mubr.bf16.mxu0 %v14408_v34  ;;  %16934 = vmatpush3.bf16.msra.mxu0 %v18261_v30  ;;  %v19820_v30 = vsel %vm18773_vm4, %v2930_v57, %v2931_v49  ;;  %v19841_v49 = vsel %vm18773_vm4, %v2265_v62, %v2266_v58  ;;  %v19863_v62 = vsel %vm18803_vm5, %v14314_v59, %v2640_v44  ;;  %v19880_v59 = vld [vmem:[%s18758_s9 + $0x358] sm:$0x1] }
 0x103   : > { %16935 = vmatprep.subr.bf16.mxu0 %v18265_v45  ;;  %v19830_v45 = vld [vmem:[%s18758_s9 + $0x374] sm:$0x1]  ;;  %v14410_v58 = vcombine.low %v19816_v29, %v19820_v30 }
 0x104   : > { %4381 = vmatmul.mubr.bf16.gmra.mrb[100].mxu1 %v14207_v32  ;;  %v19824_v32 = vld [vmem:[%s18758_s9 + $0x36c] sm:$0xe] }
 0x105   : > { %4388 = vmatprep.mubr.bf16.mxu1 %v18253_v52  ;;  %v2938_v52 = vrot.slane %v14359_v21, 5  ;;  %v14195_v18 = vrot.slane %v19824_v32, 9 }
 0x106   : > { %16936 = vmatpush3.bf16.msra.mxu0 %v18266_v15  ;;  %v14210_v15 = vcombine.low %v19837_v48, %v19841_v49 }
 0x107   : > { %v19905_v21 = vsel %vm18773_vm4, %v2937_v0, %v2938_v52  ;;  %v2944_v52 = vrot.slane %v2942_v11, 4 }
 0x109   : > { %4486 = vmatmul.mubr.bf16.gmra.mrb[104].mxu0 %v14328_v36 }
 0x10a   : > { %4493 = vmatprep.mubr.bf16.mxu0 %v14409_v41  ;;  %v19892_v41 = vld [vmem:[%s18758_s9 + $0x38c] sm:$0xf] }
 0x10b   : > { %v17900_v46 = vpop.f32.mrb[0].mxu0  ;;  %v2277_v50 = vrot.slane %v19892_v41, 5 }
 0x10c   : > { %v16305_v53 = vpack.c.bf16 %v17900_v46, %v17900_v46  ;;  %v674_v55 = vpop.f32.mrb[1].mxu0  ;;  %v16473_v60 = vpop.f32.mrb[0].mxu1  ;;  %v1001_v25 = vmul.f32 %v17900_v46, %v17900_v46  ;;  %4389 = vmatmul.mubr.bf16.gmra.mrb[104].mxu1 %v14208_v35 }
 0x10d   : > { %v16303_v37 = vpack.c.bf16 %v674_v55, %v674_v55  ;;  %v17901_v51 = vpop.f32.mrb[2].mxu0  ;;  %v999_v1 = vmul.f32 %v674_v55, %v674_v55  ;;  %v16474_v2 = vpop.f32.mrb[1].mxu1 }
 0x10e   : > { %931 = vst [vmem:[%s19793_s18 + $0x20] sm:$0xf] %v16305_v53  ;;  %v16306_v3 = vpack.c.bf16 %v17901_v51, %v17901_v51  ;;  %v677_v6 = vpop.f32.mrb[3].mxu0  ;;  %v19807_v16 = vadd.f32 %v16474_v2, %v16473_v60  ;;  %v16476_v17 = vpop.f32.mrb[2].mxu1  ;;  %v19844_v53 = vld [vmem:[%s18758_s9 + $0x330] sm:$0xc]  ;;  %v1002_v57 = vmul.f32 %v17901_v51, %v17901_v51 }
 0x10f   : > { %929 = vst [vmem:[%s19793_s18] sm:$0xf] %v16303_v37  ;;  %v16304_v19 = vpack.c.bf16 %v677_v6, %v677_v6  ;;  %v961_v22 = vadd.f32 %v677_v6, %v674_v55  ;;  %v1000_v5 = vmul.f32 %v677_v6, %v677_v6  ;;  %v16477_v28 = vpop.f32.mrb[3].mxu1  ;;  %v19847_v55 = vld [vmem:[%s18758_s9 + $0x334] sm:$0xf]  ;;  %v18257_v37 = vld [vmem:[%s18758_s9 + $0x338] sm:$0xff]   ;;  %v14315_v36 = vrot.slane %v19844_v53, 10 }
 0x110   : > { %932 = vst [vmem:[%s19793_s18 + $0x30] sm:$0xf] %v16306_v3  ;;  %v19827_v4 = vadd.f32 %v16477_v28, %v16476_v17  ;;  %v19870_v2 = vld [vmem:[%s18758_s9 + $0x350] sm:$0xe]  ;;  %v2647_v44 = vrot.slane %v19847_v55, 6  ;;  %4396 = vmatprep.mubr.bf16.mxu1 %v18257_v37  ;;  %v2945_v53 = vrot.slane %v19880_v59, 5 }
 0x111   : > { %930 = vst [vmem:[%s19793_s18 + $0x10] sm:$0xf] %v16304_v19  ;;  %v962_v33 = vadd.f32 %v17900_v46, %v961_v22  ;;  %v1031_v34 = vadd.f32 %v1000_v5, %v999_v1  ;;  %v14395_v46 = vrot.slane %v14357_v20, 9  ;;  %v19867_v1 = vld [vmem:[%s18758_s9 + $0x338] sm:$0x3]  ;;  %v14396_v8 = vrot.slane %v19870_v2, 9  ;;  %4494 = vmatmul.mubr.bf16.gmra.mrb[108].mxu0 %v14329_v7 }
 0x112   : > { %v2650_v20 = vrot.slane %v19867_v1, 6  ;;  %v18271_v55 = vld [vmem:[%s25093_s2 + $0x300] sm:$0xff]   ;;  %v18258_v1 = vld [vmem:[%s18758_s9 + $0x354] sm:$0xff]   ;;  %v14330_v2 = vcombine.low %v19863_v62, %v19888_v27  ;;  %v19936_v59 = vld [vmem:[%s18758_s9 + $0x388] sm:$0xe]  ;;  %4501 = vmatprep.mubr.bf16.mxu0 %v14410_v58 }
 0x113   : > { %v1032_v60 = vadd.f32 %v1031_v34, %v1001_v25  ;;  %v963_v14 = vadd.f32 %v17901_v51, %v962_v33  ;;  %v2273_v51 = vrot.slane %v19830_v45, 5  ;;  %v17904_v54 = vpop.f32.mrb[4].mxu0  ;;  %v19901_v10 = vsel %vm18773_vm4, %v14395_v46, %v2935_v31  ;;  %v18270_v33 = vld [vmem:[%s25093_s2 + $0x2a0] sm:$0xff]   ;;  %17041 = vmatprep.subr.bf16.mxu1 %v18271_v55  ;;  %v19971_v58 = vld [vmem:[%s18758_s9 + $0x354] sm:$0x3] }
 0x114   : > { %v16309_v3 = vpack.c.bf16 %v17904_v54, %v17904_v54  ;;  %v690_v6 = vpop.f32.mrb[5].mxu0  ;;  %v16479_v9 = vpop.f32.mrb[4].mxu1  ;;  %v1005_v34 = vmul.f32 %v17904_v54, %v17904_v54  ;;  %v2649_v46 = vrot.slane %v2647_v44, 4  ;;  %16937 = vmatprep.subr.bf16.mxu0 %v18270_v33  ;;  %v19968_v30 = vsel %vm18773_vm4, %v14396_v8, %v2942_v11  ;;  %v19974_v45 = vld [vmem:[%s18758_s9 + $0x370] sm:$0xf]  ;;  %4397 = vmatmul.mubr.bf16.gmra.mrb[108].mxu1 %v14209_v61 }
 0x115   : > { %v1033_v23 = vadd.f32 %v1032_v60, %v1002_v57  ;;  %v16307_v17 = vpack.c.bf16 %v690_v6, %v690_v6  ;;  %v964_v19 = vadd.f32 %v963_v14, %v690_v6  ;;  %v1003_v22 = vmul.f32 %v690_v6, %v690_v6  ;;  %v17905_v5 = vpop.f32.mrb[6].mxu0  ;;  %v16480_v31 = vpop.f32.mrb[5].mxu1  ;;  %4404 = vmatprep.mubr.bf16.mxu1 %v18258_v1 }
 0x116   : > { %935 = vst [vmem:[%s19793_s18 + $0x60] sm:$0xf] %v16309_v3  ;;  %v16310_v40 = vpack.c.bf16 %v17905_v5, %v17905_v5  ;;  %v693_v63 = vpop.f32.mrb[7].mxu0  ;;  %v19917_v57 = vadd.f32 %v16480_v31, %v16479_v9  ;;  %v16482_v60 = vpop.f32.mrb[6].mxu1  ;;  %v1006_v43 = vmul.f32 %v17905_v5, %v17905_v5  ;;  %v19944_v3 = vld [vmem:[%s18758_s9 + $0x390] sm:$0x1]  ;;  %v19960_v6 = vsel %vm18803_vm5, %v14315_v36, %v2647_v44 }
 0x117   : > { %933 = vst [vmem:[%s19793_s18 + $0x40] sm:$0xf] %v16307_v17  ;;  %v1034_v35 = vadd.f32 %v1033_v23, %v1003_v22  ;;  %v16308_v25 = vpack.c.bf16 %v693_v63, %v693_v63  ;;  %v965_v28 = vadd.f32 %v964_v19, %v693_v63  ;;  %v1004_v32 = vmul.f32 %v693_v63, %v693_v63  ;;  %v16483_v0 = vpop.f32.mrb[7].mxu1  ;;  %v19990_v17 = vld [vmem:[%s18758_s9 + $0x36c] sm:$0xe] }
 0x118   : > { %936 = vst [vmem:[%s19793_s18 + $0x70] sm:$0xf] %v16310_v40  ;;  %v14411_v23 = vcombine.low %v19901_v10, %v19905_v21  ;;  %v19938_v7 = vadd.f32 %v16483_v0, %v16482_v60  ;;  %v19964_v29 = vsel %vm18803_vm5, %v2649_v46, %v2650_v20  ;;  %v19984_v44 = vsel %vm18773_vm4, %v2944_v52, %v2945_v53  ;;  %v20012_v0 = vld [vmem:[%s18758_s9 + $0x3a8] sm:$0xf] }
 0x119   : > { %934 = vst [vmem:[%s19793_s18 + $0x50] sm:$0xf] %v16308_v25  ;;  %v966_v37 = vadd.f32 %v17904_v54, %v965_v28  ;;  %v1035_v14 = vadd.f32 %v1034_v35, %v1004_v32  ;;  %v19933_v54 = vsel %vm18773_vm4, %v14195_v18, %v2270_v24  ;;  %v19950_v24 = vld [vmem:[%s18758_s9 + $0x350] sm:$0xf]  ;;  %v19956_v18 = vsel %vm18773_vm4, %v2272_v39, %v2273_v51  ;;  %v18272_v51 = vld [vmem:[%s25093_s2 + $0x260] sm:$0xff]  }
 0x11a   : > { %v14196_v27 = vrot.slane %v19936_v59, 9  ;;  %v2279_v11 = vrot.slane %v2277_v50, 4  ;;  %v2280_v38 = vrot.slane %v19944_v3, 5  ;;  %v2654_v61 = vrot.slane %v19950_v24, 6  ;;  %16938 = vmatpush3.bf16.msra.mxu0 %v18272_v51  ;;  %v20020_v3 = vld [vmem:[%s18758_s9 + $0x3ac] sm:$0x1] }
 0x11b   : > { %v1036_v47 = vadd.f32 %v1035_v14, %v1005_v34  ;;  %v967_v62 = vadd.f32 %v17905_v5, %v966_v37  ;;  %v17908_v39 = vpop.f32.mrb[8].mxu0  ;;  %v19996_v5 = vld [vmem:[%s18758_s9 + $0x374] sm:$0x1]  ;;  %v2949_v35 = vrot.slane %v19974_v45, 5  ;;  %v14211_v33 = vcombine.low %v19933_v54, %v19956_v18  ;;  %v20009_v14 = vld [vmem:[%s18758_s9 + $0x3a4] sm:$0xe]  ;;  %4502 = vmatmul.mubr.bf16.gmra.mrb[112].mxu0 %v14330_v2 }
 0x11c   : > { %v16313_v19 = vpack.c.bf16 %v17908_v39, %v17908_v39  ;;  %v706_v22 = vpop.f32.mrb[9].mxu0  ;;  %v16485_v20 = vpop.f32.mrb[8].mxu1  ;;  %v2657_v34 = vrot.slane %v19971_v58, 6  ;;  %v14397_v31 = vrot.slane %v19990_v17, 9  ;;  %v18262_v37 = vld [vmem:[%s18758_s9 + $0x370] sm:$0xff]   ;;  %4509 = vmatprep.mubr.bf16.mxu0 %v14411_v23  ;;  %v2284_v51 = vrot.slane %v20012_v0, 5  ;;  %4405 = vmatmul.mubr.bf16.gmra.mrb[112].mxu1 %v14210_v15 }
 0x11d   : > { %v1037_v36 = vadd.f32 %v1036_v47, %v1006_v43  ;;  %v16311_v40 = vpack.c.bf16 %v706_v22, %v706_v22  ;;  %v968_v63 = vadd.f32 %v967_v62, %v706_v22  ;;  %v1007_v8 = vmul.f32 %v706_v22, %v706_v22  ;;  %v17909_v9 = vpop.f32.mrb[10].mxu0  ;;  %v16486_v25 = vpop.f32.mrb[9].mxu1  ;;  %4412 = vmatprep.mubr.bf16.mxu1 %v18262_v37  ;;  %v18263_v37 = vld [vmem:[%s18758_s9 + $0x38c] sm:$0xff]  }
 0x11e   : > { %939 = vst [vmem:[%s19793_s18 + $0xa0] sm:$0xf] %v16313_v19  ;;  %v16314_v28 = vpack.c.bf16 %v17909_v9, %v17909_v9  ;;  %v709_v32 = vpop.f32.mrb[11].mxu0  ;;  %v20005_v52 = vadd.f32 %v16486_v25, %v16485_v20  ;;  %v16488_v53 = vpop.f32.mrb[10].mxu1  ;;  %v14331_v43 = vcombine.low %v19960_v6, %v19964_v29  ;;  %v14412_v47 = vcombine.low %v19968_v30, %v19984_v44  ;;  %v20117_v18 = vld [vmem:[%s18758_s9 + $0x38c] sm:$0x3] }
 0x11f   : > { %937 = vst [vmem:[%s19793_s18 + $0x80] sm:$0xf] %v16311_v40  ;;  %v1038_v46 = vadd.f32 %v1037_v36, %v1007_v8  ;;  %v16312_v55 = vpack.c.bf16 %v709_v32, %v709_v32  ;;  %v969_v60 = vadd.f32 %v968_v63, %v709_v32  ;;  %v1008_v1 = vmul.f32 %v709_v32, %v709_v32  ;;  %v16489_v59 = vpop.f32.mrb[11].mxu1  ;;  %v20035_v36 = vld [vmem:[%s18758_s9 + $0x368] sm:$0xc] }
 0x120   : > { %940 = vst [vmem:[%s19793_s18 + $0xb0] sm:$0xf] %v16314_v28  ;;  %v2656_v62 = vrot.slane %v2654_v61, 4  ;;  %v20026_v58 = vadd.f32 %v16489_v59, %v16488_v53  ;;  %v2951_v2 = vrot.slane %v2949_v35, 4  ;;  %v2952_v6 = vrot.slane %v19996_v5, 5 }
 0x121   : > { %938 = vst [vmem:[%s19793_s18 + $0x90] sm:$0xf] %v16312_v55  ;;  %v970_v24 = vadd.f32 %v17908_v39, %v969_v60  ;;  %v1009_v29 = vmul.f32 %v17908_v39, %v17908_v39  ;;  %v1039_v45 = vadd.f32 %v1038_v46, %v1008_v1  ;;  %v14197_v30 = vrot.slane %v20009_v14, 9  ;;  %v20055_v39 = vld [vmem:[%s18758_s9 + $0x370] sm:$0x3] }
 0x122   : > { %v20044_v10 = vsel %vm18773_vm4, %v14196_v27, %v2277_v50  ;;  %v20048_v21 = vsel %vm18773_vm4, %v2279_v11, %v2280_v38  ;;  %v20052_v23 = vsel %vm18803_vm5, %v14316_v42, %v2654_v61  ;;  %v1010_v17 = vmul.f32 %v17909_v9, %v17909_v9  ;;  %v20063_v50 = vld [vmem:[%s18758_s9 + $0x388] sm:$0xe]  ;;  %v20066_v27 = vld [vmem:[%s18758_s9 + $0x38c] sm:$0xf] }
 0x123   : > { %v971_v44 = vadd.f32 %v17909_v9, %v970_v24  ;;  %v1040_v48 = vadd.f32 %v1039_v45, %v1009_v29  ;;  %v17912_v49 = vpop.f32.mrb[12].mxu0  ;;  %v20059_v15 = vsel %vm18803_vm5, %v2656_v62, %v2657_v34  ;;  %v2287_v41 = vrot.slane %v20020_v3, 5  ;;  %v20078_v8 = vld [vmem:[%s18758_s9 + $0x388] sm:$0xf]  ;;  %4510 = vmatmul.mubr.bf16.gmra.mrb[116].mxu0 %v14331_v43  ;;  %v14368_v45 = vld [vmem:[%s18758_s9 + $0x390] sm:$0x1] }
 0x124   : > { %v16317_v11 = vpack.c.bf16 %v17912_v49, %v17912_v49  ;;  %v722_v19 = vpop.f32.mrb[13].mxu0  ;;  %v20070_v22 = vsel %vm18773_vm4, %v14397_v31, %v2949_v35  ;;  %v20074_v38 = vsel %vm18773_vm4, %v2951_v2, %v2952_v6  ;;  %v2661_v42 = vrot.slane %v20023_v12, 6  ;;  %v18280_v34 = vld [vmem:[%s25093_s2 + $0x2a8] sm:$0xff]   ;;  %v16491_v31 = vpop.f32.mrb[12].mxu1  ;;  %4517 = vmatprep.mubr.bf16.mxu0 %v14412_v47  ;;  %4413 = vmatmul.mubr.bf16.gmra.mrb[116].mxu1 %v14211_v33 }
 0x125   : > { %v16315_v61 = vpack.c.bf16 %v722_v19, %v722_v19  ;;  %v972_v5 = vadd.f32 %v971_v44, %v722_v19  ;;  %v1011_v20 = vmul.f32 %v722_v19, %v722_v19  ;;  %v1041_v40 = vadd.f32 %v1040_v48, %v1010_v17  ;;  %v17913_v63 = vpop.f32.mrb[14].mxu0  ;;  %v16492_v59 = vpop.f32.mrb[13].mxu1  ;;  %16939 = vmatprep.subr.bf16.mxu0 %v18280_v34  ;;  %v20109_v48 = vld [vmem:[%s18758_s9 + $0x3a8] sm:$0xf] }
 0x126   : > { %943 = vst [vmem:[%s19793_s18 + $0xe0] sm:$0xf] %v16317_v11  ;;  %v16318_v9 = vpack.c.bf16 %v17913_v63, %v17913_v63  ;;  %v725_v35 = vpop.f32.mrb[15].mxu0  ;;  %v2286_v25 = vrot.slane %v2284_v51, 4  ;;  %v14317_v28 = vrot.slane %v20035_v36, 10  ;;  %v2664_v32 = vrot.slane %v20055_v39, 6  ;;  %4420 = vmatprep.mubr.bf16.mxu1 %v18263_v37 }
 0x127   : > { %941 = vst [vmem:[%s19793_s18 + $0xc0] sm:$0xf] %v16315_v61  ;;  %v1042_v46 = vadd.f32 %v1041_v40, %v1011_v20  ;;  %v16316_v53 = vpack.c.bf16 %v725_v35, %v725_v35  ;;  %v973_v55 = vadd.f32 %v972_v5, %v725_v35  ;;  %v1012_v60 = vmul.f32 %v725_v35, %v725_v35  ;;  %v16494_v2 = vpop.f32.mrb[14].mxu1  ;;  %v20098_v36 = vld [vmem:[%s18758_s9 + $0x384] sm:$0xc]  ;;  %v18267_v5 = vld [vmem:[%s18758_s9 + $0x3a8] sm:$0xff]  }
 0x128   : > { %v1013_v1 = vmul.f32 %v17912_v49, %v17912_v49  ;;  %944 = vst [vmem:[%s19793_s18 + $0xf0] sm:$0xf] %v16318_v9  ;;  %v2663_v62 = vrot.slane %v2661_v42, 4  ;;  %v14398_v12 = vrot.slane %v20063_v50, 9  ;;  %v2956_v43 = vrot.slane %v20066_v27, 5  ;;  %v16495_v47 = vpop.f32.mrb[15].mxu1 }
 0x129   : > { %v20093_v24 = vadd.f32 %v16492_v59, %v16491_v31  ;;  %942 = vst [vmem:[%s19793_s18 + $0xd0] sm:$0xf] %v16316_v53  ;;  %v974_v6 = vadd.f32 %v17912_v49, %v973_v55  ;;  %v1043_v29 = vadd.f32 %v1042_v46, %v1012_v60  ;;  %v2668_v44 = vrot.slane %v20078_v8, 6  ;;  %v18282_v49 = vld [vmem:[%s25093_s2 + $0x268] sm:$0xff]   ;;  %v20151_v40 = vld [vmem:[%s18758_s9 + $0x3a0] sm:$0xc] }
 0x12a   : > { %v14212_v39 = vcombine.low %v20044_v10, %v20048_v21  ;;  %v14332_v17 = vcombine.low %v20052_v23, %v20059_v15  ;;  %v1014_v50 = vmul.f32 %v17913_v63, %v17913_v63  ;;  %v20114_v11 = vadd.f32 %v16495_v47, %v16494_v2  ;;  %16940 = vmatpush3.bf16.msra.mxu0 %v18282_v49 }
 0x12b   : > { %v1044_v27 = vadd.f32 %v1043_v29, %v1013_v1  ;;  %v975_v54 = vadd.f32 %v17913_v63, %v974_v6  ;;  %v14413_v33 = vcombine.low %v20070_v22, %v20074_v38  ;;  %v20127_v10 = vsel %vm18773_vm4, %v14197_v30, %v2284_v51  ;;  %v17916_v15 = vpop.f32.mrb[16].mxu0  ;;  %v14369_v30 = vld [vmem:[%s18758_s9 + $0x3a4] sm:$0xe]  ;;  %v20142_v51 = vld [vmem:[%s18758_s9 + $0x3ac] sm:$0x1] }
 0x12c   : > { %v2958_v21 = vrot.slane %v2956_v43, 4  ;;  %v2959_v23 = vrot.slane %v14368_v45, 5  ;;  %v20133_v61 = vsel %vm18773_vm4, %v2286_v25, %v2287_v41  ;;  %v20137_v0 = vsel %vm18803_vm5, %v14317_v28, %v2661_v42  ;;  %v738_v38 = vpop.f32.mrb[17].mxu0  ;;  %4518 = vmatmul.mubr.bf16.gmra.mrb[120].mxu0 %v14332_v17  ;;  %v16497_v42 = vpop.f32.mrb[16].mxu1  ;;  %4421 = vmatmul.mubr.bf16.gmra.mrb[120].mxu1 %v14212_v39  ;;  %v20178_v39 = vld [vmem:[%s18758_s9 + $0x3c0] sm:$0xe] }
 0x12d   : > { %v1045_v19 = vadd.f32 %v1044_v27, %v1014_v50  ;;  %v14318_v14 = vrot.slane %v20098_v36, 10  ;;  %v16321_v22 = vpack.c.bf16 %v17916_v15, %v17916_v15  ;;  %v2665_v3 = vsel %vm18803_vm5, %v2663_v62, %v2664_v32  ;;  %v17917_v25 = vpop.f32.mrb[18].mxu0  ;;  %v16498_v32 = vpop.f32.mrb[17].mxu1  ;;  %4525 = vmatprep.mubr.bf16.mxu0 %v14413_v33  ;;  %4428 = vmatprep.mubr.bf16.mxu1 %v18267_v5  ;;  %v20187_v33 = vld [vmem:[%s18758_s9 + $0x3c4] sm:$0xf]  ;;  %v18268_v5 = vld [vmem:[%s18758_s9 + $0x2ac] sm:$0xff]  }
 0x12e   : > { %v2670_v41 = vrot.slane %v2668_v44, 4  ;;  %v2963_v20 = vrot.slane %v20109_v48, 5  ;;  %v16319_v63 = vpack.c.bf16 %v738_v38, %v738_v38  ;;  %v976_v9 = vadd.f32 %v975_v54, %v738_v38  ;;  %v741_v31 = vpop.f32.mrb[19].mxu0  ;;  %v16500_v1 = vpop.f32.mrb[18].mxu1 }
 0x12f   : > { %v1015_v35 = vmul.f32 %v738_v38, %v738_v38  ;;  %v2957_v28 = vsel %vm18773_vm4, %v14398_v12, %v2956_v43  ;;  %947 = vst [vmem:[%s19793_s18 + $0x120] sm:$0xf] %v16321_v22  ;;  %v16322_v34 = vpack.c.bf16 %v17917_v25, %v17917_v25  ;;  %v2960_v46 = vsel %vm18773_vm4, %v2958_v21, %v2959_v23  ;;  %v20163_v12 = vld [vmem:[%s18758_s9 + $0x3a4] sm:$0xf]  ;;  %v20166_v43 = vld [vmem:[%s18758_s9 + $0x3a8] sm:$0x3] }
 0x130   : > { %v2671_v53 = vrot.slane %v20117_v18, 6  ;;  %v14399_v55 = vrot.slane %v14369_v30, 9  ;;  %945 = vst [vmem:[%s19793_s18 + $0x100] sm:$0xf] %v16319_v63  ;;  %v20160_v37 = vadd.f32 %v16498_v32, %v16497_v42  ;;  %v16320_v59 = vpack.c.bf16 %v741_v31, %v741_v31  ;;  %v16501_v6 = vpop.f32.mrb[19].mxu1 }
 0x131   : > { %v1046_v60 = vadd.f32 %v1045_v19, %v1015_v35  ;;  %v977_v62 = vadd.f32 %v976_v9, %v741_v31  ;;  %948 = vst [vmem:[%s19793_s18 + $0x130] sm:$0xf] %v16322_v34  ;;  %v1016_v2 = vmul.f32 %v741_v31, %v741_v31  ;;  %v2965_v29 = vrot.slane %v2963_v20, 4 }
 0x132   : > { %v2966_v45 = vrot.slane %v20142_v51, 5  ;;  %v14319_v36 = vrot.slane %v20151_v40, 10  ;;  %946 = vst [vmem:[%s19793_s18 + $0x110] sm:$0xf] %v16320_v59  ;;  %v20172_v17 = vadd.f32 %v16501_v6, %v16500_v1  ;;  %v14213_v48 = vcombine.low %v20127_v10, %v20133_v61  ;;  %v20215_v59 = vld [vmem:[%s18758_s9 + $0x3bc] sm:$0xc] }
 0x133   : > { %v978_v47 = vadd.f32 %v17916_v15, %v977_v62  ;;  %v14333_v49 = vcombine.low %v20137_v0, %v2665_v3  ;;  %v1017_v50 = vmul.f32 %v17916_v15, %v17916_v15  ;;  %v1047_v27 = vadd.f32 %v1046_v60, %v1016_v2  ;;  %v17920_v21 = vpop.f32.mrb[20].mxu0  ;;  %v20218_v62 = vld [vmem:[%s18758_s9 + $0x3c4] sm:$0x3] }
 0x134   : > { %v14414_v54 = vcombine.low %v2957_v28, %v2960_v46  ;;  %v20184_v18 = vsel %vm18803_vm5, %v14318_v14, %v2668_v44  ;;  %v20191_v10 = vsel %vm18803_vm5, %v2670_v41, %v2671_v53  ;;  %v20195_v15 = vsel %vm18773_vm4, %v14399_v55, %v2963_v20  ;;  %v754_v0 = vpop.f32.mrb[21].mxu0  ;;  %v14374_v41 = vld [vmem:[%s18758_s9 + $0x3c8] sm:$0x1]  ;;  %v18290_v28 = vld [vmem:[%s25093_s2 + $0x2b0] sm:$0xff]   ;;  %v16503_v32 = vpop.f32.mrb[20].mxu1  ;;  %4429 = vmatmul.mubr.bf16.gmra.mrb[124].mxu1 %v14213_v48 }
 0x135   : > { %v979_v23 = vadd.f32 %v17917_v25, %v978_v47  ;;  %v2675_v8 = vrot.slane %v20163_v12, 6  ;;  %v1018_v19 = vmul.f32 %v17917_v25, %v17917_v25  ;;  %v1048_v44 = vadd.f32 %v1047_v27, %v1017_v50  ;;  %4526 = vmatmul.mubr.bf16.gmra.mrb[124].mxu0 %v14333_v49  ;;  %v17921_v38 = vpop.f32.mrb[22].mxu0  ;;  %v20207_v25 = vld [vmem:[%s18758_s9 + $0x3c0] sm:$0xf]  ;;  %v16504_v60 = vpop.f32.mrb[21].mxu1  ;;  %16941 = vmatprep.subr.bf16.mxu0 %v18290_v28  ;;  %v18269_v50 = vld [vmem:[%s18758_s9 + $0x2c8] sm:$0xff]  }
 0x136   : > { %v16325_v61 = vpack.c.bf16 %v17920_v21, %v17920_v21  ;;  %v2678_v14 = vrot.slane %v20166_v43, 6  ;;  %v16323_v30 = vpack.c.bf16 %v754_v0, %v754_v0  ;;  %v1019_v22 = vmul.f32 %v754_v0, %v754_v0  ;;  %v757_v63 = vpop.f32.mrb[23].mxu0  ;;  %4533 = vmatprep.mubr.bf16.mxu0 %v14414_v54  ;;  %v16506_v43 = vpop.f32.mrb[22].mxu1  ;;  %17946 = vmatprep.mubr.bf16.mxu1 %v18268_v5  ;;  %v20230_v47 = vld [vmem:[%s18758_s9 + $0x3e0] sm:$0xf] }
 0x137   : > { %v980_v51 = vadd.f32 %v979_v23, %v754_v0  ;;  %v2967_v3 = vsel %vm18773_vm4, %v2965_v29, %v2966_v45  ;;  %v1049_v20 = vadd.f32 %v1048_v44, %v1018_v19  ;;  %v16326_v42 = vpack.c.bf16 %v17921_v38, %v17921_v38  ;;  %v20227_v45 = vld [vmem:[%s18758_s9 + $0x3dc] sm:$0xe]  ;;  %v18273_v44 = vld [vmem:[%s25093_s2 + $0x2c0] sm:$0xff]  }
 0x138   : > { %951 = vst [vmem:[%s19793_s18 + $0x160] sm:$0xf] %v16325_v61  ;;  %v14400_v9 = vrot.slane %v20178_v39, 9  ;;  %v2970_v35 = vrot.slane %v20187_v33, 5  ;;  %949 = vst [vmem:[%s19793_s18 + $0x140] sm:$0xf] %v16323_v30  ;;  %v16324_v34 = vpack.c.bf16 %v757_v63, %v757_v63  ;;  %v1020_v46 = vmul.f32 %v757_v63, %v757_v63 }
 0x139   : > { %v981_v31 = vadd.f32 %v980_v51, %v757_v63  ;;  %v2677_v53 = vrot.slane %v2675_v8, 4  ;;  %v1050_v55 = vadd.f32 %v1049_v20, %v1019_v22  ;;  %952 = vst [vmem:[%s19793_s18 + $0x170] sm:$0xf] %v16326_v42  ;;  %v2973_v1 = vrot.slane %v14374_v41, 5  ;;  %v16507_v39 = vpop.f32.mrb[23].mxu1  ;;  %v18274_v0 = vld [vmem:[%s18758_s9 + $0x2e4] sm:$0xff]  }
 0x13a   : > { %v20220_v12 = vadd.f32 %v16504_v60, %v16503_v32  ;;  %950 = vst [vmem:[%s19793_s18 + $0x150] sm:$0xf] %v16324_v34  ;;  %v14334_v6 = vcombine.low %v20184_v18, %v20191_v10  ;;  %v2682_v29 = vrot.slane %v20207_v25, 6  ;;  %v1021_v48 = vmul.f32 %v17920_v21, %v17920_v21  ;;  %v20243_v10 = vld [vmem:[%s18758_s9 + $0x3e4] sm:$0x1] }
 0x13b   : > { %v982_v2 = vadd.f32 %v17920_v21, %v981_v31  ;;  %v1051_v49 = vadd.f32 %v1050_v55, %v1020_v46  ;;  %v14415_v27 = vcombine.low %v20195_v15, %v2967_v3  ;;  %v2972_v54 = vrot.slane %v2970_v35, 4  ;;  %v17924_v40 = vpop.f32.mrb[24].mxu0  ;;  %v20273_v32 = vld [vmem:[%s18758_s9 + $0x3dc] sm:$0xf] }
 0x13c   : > { %v20234_v33 = vadd.f32 %v16507_v39, %v16506_v43  ;;  %v20240_v18 = vsel %vm18803_vm5, %v14319_v36, %v2675_v8  ;;  %v1022_v19 = vmul.f32 %v17921_v38, %v17921_v38  ;;  %v20250_v15 = vsel %vm18803_vm5, %v2677_v53, %v2678_v14  ;;  %v18276_v36 = vld [vmem:[%s25093_s2 + $0x308] sm:$0xff]   ;;  %17947 = vmatmul.mubr.bf16.vlgmr.msra.gmra.mrb[128].mxu1 %v18269_v50  ;;  %v18281_v53 = vld [vmem:[%s25093_s2 + $0x310] sm:$0xff]   ;;  %v20284_v60 = vld [vmem:[%s18758_s9 + $0x3fc] sm:$0xf] }
 0x13d   : > { %v983_v23 = vadd.f32 %v17921_v38, %v982_v2  ;;  %v1052_v21 = vadd.f32 %v1051_v49, %v1021_v48  ;;  %v2977_v61 = vrot.slane %v20230_v47, 5  ;;  %4534 = vmatmul.mubr.bf16.gmra.mrb[128].mxu0 %v14334_v6  ;;  %v20259_v8 = vsel %vm18773_vm4, %v14400_v9, %v2970_v35  ;;  %v770_v38 = vpop.f32.mrb[25].mxu0  ;;  %v18277_v35 = vld [vmem:[%s25093_s2 + $0x2c8] sm:$0xff]   ;;  %17042 = vmatpush3.bf16.msra.mxu1 %v18273_v44  ;;  %v20288_v6 = vld [vmem:[%s18758_s9 + $0x3d8] sm:$0xc]  ;;  %v18292_v49 = vld [vmem:[%s25093_s2 + $0x270] sm:$0xff]  }
 0x13e   : > { %v14320_v30 = vrot.slane %v20215_v59, 10  ;;  %v2684_v14 = vrot.slane %v2682_v29, 4  ;;  %v2685_v51 = vrot.slane %v20218_v62, 6  ;;  %v16329_v22 = vpack.c.bf16 %v17924_v40, %v17924_v40  ;;  %4541 = vmatprep.mubr.bf16.mxu0 %v14415_v27  ;;  %v17925_v9 = vpop.f32.mrb[26].mxu0  ;;  %v20291_v48 = vld [vmem:[%s18758_s9 + $0x3e0] sm:$0x3]  ;;  %17950 = vmatprep.mubr.bf16.mxu1 %v18274_v0 }
 0x13f   : > { %v1053_v5 = vadd.f32 %v1052_v21, %v1022_v19  ;;  %v2974_v3 = vsel %vm18773_vm4, %v2972_v54, %v2973_v1  ;;  %v14401_v41 = vrot.slane %v20227_v45, 9  ;;  %v16327_v20 = vpack.c.bf16 %v770_v38, %v770_v38  ;;  %v773_v31 = vpop.f32.mrb[27].mxu0  ;;  %v16509_v1 = vpop.f32.mrb[24].mxu1  ;;  %v18275_v50 = vld [vmem:[%s18758_s9 + $0x300] sm:$0xff]   ;;  %17043 = vmatprep.subr.bf16.mxu1 %v18276_v36  ;;  %16942 = vmatpush3.bf16.msra.mxu0 %v18292_v49  ;;  %v20365_v49 = vld [vmem:[%s18758_s9 + $0x418] sm:$0xf] }
 0x140   : > { %v984_v42 = vadd.f32 %v983_v23, %v770_v38  ;;  %v1023_v63 = vmul.f32 %v770_v38, %v770_v38  ;;  %v2980_v28 = vrot.slane %v20243_v10, 5  ;;  %955 = vst [vmem:[%s19793_s18 + $0x1a0] sm:$0xf] %v16329_v22  ;;  %v16330_v34 = vpack.c.bf16 %v17925_v9, %v17925_v9  ;;  %v16510_v39 = vpop.f32.mrb[25].mxu1  ;;  %v20311_v10 = vld [vmem:[%s18758_s9 + $0x3f8] sm:$0xe] }
 0x141   : > { %v14335_v46 = vcombine.low %v20240_v18, %v20250_v15  ;;  %v2979_v55 = vrot.slane %v2977_v61, 4  ;;  %953 = vst [vmem:[%s19793_s18 + $0x180] sm:$0xf] %v16327_v20  ;;  %v16328_v62 = vpack.c.bf16 %v773_v31, %v773_v31  ;;  %v1024_v2 = vmul.f32 %v773_v31, %v773_v31  ;;  %v16512_v44 = vpop.f32.mrb[26].mxu1  ;;  %v18278_v0 = vld [vmem:[%s18758_s9 + $0x31c] sm:$0xff]   ;;  %17044 = vmatpush3.bf16.msra.mxu1 %v18277_v35 }
 0x142   : > { %v1054_v59 = vadd.f32 %v1053_v5, %v1023_v63  ;;  %v985_v43 = vadd.f32 %v984_v42, %v773_v31  ;;  %956 = vst [vmem:[%s19793_s18 + $0x1b0] sm:$0xf] %v16330_v34  ;;  %v14416_v27 = vcombine.low %v20259_v8, %v2974_v3  ;;  %v20303_v54 = vsel %vm18803_vm5, %v14320_v30, %v2682_v29  ;;  %v18283_v29 = vld [vmem:[%s25093_s2 + $0x2d0] sm:$0xff]   ;;  %v20321_v36 = vld [vmem:[%s18758_s9 + $0x400] sm:$0x1]  ;;  %v16513_v30 = vpop.f32.mrb[27].mxu1 }
 0x143   : > { %v20307_v23 = vsel %vm18803_vm5, %v2684_v14, %v2685_v51  ;;  %v2689_v18 = vrot.slane %v20273_v32, 6  ;;  %v1025_v19 = vmul.f32 %v17924_v40, %v17924_v40  ;;  %v20313_v21 = vadd.f32 %v16510_v39, %v16509_v1  ;;  %954 = vst [vmem:[%s19793_s18 + $0x190] sm:$0xf] %v16328_v62  ;;  %v20327_v38 = vld [vmem:[%s18758_s9 + $0x3f4] sm:$0xc]  ;;  %17045 = vmatprep.subr.bf16.mxu1 %v18281_v53  ;;  %v18286_v63 = vld [vmem:[%s25093_s2 + $0x318] sm:$0xff]  }
 0x144   : > { %v986_v15 = vadd.f32 %v17924_v40, %v985_v43  ;;  %v1055_v25 = vadd.f32 %v1054_v59, %v1024_v2  ;;  %v1026_v8 = vmul.f32 %v17925_v9, %v17925_v9  ;;  %v2984_v14 = vrot.slane %v20284_v60, 5  ;;  %v20339_v35 = vld [vmem:[%s18758_s9 + $0x3f8] sm:$0xf]  ;;  %v20351_v1 = vld [vmem:[%s18758_s9 + $0x3fc] sm:$0x3]  ;;  %17951 = vmatmul.mubr.bf16.gmra.mrb[132].mxu1 %v18275_v50 }
 0x145   : > { %v20324_v22 = vadd.f32 %v16513_v30, %v16512_v44  ;;  %4542 = vmatmul.mubr.bf16.gmra.mrb[132].mxu0 %v14335_v46  ;;  %v14336_v5 = vcombine.low %v20303_v54, %v20307_v23  ;;  %v14321_v3 = vrot.slane %v20288_v6, 10  ;;  %v2691_v20 = vrot.slane %v2689_v18, 4  ;;  %17954 = vmatprep.mubr.bf16.mxu1 %v18278_v0  ;;  %v18287_v2 = vld [vmem:[%s25093_s2 + $0x2d8] sm:$0xff]  }
 0x146   : > { %v1056_v51 = vadd.f32 %v1055_v25, %v1025_v19  ;;  %v987_v40 = vadd.f32 %v17925_v9, %v986_v15  ;;  %4549 = vmatprep.mubr.bf16.mxu0 %v14416_v27  ;;  %v2692_v42 = vrot.slane %v20291_v48, 6  ;;  %v17928_v9 = vpop.f32.mrb[28].mxu0  ;;  %v2978_v31 = vsel %vm18773_vm4, %v14401_v41, %v2977_v61  ;;  %17046 = vmatpush3.bf16.msra.mxu1 %v18283_v29  ;;  %v18291_v48 = vld [vmem:[%s25093_s2 + $0x320] sm:$0xff]   ;;  %v18279_v27 = vld [vmem:[%s18758_s9 + $0x338] sm:$0xff]  }
 0x147   : > { %v2981_v46 = vsel %vm18773_vm4, %v2979_v55, %v2980_v28  ;;  %v14402_v53 = vrot.slane %v20311_v10, 9  ;;  %v16333_v59 = vpack.c.bf16 %v17928_v9, %v17928_v9  ;;  %v786_v62 = vpop.f32.mrb[29].mxu0  ;;  %v2986_v47 = vrot.slane %v2984_v14, 4  ;;  %17047 = vmatprep.subr.bf16.mxu1 %v18286_v63  ;;  %v16515_v10 = vpop.f32.mrb[28].mxu1  ;;  %v18284_v0 = vld [vmem:[%s18758_s9 + $0x354] sm:$0xff]  }
 0x148   : > { %v1057_v34 = vadd.f32 %v1056_v51, %v1026_v8  ;;  %v2987_v45 = vrot.slane %v20321_v36, 5  ;;  %v14322_v61 = vrot.slane %v20327_v38, 10  ;;  %v16331_v41 = vpack.c.bf16 %v786_v62, %v786_v62  ;;  %v17929_v55 = vpop.f32.mrb[30].mxu0  ;;  %v16516_v36 = vpop.f32.mrb[29].mxu1  ;;  %v18293_v51 = vld [vmem:[%s25093_s2 + $0x2e0] sm:$0xff]  }
 0x149   : > { %v988_v43 = vadd.f32 %v987_v40, %v786_v62  ;;  %v1027_v28 = vmul.f32 %v786_v62, %v786_v62  ;;  %v2696_v6 = vrot.slane %v20339_v35, 6  ;;  %959 = vst [vmem:[%s19793_s18 + $0x1e0] sm:$0xf] %v16333_v59  ;;  %v16334_v39 = vpack.c.bf16 %v17929_v55, %v17929_v55  ;;  %v789_v50 = vpop.f32.mrb[31].mxu0  ;;  %v20387_v40 = vld [vmem:[%s18758_s9 + $0x414] sm:$0xe] }
 0x14a   : > { %v14417_v54 = vcombine.low %v2978_v31, %v2981_v46  ;;  %v2699_v23 = vrot.slane %v20351_v1, 6  ;;  %957 = vst [vmem:[%s19793_s18 + $0x1c0] sm:$0xf] %v16331_v41  ;;  %v16332_v44 = vpack.c.bf16 %v789_v50, %v789_v50  ;;  %v1028_v25 = vmul.f32 %v789_v50, %v789_v50  ;;  %17048 = vmatpush3.bf16.msra.mxu1 %v18287_v2  ;;  %v18296_v59 = vld [vmem:[%s25093_s2 + $0x328] sm:$0xff]  }
 0x14b   : > { %v1058_v19 = vadd.f32 %v1057_v34, %v1027_v28  ;;  %v989_v15 = vadd.f32 %v988_v43, %v789_v50  ;;  %v1029_v29 = vmul.f32 %v17928_v9, %v17928_v9  ;;  %960 = vst [vmem:[%s19793_s18 + $0x1f0] sm:$0xf] %v16334_v39  ;;  %v20377_v8 = vsel %vm18803_vm5, %v14321_v3, %v2689_v18  ;;  %v16518_v34 = vpop.f32.mrb[30].mxu1  ;;  %v20393_v18 = vld [vmem:[%s18758_s9 + $0x41c] sm:$0x1] }
 0x14c   : > { %v20381_v30 = vsel %vm18803_vm5, %v2691_v20, %v2692_v42  ;;  %v20389_v63 = vadd.f32 %v16516_v36, %v16515_v10  ;;  %958 = vst [vmem:[%s19793_s18 + $0x1d0] sm:$0xf] %v16332_v44  ;;  %v2991_v3 = vrot.slane %v20365_v49, 5  ;;  %v16519_v20 = vpop.f32.mrb[31].mxu1  ;;  %v2985_v42 = vsel %vm18773_vm4, %v14402_v53, %v2984_v14  ;;  %17049 = vmatprep.subr.bf16.mxu1 %v18291_v48  ;;  %v20414_v28 = vld [vmem:[%s18758_s9 + $0x418] sm:$0x3] }
 0x14d   : > { %v990_v32 = vadd.f32 %v17928_v9, %v989_v15  ;;  %v1059_v31 = vadd.f32 %v1058_v19, %v1028_v25  ;;  %4550 = vmatmul.mubr.bf16.gmra.mrb[136].mxu0 %v14336_v5  ;;  %v2988_v46 = vsel %vm18773_vm4, %v2986_v47, %v2987_v45  ;;  %v20403_v9 = vld [vmem:[%s18758_s9 + $0x410] sm:$0xc]  ;;  %v20406_v5 = vld [vmem:[%s18758_s9 + $0x414] sm:$0xf]  ;;  %v1030_v62 = vmul.f32 %v17929_v55, %v17929_v55  ;;  %v16585_v14 = vpop.f32.mrb[32].mxu0  ;;  %v18297_v10 = vld [vmem:[%s25093_s2 + $0x2e8] sm:$0xff]  }
 0x14e   : > { %4557 = vmatprep.mubr.bf16.mxu0 %v14417_v54  ;;  %v20411_v60 = vadd.f32 %v16519_v20, %v16518_v34  ;;  %17955 = vmatmul.mubr.bf16.gmra.mrb[136].mxu1 %v18279_v27  ;;  %v14337_v53 = vcombine.low %v20377_v8, %v20381_v30  ;;  %v2698_v47 = vrot.slane %v2696_v6, 4  ;;  %v14403_v45 = vrot.slane %v20387_v40, 9  ;;  %v20423_v48 = vld [vmem:[%s18758_s9 + $0x434] sm:$0xf]  ;;  %v16586_v50 = vpop.f32.mrb[33].mxu0  ;;  %v18300_v36 = vld [vmem:[%s25093_s2 + $0x2b8] sm:$0xff]  }
 0x14f   : > { %v991_v41 = vadd.f32 %v17929_v55, %v990_v32  ;;  %v1060_v43 = vadd.f32 %v1059_v31, %v1029_v29  ;;  %v2994_v2 = vrot.slane %v20393_v18, 5  ;;  %17958 = vmatprep.mubr.bf16.mxu1 %v18284_v0  ;;  %17050 = vmatpush3.bf16.msra.mxu1 %v18293_v51  ;;  %v2993_v27 = vrot.slane %v2991_v3, 4  ;;  %v16588_v44 = vpop.f32.mrb[34].mxu0  ;;  %v18285_v15 = vld [vmem:[%s18758_s9 + $0x370] sm:$0xff]   ;;  %v16521_v8 = vpop.f32.mrb[32].mxu1 }
 0x150   : > { %v14323_v54 = vrot.slane %v20403_v9, 10  ;;  %v16587_v19 = vadd.f32 %v16586_v50, %v16585_v14  ;;  %v14418_v25 = vcombine.low %v2985_v42, %v2988_v46  ;;  %v2703_v29 = vrot.slane %v20406_v5, 6  ;;  %17051 = vmatprep.subr.bf16.mxu1 %v18296_v59  ;;  %v16589_v30 = vpop.f32.mrb[35].mxu0  ;;  %v18288_v51 = vld [vmem:[%s18758_s9 + $0x38c] sm:$0xff]   ;;  %v20442_v34 = vld [vmem:[%s18758_s9 + $0x438] sm:$0x1]  ;;  %16943 = vmatprep.subr.bf16.mxu0 %v18300_v36 }
 0x151   : > { %v992_v55 = vrot.slane %v991_v41, 4  ;;  %v1061_v39 = vadd.f32 %v1060_v43, %v1030_v62  ;;  %v2706_v0 = vrot.slane %v20414_v28, 6  ;;  %v20439_v40 = vld [vmem:[%s18758_s9 + $0x430] sm:$0xe]  ;;  %v2998_v32 = vrot.slane %v20423_v48, 5  ;;  %v16522_v20 = vpop.f32.mrb[33].mxu1 }
 0x152   : > { %v20446_v31 = vld [vmem:[%s18758_s9 + $0x430] sm:$0xf]  ;;  %v20452_v42 = vadd.f32 %v16587_v19, %v19807_v16  ;;  %v16590_v46 = vadd.f32 %v16589_v30, %v16588_v44  ;;  %v2697_v59 = vsel %vm18803_vm5, %v14322_v61, %v2696_v6  ;;  %v20461_v62 = vld [vmem:[%s18758_s9 + $0x42c] sm:$0xc]  ;;  %v20464_v43 = vld [vmem:[%s18758_s9 + $0x434] sm:$0x3]  ;;  %v20471_v19 = vadd.f32 %v16522_v20, %v16521_v8 }
 0x153   : > { %v18301_v18 = vld [vmem:[%s25093_s2 + $0x330] sm:$0xff]   ;;  %v18302_v14 = vld [vmem:[%s25093_s2 + $0x278] sm:$0xff]   ;;  %v20469_v50 = vadd.f32 %v992_v55, %v991_v41  ;;  %v1062_v16 = vrot.slane %v1061_v39, 4  ;;  %v16524_v35 = vpop.f32.mrb[34].mxu1  ;;  %v2700_v38 = vsel %vm18803_vm5, %v2698_v47, %v2699_v23  ;;  %17052 = vmatpush3.bf16.msra.mxu1 %v18297_v10  ;;  %v2710_v44 = vrot.slane %v20446_v31, 6 }
 0x154   : > { %v16525_v61 = vpop.f32.mrb[35].mxu1  ;;  %v20478_v6 = vadd.f32 %v16590_v46, %v19827_v4  ;;  %17053 = vmatprep.subr.bf16.mxu1 %v18301_v18  ;;  %v2995_v1 = vsel %vm18773_vm4, %v2993_v27, %v2994_v2  ;;  %v2705_v23 = vrot.slane %v2703_v29, 4  ;;  %16944 = vmatpush3.bf16.msra.mxu0 %v18302_v14  ;;  %v18303_v4 = vld [vmem:[%s25093_s2 + $0x2f0] sm:$0xff]   ;;  %v16591_v47 = vpop.f32.mrb[36].mxu0  ;;  %v14338_v55 = vcombine.low %v2697_v59, %v2700_v38  ;;  %v20510_v18 = vld [vmem:[%s18758_s9 + $0x44c] sm:$0xe] }
 0x155   : > { %4558 = vmatmul.mubr.bf16.gmra.mrb[140].mxu0 %v14337_v53  ;;  %v20481_v41 = vadd.f32 %v16525_v61, %v16524_v35  ;;  %v2992_v53 = vsel %vm18773_vm4, %v14403_v45, %v2991_v3  ;;  %v14404_v49 = vrot.slane %v20439_v40, 9  ;;  %v3000_v3 = vrot.slane %v2998_v32, 4  ;;  %v16592_v10 = vpop.f32.mrb[37].mxu0  ;;  %v20504_v36 = vld [vmem:[%s18758_s9 + $0x450] sm:$0xf]  ;;  %v18289_v40 = vld [vmem:[%s18758_s9 + $0x3a8] sm:$0xff]  }
 0x156   : > { %4565 = vmatprep.mubr.bf16.mxu0 %v14418_v25  ;;  %17959 = vmatmul.mubr.bf16.gmra.mrb[140].mxu1 %v18285_v15  ;;  %v3001_v45 = vrot.slane %v20442_v34, 5  ;;  %v994_v2 = vrot.slane %v20469_v50, 2  ;;  %v20499_v27 = vadd.f32 %v1062_v16, %v1061_v39  ;;  %v14324_v15 = vrot.slane %v20461_v62, 10  ;;  %v16594_v30 = vpop.f32.mrb[38].mxu0  ;;  %v18294_v46 = vld [vmem:[%s18758_s9 + $0x3c4] sm:$0xff]   ;;  %v18307_v28 = vld [vmem:[%s25093_s2 + $0x2f8] sm:$0xff]  }
 0x157   : > { %17962 = vmatprep.mubr.bf16.mxu1 %v18288_v51  ;;  %v2713_v25 = vrot.slane %v20464_v43, 6  ;;  %17054 = vmatpush3.bf16.msra.mxu1 %v18303_v4  ;;  %v16593_v8 = vadd.f32 %v16592_v10, %v16591_v47  ;;  %v14419_v34 = vcombine.low %v2992_v53, %v2995_v1  ;;  %v2712_v39 = vrot.slane %v2710_v44, 4  ;;  %v16527_v51 = vpop.f32.mrb[36].mxu1  ;;  %v16595_v20 = vpop.f32.mrb[39].mxu0  ;;  %v20514_v59 = vld [vmem:[%s18758_s9 + $0x454] sm:$0x1] }
 0x158   : > { %v16528_v62 = vpop.f32.mrb[37].mxu1  ;;  %v16596_v16 = vadd.f32 %v16595_v20, %v16594_v30  ;;  %v3005_v35 = vrot.slane %v20504_v36, 5  ;;  %v20521_v38 = vld [vmem:[%s18758_s9 + $0x448] sm:$0xc]  ;;  %v20524_v61 = vld [vmem:[%s18758_s9 + $0x44c] sm:$0xf]  ;;  %v3002_v9 = vsel %vm18773_vm4, %v3000_v3, %v3001_v45 }
 0x159   : > { %v20517_v14 = vadd.f32 %v16593_v8, %v19917_v57  ;;  %v20527_v1 = vadd.f32 %v16528_v62, %v16527_v51  ;;  %v16530_v4 = vpop.f32.mrb[38].mxu1  ;;  %v20530_v47 = vld [vmem:[%s18758_s9 + $0x450] sm:$0x3]  ;;  %v2717_v10 = vrot.slane %v20524_v61, 6  ;;  %v18306_v57 = vld [vmem:[%s25093_s2 + $0x338] sm:$0xff]   ;;  %v2707_v51 = vsel %vm18803_vm5, %v2705_v23, %v2706_v0 }
 0x15a   : > { %v16531_v8 = vpop.f32.mrb[39].mxu1  ;;  %v20537_v30 = vadd.f32 %v16596_v16, %v19938_v7  ;;  %v14405_v20 = vrot.slane %v20510_v18, 9  ;;  %v2999_v7 = vsel %vm18773_vm4, %v14404_v49, %v2998_v32  ;;  %v3008_v5 = vrot.slane %v20514_v59, 5  ;;  %17055 = vmatprep.subr.bf16.mxu1 %v18306_v57  ;;  %v20569_v3 = vld [vmem:[%s18758_s9 + $0xb4] sm:$0xf]  ;;  %v18308_v16 = vld [vmem:[%s25093_s2 + $0x380] sm:$0xff]  }
 0x15b   : > { %v20550_v62 = vadd.f32 %v16531_v8, %v16530_v4  ;;  %v3007_v48 = vrot.slane %v3005_v35, 4  ;;  %v14325_v32 = vrot.slane %v20521_v38, 10  ;;  %v2719_v23 = vrot.slane %v2717_v10, 4  ;;  %17056 = vmatpush3.bf16.msra.mxu1 %v18307_v28  ;;  %v20573_v59 = vld [vmem:[%s18758_s9 + $0xb0] sm:$0xe]  ;;  %17153 = vmatprep.subr.bf16.mxu0 %v18308_v16 }
 0x15c   : > { %v2720_v49 = vrot.slane %v20530_v47, 6  ;;  %v14420_v18 = vcombine.low %v2999_v7, %v3002_v9  ;;  %v20585_v47 = vsel %vm18803_vm5, %v14324_v15, %v2710_v44  ;;  %v5417_v57 = vrot.slane %v20569_v3, 5  ;;  %v20589_v8 = vld [vmem:[%s18758_s9 + $0x1f8] sm:$0x8]  ;;  %v20602_v44 = vld [vmem:[%s18758_s9 + $0x1fc] sm:$0xf] }
 0x15d   : > { %4566 = vmatmul.mubr.bf16.gmra.mrb[144].mxu0 %v14338_v55  ;;  %v2704_v55 = vsel %vm18803_vm5, %v14323_v54, %v2703_v29  ;;  %v16597_v54 = vpop.f32.mrb[40].mxu0  ;;  %v2714_v31 = vsel %vm18803_vm5, %v2712_v39, %v2713_v25  ;;  %v20605_v15 = vld [vmem:[%s18758_s9 + $0x200] sm:$0x7] }
 0x15e   : > { %4573 = vmatprep.mubr.bf16.mxu0 %v14419_v34  ;;  %17963 = vmatmul.mubr.bf16.gmra.mrb[144].mxu1 %v18289_v40  ;;  %v16598_v29 = vpop.f32.mrb[41].mxu0  ;;  %v14339_v0 = vcombine.low %v2704_v55, %v2707_v51  ;;  %v18295_v34 = vld [vmem:[%s18758_s9 + $0x3e0] sm:$0xff]   ;;  %v5996_v36 = vrot.slane %v20605_v15, 7  ;;  %v18299_v15 = vld [vmem:[%s18758_s9 + $0x418] sm:$0xff]  }
 0x15f   : > { %17966 = vmatprep.mubr.bf16.mxu1 %v18294_v46  ;;  %v16599_v45 = vadd.f32 %v16598_v29, %v16597_v54  ;;  %v16600_v40 = vpop.f32.mrb[42].mxu0  ;;  %v20576_v46 = vld [vmem:[%s18758_s9 + $0xb8] sm:$0x1]  ;;  %v16533_v38 = vpop.f32.mrb[40].mxu1  ;;  %v18309_v55 = vld [vmem:[%s25093_s2 + $0x400] sm:$0xff]   ;;  %v14702_v29 = vrot.slane %v20573_v59, 9 }
 0x160   : > { %v16601_v4 = vpop.f32.mrb[43].mxu0  ;;  %v16534_v51 = vpop.f32.mrb[41].mxu1  ;;  %v5420_v43 = vrot.slane %v20576_v46, 5  ;;  %17265 = vmatprep.subr.bf16.mxu1 %v18309_v55  ;;  %v14574_v59 = vld [vmem:[%s18758_s9 + $0xa8] sm:$0x8] }
 0x161   : > { %v20595_v7 = vadd.f32 %v16599_v45, %v20005_v52  ;;  %v16602_v9 = vadd.f32 %v16601_v4, %v16600_v40  ;;  %v20607_v28 = vadd.f32 %v16534_v51, %v16533_v38  ;;  %v16536_v54 = vpop.f32.mrb[42].mxu1  ;;  %v18298_v52 = vld [vmem:[%s18758_s9 + $0x3fc] sm:$0xff]   ;;  %v3006_v45 = vsel %vm18773_vm4, %v14405_v20, %v3005_v35  ;;  %v14575_v46 = vld [vmem:[%s18758_s9 + $0xac] sm:$0xf]  ;;  %v14576_v20 = vld [vmem:[%s18758_s9 + $0xb0] sm:$0x7] }
 0x162   : > { %v16537_v25 = vpop.f32.mrb[43].mxu1  ;;  %v5993_v40 = vrot.slane %v20602_v44, 7  ;;  %v20637_v38 = vadd.f32 %v994_v2, %v20469_v50  ;;  %v14622_v51 = vrot.slane %v14574_v59, 11  ;;  %v20652_v50 = vsel %vm18803_vm5, %v2719_v23, %v2720_v49 }
 0x163   : > { %v20613_v39 = vadd.f32 %v16602_v9, %v20026_v58  ;;  %v20624_v16 = vadd.f32 %v16537_v25, %v16536_v54  ;;  %v5419_v58 = vrot.slane %v5417_v57, 4  ;;  %v20641_v9 = vld [vmem:[%s18758_s9 + $0xb4] sm:$0x8]  ;;  %v20648_v54 = vsel %vm18803_vm5, %v14325_v32, %v2717_v10 }
 0x164   : > { %v16603_v35 = vpop.f32.mrb[44].mxu0  ;;  %v5995_v2 = vrot.slane %v5993_v40, 4  ;;  %v18304_v25 = vld [vmem:[%s18758_s9 + $0x434] sm:$0xff]  }
 0x165   : > { %4574 = vmatmul.mubr.bf16.gmra.mrb[148].mxu0 %v14339_v0  ;;  %v3009_v0 = vsel %vm18773_vm4, %v3007_v48, %v3008_v5  ;;  %v5129_v5 = vrot.slane %v14575_v46, 7  ;;  %v20632_v48 = vld [vmem:[%s18758_s9 + $0xb8] sm:$0xf]  ;;  %v16604_v4 = vpop.f32.mrb[45].mxu0 }
 0x166   : > { %4581 = vmatprep.mubr.bf16.mxu0 %v14420_v18  ;;  %v14862_v18 = vrot.slane %v20589_v8, 11  ;;  %17967 = vmatmul.mubr.bf16.gmra.mrb[148].mxu1 %v18295_v34  ;;  %v14340_v8 = vcombine.low %v20585_v47, %v2714_v31  ;;  %v14421_v55 = vcombine.low %v3006_v45, %v3009_v0  ;;  %v16605_v34 = vadd.f32 %v16604_v4, %v16603_v35  ;;  %v16606_v44 = vpop.f32.mrb[46].mxu0 }
 0x167   : > { %17970 = vmatprep.mubr.bf16.mxu1 %v18298_v52  ;;  %v20655_v52 = vld [vmem:[%s18758_s9 + $0xbc] sm:$0x7]  ;;  %v16539_v47 = vpop.f32.mrb[44].mxu1  ;;  %v16607_v31 = vpop.f32.mrb[47].mxu0  ;;  %v5132_v45 = vrot.slane %v14576_v20, 7  ;;  %v5705_v0 = vrot.slane %v20632_v48, 7  ;;  %v5418_v4 = vsel %vm18773_vm4, %v14702_v29, %v5417_v57 }
 0x168   : > { %v16540_v59 = vpop.f32.mrb[45].mxu1  ;;  %v20660_v61 = vadd.f32 %v16605_v34, %v20093_v24  ;;  %v16608_v10 = vadd.f32 %v16607_v31, %v16606_v44  ;;  %v5131_v23 = vrot.slane %v5129_v5, 4  ;;  %v14341_v24 = vcombine.low %v20648_v54, %v20652_v50  ;;  %v14817_v57 = vld [vmem:[%s18758_s9 + $0x214] sm:$0x8] }
 0x169   : > { %v20669_v46 = vadd.f32 %v16540_v59, %v16539_v47  ;;  %v16542_v35 = vpop.f32.mrb[46].mxu1  ;;  %v5421_v34 = vsel %vm18773_vm4, %v5419_v58, %v5420_v43  ;;  %v14782_v44 = vrot.slane %v20641_v9, 11  ;;  %v14658_v47 = vld [vmem:[%s18758_s9 + $0xd0] sm:$0xf]  ;;  %v5708_v3 = vrot.slane %v20655_v52, 7 }
 0x16a   : > { %v16543_v20 = vpop.f32.mrb[47].mxu1  ;;  %v20674_v48 = vadd.f32 %v16608_v10, %v20114_v11  ;;  %v20689_v11 = vsel %vm20664_vm8, %v14862_v18, %v5993_v40  ;;  %v5424_v50 = vrot.slane %v14658_v47, 5  ;;  %v5997_v43 = vsel %vm20664_vm8, %v5995_v2, %v5996_v36  ;;  %v14818_v9 = vld [vmem:[%s18758_s9 + $0x218] sm:$0xf]  ;;  %v14819_v52 = vld [vmem:[%s18758_s9 + $0x21c] sm:$0x7] }
 0x16b   : > { %v20685_v54 = vadd.f32 %v16543_v20, %v16542_v35  ;;  %v20698_v58 = vsel %vm20664_vm8, %v14622_v51, %v5129_v5  ;;  %v20702_v40 = vsel %vm20664_vm8, %v5131_v23, %v5132_v45  ;;  %v5707_v18 = vrot.slane %v5705_v0, 4  ;;  %v18305_v5 = vld [vmem:[%s18758_s9 + $0x450] sm:$0xff]   ;;  %v20708_v45 = vld [vmem:[%s18758_s9 + $0xc4] sm:$0x8]  ;;  %v20711_v23 = vld [vmem:[%s18758_s9 + $0xc8] sm:$0xf] }
 0x16c   : > { %v16609_v29 = vpop.f32.mrb[48].mxu0  ;;  %v5426_v59 = vrot.slane %v5424_v50, 4  ;;  %v6000_v36 = vrot.slane %v14818_v9, 7  ;;  %v14718_v51 = vcombine.low %v5418_v4, %v5421_v34  ;;  %v14863_v20 = vrot.slane %v14817_v57, 11  ;;  %v20719_v4 = vld [vmem:[%s18758_s9 + $0xcc] sm:$0x7] }
 0x16d   : > { %4582 = vmatmul.mubr.bf16.gmra.mrb[152].mxu0 %v14340_v8  ;;  %v14657_v8 = vld [vmem:[%s18758_s9 + $0xcc] sm:$0xe]  ;;  %v16610_v31 = vpop.f32.mrb[49].mxu0 }
 0x16e   : > { %4589 = vmatprep.mubr.bf16.mxu0 %v14421_v55  ;;  %v14659_v55 = vld [vmem:[%s18758_s9 + $0xd4] sm:$0x1]  ;;  %17971 = vmatmul.mubr.bf16.gmra.mrb[152].mxu1 %v18299_v15  ;;  %v14703_v15 = vrot.slane %v14657_v8, 9  ;;  %v16611_v2 = vadd.f32 %v16610_v31, %v16609_v29  ;;  %v16612_v35 = vpop.f32.mrb[50].mxu0  ;;  %v20716_v8 = vsel %vm20664_vm8, %v14782_v44, %v5705_v0  ;;  %v6003_v29 = vrot.slane %v14819_v52, 7 }
 0x16f   : > { %17974 = vmatprep.mubr.bf16.mxu1 %v18304_v25  ;;  %v5427_v10 = vrot.slane %v14659_v55, 5  ;;  %v16545_v47 = vpop.f32.mrb[48].mxu1  ;;  %v16613_v49 = vpop.f32.mrb[51].mxu0  ;;  %v14878_v25 = vcombine.low %v20689_v11, %v5997_v43  ;;  %v6002_v55 = vrot.slane %v6000_v36, 4  ;;  %v5136_v11 = vrot.slane %v20711_v23, 7 }
 0x170   : > { %v16546_v34 = vpop.f32.mrb[49].mxu1  ;;  %v20722_v57 = vadd.f32 %v16611_v2, %v20160_v37  ;;  %v16614_v9 = vadd.f32 %v16613_v49, %v16612_v35  ;;  %v20728_v43 = vld [vmem:[%s18758_s9 + $0xd0] sm:$0x8]  ;;  %v20731_v0 = vld [vmem:[%s18758_s9 + $0xd4] sm:$0xf]  ;;  %v20737_v37 = vsel %vm20664_vm8, %v5707_v18, %v5708_v3  ;;  %v20741_v49 = vsel %vm18773_vm4, %v14703_v15, %v5424_v50 }
 0x171   : > { %v20733_v44 = vadd.f32 %v16546_v34, %v16545_v47  ;;  %v16548_v52 = vpop.f32.mrb[50].mxu1  ;;  %v14623_v2 = vrot.slane %v20708_v45, 11  ;;  %v20745_v35 = vld [vmem:[%s18758_s9 + $0xd8] sm:$0x7]  ;;  %v14660_v23 = vld [vmem:[%s18758_s9 + $0xe8] sm:$0xe]  ;;  %v20755_v3 = vsel %vm20664_vm8, %v14863_v20, %v6000_v36 }
 0x172   : > { %25117 = vst [vmem:[#allocation12_spill] sm:$0xff] %v20722_v57  ;;  %v16549_v53 = vpop.f32.mrb[51].mxu1  ;;  %v20749_v47 = vadd.f32 %v16614_v9, %v20172_v17  ;;  %v5139_v50 = vrot.slane %v20719_v4, 7  ;;  %v14661_v18 = vld [vmem:[%s18758_s9 + $0xec] sm:$0xf]  ;;  %v5138_v34 = vrot.slane %v5136_v11, 4 }
 0x173   : > { %25118 = vst [vmem:[#allocation13_spill] sm:$0xff] %v20733_v44  ;;  %v20760_v15 = vld [vmem:[%s18758_s9 + $0xf0] sm:$0x1]  ;;  %v20762_v45 = vadd.f32 %v16549_v53, %v16548_v52  ;;  %v14783_v17 = vrot.slane %v20728_v43, 11  ;;  %v20767_v9 = vld [vmem:[%s18758_s9 + $0x230] sm:$0x8] }
 0x174   : > { %25119 = vst [vmem:[#allocation14_spill] sm:$0xff] %v20749_v47  ;;  %v5715_v36 = vrot.slane %v20745_v35, 7  ;;  %v14704_v20 = vrot.slane %v14660_v23, 9  ;;  %v5431_v4 = vrot.slane %v14661_v18, 5  ;;  %v14821_v53 = vld [vmem:[%s18758_s9 + $0x234] sm:$0xf] }
 0x175   : > { %4590 = vmatmul.mubr.bf16.gmra.mrb[156].mxu0 %v14341_v24  ;;  %v5428_v24 = vsel %vm18773_vm4, %v5426_v59, %v5427_v10  ;;  %25120 = vst [vmem:[#allocation15_spill] sm:$0xff] %v20762_v45  ;;  %v16615_v59 = vpop.f32.mrb[52].mxu0  ;;  %v20771_v10 = vsel %vm20664_vm8, %v6002_v55, %v6003_v29  ;;  %v5434_v43 = vrot.slane %v20760_v15, 5  ;;  %v6007_v13 = vrot.slane %v14821_v53, 7  ;;  %v18310_v29 = vld [vmem:[%s25093_s2 + $0x340] sm:$0xff]  }
 0x176   : > { %8377 = vmatprep.mubr.bf16.mxu0 %v14718_v51  ;;  %v5712_v51 = vrot.slane %v20731_v0, 7  ;;  %17975 = vmatmul.mubr.bf16.gmra.mrb[156].mxu1 %v18305_v5  ;;  %v16616_v52 = vpop.f32.mrb[53].mxu0  ;;  %v14719_v31 = vcombine.low %v20741_v49, %v5428_v24  ;;  %v14822_v0 = vld [vmem:[%s18758_s9 + $0x238] sm:$0x7]  ;;  %v14864_v5 = vrot.slane %v20767_v9, 11  ;;  %v5433_v23 = vrot.slane %v5431_v4, 4 }
 0x177   : > { %8538 = vmatprep.mubr.bf16.mxu1 %v14878_v25  ;;  %v16617_v56 = vadd.f32 %v16616_v52, %v16615_v59  ;;  %v16618_v55 = vpop.f32.mrb[54].mxu0  ;;  %v6010_v25 = vrot.slane %v14822_v0, 7  ;;  %v18312_v49 = vld [vmem:[%s25093_s2 + $0x388] sm:$0xff]   ;;  %v16551_v24 = vpop.f32.mrb[52].mxu1  ;;  %v14798_v15 = vcombine.low %v20716_v8, %v20737_v37  ;;  %v18311_v9 = vld [vmem:[%s25093_s2 + $0x3c0] sm:$0xff]   ;;  %v14879_v59 = vcombine.low %v20755_v3, %v20771_v10 }
 0x178   : > { %v5714_v35 = vrot.slane %v5712_v51, 4  ;;  %v16619_v18 = vpop.f32.mrb[55].mxu0  ;;  %v20794_v53 = vsel %vm20664_vm8, %v14623_v2, %v5136_v11  ;;  %v14580_v52 = vld [vmem:[%s18758_s9 + $0xe0] sm:$0x8]  ;;  %v14581_v0 = vld [vmem:[%s18758_s9 + $0xe4] sm:$0xf]  ;;  %v20803_v37 = vsel %vm20664_vm8, %v5138_v34, %v5139_v50  ;;  %v20820_v50 = vsel %vm20664_vm8, %v14783_v17, %v5712_v51 }
 0x179   : > { %v16552_v47 = vpop.f32.mrb[53].mxu1  ;;  %v20799_v57 = vadd.f32 %v16617_v56, %v20220_v12  ;;  %v16620_v8 = vadd.f32 %v16619_v18, %v16618_v55  ;;  %v6009_v45 = vrot.slane %v6007_v13, 4  ;;  %v14582_v44 = vld [vmem:[%s18758_s9 + $0xe8] sm:$0x7]  ;;  %v14740_v3 = vld [vmem:[%s18758_s9 + $0xec] sm:$0x8]  ;;  %v25123_v12 = vcombine.low %v20698_v58, %v20702_v40 }
 0x17a   : > { %v18313_v11 = vld [vmem:[%s25093_s2 + $0x408] sm:$0xff]   ;;  %v20813_v10 = vadd.f32 %v16552_v47, %v16551_v24  ;;  %v16554_v56 = vpop.f32.mrb[54].mxu1  ;;  %v20824_v34 = vsel %vm18773_vm4, %v14704_v20, %v5431_v4  ;;  %v5143_v55 = vrot.slane %v14581_v0, 7  ;;  %v14741_v18 = vld [vmem:[%s18758_s9 + $0xf0] sm:$0xf]  ;;  %v14624_v58 = vrot.slane %v14580_v52, 11 }
 0x17b   : > { %25121 = vst [vmem:[#allocation16_spill] sm:$0xff] %v20799_v57  ;;  %v18314_v2 = vld [vmem:[%s25093_s2 + $0x348] sm:$0xff]   ;;  %v14742_v57 = vld [vmem:[%s18758_s9 + $0xf4] sm:$0x7]  ;;  %v16555_v24 = vpop.f32.mrb[55].mxu1  ;;  %v5146_v40 = vrot.slane %v14582_v44, 7  ;;  %v5435_v20 = vsel %vm18773_vm4, %v5433_v23, %v5434_v43  ;;  %v20845_v44 = vsel %vm20664_vm8, %v14864_v5, %v6007_v13  ;;  %v20849_v43 = vsel %vm20664_vm8, %v6009_v45, %v6010_v25 }
 0x17c   : > { %25122 = vst [vmem:[#allocation17_spill] sm:$0xff] %v20813_v10  ;;  %v18316_v47 = vld [vmem:[%s25093_s2 + $0x390] sm:$0xff]   ;;  %v20832_v10 = vadd.f32 %v16620_v8, %v20234_v33  ;;  %v14784_v17 = vrot.slane %v14740_v3, 11  ;;  %v20834_v51 = vadd.f32 %v16555_v24, %v16554_v56  ;;  %v5145_v4 = vrot.slane %v5143_v55, 4  ;;  %v16621_v33 = vpop.f32.mrb[56].mxu0 }
 0x17d   : > { %8378 = vmatmul.mubr.bf16.vlgmr.msra.gmra.mrb[160].mxu0 %v25123_v12  ;;  %v5719_v0 = vrot.slane %v14741_v18, 7  ;;  %v18315_v12 = vld [vmem:[%s25093_s2 + $0x3c8] sm:$0xff]   ;;  %v18317_v23 = vld [vmem:[%s25093_s2 + $0x410] sm:$0xff]   ;;  %v14663_v25 = vld [vmem:[%s18758_s9 + $0x104] sm:$0xe]  ;;  %v14880_v52 = vcombine.low %v20845_v44, %v20849_v43  ;;  %v20869_v8 = vsel %vm20664_vm8, %v14624_v58, %v5143_v55 }
 0x17e   : > { %17154 = vmatpush3.bf16.msra.mxu0 %v18310_v29  ;;  %8385 = vmatprep.mubr.bf16.mxu0 %v14719_v31  ;;  %v5716_v31 = vsel %vm20664_vm8, %v5714_v35, %v5715_v36  ;;  %v5722_v29 = vrot.slane %v14742_v57, 7  ;;  %v14639_v36 = vcombine.low %v20794_v53, %v20803_v37  ;;  %v18318_v13 = vld [vmem:[%s25093_s2 + $0x350] sm:$0xff]   ;;  %v14720_v57 = vcombine.low %v20824_v34, %v5435_v20  ;;  %v14664_v3 = vld [vmem:[%s18758_s9 + $0x108] sm:$0xf]  ;;  %v14823_v24 = vld [vmem:[%s18758_s9 + $0x24c] sm:$0x8] }
 0x17f   : > { %17155 = vmatprep.subr.bf16.mxu0 %v18312_v49  ;;  %8539 = vmatmul.mubr.bf16.vlgmr.msra.gmra.mrb[160].mxu1 %v14798_v15  ;;  %v16622_v49 = vpop.f32.mrb[57].mxu0  ;;  %v5721_v35 = vrot.slane %v5719_v0, 4  ;;  %v18320_v15 = vld [vmem:[%s25093_s2 + $0x398] sm:$0xff]   ;;  %v14799_v53 = vcombine.low %v20820_v50, %v5716_v31  ;;  %v20873_v37 = vsel %vm20664_vm8, %v5145_v4, %v5146_v40  ;;  %v20885_v55 = vsel %vm20664_vm8, %v14784_v17, %v5719_v0  ;;  %v14824_v58 = vld [vmem:[%s18758_s9 + $0x250] sm:$0xf] }
 0x180   : > { %17266 = vmatpush3.bf16.msra.mxu1 %v18311_v9  ;;  %8546 = vmatprep.mubr.bf16.mxu1 %v14879_v59  ;;  %v16623_v45 = vadd.f32 %v16622_v49, %v16621_v33  ;;  %v16624_v5 = vpop.f32.mrb[58].mxu0  ;;  %v16557_v9 = vpop.f32.mrb[56].mxu1  ;;  %v14705_v18 = vrot.slane %v14663_v25, 9  ;;  %v5438_v17 = vrot.slane %v14664_v3, 5  ;;  %v14825_v0 = vld [vmem:[%s18758_s9 + $0x254] sm:$0x7] }
 0x181   : > { %17267 = vmatprep.subr.bf16.mxu1 %v18313_v11  ;;  %v16625_v59 = vpop.f32.mrb[59].mxu0  ;;  %v14665_v11 = vld [vmem:[%s18758_s9 + $0x10c] sm:$0x1]  ;;  %v16558_v56 = vpop.f32.mrb[57].mxu1  ;;  %v18322_v33 = vld [vmem:[%s25093_s2 + $0x358] sm:$0xff]   ;;  %v14865_v43 = vrot.slane %v14823_v24, 11 }
 0x182   : > { %17156 = vmatpush3.bf16.msra.mxu0 %v18314_v2  ;;  %v18319_v2 = vld [vmem:[%s25093_s2 + $0x3d0] sm:$0xff]   ;;  %v20881_v50 = vadd.f32 %v16623_v45, %v20313_v21  ;;  %v16626_v34 = vadd.f32 %v16625_v59, %v16624_v5  ;;  %v20892_v40 = vadd.f32 %v16558_v56, %v16557_v9  ;;  %v16560_v20 = vpop.f32.mrb[58].mxu1  ;;  %v20896_v21 = vsel %vm20664_vm8, %v5721_v35, %v5722_v29  ;;  %v14583_v29 = vld [vmem:[%s18758_s9 + $0xfc] sm:$0x8]  ;;  %v14584_v5 = vld [vmem:[%s18758_s9 + $0x100] sm:$0xf] }
 0x183   : > { %17157 = vmatprep.subr.bf16.mxu0 %v18316_v47  ;;  %v18321_v47 = vld [vmem:[%s25093_s2 + $0x418] sm:$0xff]   ;;  %v5441_v4 = vrot.slane %v14665_v11, 5  ;;  %v16561_v31 = vpop.f32.mrb[59].mxu1  ;;  %v6014_v49 = vrot.slane %v14824_v58, 7  ;;  %v5439_v35 = vsel %vm18773_vm4, %v14705_v18, %v5438_v17  ;;  %v5440_v45 = vrot.slane %v5438_v17, 4 }
 0x184   : > { %17268 = vmatpush3.bf16.msra.mxu1 %v18315_v12  ;;  %v20903_v44 = vadd.f32 %v16626_v34, %v20324_v22  ;;  %v20906_v12 = vadd.f32 %v16561_v31, %v16560_v20  ;;  %v14585_v25 = vld [vmem:[%s18758_s9 + $0x104] sm:$0x7]  ;;  %v14625_v9 = vrot.slane %v14583_v29, 11  ;;  %v18323_v22 = vld [vmem:[%s25093_s2 + $0x3d8] sm:$0xff]   ;;  %v14743_v11 = vld [vmem:[%s18758_s9 + $0x108] sm:$0x8]  ;;  %v14640_v34 = vcombine.low %v20869_v8, %v20873_v37 }
 0x185   : > { %8386 = vmatmul.mubr.bf16.gmra.mrb[164].mxu0 %v14639_v36  ;;  %v6017_v36 = vrot.slane %v14825_v0, 7  ;;  %17269 = vmatprep.subr.bf16.mxu1 %v18317_v23  ;;  %v6016_v59 = vrot.slane %v6014_v49, 4  ;;  %v5150_v23 = vrot.slane %v14584_v5, 7  ;;  %v5153_v3 = vrot.slane %v14585_v25, 7  ;;  %v14745_v24 = vld [vmem:[%s18758_s9 + $0x110] sm:$0x7] }
 0x186   : > { %8393 = vmatprep.mubr.bf16.mxu0 %v14720_v57  ;;  %17158 = vmatpush3.bf16.msra.mxu0 %v18318_v13  ;;  %v16627_v57 = vpop.f32.mrb[60].mxu0  ;;  %v14800_v13 = vcombine.low %v20885_v55, %v20896_v21  ;;  %v5442_v18 = vsel %vm18773_vm4, %v5440_v45, %v5441_v4  ;;  %v14785_v58 = vrot.slane %v14743_v11, 11  ;;  %v14666_v8 = vld [vmem:[%s18758_s9 + $0x120] sm:$0xe]  ;;  %v14667_v37 = vld [vmem:[%s18758_s9 + $0x124] sm:$0xf] }
 0x187   : > { %8547 = vmatmul.mubr.bf16.gmra.mrb[164].mxu1 %v14799_v53  ;;  %17159 = vmatprep.subr.bf16.mxu0 %v18320_v15  ;;  %v16628_v56 = vpop.f32.mrb[61].mxu0  ;;  %v14744_v53 = vld [vmem:[%s18758_s9 + $0x10c] sm:$0xf]  ;;  %v14721_v0 = vcombine.low %v5439_v35, %v5442_v18  ;;  %v6015_v15 = vsel %vm20664_vm8, %v14865_v43, %v6014_v49  ;;  %v18324_v55 = vld [vmem:[%s25093_s2 + $0x3a0] sm:$0xff]   ;;  %v16563_v21 = vpop.f32.mrb[60].mxu1  ;;  %v5152_v31 = vrot.slane %v5150_v23, 4 }
 0x188   : > { %8554 = vmatprep.mubr.bf16.mxu1 %v14880_v52  ;;  %17270 = vmatpush3.bf16.msra.mxu1 %v18319_v2  ;;  %v16629_v20 = vadd.f32 %v16628_v56, %v16627_v57  ;;  %v16630_v17 = vpop.f32.mrb[62].mxu0  ;;  %v6018_v52 = vsel %vm20664_vm8, %v6016_v59, %v6017_v36  ;;  %v20935_v2 = vsel %vm20664_vm8, %v14625_v9, %v5150_v23  ;;  %v5726_v29 = vrot.slane %v14744_v53, 7  ;;  %v18325_v49 = vld [vmem:[%s25093_s2 + $0x420] sm:$0xff]   ;;  %v14668_v45 = vld [vmem:[%s18758_s9 + $0x128] sm:$0x1] }
 0x189   : > { %17271 = vmatprep.subr.bf16.mxu1 %v18321_v47  ;;  %v16631_v4 = vpop.f32.mrb[63].mxu0  ;;  %v5729_v43 = vrot.slane %v14745_v24, 7  ;;  %v16564_v47 = vpop.f32.mrb[61].mxu1  ;;  %v14706_v5 = vrot.slane %v14666_v8, 9  ;;  %v5445_v25 = vrot.slane %v14667_v37, 5  ;;  %v18326_v9 = vld [vmem:[%s25093_s2 + $0x360] sm:$0xff]   ;;  %v14881_v59 = vcombine.low %v6015_v15, %v6018_v52 }
 0x18a   : > { %17160 = vmatpush3.bf16.msra.mxu0 %v18322_v33  ;;  %v20941_v36 = vadd.f32 %v16629_v20, %v20389_v63  ;;  %v16632_v35 = vadd.f32 %v16631_v4, %v16630_v17  ;;  %v20947_v33 = vadd.f32 %v16564_v47, %v16563_v21  ;;  %v16566_v57 = vpop.f32.mrb[62].mxu1  ;;  %v5154_v63 = vsel %vm20664_vm8, %v5152_v31, %v5153_v3  ;;  %v14826_v11 = vld [vmem:[%s18758_s9 + $0x268] sm:$0x8]  ;;  %v14827_v56 = vld [vmem:[%s18758_s9 + $0x26c] sm:$0xf] }
 0x18b   : > { %17161 = vmatprep.subr.bf16.mxu0 %v18324_v55  ;;  %v5728_v23 = vrot.slane %v5726_v29, 4  ;;  %v16567_v18 = vpop.f32.mrb[63].mxu1  ;;  %v14641_v24 = vcombine.low %v20935_v2, %v5154_v63  ;;  %v5447_v20 = vrot.slane %v5445_v25, 4  ;;  %v14828_v17 = vld [vmem:[%s18758_s9 + $0x270] sm:$0x7]  ;;  %v5448_v52 = vrot.slane %v14668_v45, 5 }
 0x18c   : > { %17272 = vmatpush3.bf16.msra.mxu1 %v18323_v22  ;;  %v20954_v53 = vadd.f32 %v16632_v35, %v20411_v60  ;;  %v14586_v3 = vld [vmem:[%s18758_s9 + $0x118] sm:$0x8]  ;;  %v20961_v15 = vadd.f32 %v16567_v18, %v16566_v57  ;;  %v5446_v22 = vsel %vm18773_vm4, %v14706_v5, %v5445_v25  ;;  %v14866_v8 = vrot.slane %v14826_v11, 11  ;;  %v14587_v60 = vld [vmem:[%s18758_s9 + $0x11c] sm:$0xf]  ;;  %v16633_v37 = vpop.f32.mrb[64].mxu0 }
 0x18d   : > { %8394 = vmatmul.mubr.bf16.gmra.mrb[168].mxu0 %v14640_v34  ;;  %v5727_v34 = vsel %vm20664_vm8, %v14785_v58, %v5726_v29  ;;  %17273 = vmatprep.subr.bf16.mxu1 %v18325_v49  ;;  %v5730_v58 = vsel %vm20664_vm8, %v5728_v23, %v5729_v43  ;;  %v6021_v55 = vrot.slane %v14827_v56, 7  ;;  %v6024_v21 = vrot.slane %v14828_v17, 7  ;;  %v14746_v2 = vld [vmem:[%s18758_s9 + $0x124] sm:$0x8]  ;;  %v16634_v31 = vpop.f32.mrb[65].mxu0 }
 0x18e   : > { %8401 = vmatprep.mubr.bf16.mxu0 %v14721_v0  ;;  %v14588_v0 = vld [vmem:[%s18758_s9 + $0x120] sm:$0x7]  ;;  %17162 = vmatpush3.bf16.msra.mxu0 %v18326_v9  ;;  %v14626_v4 = vrot.slane %v14586_v3, 11  ;;  %v5449_v29 = vsel %vm18773_vm4, %v5447_v20, %v5448_v52  ;;  %v5157_v49 = vrot.slane %v14587_v60, 7  ;;  %v14747_v35 = vld [vmem:[%s18758_s9 + $0x128] sm:$0xf]  ;;  %v16635_v5 = vadd.f32 %v16634_v31, %v16633_v37 }
 0x18f   : > { %8555 = vmatmul.mubr.bf16.gmra.mrb[168].mxu1 %v14800_v13  ;;  %v5160_v47 = vrot.slane %v14588_v0, 7  ;;  %v14786_v45 = vrot.slane %v14746_v2, 11  ;;  %v16636_v13 = vpop.f32.mrb[66].mxu0  ;;  %v14722_v25 = vcombine.low %v5446_v22, %v5449_v29  ;;  %v6022_v43 = vsel %vm20664_vm8, %v14866_v8, %v6021_v55  ;;  %v14748_v57 = vld [vmem:[%s18758_s9 + $0x12c] sm:$0x7]  ;;  %v16697_v63 = vpop.f32.mrb[64].mxu1 }
 0x190   : > { %8562 = vmatprep.mubr.bf16.mxu1 %v14881_v59  ;;  %v6023_v9 = vrot.slane %v6021_v55, 4  ;;  %v16637_v23 = vpop.f32.mrb[67].mxu0  ;;  %v5159_v11 = vrot.slane %v5157_v49, 4  ;;  %v5733_v56 = vrot.slane %v14747_v35, 7  ;;  %v5736_v59 = vrot.slane %v14748_v57, 7  ;;  %v18327_v18 = vld [vmem:[%s25093_s2 + $0x3e0] sm:$0xff]  }
 0x191   : > { %v20980_v20 = vadd.f32 %v16635_v5, %v20471_v19  ;;  %v16698_v17 = vpop.f32.mrb[65].mxu1  ;;  %v16638_v3 = vadd.f32 %v16637_v23, %v16636_v13  ;;  %v14801_v22 = vcombine.low %v5727_v34, %v5730_v58  ;;  %v18328_v8 = vld [vmem:[%s25093_s2 + $0x3a8] sm:$0xff]   ;;  %v5158_v58 = vsel %vm20664_vm8, %v14626_v4, %v5157_v49  ;;  %17274 = vmatpush3.bf16.msra.mxu1 %v18327_v18  ;;  %v14669_v29 = vld [vmem:[%s18758_s9 + $0x13c] sm:$0xe]  ;;  %v14670_v35 = vld [vmem:[%s18758_s9 + $0x140] sm:$0xf] }
 0x192   : > { %v6025_v52 = vsel %vm20664_vm8, %v6023_v9, %v6024_v21  ;;  %v16699_v60 = vadd.f32 %v16698_v17, %v16697_v63  ;;  %v16700_v0 = vpop.f32.mrb[66].mxu1  ;;  %v18329_v19 = vld [vmem:[%s25093_s2 + $0x428] sm:$0xff]   ;;  %v5161_v21 = vsel %vm20664_vm8, %v5159_v11, %v5160_v47  ;;  %v5735_v2 = vrot.slane %v5733_v56, 4  ;;  %17163 = vmatprep.subr.bf16.mxu0 %v18328_v8  ;;  %v14671_v47 = vld [vmem:[%s18758_s9 + $0x144] sm:$0x1] }
 0x193   : > { %v14882_v37 = vcombine.low %v6022_v43, %v6025_v52  ;;  %v20991_v55 = vadd.f32 %v16638_v3, %v20481_v41  ;;  %v16701_v34 = vpop.f32.mrb[67].mxu1  ;;  %17275 = vmatprep.subr.bf16.mxu1 %v18329_v19  ;;  %v5734_v4 = vsel %vm20664_vm8, %v14786_v45, %v5733_v56  ;;  %v14707_v5 = vrot.slane %v14669_v29, 9  ;;  %v18330_v13 = vld [vmem:[%s25093_s2 + $0x368] sm:$0xff]   ;;  %v14829_v63 = vld [vmem:[%s18758_s9 + $0x284] sm:$0x8] }
 0x194   : > { %v16702_v31 = vadd.f32 %v16701_v34, %v16700_v0  ;;  %v16639_v41 = vpop.f32.mrb[68].mxu0  ;;  %v5737_v49 = vsel %vm20664_vm8, %v5735_v2, %v5736_v59  ;;  %v14642_v9 = vcombine.low %v5158_v58, %v5161_v21  ;;  %v5455_v57 = vrot.slane %v14671_v47, 5  ;;  %v14830_v45 = vld [vmem:[%s18758_s9 + $0x288] sm:$0xf]  ;;  %v14831_v18 = vld [vmem:[%s18758_s9 + $0x28c] sm:$0x7]  ;;  %17164 = vmatpush3.bf16.msra.mxu0 %v18330_v13 }
 0x195   : > { %8402 = vmatmul.mubr.bf16.gmra.mrb[172].mxu0 %v14641_v24  ;;  %v20998_v24 = vadd.f32 %v16699_v60, %v20452_v42  ;;  %v5452_v42 = vrot.slane %v14670_v35, 5  ;;  %v16640_v43 = vpop.f32.mrb[69].mxu0  ;;  %v14867_v17 = vrot.slane %v14829_v63, 11  ;;  %v25124_v3 = vrot.slane %v20499_v27, 2  ;;  %v14589_v19 = vld [vmem:[%s18758_s9 + $0x134] sm:$0x8] }
 0x196   : > { %8409 = vmatprep.mubr.bf16.mxu0 %v14722_v25  ;;  %v21011_v25 = vadd.f32 %v16702_v31, %v20478_v6  ;;  %v16641_v23 = vadd.f32 %v16640_v43, %v16639_v41  ;;  %v16642_v11 = vpop.f32.mrb[70].mxu0  ;;  %v18331_v6 = vld [vmem:[%s25093_s2 + $0x3e8] sm:$0xff]   ;;  %v14802_v60 = vcombine.low %v5734_v4, %v5737_v49  ;;  %v6028_v0 = vrot.slane %v14830_v45, 7  ;;  %v14590_v31 = vld [vmem:[%s18758_s9 + $0x138] sm:$0xf] }
 0x197   : > { %8563 = vmatmul.mubr.bf16.gmra.mrb[172].mxu1 %v14801_v22  ;;  %v5453_v56 = vsel %vm18773_vm4, %v14707_v5, %v5452_v42  ;;  %v5454_v59 = vrot.slane %v5452_v42, 4  ;;  %v21024_v22 = vadd.f32 %v25124_v3, %v20499_v27  ;;  %v16703_v52 = vpop.f32.mrb[68].mxu1  ;;  %v16643_v8 = vpop.f32.mrb[71].mxu0  ;;  %v14591_v27 = vld [vmem:[%s18758_s9 + $0x13c] sm:$0x7]  ;;  %v14627_v29 = vrot.slane %v14589_v19, 11 }
 0x198   : > { %8570 = vmatprep.mubr.bf16.mxu1 %v14882_v37  ;;  %v6031_v37 = vrot.slane %v14831_v18, 7  ;;  %v21028_v34 = vadd.f32 %v16641_v23, %v20527_v1  ;;  %v16704_v58 = vpop.f32.mrb[69].mxu1  ;;  %v16644_v21 = vadd.f32 %v16643_v8, %v16642_v11  ;;  %17276 = vmatpush3.bf16.msra.mxu1 %v18331_v6  ;;  %v6029_v49 = vsel %vm20664_vm8, %v14867_v17, %v6028_v0  ;;  %v14749_v47 = vld [vmem:[%s18758_s9 + $0x140] sm:$0x8]  ;;  %v14750_v5 = vld [vmem:[%s18758_s9 + $0x144] sm:$0xf] }
 0x199   : > { %v5456_v2 = vsel %vm18773_vm4, %v5454_v59, %v5455_v57  ;;  %v16705_v35 = vadd.f32 %v16704_v58, %v16703_v52  ;;  %v16706_v41 = vpop.f32.mrb[70].mxu1  ;;  %v6030_v1 = vrot.slane %v6028_v0, 4  ;;  %v5164_v43 = vrot.slane %v14590_v31, 7  ;;  %v14751_v63 = vld [vmem:[%s18758_s9 + $0x148] sm:$0x7]  ;;  %v18333_v0 = vld [vmem:[%s25093_s2 + $0x430] sm:$0xff]  }
 0x19a   : > { %v14723_v4 = vcombine.low %v5453_v56, %v5456_v2  ;;  %v21039_v42 = vadd.f32 %v16644_v21, %v20550_v62  ;;  %v16707_v13 = vpop.f32.mrb[71].mxu1  ;;  %v5167_v57 = vrot.slane %v14591_v27, 7  ;;  %v14787_v45 = vrot.slane %v14749_v47, 11  ;;  %v14672_v59 = vld [vmem:[%s18758_s9 + $0x158] sm:$0xe]  ;;  %v18332_v62 = vld [vmem:[%s25093_s2 + $0x3b0] sm:$0xff]   ;;  %17277 = vmatprep.subr.bf16.mxu1 %v18333_v0 }
 0x19b   : > { %v16708_v23 = vadd.f32 %v16707_v13, %v16706_v41  ;;  %v6032_v11 = vsel %vm20664_vm8, %v6030_v1, %v6031_v37  ;;  %v5740_v56 = vrot.slane %v14750_v5, 7  ;;  %v14673_v18 = vld [vmem:[%s18758_s9 + $0x15c] sm:$0xf]  ;;  %v5166_v3 = vrot.slane %v5164_v43, 4  ;;  %v14674_v8 = vld [vmem:[%s18758_s9 + $0x160] sm:$0x1]  ;;  %17165 = vmatprep.subr.bf16.mxu0 %v18332_v62 }
 0x19c   : > { %v16645_v17 = vpop.f32.mrb[72].mxu0  ;;  %v14883_v6 = vcombine.low %v6029_v49, %v6032_v11  ;;  %v5743_v52 = vrot.slane %v14751_v63, 7  ;;  %v14708_v21 = vrot.slane %v14672_v59, 9  ;;  %v14832_v2 = vld [vmem:[%s18758_s9 + $0x2a0] sm:$0x8]  ;;  %v18334_v31 = vld [vmem:[%s25093_s2 + $0x370] sm:$0xff]  }
 0x19d   : > { %8410 = vmatmul.mubr.bf16.gmra.mrb[176].mxu0 %v14642_v9  ;;  %v21043_v9 = vadd.f32 %v16705_v35, %v20517_v14  ;;  %v5165_v14 = vsel %vm20664_vm8, %v14627_v29, %v5164_v43  ;;  %v21059_v37 = vadd.f32 %v16708_v23, %v20537_v30  ;;  %v16646_v19 = vpop.f32.mrb[73].mxu0  ;;  %v5742_v58 = vrot.slane %v5740_v56, 4  ;;  %v18335_v49 = vld [vmem:[%s25093_s2 + $0x3f0] sm:$0xff]   ;;  %v14834_v43 = vld [vmem:[%s18758_s9 + $0x2a8] sm:$0x7]  ;;  %v18337_v0 = vld [vmem:[%s25093_s2 + $0x438] sm:$0xff]  }
 0x19e   : > { %8417 = vmatprep.mubr.bf16.mxu0 %v14723_v4  ;;  %v16647_v27 = vadd.f32 %v16646_v19, %v16645_v17  ;;  %v16648_v29 = vpop.f32.mrb[74].mxu0  ;;  %v5168_v30 = vsel %vm20664_vm8, %v5166_v3, %v5167_v57  ;;  %v5459_v35 = vrot.slane %v14673_v18, 5  ;;  %v5462_v41 = vrot.slane %v14674_v8, 5  ;;  %v14833_v4 = vld [vmem:[%s18758_s9 + $0x2a4] sm:$0xf]  ;;  %17166 = vmatpush3.bf16.msra.mxu0 %v18334_v31  ;;  %v18336_v17 = vld [vmem:[%s25093_s2 + $0x3b8] sm:$0xff]  }
 0x19f   : > { %8571 = vmatmul.mubr.bf16.gmra.mrb[176].mxu1 %v14802_v60  ;;  %v5741_v60 = vsel %vm20664_vm8, %v14787_v45, %v5740_v56  ;;  %v16709_v1 = vpop.f32.mrb[72].mxu1  ;;  %v16649_v47 = vpop.f32.mrb[75].mxu0  ;;  %v14643_v5 = vcombine.low %v5165_v14, %v5168_v30  ;;  %v5744_v13 = vsel %vm20664_vm8, %v5742_v58, %v5743_v52  ;;  %v14868_v63 = vrot.slane %v14832_v2, 11  ;;  %v14592_v18 = vld [vmem:[%s18758_s9 + $0x150] sm:$0x8]  ;;  %17167 = vmatprep.subr.bf16.mxu0 %v18336_v17 }
 0x1a0   : > { %8578 = vmatprep.mubr.bf16.mxu1 %v14883_v6  ;;  %v6035_v45 = vrot.slane %v14833_v4, 7  ;;  %v21077_v57 = vadd.f32 %v16647_v27, %v20607_v28  ;;  %v16710_v23 = vpop.f32.mrb[73].mxu1  ;;  %v16650_v11 = vadd.f32 %v16649_v47, %v16648_v29  ;;  %v14803_v56 = vcombine.low %v5741_v60, %v5744_v13  ;;  %v14593_v62 = vld [vmem:[%s18758_s9 + $0x154] sm:$0xf]  ;;  %17278 = vmatpush3.bf16.msra.mxu1 %v18335_v49  ;;  %v14594_v8 = vld [vmem:[%s18758_s9 + $0x158] sm:$0x7] }
 0x1a1   : > { %v5460_v59 = vsel %vm18773_vm4, %v14708_v21, %v5459_v35  ;;  %v16711_v6 = vadd.f32 %v16710_v23, %v16709_v1  ;;  %v16712_v14 = vpop.f32.mrb[74].mxu1  ;;  %v5461_v3 = vrot.slane %v5459_v35, 4  ;;  %v6038_v58 = vrot.slane %v14834_v43, 7  ;;  %v14752_v31 = vld [vmem:[%s18758_s9 + $0x15c] sm:$0x8]  ;;  %17279 = vmatprep.subr.bf16.mxu1 %v18337_v0 }
 0x1a2   : > { %v6036_v28 = vsel %vm20664_vm8, %v14868_v63, %v6035_v45  ;;  %v6037_v52 = vrot.slane %v6035_v45, 4  ;;  %v21093_v19 = vadd.f32 %v16650_v11, %v20624_v16  ;;  %v16713_v60 = vpop.f32.mrb[75].mxu1  ;;  %v14628_v21 = vrot.slane %v14592_v18, 11  ;;  %v14753_v4 = vld [vmem:[%s18758_s9 + $0x160] sm:$0xf]  ;;  %v18338_v16 = vld [vmem:[%s25093_s2 + $0x378] sm:$0xff]  }
 0x1a3   : > { %v5171_v2 = vrot.slane %v14593_v62, 7  ;;  %v21097_v27 = vadd.f32 %v16711_v6, %v20595_v7  ;;  %v16714_v29 = vadd.f32 %v16713_v60, %v16712_v14  ;;  %v5463_v30 = vsel %vm18773_vm4, %v5461_v3, %v5462_v41  ;;  %v14754_v49 = vld [vmem:[%s18758_s9 + $0x164] sm:$0x7]  ;;  %17168 = vmatpush3.bf16.msra.mxu0 %v18338_v16  ;;  %v18339_v11 = vld [vmem:[%s25093_s2 + $0x3f8] sm:$0xff]  }
 0x1a4   : > { %v5174_v35 = vrot.slane %v14594_v8, 7  ;;  %v16651_v1 = vpop.f32.mrb[76].mxu0  ;;  %v14724_v47 = vcombine.low %v5460_v59, %v5463_v30  ;;  %v14788_v45 = vrot.slane %v14752_v31, 11  ;;  %v5747_v23 = vrot.slane %v14753_v4, 7  ;;  %17280 = vmatpush3.bf16.msra.mxu1 %v18339_v11  ;;  %v18341_v60 = vld [vmem:[%s25093_s2 + $0x4c0] sm:$0xff]  }
 0x1a5   : > { %8418 = vmatmul.mubr.bf16.gmra.mrb[180].mxu0 %v14643_v5  ;;  %v6039_v5 = vsel %vm20664_vm8, %v6037_v52, %v6038_v58  ;;  %v5172_v7 = vsel %vm20664_vm8, %v14628_v21, %v5171_v2  ;;  %v5173_v13 = vrot.slane %v5171_v2, 4  ;;  %v21111_v41 = vadd.f32 %v16714_v29, %v20613_v39  ;;  %v16652_v43 = vpop.f32.mrb[77].mxu0  ;;  %v14675_v29 = vld [vmem:[%s18758_s9 + $0x174] sm:$0xe]  ;;  %v14676_v30 = vld [vmem:[%s18758_s9 + $0x178] sm:$0xf]  ;;  %17401 = vmatprep.subr.bf16.mxu1 %v18341_v60 }
 0x1a6   : > { %v14884_v63 = vcombine.low %v6036_v28, %v6039_v5  ;;  %v16654_v59 = vpop.f32.mrb[78].mxu0  ;;  %8425 = vmatprep.mubr.bf16.mxu0 %v14724_v47  ;;  %v5750_v62 = vrot.slane %v14754_v49, 7  ;;  %v5748_v14 = vsel %vm20664_vm8, %v14788_v45, %v5747_v23  ;;  %v5749_v3 = vrot.slane %v5747_v23, 4  ;;  %v18340_v28 = vld [vmem:[%s25093_s2 + $0x440] sm:$0xff]   ;;  %v14677_v49 = vld [vmem:[%s18758_s9 + $0x17c] sm:$0x1] }
 0x1a7   : > { %8579 = vmatmul.mubr.bf16.gmra.mrb[180].mxu1 %v14803_v56  ;;  %v16653_v56 = vadd.f32 %v16652_v43, %v16651_v1  ;;  %v5175_v18 = vsel %vm20664_vm8, %v5173_v13, %v5174_v35  ;;  %v16715_v17 = vpop.f32.mrb[76].mxu1  ;;  %v16655_v6 = vpop.f32.mrb[79].mxu0  ;;  %v1066_v58 = vrot.slane %v21024_v22, 1  ;;  %17978 = vmatprep.subr.bf16.mxu0 %v18340_v28  ;;  %v14709_v16 = vrot.slane %v14675_v29, 9  ;;  %v14835_v13 = vld [vmem:[%s18758_s9 + $0x2bc] sm:$0x8] }
 0x1a8   : > { %8586 = vmatprep.mubr.bf16.mxu1 %v14884_v63  ;;  %v14644_v39 = vcombine.low %v5172_v7, %v5175_v18  ;;  %v16716_v8 = vpop.f32.mrb[77].mxu1  ;;  %v16656_v0 = vadd.f32 %v16655_v6, %v16654_v59  ;;  %v5751_v31 = vsel %vm20664_vm8, %v5749_v3, %v5750_v62  ;;  %v5466_v1 = vrot.slane %v14676_v30, 5  ;;  %v14836_v43 = vld [vmem:[%s18758_s9 + $0x2c0] sm:$0xf]  ;;  %v14837_v23 = vld [vmem:[%s18758_s9 + $0x2c4] sm:$0x7] }
 0x1a9   : > { %v21124_v52 = vadd.f32 %v16653_v56, %v20669_v46  ;;  %v16717_v21 = vadd.f32 %v16716_v8, %v16715_v17  ;;  %v16718_v2 = vpop.f32.mrb[78].mxu1  ;;  %v14804_v4 = vcombine.low %v5748_v14, %v5751_v31  ;;  %v5469_v7 = vrot.slane %v14677_v49, 5  ;;  %v14596_v14 = vld [vmem:[%s18758_s9 + $0x170] sm:$0xf]  ;;  %v14597_v60 = vld [vmem:[%s18758_s9 + $0x174] sm:$0x7] }
 0x1aa   : > { %v21135_v46 = vadd.f32 %v16656_v0, %v20685_v54  ;;  %v16719_v35 = vpop.f32.mrb[79].mxu1  ;;  %v5467_v54 = vsel %vm18773_vm4, %v14709_v16, %v5466_v1  ;;  %v5468_v45 = vrot.slane %v5466_v1, 4  ;;  %v14869_v11 = vrot.slane %v14835_v13, 11  ;;  %v25126_v30 = vld [vmem:[#allocation13_spill] sm:$0xff]  ;;  %v14756_v1 = vld [vmem:[%s18758_s9 + $0x17c] sm:$0xf] }
 0x1ab   : > { %v21139_v47 = vadd.f32 %v16717_v21, %v20660_v61  ;;  %v16720_v5 = vadd.f32 %v16719_v35, %v16718_v2  ;;  %v6042_v56 = vrot.slane %v14836_v43, 7  ;;  %v25125_v61 = vrot.slane %v20637_v38, 1 }
 0x1ac   : > { %v16657_v63 = vpop.f32.mrb[80].mxu0  ;;  %v1067_v18 = vadd.f32 %v1066_v58, %v21024_v22  ;;  %v6045_v6 = vrot.slane %v14837_v23, 7  ;;  %v5470_v8 = vsel %vm18773_vm4, %v5468_v45, %v5469_v7  ;;  %v14755_v22 = vld [vmem:[%s18758_s9 + $0x178] sm:$0x8]  ;;  %v5178_v31 = vrot.slane %v14596_v14, 7 }
 0x1ad   : > { %8426 = vmatmul.mubr.bf16.gmra.mrb[184].mxu0 %v14644_v39  ;;  %v997_v59 = vadd.f32 %v25125_v61, %v20637_v38  ;;  %v21151_v62 = vadd.f32 %v16720_v5, %v20674_v48  ;;  %v16658_v17 = vpop.f32.mrb[81].mxu0  ;;  %v14595_v39 = vld [vmem:[%s18758_s9 + $0x16c] sm:$0x8]  ;;  %v6043_v0 = vsel %vm20664_vm8, %v14869_v11, %v6042_v56  ;;  %v6044_v38 = vrot.slane %v6042_v56, 4  ;;  %v14757_v5 = vld [vmem:[%s18758_s9 + $0x180] sm:$0x7] }
 0x1ae   : > { %v16659_v3 = vadd.f32 %v16658_v17, %v16657_v63  ;;  %v16660_v28 = vpop.f32.mrb[82].mxu0  ;;  %v14725_v21 = vcombine.low %v5467_v54, %v5470_v8  ;;  %v14629_v2 = vrot.slane %v14595_v39, 11  ;;  %v5181_v29 = vrot.slane %v14597_v60, 7  ;;  %v14678_v23 = vld [vmem:[%s18758_s9 + $0x190] sm:$0xe]  ;;  %v25127_v56 = vld [vmem:[#allocation15_spill] sm:$0xff] }
 0x1af   : > { %8587 = vmatmul.mubr.bf16.gmra.mrb[184].mxu1 %v14804_v4  ;;  %v16721_v58 = vpop.f32.mrb[80].mxu1  ;;  %v16661_v48 = vpop.f32.mrb[83].mxu0  ;;  %v6046_v16 = vsel %vm20664_vm8, %v6044_v38, %v6045_v6  ;;  %v14789_v7 = vrot.slane %v14755_v22, 11  ;;  %v5180_v45 = vrot.slane %v5178_v31, 4  ;;  %v14679_v11 = vld [vmem:[%s18758_s9 + $0x194] sm:$0xf] }
 0x1b0   : > { %v21162_v35 = vadd.f32 %v16659_v3, %v25126_v30  ;;  %v16722_v4 = vpop.f32.mrb[81].mxu1  ;;  %v16662_v49 = vadd.f32 %v16661_v48, %v16660_v28  ;;  %8433 = vmatprep.mubr.bf16.mxu0 %v14725_v21  ;;  %v14885_v63 = vcombine.low %v6043_v0, %v6046_v16  ;;  %v5179_v54 = vsel %vm20664_vm8, %v14629_v2, %v5178_v31  ;;  %v14680_v14 = vld [vmem:[%s18758_s9 + $0x198] sm:$0x1]  ;;  %v25128_v28 = vld [vmem:[#allocation12_spill] sm:$0xff]  ;;  %v14838_v22 = vld [vmem:[%s18758_s9 + $0x2d8] sm:$0x8] }
 0x1b1   : > { %v16723_v13 = vadd.f32 %v16722_v4, %v16721_v58  ;;  %v16724_v43 = vpop.f32.mrb[82].mxu1  ;;  %v5754_v6 = vrot.slane %v14756_v1, 7  ;;  %v5757_v39 = vrot.slane %v14757_v5, 7  ;;  %v14710_v3 = vrot.slane %v14678_v23, 9  ;;  %v14839_v58 = vld [vmem:[%s18758_s9 + $0x2dc] sm:$0xf] }
 0x1b2   : > { %v21173_v61 = vadd.f32 %v16662_v49, %v25127_v56  ;;  %v16725_v17 = vpop.f32.mrb[83].mxu1  ;;  %8594 = vmatprep.mubr.bf16.mxu1 %v14885_v63  ;;  %v5182_v38 = vsel %vm20664_vm8, %v5180_v45, %v5181_v29  ;;  %v5473_v60 = vrot.slane %v14679_v11, 5  ;;  %v5476_v30 = vrot.slane %v14680_v14, 5  ;;  %v14840_v4 = vld [vmem:[%s18758_s9 + $0x2e0] sm:$0x7]  ;;  %v25129_v49 = vld [vmem:[#allocation14_spill] sm:$0xff] }
 0x1b3   : > { %v21177_v8 = vadd.f32 %v16723_v13, %v25128_v28  ;;  %v16726_v0 = vadd.f32 %v16725_v17, %v16724_v43  ;;  %v14645_v48 = vcombine.low %v5179_v54, %v5182_v38  ;;  %v5755_v21 = vsel %vm20664_vm8, %v14789_v7, %v5754_v6  ;;  %v14598_v43 = vld [vmem:[%s18758_s9 + $0x188] sm:$0x8]  ;;  %998 = vst [vmem:[%s21193_s16] sm:$0x1] %v997_v59  ;;  %v14599_v11 = vld [vmem:[%s18758_s9 + $0x18c] sm:$0xf] }
 0x1b4   : > { %v5756_v2 = vrot.slane %v5754_v6, 4  ;;  %v16663_v31 = vpop.f32.mrb[84].mxu0  ;;  %v5474_v29 = vsel %vm18773_vm4, %v14710_v3, %v5473_v60  ;;  %v5475_v5 = vrot.slane %v5473_v60, 4  ;;  %v14870_v13 = vrot.slane %v14838_v22, 11  ;;  %1068 = vst [vmem:[%s21193_s16 + $0x1] sm:$0x1] %v1067_v18 }
 0x1b5   : > { %v21188_v16 = vadd.f32 %v16726_v0, %v25129_v49  ;;  %v16664_v1 = vpop.f32.mrb[85].mxu0  ;;  %8434 = vmatmul.mubr.bf16.gmra.mrb[188].mxu0 %v14645_v48  ;;  %v6049_v45 = vrot.slane %v14839_v58, 7  ;;  %v6052_v23 = vrot.slane %v14840_v4, 7  ;;  %v14600_v3 = vld [vmem:[%s18758_s9 + $0x190] sm:$0x7]  ;;  %v14630_v59 = vrot.slane %v14598_v43, 11 }
 0x1b6   : > { %v5758_v7 = vsel %vm20664_vm8, %v5756_v2, %v5757_v39  ;;  %v16665_v63 = vadd.f32 %v16664_v1, %v16663_v31  ;;  %v16666_v54 = vpop.f32.mrb[86].mxu0  ;;  %v5477_v14 = vsel %vm18773_vm4, %v5475_v5, %v5476_v30  ;;  %v5185_v18 = vrot.slane %v14599_v11, 7  ;;  %v25130_v28 = vld [vmem:[#allocation17_spill] sm:$0xff]  ;;  %v14758_v58 = vld [vmem:[%s18758_s9 + $0x194] sm:$0x8] }
 0x1b7   : > { %v14805_v56 = vcombine.low %v5755_v21, %v5758_v7  ;;  %v16727_v17 = vpop.f32.mrb[84].mxu1  ;;  %v16667_v6 = vpop.f32.mrb[87].mxu0  ;;  %v14726_v60 = vcombine.low %v5474_v29, %v5477_v14  ;;  %v6050_v22 = vsel %vm20664_vm8, %v14870_v13, %v6049_v45  ;;  %v14759_v48 = vld [vmem:[%s18758_s9 + $0x198] sm:$0xf]  ;;  %v6051_v31 = vrot.slane %v6049_v45, 4  ;;  %v25131_v7 = vld [vmem:[#allocation16_spill] sm:$0xff] }
 0x1b8   : > { %v21204_v0 = vadd.f32 %v16665_v63, %v25130_v28  ;;  %v16728_v39 = vpop.f32.mrb[85].mxu1  ;;  %v16668_v38 = vadd.f32 %v16667_v6, %v16666_v54  ;;  %v5186_v30 = vsel %vm20664_vm8, %v14630_v59, %v5185_v18  ;;  %v5187_v4 = vrot.slane %v5185_v18, 4  ;;  %v14760_v49 = vld [vmem:[%s18758_s9 + $0x19c] sm:$0x7]  ;;  %v14681_v28 = vld [vmem:[%s18758_s9 + $0x1ac] sm:$0xe] }
 0x1b9   : > { %8595 = vmatmul.mubr.bf16.gmra.mrb[188].mxu1 %v14805_v56  ;;  %v16729_v21 = vadd.f32 %v16728_v39, %v16727_v17  ;;  %v16730_v2 = vpop.f32.mrb[86].mxu1  ;;  %8441 = vmatprep.mubr.bf16.mxu0 %v14726_v60  ;;  %v5188_v29 = vrot.slane %v14600_v3, 7  ;;  %v14790_v43 = vrot.slane %v14758_v58, 11  ;;  %v5761_v13 = vrot.slane %v14759_v48, 7  ;;  %v14682_v39 = vld [vmem:[%s18758_s9 + $0x1b0] sm:$0xf] }
 0x1ba   : > { %v21214_v1 = vadd.f32 %v16668_v38, %v20834_v51  ;;  %v16731_v5 = vpop.f32.mrb[87].mxu1  ;;  %v6053_v45 = vsel %vm20664_vm8, %v6051_v31, %v6052_v23  ;;  %v5764_v11 = vrot.slane %v14760_v49, 7  ;;  %v14683_v48 = vld [vmem:[%s18758_s9 + $0x1b4] sm:$0x1] }
 0x1bb   : > { %v21217_v63 = vadd.f32 %v16729_v21, %v25131_v7  ;;  %v16732_v54 = vadd.f32 %v16731_v5, %v16730_v2  ;;  %v14886_v56 = vcombine.low %v6050_v22, %v6053_v45  ;;  %v5189_v51 = vsel %vm20664_vm8, %v5187_v4, %v5188_v29  ;;  %v14841_v4 = vld [vmem:[%s18758_s9 + $0x2f4] sm:$0x8]  ;;  %v14842_v7 = vld [vmem:[%s18758_s9 + $0x2f8] sm:$0xf] }
 0x1bc   : > { %v5762_v17 = vsel %vm20664_vm8, %v14790_v43, %v5761_v13  ;;  %v5763_v6 = vrot.slane %v5761_v13, 4  ;;  %v16669_v14 = vpop.f32.mrb[88].mxu0  ;;  %v14646_v59 = vcombine.low %v5186_v30, %v5189_v51  ;;  %v14711_v21 = vrot.slane %v14681_v28, 9 }
 0x1bd   : > { %v21226_v3 = vadd.f32 %v16732_v54, %v20832_v10  ;;  %8602 = vmatprep.mubr.bf16.mxu1 %v14886_v56  ;;  %v16670_v18 = vpop.f32.mrb[89].mxu0  ;;  %v5480_v10 = vrot.slane %v14682_v39, 5  ;;  %v5483_v30 = vrot.slane %v14683_v48, 5  ;;  %v14843_v54 = vld [vmem:[%s18758_s9 + $0x2fc] sm:$0x7]  ;;  %v14871_v56 = vrot.slane %v14841_v4, 11 }
 0x1be   : > { %v5765_v23 = vsel %vm20664_vm8, %v5763_v6, %v5764_v11  ;;  %8442 = vmatmul.mubr.bf16.gmra.mrb[192].mxu0 %v14646_v59  ;;  %v16671_v22 = vadd.f32 %v16670_v18, %v16669_v14  ;;  %v16672_v58 = vpop.f32.mrb[90].mxu0  ;;  %v6056_v51 = vrot.slane %v14842_v7, 7  ;;  %v14601_v59 = vld [vmem:[%s18758_s9 + $0x1a4] sm:$0x8]  ;;  %v14603_v18 = vld [vmem:[%s18758_s9 + $0x1ac] sm:$0x7] }
 0x1bf   : > { %v14806_v38 = vcombine.low %v5762_v17, %v5765_v23  ;;  %v16733_v60 = vpop.f32.mrb[88].mxu1  ;;  %v16673_v31 = vpop.f32.mrb[91].mxu0  ;;  %v5481_v13 = vsel %vm18773_vm4, %v14711_v21, %v5480_v10  ;;  %v5482_v11 = vrot.slane %v5480_v10, 4  ;;  %v6059_v17 = vrot.slane %v14843_v54, 7  ;;  %v14602_v23 = vld [vmem:[%s18758_s9 + $0x1a8] sm:$0xf] }
 0x1c0   : > { %v16734_v2 = vpop.f32.mrb[89].mxu1  ;;  %v21235_v49 = vadd.f32 %v16671_v22, %v20892_v40  ;;  %v16674_v43 = vadd.f32 %v16673_v31, %v16672_v58  ;;  %v6057_v39 = vsel %vm20664_vm8, %v14871_v56, %v6056_v51  ;;  %v14761_v22 = vld [vmem:[%s18758_s9 + $0x1b0] sm:$0x8]  ;;  %v5192_v48 = vrot.slane %v14602_v23, 7  ;;  %v14763_v10 = vld [vmem:[%s18758_s9 + $0x1b8] sm:$0x7] }
 0x1c1   : > { %8603 = vmatmul.mubr.bf16.gmra.mrb[192].mxu1 %v14806_v38  ;;  %v16735_v5 = vadd.f32 %v16734_v2, %v16733_v60  ;;  %v16736_v29 = vpop.f32.mrb[90].mxu1  ;;  %v5484_v28 = vsel %vm18773_vm4, %v5482_v11, %v5483_v30  ;;  %v6058_v38 = vrot.slane %v6056_v51, 4  ;;  %v14631_v60 = vrot.slane %v14601_v59, 11  ;;  %v14685_v56 = vld [vmem:[%s18758_s9 + $0x1cc] sm:$0xf] }
 0x1c2   : > { %v16737_v45 = vpop.f32.mrb[91].mxu1  ;;  %v21245_v6 = vadd.f32 %v16674_v43, %v20906_v12  ;;  %v14727_v12 = vcombine.low %v5481_v13, %v5484_v28  ;;  %v5195_v21 = vrot.slane %v14603_v18, 7  ;;  %v14791_v30 = vrot.slane %v14761_v22, 11  ;;  %v14684_v43 = vld [vmem:[%s18758_s9 + $0x1c8] sm:$0xe] }
 0x1c3   : > { %v21242_v40 = vadd.f32 %v16735_v5, %v20881_v50  ;;  %v16738_v14 = vadd.f32 %v16737_v45, %v16736_v29  ;;  %v14762_v50 = vld [vmem:[%s18758_s9 + $0x1b4] sm:$0xf]  ;;  %v6060_v31 = vsel %vm20664_vm8, %v6058_v38, %v6059_v17  ;;  %v5771_v5 = vrot.slane %v14763_v10, 7  ;;  %v14686_v23 = vld [vmem:[%s18758_s9 + $0x1d0] sm:$0x1] }
 0x1c4   : > { %v16675_v2 = vpop.f32.mrb[92].mxu0  ;;  %v5768_v4 = vrot.slane %v14762_v50, 7  ;;  %8449 = vmatprep.mubr.bf16.mxu0 %v14727_v12  ;;  %v14887_v7 = vcombine.low %v6057_v39, %v6060_v31  ;;  %v5194_v13 = vrot.slane %v5192_v48, 4  ;;  %v14712_v18 = vrot.slane %v14684_v43, 9  ;;  %v14844_v50 = vld [vmem:[%s18758_s9 + $0x310] sm:$0x8] }
 0x1c5   : > { %v21257_v58 = vadd.f32 %v16738_v14, %v20903_v44  ;;  %v16676_v29 = vpop.f32.mrb[93].mxu0  ;;  %v5193_v44 = vsel %vm20664_vm8, %v14631_v60, %v5192_v48  ;;  %v14845_v12 = vld [vmem:[%s18758_s9 + $0x314] sm:$0xf]  ;;  %v5487_v31 = vrot.slane %v14685_v56, 5  ;;  %v14764_v56 = vld [vmem:[%s18758_s9 + $0x1cc] sm:$0x8] }
 0x1c6   : > { %v16677_v45 = vadd.f32 %v16676_v29, %v16675_v2  ;;  %v16678_v11 = vpop.f32.mrb[94].mxu0  ;;  %v5769_v51 = vsel %vm20664_vm8, %v14791_v30, %v5768_v4  ;;  %v5770_v17 = vrot.slane %v5768_v4, 4  ;;  %8610 = vmatprep.mubr.bf16.mxu1 %v14887_v7  ;;  %v5196_v28 = vsel %vm20664_vm8, %v5194_v13, %v5195_v21  ;;  %v14846_v21 = vld [vmem:[%s18758_s9 + $0x318] sm:$0x7]  ;;  %v14604_v7 = vld [vmem:[%s18758_s9 + $0x1c0] sm:$0x8] }
 0x1c7   : > { %v16739_v54 = vpop.f32.mrb[92].mxu1  ;;  %v16679_v59 = vpop.f32.mrb[95].mxu0  ;;  %v14647_v48 = vcombine.low %v5193_v44, %v5196_v28  ;;  %v5490_v30 = vrot.slane %v14686_v23, 5  ;;  %v14605_v13 = vld [vmem:[%s18758_s9 + $0x1c4] sm:$0xf] }
 0x1c8   : > { %v16740_v14 = vpop.f32.mrb[93].mxu1  ;;  %v21272_v39 = vadd.f32 %v16677_v45, %v20947_v33  ;;  %v16680_v22 = vadd.f32 %v16679_v59, %v16678_v11  ;;  %v5772_v10 = vsel %vm20664_vm8, %v5770_v17, %v5771_v5  ;;  %v14606_v44 = vld [vmem:[%s18758_s9 + $0x1c8] sm:$0x7]  ;;  %v5488_v5 = vsel %vm18773_vm4, %v14712_v18, %v5487_v31  ;;  %v14765_v59 = vld [vmem:[%s18758_s9 + $0x1d0] sm:$0xf] }
 0x1c9   : > { %v16741_v38 = vadd.f32 %v16740_v14, %v16739_v54  ;;  %v16742_v60 = vpop.f32.mrb[94].mxu1  ;;  %v14807_v4 = vcombine.low %v5769_v51, %v5772_v10  ;;  %8450 = vmatmul.mubr.bf16.gmra.mrb[196].mxu0 %v14647_v48  ;;  %v5489_v54 = vrot.slane %v5487_v31, 4  ;;  %v14872_v45 = vrot.slane %v14844_v50, 11 }
 0x1ca   : > { %v16743_v2 = vpop.f32.mrb[95].mxu1  ;;  %v21283_v29 = vadd.f32 %v16680_v22, %v20961_v15  ;;  %v6063_v11 = vrot.slane %v14845_v12, 7  ;;  %v6066_v15 = vrot.slane %v14846_v21, 7  ;;  %v14632_v17 = vrot.slane %v14604_v7, 11  ;;  %v14766_v22 = vld [vmem:[%s18758_s9 + $0x1d4] sm:$0x7] }
 0x1cb   : > { %v21280_v33 = vadd.f32 %v16741_v38, %v20941_v36  ;;  %v16744_v43 = vadd.f32 %v16743_v2, %v16742_v60  ;;  %8611 = vmatmul.mubr.bf16.gmra.mrb[196].mxu1 %v14807_v4  ;;  %v5199_v14 = vrot.slane %v14605_v13, 7  ;;  %v5491_v28 = vsel %vm18773_vm4, %v5489_v54, %v5490_v30  ;;  %v14687_v54 = vld [vmem:[%s18758_s9 + $0x1e4] sm:$0xe] }
 0x1cc   : > { %v16809_v51 = vpop.f32.mrb[96].mxu0  ;;  %v6064_v18 = vsel %vm20664_vm8, %v14872_v45, %v6063_v11  ;;  %v6065_v38 = vrot.slane %v6063_v11, 4  ;;  %v5202_v60 = vrot.slane %v14606_v44, 7  ;;  %v14728_v50 = vcombine.low %v5488_v5, %v5491_v28 }
 0x1cd   : > { %v21292_v36 = vadd.f32 %v16744_v43, %v20954_v53  ;;  %v16810_v23 = vpop.f32.mrb[97].mxu0  ;;  %v5200_v53 = vsel %vm20664_vm8, %v14632_v17, %v5199_v14  ;;  %v5201_v12 = vrot.slane %v5199_v14, 4  ;;  %v14792_v48 = vrot.slane %v14764_v56, 11 }
 0x1ce   : > { %v6067_v10 = vsel %vm20664_vm8, %v6065_v38, %v6066_v15  ;;  %v5775_v2 = vrot.slane %v14765_v59, 7  ;;  %v5778_v31 = vrot.slane %v14766_v22, 7  ;;  %v16811_v30 = vadd.f32 %v16810_v23, %v16809_v51  ;;  %8457 = vmatprep.mubr.bf16.mxu0 %v14728_v50  ;;  %v16812_v5 = vpop.f32.mrb[98].mxu0  ;;  %v14688_v51 = vld [vmem:[%s18758_s9 + $0x1e8] sm:$0xf] }
 0x1cf   : > { %v14888_v21 = vcombine.low %v6064_v18, %v6067_v10  ;;  %v5203_v4 = vsel %vm20664_vm8, %v5201_v12, %v5202_v60  ;;  %v16745_v44 = vpop.f32.mrb[96].mxu1  ;;  %v16813_v56 = vpop.f32.mrb[99].mxu0  ;;  %v14689_v15 = vld [vmem:[%s18758_s9 + $0x1ec] sm:$0x1]  ;;  %v14713_v28 = vrot.slane %v14687_v54, 9  ;;  %v5494_v22 = vrot.slane %v14688_v51, 5 }
 0x1d0   : > { %v14648_v43 = vcombine.low %v5200_v53, %v5203_v4  ;;  %v5776_v7 = vsel %vm20664_vm8, %v14792_v48, %v5775_v2  ;;  %v5777_v13 = vrot.slane %v5775_v2, 4  ;;  %v21310_v45 = vadd.f32 %v16811_v30, %v20998_v24  ;;  %v16746_v11 = vpop.f32.mrb[97].mxu1  ;;  %v14847_v18 = vld [vmem:[%s18758_s9 + $0x32c] sm:$0x8]  ;;  %v14848_v24 = vld [vmem:[%s18758_s9 + $0x330] sm:$0xf] }
 0x1d1   : > { %8618 = vmatprep.mubr.bf16.mxu1 %v14888_v21  ;;  %v16747_v14 = vadd.f32 %v16746_v11, %v16745_v44  ;;  %v16748_v59 = vpop.f32.mrb[98].mxu1  ;;  %v21316_v23 = vadd.f32 %v16813_v56, %v16812_v5  ;;  %v5497_v50 = vrot.slane %v14689_v15, 5  ;;  %v14849_v53 = vld [vmem:[%s18758_s9 + $0x334] sm:$0x7]  ;;  %v14873_v12 = vrot.slane %v14847_v18, 11 }
 0x1d2   : > { %8458 = vmatmul.mubr.bf16.gmra.mrb[200].mxu0 %v14648_v43  ;;  %v5779_v17 = vsel %vm20664_vm8, %v5777_v13, %v5778_v31  ;;  %v16749_v60 = vpop.f32.mrb[99].mxu1  ;;  %v6070_v2 = vrot.slane %v14848_v24, 7  ;;  %v6073_v31 = vrot.slane %v14849_v53, 7  ;;  %v14607_v30 = vld [vmem:[%s18758_s9 + $0x1dc] sm:$0x8]  ;;  %v5495_v4 = vsel %vm18773_vm4, %v14713_v28, %v5494_v22 }
 0x1d3   : > { %v14808_v38 = vcombine.low %v5776_v7, %v5779_v17  ;;  %v21322_v48 = vadd.f32 %v16747_v14, %v20980_v20  ;;  %v16750_v10 = vadd.f32 %v16749_v60, %v16748_v59  ;;  %v14608_v21 = vld [vmem:[%s18758_s9 + $0x1e0] sm:$0xf]  ;;  %v5496_v43 = vrot.slane %v5494_v22, 4  ;;  %v14609_v7 = vld [vmem:[%s18758_s9 + $0x1e4] sm:$0x7] }
 0x1d4   : > { %v14633_v13 = vrot.slane %v14607_v30, 11  ;;  %v5206_v44 = vrot.slane %v14608_v21, 7  ;;  %v6071_v54 = vsel %vm20664_vm8, %v14873_v12, %v6070_v2  ;;  %v6072_v11 = vrot.slane %v6070_v2, 4  ;;  %v14767_v51 = vld [vmem:[%s18758_s9 + $0x1e8] sm:$0x8] }
 0x1d5   : > { %8619 = vmatmul.mubr.bf16.gmra.mrb[200].mxu1 %v14808_v38  ;;  %v21330_v20 = vadd.f32 %v16750_v10, %v20991_v55  ;;  %v5209_v56 = vrot.slane %v14609_v7, 7  ;;  %v14768_v15 = vld [vmem:[%s18758_s9 + $0x1ec] sm:$0xf]  ;;  %v5498_v17 = vsel %vm18773_vm4, %v5496_v43, %v5497_v50  ;;  %v14769_v28 = vld [vmem:[%s18758_s9 + $0x1f0] sm:$0x7]  ;;  %v14793_v18 = vrot.slane %v14767_v51, 11 }
 0x1d6   : > { %v5207_v14 = vsel %vm20664_vm8, %v14633_v13, %v5206_v44  ;;  %v5208_v59 = vrot.slane %v5206_v44, 4  ;;  %v16815_v55 = vpop.f32.mrb[100].mxu0  ;;  %v14729_v38 = vcombine.low %v5495_v4, %v5498_v17  ;;  %v6074_v60 = vsel %vm20664_vm8, %v6072_v11, %v6073_v31  ;;  %v14690_v50 = vld [vmem:[%s18758_s9 + $0x200] sm:$0xe]  ;;  %v14691_v4 = vld [vmem:[%s18758_s9 + $0x204] sm:$0xf] }
 0x1d7   : > { %v16751_v5 = vpop.f32.mrb[100].mxu1  ;;  %v5782_v22 = vrot.slane %v14768_v15, 7  ;;  %v5785_v53 = vrot.slane %v14769_v28, 7  ;;  %v16816_v12 = vpop.f32.mrb[101].mxu0  ;;  %v14889_v2 = vcombine.low %v6071_v54, %v6074_v60  ;;  %v14692_v44 = vld [vmem:[%s18758_s9 + $0x208] sm:$0x1] }
 0x1d8   : > { %v16752_v24 = vpop.f32.mrb[101].mxu1  ;;  %v5210_v30 = vsel %vm20664_vm8, %v5208_v59, %v5209_v56  ;;  %v16817_v43 = vadd.f32 %v16816_v12, %v16815_v55  ;;  %v16818_v7 = vpop.f32.mrb[102].mxu0  ;;  %8465 = vmatprep.mubr.bf16.mxu0 %v14729_v38  ;;  %v14850_v17 = vld [vmem:[%s18758_s9 + $0x348] sm:$0x8]  ;;  %v14851_v56 = vld [vmem:[%s18758_s9 + $0x34c] sm:$0xf] }
 0x1d9   : > { %v16754_v10 = vpop.f32.mrb[102].mxu1  ;;  %v16753_v21 = vadd.f32 %v16752_v24, %v16751_v5  ;;  %v14649_v31 = vcombine.low %v5207_v14, %v5210_v30  ;;  %v5783_v11 = vsel %vm20664_vm8, %v14793_v18, %v5782_v22  ;;  %v5784_v51 = vrot.slane %v5782_v22, 4  ;;  %v16819_v54 = vpop.f32.mrb[103].mxu0  ;;  %8626 = vmatprep.mubr.bf16.mxu1 %v14889_v2  ;;  %v14852_v14 = vld [vmem:[%s18758_s9 + $0x350] sm:$0x7] }
 0x1da   : > { %v16755_v13 = vpop.f32.mrb[103].mxu1  ;;  %v16820_v59 = vadd.f32 %v16819_v54, %v16818_v7  ;;  %v14714_v28 = vrot.slane %v14690_v50, 9  ;;  %v5501_v55 = vrot.slane %v14691_v4, 5  ;;  %v14610_v24 = vld [vmem:[%s18758_s9 + $0x1f8] sm:$0x8]  ;;  %v5504_v60 = vrot.slane %v14692_v44, 5 }
 0x1db   : > { %v16756_v15 = vadd.f32 %v16755_v13, %v16754_v10  ;;  %v21353_v5 = vadd.f32 %v16753_v21, %v21028_v34  ;;  %8466 = vmatmul.mubr.bf16.gmra.mrb[204].mxu0 %v14649_v31  ;;  %v5786_v18 = vsel %vm20664_vm8, %v5784_v51, %v5785_v53  ;;  %v14874_v22 = vrot.slane %v14850_v17, 11  ;;  %v14611_v12 = vld [vmem:[%s18758_s9 + $0x1fc] sm:$0xf]  ;;  %v14612_v34 = vld [vmem:[%s18758_s9 + $0x200] sm:$0x7] }
 0x1dc   : > { %v14809_v10 = vcombine.low %v5783_v11, %v5786_v18  ;;  %v5502_v50 = vsel %vm18773_vm4, %v14714_v28, %v5501_v55  ;;  %v5503_v2 = vrot.slane %v5501_v55, 4  ;;  %v6077_v30 = vrot.slane %v14851_v56, 7  ;;  %v14770_v21 = vld [vmem:[%s18758_s9 + $0x204] sm:$0x8]  ;;  %v14771_v7 = vld [vmem:[%s18758_s9 + $0x208] sm:$0xf] }
 0x1dd   : > { %v21360_v38 = vadd.f32 %v16756_v15, %v21039_v42  ;;  %v6080_v13 = vrot.slane %v14852_v14, 7  ;;  %v14634_v4 = vrot.slane %v14610_v24, 11  ;;  %v5213_v31 = vrot.slane %v14611_v12, 7  ;;  %v14772_v51 = vld [vmem:[%s18758_s9 + $0x20c] sm:$0x7] }
 0x1de   : > { %v5216_v53 = vrot.slane %v14612_v34, 7  ;;  %8627 = vmatmul.mubr.bf16.gmra.mrb[204].mxu1 %v14809_v10  ;;  %v5505_v42 = vsel %vm18773_vm4, %v5503_v2, %v5504_v60  ;;  %v6078_v44 = vsel %vm20664_vm8, %v14874_v22, %v6077_v30  ;;  %v6079_v11 = vrot.slane %v6077_v30, 4 }
 0x1df   : > { %v14794_v15 = vrot.slane %v14770_v21, 11  ;;  %v14730_v54 = vcombine.low %v5502_v50, %v5505_v42  ;;  %v5214_v17 = vsel %vm20664_vm8, %v14634_v4, %v5213_v31  ;;  %v5215_v56 = vrot.slane %v5213_v31, 4  ;;  %v16757_v24 = vpop.f32.mrb[104].mxu1  ;;  %v16821_v50 = vpop.f32.mrb[104].mxu0 }
 0x1e0   : > { %v5789_v28 = vrot.slane %v14771_v7, 7  ;;  %v6081_v55 = vsel %vm20664_vm8, %v6079_v11, %v6080_v13  ;;  %v5792_v14 = vrot.slane %v14772_v51, 7  ;;  %v21378_v18 = vadd.f32 %v16817_v43, %v21043_v9  ;;  %v16758_v30 = vpop.f32.mrb[105].mxu1  ;;  %v16822_v21 = vpop.f32.mrb[105].mxu0  ;;  %v14693_v7 = vld [vmem:[%s18758_s9 + $0x21c] sm:$0xe] }
 0x1e1   : > { %v21381_v60 = vadd.f32 %v16820_v59, %v21059_v37  ;;  %8473 = vmatprep.mubr.bf16.mxu0 %v14730_v54  ;;  %v14890_v22 = vcombine.low %v6078_v44, %v6081_v55  ;;  %v5217_v12 = vsel %vm20664_vm8, %v5215_v56, %v5216_v53  ;;  %v14694_v9 = vld [vmem:[%s18758_s9 + $0x220] sm:$0xf]  ;;  %v21391_v37 = vadd.f32 %v21316_v23, %v21011_v25  ;;  %v16760_v4 = vpop.f32.mrb[106].mxu1  ;;  %v16824_v31 = vpop.f32.mrb[106].mxu0  ;;  %v14695_v53 = vld [vmem:[%s18758_s9 + $0x224] sm:$0x1] }
 0x1e2   : > { %v5790_v34 = vsel %vm20664_vm8, %v14794_v15, %v5789_v28  ;;  %v5791_v10 = vrot.slane %v5789_v28, 4  ;;  %v14650_v2 = vcombine.low %v5214_v17, %v5217_v12  ;;  %v16759_v59 = vadd.f32 %v16758_v30, %v16757_v24  ;;  %v16761_v44 = vpop.f32.mrb[107].mxu1  ;;  %v16825_v11 = vpop.f32.mrb[107].mxu0  ;;  %v14853_v23 = vld [vmem:[%s18758_s9 + $0x364] sm:$0x8] }
 0x1e3   : > { %8634 = vmatprep.mubr.bf16.mxu1 %v14890_v22  ;;  %v16823_v13 = vadd.f32 %v16822_v21, %v16821_v50  ;;  %v14715_v51 = vrot.slane %v14693_v7, 9  ;;  %v5508_v15 = vrot.slane %v14694_v9, 5  ;;  %v5511_v25 = vrot.slane %v14695_v53, 5  ;;  %v14854_v28 = vld [vmem:[%s18758_s9 + $0x368] sm:$0xf] }
 0x1e4   : > { %v5793_v43 = vsel %vm20664_vm8, %v5791_v10, %v5792_v14  ;;  %8474 = vmatmul.mubr.bf16.gmra.mrb[208].mxu0 %v14650_v2  ;;  %v21398_v54 = vadd.f32 %v16759_v59, %v21077_v57  ;;  %v16762_v17 = vadd.f32 %v16761_v44, %v16760_v4  ;;  %v16826_v56 = vadd.f32 %v16825_v11, %v16824_v31  ;;  %v14855_v55 = vld [vmem:[%s18758_s9 + $0x36c] sm:$0x7]  ;;  %v14613_v50 = vld [vmem:[%s18758_s9 + $0x214] sm:$0x8]  ;;  %v16827_v2 = vpop.f32.mrb[108].mxu0 }
 0x1e5   : > { %v14810_v42 = vcombine.low %v5790_v34, %v5793_v43  ;;  %v14875_v14 = vrot.slane %v14853_v23, 11  ;;  %v5509_v22 = vsel %vm18773_vm4, %v14715_v51, %v5508_v15  ;;  %v5510_v12 = vrot.slane %v5508_v15, 4  ;;  %v14614_v30 = vld [vmem:[%s18758_s9 + $0x218] sm:$0xf]  ;;  %v14615_v21 = vld [vmem:[%s18758_s9 + $0x21c] sm:$0x7] }
 0x1e6   : > { %v6084_v34 = vrot.slane %v14854_v28, 7  ;;  %v6087_v10 = vrot.slane %v14855_v55, 7  ;;  %v21406_v57 = vadd.f32 %v16762_v17, %v21093_v19  ;;  %v14635_v7 = vrot.slane %v14613_v50, 11  ;;  %v14773_v51 = vld [vmem:[%s18758_s9 + $0x220] sm:$0x8] }
 0x1e7   : > { %v16763_v24 = vpop.f32.mrb[108].mxu1  ;;  %8635 = vmatmul.mubr.bf16.gmra.mrb[208].mxu1 %v14810_v42  ;;  %v21411_v43 = vadd.f32 %v16823_v13, %v21097_v27  ;;  %v21414_v59 = vadd.f32 %v16826_v56, %v21111_v41  ;;  %v5512_v4 = vsel %vm18773_vm4, %v5510_v12, %v5511_v25  ;;  %v5220_v19 = vrot.slane %v14614_v30, 7  ;;  %v14774_v42 = vld [vmem:[%s18758_s9 + $0x224] sm:$0xf]  ;;  %v14775_v15 = vld [vmem:[%s18758_s9 + $0x228] sm:$0x7] }
 0x1e8   : > { %25132 = vst [vmem:[#allocation13_spill] sm:$0xff] %v21406_v57  ;;  %v16764_v9 = vpop.f32.mrb[109].mxu1  ;;  %v6085_v31 = vsel %vm20664_vm8, %v14875_v14, %v6084_v34  ;;  %v6086_v53 = vrot.slane %v6084_v34, 4  ;;  %v14731_v44 = vcombine.low %v5509_v22, %v5512_v4  ;;  %v5223_v11 = vrot.slane %v14615_v21, 7  ;;  %v16828_v13 = vpop.f32.mrb[109].mxu0 }
 0x1e9   : > { %v14795_v23 = vrot.slane %v14773_v51, 11  ;;  %v5796_v27 = vrot.slane %v14774_v42, 7  ;;  %v5221_v25 = vsel %vm20664_vm8, %v14635_v7, %v5220_v19  ;;  %v5222_v17 = vrot.slane %v5220_v19, 4  ;;  %v16766_v28 = vpop.f32.mrb[110].mxu1  ;;  %v16830_v55 = vpop.f32.mrb[110].mxu0 }
 0x1ea   : > { %v6088_v41 = vsel %vm20664_vm8, %v6086_v53, %v6087_v10  ;;  %v5799_v56 = vrot.slane %v14775_v15, 7  ;;  %v14696_v14 = vld [vmem:[%s18758_s9 + $0x238] sm:$0xe]  ;;  %8481 = vmatprep.mubr.bf16.mxu0 %v14731_v44  ;;  %v16765_v50 = vadd.f32 %v16764_v9, %v16763_v24  ;;  %v16767_v10 = vpop.f32.mrb[111].mxu1  ;;  %v16831_v30 = vpop.f32.mrb[111].mxu0  ;;  %v16829_v4 = vadd.f32 %v16828_v13, %v16827_v2 }
 0x1eb   : > { %v14891_v22 = vcombine.low %v6085_v31, %v6088_v41  ;;  %v5797_v12 = vsel %vm20664_vm8, %v14795_v23, %v5796_v27  ;;  %v5798_v34 = vrot.slane %v5796_v27, 4  ;;  %v14697_v21 = vld [vmem:[%s18758_s9 + $0x23c] sm:$0xf]  ;;  %v5224_v7 = vsel %vm20664_vm8, %v5222_v17, %v5223_v11  ;;  %v14698_v51 = vld [vmem:[%s18758_s9 + $0x240] sm:$0x1] }
 0x1ec   : > { %v16768_v53 = vadd.f32 %v16767_v10, %v16766_v28  ;;  %v16832_v19 = vadd.f32 %v16831_v30, %v16830_v55  ;;  %v14856_v31 = vld [vmem:[%s18758_s9 + $0x380] sm:$0x8]  ;;  %v14857_v42 = vld [vmem:[%s18758_s9 + $0x384] sm:$0xf]  ;;  %v14651_v44 = vcombine.low %v5221_v25, %v5224_v7  ;;  %v21439_v9 = vadd.f32 %v16765_v50, %v21124_v52  ;;  %v14858_v23 = vld [vmem:[%s18758_s9 + $0x388] sm:$0x7] }
 0x1ed   : > { %8642 = vmatprep.mubr.bf16.mxu1 %v14891_v22  ;;  %v5800_v24 = vsel %vm20664_vm8, %v5798_v34, %v5799_v56  ;;  %v14716_v15 = vrot.slane %v14696_v14, 9  ;;  %v14616_v11 = vld [vmem:[%s18758_s9 + $0x230] sm:$0x8]  ;;  %v5515_v41 = vrot.slane %v14697_v21, 5  ;;  %v5518_v17 = vrot.slane %v14698_v51, 5 }
 0x1ee   : > { %v14811_v27 = vcombine.low %v5797_v12, %v5800_v24  ;;  %v21444_v13 = vadd.f32 %v16768_v53, %v21135_v46  ;;  %v14617_v28 = vld [vmem:[%s18758_s9 + $0x234] sm:$0xf]  ;;  %v14618_v25 = vld [vmem:[%s18758_s9 + $0x238] sm:$0x7]  ;;  %8482 = vmatmul.mubr.bf16.gmra.mrb[212].mxu0 %v14651_v44  ;;  %v14876_v56 = vrot.slane %v14856_v31, 11  ;;  %v6091_v55 = vrot.slane %v14857_v42, 7 }
 0x1ef   : > { %v16769_v2 = vpop.f32.mrb[112].mxu1  ;;  %v6094_v52 = vrot.slane %v14858_v23, 7  ;;  %v14636_v22 = vrot.slane %v14616_v11, 11  ;;  %v14776_v34 = vld [vmem:[%s18758_s9 + $0x23c] sm:$0x8]  ;;  %v5516_v14 = vsel %vm18773_vm4, %v14716_v15, %v5515_v41  ;;  %v5517_v12 = vrot.slane %v5515_v41, 4 }
 0x1f0   : > { %8643 = vmatmul.mubr.bf16.gmra.mrb[212].mxu1 %v14811_v27  ;;  %v5227_v50 = vrot.slane %v14617_v28, 7  ;;  %v5230_v46 = vrot.slane %v14618_v25, 7  ;;  %v14777_v10 = vld [vmem:[%s18758_s9 + $0x240] sm:$0xf]  ;;  %v16833_v30 = vpop.f32.mrb[112].mxu0  ;;  %v6092_v21 = vsel %vm20664_vm8, %v14876_v56, %v6091_v55  ;;  %v6093_v7 = vrot.slane %v6091_v55, 4 }
 0x1f1   : > { %v14778_v53 = vld [vmem:[%s18758_s9 + $0x244] sm:$0x7]  ;;  %v14796_v51 = vrot.slane %v14776_v34, 11  ;;  %v5803_v31 = vrot.slane %v14777_v10, 7  ;;  %v16770_v42 = vpop.f32.mrb[113].mxu1  ;;  %v5519_v44 = vsel %vm18773_vm4, %v5517_v12, %v5518_v17  ;;  %v16834_v25 = vpop.f32.mrb[113].mxu0  ;;  %v21469_v10 = vadd.f32 %v16829_v4, %v21139_v47 }
 0x1f2   : > { %v5228_v24 = vsel %vm20664_vm8, %v14636_v22, %v5227_v50  ;;  %v5229_v15 = vrot.slane %v5227_v50, 4  ;;  %v5806_v23 = vrot.slane %v14778_v53, 7  ;;  %v14732_v11 = vcombine.low %v5516_v14, %v5519_v44  ;;  %v16772_v12 = vpop.f32.mrb[114].mxu1  ;;  %v14699_v50 = vld [vmem:[%s18758_s9 + $0x254] sm:$0xe] }
 0x1f3   : > { %v6095_v27 = vsel %vm20664_vm8, %v6093_v7, %v6094_v52  ;;  %v5804_v41 = vsel %vm20664_vm8, %v14796_v51, %v5803_v31  ;;  %v5805_v28 = vrot.slane %v5803_v31, 4  ;;  %v16771_v17 = vadd.f32 %v16770_v42, %v16769_v2  ;;  %v16836_v52 = vpop.f32.mrb[114].mxu0  ;;  %v14700_v53 = vld [vmem:[%s18758_s9 + $0x258] sm:$0xf]  ;;  %v14701_v51 = vld [vmem:[%s18758_s9 + $0x25c] sm:$0x1] }
 0x1f4   : > { %v14892_v56 = vcombine.low %v6092_v21, %v6095_v27  ;;  %v5231_v55 = vsel %vm20664_vm8, %v5229_v15, %v5230_v46  ;;  %v16835_v22 = vadd.f32 %v16834_v25, %v16833_v30  ;;  %8489 = vmatprep.mubr.bf16.mxu0 %v14732_v11  ;;  %v21472_v21 = vadd.f32 %v16832_v19, %v21151_v62  ;;  %v16773_v30 = vpop.f32.mrb[115].mxu1  ;;  %v16837_v7 = vpop.f32.mrb[115].mxu0  ;;  %v14859_v42 = vld [vmem:[%s18758_s9 + $0x39c] sm:$0x8]  ;;  %v14860_v44 = vld [vmem:[%s18758_s9 + $0x3a0] sm:$0xf] }
 0x1f5   : > { %v14652_v34 = vcombine.low %v5228_v24, %v5231_v55  ;;  %v5807_v14 = vsel %vm20664_vm8, %v5805_v28, %v5806_v23  ;;  %v21475_v46 = vadd.f32 %v16771_v17, %v21162_v35  ;;  %v16774_v47 = vadd.f32 %v16773_v30, %v16772_v12  ;;  %v14861_v24 = vld [vmem:[%s18758_s9 + $0x3a4] sm:$0x7]  ;;  %v14619_v25 = vld [vmem:[%s18758_s9 + $0x24c] sm:$0x8] }
 0x1f6   : > { %8650 = vmatprep.mubr.bf16.mxu1 %v14892_v56  ;;  %v14812_v2 = vcombine.low %v5804_v41, %v5807_v14  ;;  %v21480_v31 = vadd.f32 %v16835_v22, %v21177_v8  ;;  %v16838_v4 = vadd.f32 %v16837_v7, %v16836_v52  ;;  %v14717_v62 = vrot.slane %v14699_v50, 9  ;;  %v14620_v56 = vld [vmem:[%s18758_s9 + $0x250] sm:$0xf]  ;;  %v14621_v22 = vld [vmem:[%s18758_s9 + $0x254] sm:$0x7]  ;;  %v16839_v12 = vpop.f32.mrb[116].mxu0 }
 0x1f7   : > { %25133 = vst [vmem:[#allocation15_spill] sm:$0xff] %v21475_v46  ;;  %8490 = vmatmul.mubr.bf16.gmra.mrb[216].mxu0 %v14652_v34  ;;  %v5522_v19 = vrot.slane %v14700_v53, 5  ;;  %v5525_v35 = vrot.slane %v14701_v51, 5  ;;  %v14877_v15 = vrot.slane %v14859_v42, 11  ;;  %v6098_v23 = vrot.slane %v14860_v44, 7  ;;  %v16775_v11 = vpop.f32.mrb[116].mxu1 }
 0x1f8   : > { %8651 = vmatmul.mubr.bf16.gmra.mrb[216].mxu1 %v14812_v2  ;;  %v21486_v8 = vadd.f32 %v16774_v47, %v21173_v61  ;;  %v6101_v28 = vrot.slane %v14861_v24, 7  ;;  %v14637_v34 = vrot.slane %v14619_v25, 11  ;;  %v5234_v14 = vrot.slane %v14620_v56, 7  ;;  %v14779_v50 = vld [vmem:[%s18758_s9 + $0x258] sm:$0x8]  ;;  %v16776_v30 = vpop.f32.mrb[117].mxu1 }
 0x1f9   : > { %v5523_v27 = vsel %vm18773_vm4, %v14717_v62, %v5522_v19  ;;  %v5524_v41 = vrot.slane %v5522_v19, 4  ;;  %v6099_v55 = vsel %vm20664_vm8, %v14877_v15, %v6098_v23  ;;  %v6100_v17 = vrot.slane %v6098_v23, 4  ;;  %v14780_v2 = vld [vmem:[%s18758_s9 + $0x25c] sm:$0xf]  ;;  %v14781_v19 = vld [vmem:[%s18758_s9 + $0x260] sm:$0x7] }
 0x1fa   : > { %25134 = vst [vmem:[#allocation12_spill] sm:$0xff] %v21486_v8  ;;  %v5237_v52 = vrot.slane %v14621_v22, 7  ;;  %v21500_v7 = vadd.f32 %v16838_v4, %v21188_v16  ;;  %v5235_v47 = vsel %vm20664_vm8, %v14637_v34, %v5234_v14  ;;  %v5236_v62 = vrot.slane %v5234_v14, 4  ;;  %v16840_v42 = vpop.f32.mrb[117].mxu0  ;;  %v16778_v44 = vpop.f32.mrb[118].mxu1 }
 0x1fb   : > { %v5526_v61 = vsel %vm18773_vm4, %v5524_v41, %v5525_v35  ;;  %v6102_v51 = vsel %vm20664_vm8, %v6100_v17, %v6101_v28  ;;  %v14797_v24 = vrot.slane %v14779_v50, 11  ;;  %v5810_v15 = vrot.slane %v14780_v2, 7  ;;  %v16842_v41 = vpop.f32.mrb[118].mxu0  ;;  %v16779_v16 = vpop.f32.mrb[119].mxu1  ;;  %v14974_v17 = vld [vmem:[%s18758_s9 + $0x204] sm:$0x8] }
 0x1fc   : > { %v14733_v53 = vcombine.low %v5523_v27, %v5526_v61  ;;  %v14893_v35 = vcombine.low %v6099_v55, %v6102_v51  ;;  %v5813_v23 = vrot.slane %v14781_v19, 7  ;;  %v5238_v4 = vsel %vm20664_vm8, %v5236_v62, %v5237_v52  ;;  %v16843_v56 = vpop.f32.mrb[119].mxu0  ;;  %v14975_v22 = vld [vmem:[%s18758_s9 + $0x208] sm:$0xf]  ;;  %v14976_v2 = vld [vmem:[%s18758_s9 + $0x20c] sm:$0x7] }
 0x1fd   : > { %v16777_v27 = vadd.f32 %v16776_v30, %v16775_v11  ;;  %v16841_v28 = vadd.f32 %v16840_v42, %v16839_v12  ;;  %v16780_v25 = vadd.f32 %v16779_v16, %v16778_v44  ;;  %v14653_v34 = vcombine.low %v5235_v47, %v5238_v4  ;;  %v15135_v47 = vld [vmem:[%s18758_s9 + $0x354] sm:$0xf]  ;;  %v15136_v62 = vld [vmem:[%s18758_s9 + $0x358] sm:$0x1]  ;;  %v14895_v4 = vld [vmem:[%s18758_s9 + $0x204] sm:$0xf] }
 0x1fe   : > { %8497 = vmatprep.mubr.bf16.mxu0 %v14733_v53  ;;  %8658 = vmatprep.mubr.bf16.mxu1 %v14893_v35  ;;  %v5811_v14 = vsel %vm20664_vm8, %v14797_v24, %v5810_v15  ;;  %v5812_v61 = vrot.slane %v5810_v15, 4  ;;  %v16844_v50 = vadd.f32 %v16843_v56, %v16842_v41  ;;  %v15134_v53 = vld [vmem:[%s18758_s9 + $0x350] sm:$0xe]  ;;  %v15022_v30 = vrot.slane %v14974_v17, 11  ;;  %v14894_v24 = vld [vmem:[%s18758_s9 + $0x200] sm:$0xe] }
 0x1ff   : > { %v16781_v55 = vpop.f32.mrb[120].mxu1  ;;  %v16845_v52 = vpop.f32.mrb[120].mxu0  ;;  %v21516_v11 = vadd.f32 %v16777_v27, %v21204_v0  ;;  %v21519_v12 = vadd.f32 %v16780_v25, %v21214_v1  ;;  %v6569_v51 = vrot.slane %v14975_v22, 7  ;;  %8498 = vmatmul.mubr.bf16.gmra.mrb[220].mxu0 %v14653_v34  ;;  %v6572_v42 = vrot.slane %v14976_v2, 7  ;;  %v14896_v27 = vld [vmem:[%s18758_s9 + $0x208] sm:$0x1] }
 0x200   : > { %v5814_v19 = vsel %vm20664_vm8, %v5812_v61, %v5813_v23  ;;  %v15182_v44 = vrot.slane %v15134_v53, 9  ;;  %v7146_v35 = vrot.slane %v15135_v47, 5  ;;  %v16782_v0 = vpop.f32.mrb[121].mxu1  ;;  %v7149_v16 = vrot.slane %v15136_v62, 5  ;;  %v15054_v22 = vld [vmem:[%s18758_s9 + $0x348] sm:$0x8] }
 0x201   : > { %25135 = vst [vmem:[#allocation14_spill] sm:$0xff] %v21516_v11  ;;  %25136 = vst [vmem:[#allocation17_spill] sm:$0xff] %v21519_v12  ;;  %v14813_v15 = vcombine.low %v5811_v14, %v5814_v19  ;;  %v6570_v1 = vsel %vm20664_vm8, %v15022_v30, %v6569_v51  ;;  %v6571_v41 = vrot.slane %v6569_v51, 4  ;;  %v14942_v56 = vrot.slane %v14894_v24, 9  ;;  %v16846_v34 = vpop.f32.mrb[121].mxu0 }
 0x202   : > { %v7147_v25 = vsel %vm18773_vm4, %v15182_v44, %v7146_v35  ;;  %v7148_v23 = vrot.slane %v7146_v35, 4  ;;  %v6281_v17 = vrot.slane %v14895_v4, 5  ;;  %v6284_v61 = vrot.slane %v14896_v27, 5  ;;  %v15055_v2 = vld [vmem:[%s18758_s9 + $0x34c] sm:$0xf]  ;;  %v16784_v35 = vpop.f32.mrb[122].mxu1 }
 0x203   : > { %8659 = vmatmul.mubr.bf16.gmra.mrb[220].mxu1 %v14813_v15  ;;  %v6573_v14 = vsel %vm20664_vm8, %v6571_v41, %v6572_v42  ;;  %v15056_v53 = vld [vmem:[%s18758_s9 + $0x350] sm:$0x7]  ;;  %v15102_v30 = vrot.slane %v15054_v22, 11  ;;  %v16783_v51 = vadd.f32 %v16782_v0, %v16781_v55  ;;  %v6858_v4 = vrot.slane %v15055_v2, 7  ;;  %v21547_v55 = vld [vmem:[%s25093_s2 + $0x448] sm:$0xff]   ;;  %v16785_v41 = vpop.f32.mrb[123].mxu1 }
 0x204   : > { %v15038_v47 = vcombine.low %v6570_v1, %v6573_v14  ;;  %v7150_v62 = vsel %vm18773_vm4, %v7148_v23, %v7149_v16  ;;  %v6282_v19 = vsel %vm18773_vm4, %v14942_v56, %v6281_v17  ;;  %v6283_v44 = vrot.slane %v6281_v17, 4  ;;  %v16848_v1 = vpop.f32.mrb[122].mxu0  ;;  %v18342_v56 = vld [vmem:[%s25093_s2 + $0x480] sm:$0xff]   ;;  %v15137_v14 = vld [vmem:[%s18758_s9 + $0x36c] sm:$0xe] }
 0x205   : > { %v15198_v24 = vcombine.low %v7147_v25, %v7150_v62  ;;  %v6861_v15 = vrot.slane %v15056_v53, 7  ;;  %v21542_v8 = vadd.f32 %v16783_v51, %v21235_v49  ;;  %v16847_v0 = vadd.f32 %v16846_v34, %v16845_v52  ;;  %v16849_v17 = vpop.f32.mrb[123].mxu0  ;;  %v14977_v22 = vld [vmem:[%s18758_s9 + $0x220] sm:$0x8]  ;;  %v14979_v34 = vld [vmem:[%s18758_s9 + $0x228] sm:$0x7] }
 0x206   : > { %8699 = vmatprep.mubr.bf16.mxu0 %v15038_v47  ;;  %v6285_v42 = vsel %vm18773_vm4, %v6283_v44, %v6284_v61  ;;  %v21552_v16 = vadd.f32 %v16841_v28, %v21217_v63  ;;  %v21555_v49 = vadd.f32 %v16844_v50, %v21226_v3  ;;  %v6859_v25 = vsel %vm20664_vm8, %v15102_v30, %v6858_v4  ;;  %v14978_v63 = vld [vmem:[%s18758_s9 + $0x224] sm:$0xf]  ;;  %v18344_v61 = vld [vmem:[%s25093_s2 + $0x4c8] sm:$0xff]   ;;  %v15138_v47 = vld [vmem:[%s18758_s9 + $0x370] sm:$0xf] }
 0x207   : > { %25137 = vst [vmem:[#allocation16_spill] sm:$0xff] %v21542_v8  ;;  %8860 = vmatprep.mubr.bf16.mxu1 %v15198_v24  ;;  %v14958_v27 = vcombine.low %v6282_v19, %v6285_v42  ;;  %v6860_v23 = vrot.slane %v6858_v4, 4  ;;  %v16786_v52 = vadd.f32 %v16785_v41, %v16784_v35  ;;  %v16850_v28 = vadd.f32 %v16849_v17, %v16848_v1  ;;  %v15139_v62 = vld [vmem:[%s18758_s9 + $0x374] sm:$0x1]  ;;  %v18476_v35 = vld [vmem:[%s25093_s2 + $0x440] sm:$0xff]  }
 0x208   : > { %v15023_v3 = vrot.slane %v14977_v22, 11  ;;  %v6576_v50 = vrot.slane %v14978_v63, 7  ;;  %v21570_v2 = vadd.f32 %v16847_v0, %v21242_v40  ;;  %v6579_v51 = vrot.slane %v14979_v34, 7  ;;  %v21582_v44 = vld [vmem:[%s25093_s2 + $0x450] sm:$0xff]   ;;  %v14898_v42 = vld [vmem:[%s18758_s9 + $0x220] sm:$0xf] }
 0x209   : > { %8700 = vmatmul.mubr.bf16.vlgmr.msra.gmra.mrb[224].mxu0 %v14958_v27  ;;  %v6862_v53 = vsel %vm20664_vm8, %v6860_v23, %v6861_v15  ;;  %v21575_v30 = vadd.f32 %v16786_v52, %v21245_v6  ;;  %v15183_v19 = vrot.slane %v15137_v14, 9  ;;  %v7153_v4 = vrot.slane %v15138_v47, 5  ;;  %v14897_v15 = vld [vmem:[%s18758_s9 + $0x21c] sm:$0xe]  ;;  %v14899_v1 = vld [vmem:[%s18758_s9 + $0x224] sm:$0x1] }
 0x20a   : > { %v15118_v40 = vcombine.low %v6859_v25, %v6862_v53  ;;  %17979 = vmatpush3.bf16.msra.mxu0 %v18476_v35  ;;  %v6577_v24 = vsel %vm20664_vm8, %v15023_v3, %v6576_v50  ;;  %v6578_v6 = vrot.slane %v6576_v50, 4  ;;  %v7156_v0 = vrot.slane %v15139_v62, 5  ;;  %v16787_v23 = vpop.f32.mrb[124].mxu1  ;;  %v18345_v25 = vld [vmem:[%s25093_s2 + $0x488] sm:$0xff]   ;;  %v15057_v3 = vld [vmem:[%s18758_s9 + $0x364] sm:$0x8] }
 0x20b   : > { %25138 = vst [vmem:[#allocation18_spill] sm:$0xff] %v21575_v30  ;;  %v14943_v41 = vrot.slane %v14897_v15, 9  ;;  %v6288_v27 = vrot.slane %v14898_v42, 5  ;;  %17980 = vmatprep.subr.bf16.mxu0 %v21547_v55  ;;  %v21597_v52 = vadd.f32 %v16850_v28, %v21257_v58  ;;  %v7154_v22 = vsel %vm18773_vm4, %v15183_v19, %v7153_v4  ;;  %v15058_v50 = vld [vmem:[%s18758_s9 + $0x368] sm:$0xf]  ;;  %v18347_v14 = vld [vmem:[%s25093_s2 + $0x4d0] sm:$0xff]  }
 0x20c   : > { %8861 = vmatmul.mubr.bf16.vlgmr.msra.gmra.mrb[224].mxu1 %v15118_v40  ;;  %v6580_v17 = vsel %vm20664_vm8, %v6578_v6, %v6579_v51  ;;  %v7155_v63 = vrot.slane %v7153_v4, 4  ;;  %v6291_v34 = vrot.slane %v14899_v1, 5  ;;  %v15059_v47 = vld [vmem:[%s18758_s9 + $0x36c] sm:$0x7]  ;;  %v15103_v51 = vrot.slane %v15057_v3, 11  ;;  %v16851_v62 = vpop.f32.mrb[124].mxu0 }
 0x20d   : > { %17402 = vmatpush3.bf16.msra.mxu1 %v18342_v56  ;;  %v15039_v53 = vcombine.low %v6577_v24, %v6580_v17  ;;  %v6289_v58 = vsel %vm18773_vm4, %v14943_v41, %v6288_v27  ;;  %v6290_v28 = vrot.slane %v6288_v27, 4  ;;  %v16788_v40 = vpop.f32.mrb[125].mxu1  ;;  %v6865_v35 = vrot.slane %v15058_v50, 7  ;;  %v16852_v15 = vpop.f32.mrb[125].mxu0  ;;  %v14980_v56 = vld [vmem:[%s18758_s9 + $0x23c] sm:$0x8] }
 0x20e   : > { %v7157_v19 = vsel %vm18773_vm4, %v7155_v63, %v7156_v0  ;;  %v6868_v6 = vrot.slane %v15059_v47, 7  ;;  %v16789_v4 = vadd.f32 %v16788_v40, %v16787_v23  ;;  %v16790_v42 = vpop.f32.mrb[126].mxu1  ;;  %17403 = vmatprep.subr.bf16.mxu1 %v18344_v61  ;;  %17981 = vmatpush3.bf16.msra.mxu0 %v21547_v55  ;;  %v21618_v24 = vld [vmem:[%s25093_s2 + $0x458] sm:$0xff]   ;;  %v21622_v41 = vadd.f32 %v16852_v15, %v16851_v62  ;;  %v16854_v27 = vpop.f32.mrb[126].mxu0  ;;  %v14981_v17 = vld [vmem:[%s18758_s9 + $0x240] sm:$0xf] }
 0x20f   : > { %8707 = vmatprep.mubr.bf16.mxu0 %v15039_v53  ;;  %v15199_v0 = vcombine.low %v7154_v22, %v7157_v19  ;;  %v6292_v1 = vsel %vm18773_vm4, %v6290_v28, %v6291_v34  ;;  %v16791_v23 = vpop.f32.mrb[127].mxu1  ;;  %v14982_v61 = vld [vmem:[%s18758_s9 + $0x244] sm:$0x7]  ;;  %17982 = vmatprep.subr.bf16.mxu0 %v21582_v44  ;;  %v6866_v63 = vsel %vm20664_vm8, %v15103_v51, %v6865_v35  ;;  %v6867_v3 = vrot.slane %v6865_v35, 4  ;;  %v16855_v50 = vpop.f32.mrb[127].mxu0  ;;  %v18348_v28 = vld [vmem:[%s25093_s2 + $0x490] sm:$0xff]  }
 0x210   : > { %v14959_v55 = vcombine.low %v6289_v58, %v6292_v1  ;;  %v21630_v22 = vadd.f32 %v16789_v4, %v21272_v39  ;;  %v15140_v34 = vld [vmem:[%s18758_s9 + $0x388] sm:$0xe]  ;;  %v15141_v53 = vld [vmem:[%s18758_s9 + $0x38c] sm:$0xf]  ;;  %v16792_v47 = vadd.f32 %v16791_v23, %v16790_v42  ;;  %v21637_v62 = vadd.f32 %v16855_v50, %v16854_v27  ;;  %v15142_v19 = vld [vmem:[%s18758_s9 + $0x390] sm:$0x1] }
 0x211   : > { %8868 = vmatprep.mubr.bf16.mxu1 %v15199_v0  ;;  %v15024_v58 = vrot.slane %v14980_v56, 11  ;;  %v6583_v40 = vrot.slane %v14981_v17, 7  ;;  %v14900_v51 = vld [vmem:[%s18758_s9 + $0x238] sm:$0xe]  ;;  %17404 = vmatpush3.bf16.msra.mxu1 %v18345_v25  ;;  %v6869_v35 = vsel %vm20664_vm8, %v6867_v3, %v6868_v6  ;;  %v6586_v4 = vrot.slane %v14982_v61, 7  ;;  %v16857_v56 = vpop.f32.mrb[128].mxu0 }
 0x212   : > { %25139 = vst [vmem:[#allocation19_spill] sm:$0xff] %v21630_v22  ;;  %v18350_v39 = vld [vmem:[%s25093_s2 + $0x4d8] sm:$0xff]   ;;  %8708 = vmatmul.mubr.bf16.gmra.mrb[228].mxu0 %v14959_v55  ;;  %v15184_v15 = vrot.slane %v15140_v34, 9  ;;  %v7160_v42 = vrot.slane %v15141_v53, 5  ;;  %17405 = vmatprep.subr.bf16.mxu1 %v18347_v14  ;;  %v21650_v25 = vld [vmem:[%s25093_s2 + $0x460] sm:$0xff]   ;;  %v15119_v1 = vcombine.low %v6866_v63, %v6869_v35  ;;  %v21653_v27 = vadd.f32 %v16792_v47, %v21283_v29  ;;  %v17948_v55 = vpop.f32.mrb[128].mxu1 }
 0x213   : > { %v14901_v0 = vld [vmem:[%s18758_s9 + $0x23c] sm:$0xf]  ;;  %v6584_v23 = vsel %vm20664_vm8, %v15024_v58, %v6583_v40  ;;  %v6585_v6 = vrot.slane %v6583_v40, 4  ;;  %v14902_v17 = vld [vmem:[%s18758_s9 + $0x240] sm:$0x1]  ;;  %17983 = vmatpush3.bf16.msra.mxu0 %v21582_v44  ;;  %v7163_v50 = vrot.slane %v15142_v19, 5 }
 0x214   : > { %25140 = vst [vmem:[#allocation20_spill] sm:$0xff] %v21653_v27  ;;  %v15060_v61 = vld [vmem:[%s18758_s9 + $0x380] sm:$0x8]  ;;  %v7161_v14 = vsel %vm18773_vm4, %v15184_v15, %v7160_v42  ;;  %v7162_v3 = vrot.slane %v7160_v42, 4  ;;  %v14944_v34 = vrot.slane %v14900_v51, 9  ;;  %v16858_v53 = vpop.f32.mrb[129].mxu0  ;;  %17984 = vmatprep.subr.bf16.mxu0 %v21618_v24  ;;  %8869 = vmatmul.mubr.bf16.gmra.mrb[228].mxu1 %v15119_v1 }
 0x215   : > { %v15061_v63 = vld [vmem:[%s18758_s9 + $0x384] sm:$0xf]  ;;  %v18351_v29 = vld [vmem:[%s25093_s2 + $0x498] sm:$0xff]   ;;  %v6587_v47 = vsel %vm20664_vm8, %v6585_v6, %v6586_v4  ;;  %v6295_v58 = vrot.slane %v14901_v0, 5  ;;  %v6298_v44 = vrot.slane %v14902_v17, 5  ;;  %v15104_v35 = vrot.slane %v15060_v61, 11  ;;  %17406 = vmatpush3.bf16.msra.mxu1 %v18348_v28 }
 0x216   : > { %v15062_v40 = vld [vmem:[%s18758_s9 + $0x388] sm:$0x7]  ;;  %v4632_v15 = vpop.f32.mrb[129].mxu1  ;;  %v18353_v19 = vld [vmem:[%s25093_s2 + $0x4e0] sm:$0xff]   ;;  %v15040_v51 = vcombine.low %v6584_v23, %v6587_v47  ;;  %v7164_v42 = vsel %vm18773_vm4, %v7162_v3, %v7163_v50  ;;  %v6872_v27 = vrot.slane %v15061_v63, 7  ;;  %v21678_v6 = vadd.f32 %v17948_v55, %v21378_v18  ;;  %v16860_v17 = vpop.f32.mrb[130].mxu0  ;;  %17407 = vmatprep.subr.bf16.mxu1 %v18350_v39 }
 0x217   : > { %v6875_v30 = vrot.slane %v15062_v40, 7  ;;  %v15200_v1 = vcombine.low %v7161_v14, %v7164_v42  ;;  %v6296_v4 = vsel %vm18773_vm4, %v14944_v34, %v6295_v58  ;;  %v6297_v0 = vrot.slane %v6295_v58, 4  ;;  %17985 = vmatpush3.bf16.msra.mxu0 %v21618_v24  ;;  %v17949_v3 = vpop.f32.mrb[130].mxu1  ;;  %v14983_v55 = vld [vmem:[%s18758_s9 + $0x258] sm:$0x8] }
 0x218   : > { %8715 = vmatprep.mubr.bf16.mxu0 %v15040_v51  ;;  %v6873_v23 = vsel %vm20664_vm8, %v15104_v35, %v6872_v27  ;;  %v6874_v61 = vrot.slane %v6872_v27, 4  ;;  %v21683_v28 = vadd.f32 %v16858_v53, %v16857_v56  ;;  %v4633_v14 = vadd.f32 %v4632_v15, %v21310_v45  ;;  %17986 = vmatprep.subr.bf16.mxu0 %v21650_v25  ;;  %v16861_v56 = vpop.f32.mrb[131].mxu0  ;;  %v4635_v27 = vpop.f32.mrb[131].mxu1  ;;  %v14984_v50 = vld [vmem:[%s18758_s9 + $0x25c] sm:$0xf] }
 0x219   : > { %8876 = vmatprep.mubr.bf16.mxu1 %v15200_v1  ;;  %v6299_v18 = vsel %vm18773_vm4, %v6297_v0, %v6298_v44  ;;  %v16337_v24 = vpack.c.bf16 %v21678_v6, %v21678_v6  ;;  %v21693_v39 = vmul.f32 %v21678_v6, %v21678_v6  ;;  %v21696_v45 = vadd.f32 %v17949_v3, %v21381_v60  ;;  %v14985_v58 = vld [vmem:[%s18758_s9 + $0x260] sm:$0x7]  ;;  %v15143_v44 = vld [vmem:[%s18758_s9 + $0x3a4] sm:$0xe]  ;;  %v15144_v40 = vld [vmem:[%s18758_s9 + $0x3a8] sm:$0xf] }
 0x21a   : > { %v14960_v34 = vcombine.low %v6296_v4, %v6299_v18  ;;  %v6876_v63 = vsel %vm20664_vm8, %v6874_v61, %v6875_v30  ;;  %v16335_v53 = vpack.c.bf16 %v4633_v14, %v4633_v14  ;;  %v4957_v47 = vmul.f32 %v4633_v14, %v4633_v14  ;;  %17408 = vmatpush3.bf16.msra.mxu1 %v18351_v29  ;;  %v15145_v30 = vld [vmem:[%s18758_s9 + $0x3ac] sm:$0x1]  ;;  %v14903_v42 = vld [vmem:[%s18758_s9 + $0x254] sm:$0xe]  ;;  %v14904_v1 = vld [vmem:[%s18758_s9 + $0x258] sm:$0xf] }
 0x21b   : > { %v15120_v60 = vcombine.low %v6873_v23, %v6876_v63  ;;  %4889 = vst [vmem:[%s19793_s18 + $0x24] sm:$0xf] %v16337_v24  ;;  %v16338_v35 = vpack.c.bf16 %v21696_v45, %v21696_v45  ;;  %v21710_v15 = vmul.f32 %v21696_v45, %v21696_v45  ;;  %v21712_v51 = vadd.f32 %v16861_v56, %v16860_v17  ;;  %v14905_v61 = vld [vmem:[%s18758_s9 + $0x25c] sm:$0x1]  ;;  %v16863_v3 = vpop.f32.mrb[132].mxu0 }
 0x21c   : > { %17409 = vmatprep.subr.bf16.mxu1 %v18353_v19  ;;  %8716 = vmatmul.mubr.bf16.gmra.mrb[232].mxu0 %v14960_v34  ;;  %4887 = vst [vmem:[%s19793_s18 + $0x4] sm:$0xf] %v16335_v53  ;;  %v4636_v29 = vadd.f32 %v4635_v27, %v21391_v37  ;;  %v15025_v4 = vrot.slane %v14983_v55, 11  ;;  %v6590_v0 = vrot.slane %v14984_v50, 7  ;;  %v6593_v23 = vrot.slane %v14985_v58, 7  ;;  %v17952_v55 = vpop.f32.mrb[132].mxu1 }
 0x21d   : > { %8877 = vmatmul.mubr.bf16.gmra.mrb[232].mxu1 %v15120_v60  ;;  %4890 = vst [vmem:[%s19793_s18 + $0x34] sm:$0xf] %v16338_v35  ;;  %v15185_v18 = vrot.slane %v15143_v44, 9  ;;  %v7167_v17 = vrot.slane %v15144_v40, 5  ;;  %v7170_v24 = vrot.slane %v15145_v30, 5  ;;  %v14945_v56 = vrot.slane %v14903_v42, 9  ;;  %17987 = vmatpush3.bf16.msra.mxu0 %v21650_v25 }
 0x21e   : > { %v15063_v63 = vld [vmem:[%s18758_s9 + $0x39c] sm:$0x8]  ;;  %v16336_v19 = vpack.c.bf16 %v4636_v29, %v4636_v29  ;;  %v4919_v34 = vadd.f32 %v4636_v29, %v4633_v14  ;;  %v4958_v53 = vmul.f32 %v4636_v29, %v4636_v29  ;;  %v6591_v37 = vsel %vm20664_vm8, %v15025_v4, %v6590_v0  ;;  %v15064_v27 = vld [vmem:[%s18758_s9 + $0x3a0] sm:$0xf]  ;;  %v16864_v50 = vpop.f32.mrb[133].mxu0  ;;  %v4648_v35 = vpop.f32.mrb[133].mxu1 }
 0x21f   : > { %v6592_v58 = vrot.slane %v6590_v0, 4  ;;  %v7168_v44 = vsel %vm18773_vm4, %v15185_v18, %v7167_v17  ;;  %v7169_v40 = vrot.slane %v7167_v17, 4  ;;  %v6302_v60 = vrot.slane %v14904_v1, 5  ;;  %v16866_v30 = vpop.f32.mrb[134].mxu0  ;;  %v18354_v25 = vld [vmem:[%s25093_s2 + $0x4a0] sm:$0xff]   ;;  %v17953_v8 = vpop.f32.mrb[134].mxu1 }
 0x220   : > { %4888 = vst [vmem:[%s19793_s18 + $0x14] sm:$0xf] %v16336_v19  ;;  %v4920_v14 = vadd.f32 %v4919_v34, %v21678_v6  ;;  %v4989_v42 = vadd.f32 %v4958_v53, %v4957_v47  ;;  %v6305_v29 = vrot.slane %v14905_v61, 5  ;;  %v15065_v4 = vld [vmem:[%s18758_s9 + $0x3a4] sm:$0x7]  ;;  %v15105_v22 = vrot.slane %v15063_v63, 11  ;;  %17410 = vmatpush3.bf16.msra.mxu1 %v18354_v25 }
 0x221   : > { %v16867_v0 = vpop.f32.mrb[135].mxu0  ;;  %v6594_v18 = vsel %vm20664_vm8, %v6592_v58, %v6593_v23  ;;  %v7171_v1 = vsel %vm18773_vm4, %v7169_v40, %v7170_v24  ;;  %v6303_v17 = vsel %vm18773_vm4, %v14945_v56, %v6302_v60  ;;  %v6304_v12 = vrot.slane %v6302_v60, 4  ;;  %v4651_v46 = vpop.f32.mrb[135].mxu1  ;;  %v14986_v58 = vld [vmem:[%s18758_s9 + $0x274] sm:$0x8] }
 0x222   : > { %v4990_v6 = vadd.f32 %v4989_v42, %v21693_v39  ;;  %v15041_v47 = vcombine.low %v6591_v37, %v6594_v18  ;;  %v15201_v61 = vcombine.low %v7168_v44, %v7171_v1  ;;  %v6879_v63 = vrot.slane %v15064_v27, 7  ;;  %v21741_v19 = vpop.f32.mrb[136].mxu0  ;;  %v21748_v53 = vpop.f32.mrb[136].mxu1  ;;  %v14987_v44 = vld [vmem:[%s18758_s9 + $0x278] sm:$0xf] }
 0x223   : > { %v6306_v23 = vsel %vm18773_vm4, %v6304_v12, %v6305_v29  ;;  %v6882_v34 = vrot.slane %v15065_v4, 7  ;;  %v4657_v24 = vadd.f32 %v17952_v55, %v21469_v10  ;;  %v21746_v56 = vadd.f32 %v16864_v50, %v16863_v3  ;;  %v21755_v10 = vpop.f32.mrb[137].mxu0  ;;  %v14988_v60 = vld [vmem:[%s18758_s9 + $0x27c] sm:$0x7]  ;;  %v15146_v25 = vld [vmem:[%s18758_s9 + $0x3c0] sm:$0xe] }
 0x224   : > { %8723 = vmatprep.mubr.bf16.mxu0 %v15041_v47  ;;  %8884 = vmatprep.mubr.bf16.mxu1 %v15201_v61  ;;  %v14961_v39 = vcombine.low %v6303_v17, %v6306_v23  ;;  %v6880_v37 = vsel %vm20664_vm8, %v15105_v22, %v6879_v63  ;;  %v6881_v27 = vrot.slane %v6879_v63, 4  ;;  %v4649_v12 = vadd.f32 %v4648_v35, %v21411_v43  ;;  %v15147_v22 = vld [vmem:[%s18758_s9 + $0x3c4] sm:$0xf]  ;;  %v15148_v42 = vld [vmem:[%s18758_s9 + $0x3c8] sm:$0x1]  ;;  %v4664_v63 = vpop.f32.mrb[137].mxu1 }
 0x225   : > { %v16341_v3 = vpack.c.bf16 %v4657_v24, %v4657_v24  ;;  %v4963_v55 = vmul.f32 %v4657_v24, %v4657_v24  ;;  %v4921_v50 = vadd.f32 %v4920_v14, %v21696_v45  ;;  %v4991_v40 = vadd.f32 %v4990_v6, %v21710_v15  ;;  %v14906_v1 = vld [vmem:[%s18758_s9 + $0x270] sm:$0xe]  ;;  %v14907_v17 = vld [vmem:[%s18758_s9 + $0x274] sm:$0xf]  ;;  %v14908_v61 = vld [vmem:[%s18758_s9 + $0x278] sm:$0x1] }
 0x226   : > { %8724 = vmatmul.mubr.bf16.gmra.mrb[236].mxu0 %v14961_v39  ;;  %v6883_v43 = vsel %vm20664_vm8, %v6881_v27, %v6882_v34  ;;  %v16339_v35 = vpack.c.bf16 %v4649_v12, %v4649_v12  ;;  %v4961_v29 = vmul.f32 %v4649_v12, %v4649_v12  ;;  %v21766_v4 = vadd.f32 %v17953_v8, %v21472_v21  ;;  %v15066_v39 = vld [vmem:[%s18758_s9 + $0x3b8] sm:$0x8] }
 0x227   : > { %v15121_v45 = vcombine.low %v6880_v37, %v6883_v43  ;;  %4893 = vst [vmem:[%s19793_s18 + $0x64] sm:$0xf] %v16341_v3  ;;  %v4922_v14 = vadd.f32 %v4921_v50, %v4649_v12  ;;  %v21769_v15 = vadd.f32 %v16867_v0, %v16866_v30  ;;  %v4652_v18 = vadd.f32 %v4651_v46, %v21414_v59  ;;  %v21782_v30 = vpop.f32.mrb[138].mxu0  ;;  %v18355_v59 = vld [vmem:[%s25093_s2 + $0x468] sm:$0xff]   ;;  %v21788_v37 = vpop.f32.mrb[138].mxu1 }
 0x228   : > { %4891 = vst [vmem:[%s19793_s18 + $0x44] sm:$0xf] %v16339_v35  ;;  %v4992_v6 = vadd.f32 %v4991_v40, %v4961_v29  ;;  %v16342_v47 = vpack.c.bf16 %v21766_v4, %v21766_v4  ;;  %v21779_v21 = vmul.f32 %v21766_v4, %v21766_v4  ;;  %v15026_v8 = vrot.slane %v14986_v58, 11  ;;  %v21790_v27 = vpop.f32.mrb[139].mxu0  ;;  %v18356_v12 = vld [vmem:[%s25093_s2 + $0x4e8] sm:$0xff]   ;;  %v21796_v43 = vpop.f32.mrb[139].mxu1  ;;  %17988 = vmatprep.subr.bf16.mxu0 %v18355_v59 }
 0x229   : > { %8885 = vmatmul.mubr.bf16.gmra.mrb[236].mxu1 %v15121_v45  ;;  %v16340_v46 = vpack.c.bf16 %v4652_v18, %v4652_v18  ;;  %v4923_v0 = vadd.f32 %v4922_v14, %v4652_v18  ;;  %v4962_v23 = vmul.f32 %v4652_v18, %v4652_v18  ;;  %v6597_v34 = vrot.slane %v14987_v44, 7  ;;  %v21798_v35 = vpop.f32.mrb[140].mxu0  ;;  %v15067_v18 = vld [vmem:[%s18758_s9 + $0x3bc] sm:$0xf]  ;;  %v21804_v11 = vpop.f32.mrb[140].mxu1  ;;  %17411 = vmatprep.subr.bf16.mxu1 %v18356_v12 }
 0x22a   : > { %4894 = vst [vmem:[%s19793_s18 + $0x74] sm:$0xf] %v16342_v47  ;;  %v6600_v58 = vrot.slane %v14988_v60, 7  ;;  %v15186_v3 = vrot.slane %v15146_v25, 9  ;;  %v7174_v50 = vrot.slane %v15147_v22, 5  ;;  %v7177_v40 = vrot.slane %v15148_v42, 5  ;;  %17989 = vmatpush3.bf16.msra.mxu0 %v18355_v59 }
 0x22b   : > { %4892 = vst [vmem:[%s19793_s18 + $0x54] sm:$0xf] %v16340_v46  ;;  %v4924_v44 = vadd.f32 %v4923_v0, %v4657_v24  ;;  %v4993_v29 = vadd.f32 %v4992_v6, %v4962_v23  ;;  %v6598_v45 = vsel %vm20664_vm8, %v15026_v8, %v6597_v34  ;;  %v6599_v14 = vrot.slane %v6597_v34, 4  ;;  %v15068_v47 = vld [vmem:[%s18758_s9 + $0x3c0] sm:$0x7]  ;;  %v21809_v57 = vpop.f32.mrb[141].mxu0 }
 0x22c   : > { %v7175_v60 = vsel %vm18773_vm4, %v15186_v3, %v7174_v50  ;;  %v7176_v25 = vrot.slane %v7174_v50, 4  ;;  %v14946_v22 = vrot.slane %v14906_v1, 9  ;;  %v6309_v42 = vrot.slane %v14907_v17, 5  ;;  %v21817_v1 = vpop.f32.mrb[141].mxu1 }
 0x22d   : > { %v4994_v24 = vadd.f32 %v4993_v29, %v4963_v55  ;;  %v6601_v6 = vsel %vm20664_vm8, %v6599_v14, %v6600_v58  ;;  %v6312_v8 = vrot.slane %v14908_v61, 5  ;;  %v15106_v46 = vrot.slane %v15066_v39, 11  ;;  %v21830_v29 = vpop.f32.mrb[142].mxu0 }
 0x22e   : > { %v15042_v0 = vcombine.low %v6598_v45, %v6601_v6  ;;  %v7178_v59 = vsel %vm18773_vm4, %v7176_v25, %v7177_v40  ;;  %v6310_v23 = vsel %vm18773_vm4, %v14946_v22, %v6309_v42  ;;  %v6311_v34 = vrot.slane %v6309_v42, 4  ;;  %v14989_v40 = vld [vmem:[%s18758_s9 + $0x290] sm:$0x8]  ;;  %v21832_v45 = vpop.f32.mrb[142].mxu1  ;;  %v14991_v22 = vld [vmem:[%s18758_s9 + $0x298] sm:$0x7] }
 0x22f   : > { %v15202_v17 = vcombine.low %v7175_v60, %v7178_v59  ;;  %v6886_v12 = vrot.slane %v15067_v18, 7  ;;  %v6889_v55 = vrot.slane %v15068_v47, 7  ;;  %v4673_v58 = vadd.f32 %v21748_v53, %v21552_v16 }
 0x230   : > { %8731 = vmatprep.mubr.bf16.mxu0 %v15042_v0  ;;  %v6313_v61 = vsel %vm18773_vm4, %v6311_v34, %v6312_v8  ;;  %v21825_v39 = vadd.f32 %v21755_v10, %v21741_v19  ;;  %v4665_v3 = vadd.f32 %v4664_v63, %v21480_v31  ;;  %v4925_v50 = vadd.f32 %v4924_v44, %v21766_v4  ;;  %v14990_v19 = vld [vmem:[%s18758_s9 + $0x294] sm:$0xf]  ;;  %v21837_v31 = vpop.f32.mrb[143].mxu0  ;;  %v21839_v10 = vpop.f32.mrb[143].mxu1  ;;  %v18357_v4 = vld [vmem:[%s25093_s2 + $0x4a8] sm:$0xff]  }
 0x231   : > { %8892 = vmatprep.mubr.bf16.mxu1 %v15202_v17  ;;  %v14962_v16 = vcombine.low %v6310_v23, %v6313_v61  ;;  %v6887_v53 = vsel %vm20664_vm8, %v15106_v46, %v6886_v12  ;;  %v6888_v14 = vrot.slane %v6886_v12, 4  ;;  %v16345_v18 = vpack.c.bf16 %v4673_v58, %v4673_v58  ;;  %v15149_v46 = vld [vmem:[%s18758_s9 + $0x3dc] sm:$0xe]  ;;  %v15150_v0 = vld [vmem:[%s18758_s9 + $0x3e0] sm:$0xf]  ;;  %17412 = vmatpush3.bf16.msra.mxu1 %v18357_v4 }
 0x232   : > { %v4967_v63 = vmul.f32 %v4673_v58, %v4673_v58  ;;  %v16343_v44 = vpack.c.bf16 %v4665_v3, %v4665_v3  ;;  %v4926_v60 = vadd.f32 %v4925_v50, %v4665_v3  ;;  %v4965_v25 = vmul.f32 %v4665_v3, %v4665_v3  ;;  %v14910_v12 = vld [vmem:[%s18758_s9 + $0x290] sm:$0xf] }
 0x233   : > { %8732 = vmatmul.mubr.bf16.gmra.mrb[240].mxu0 %v14962_v16  ;;  %v6890_v42 = vsel %vm20664_vm8, %v6888_v14, %v6889_v55  ;;  %4897 = vst [vmem:[%s19793_s18 + $0xa4] sm:$0xf] %v16345_v18  ;;  %v4995_v47 = vadd.f32 %v4994_v24, %v21779_v21  ;;  %v21851_v6 = vadd.f32 %v21788_v37, %v21555_v49  ;;  %v15027_v34 = vrot.slane %v14989_v40, 11  ;;  %v15151_v21 = vld [vmem:[%s18758_s9 + $0x3e4] sm:$0x1] }
 0x234   : > { %v21855_v8 = vadd.f32 %v21790_v27, %v21782_v30  ;;  %v15122_v59 = vcombine.low %v6887_v53, %v6890_v42  ;;  %4895 = vst [vmem:[%s19793_s18 + $0x84] sm:$0xf] %v16343_v44  ;;  %v4668_v23 = vadd.f32 %v21796_v43, %v21500_v7  ;;  %v6604_v17 = vrot.slane %v14990_v19, 7  ;;  %v14909_v49 = vld [vmem:[%s18758_s9 + $0x28c] sm:$0xe]  ;;  %v21870_v43 = vpop.f32.mrb[144].mxu0 }
 0x235   : > { %v4996_v37 = vadd.f32 %v4995_v47, %v4965_v25  ;;  %v16346_v30 = vpack.c.bf16 %v21851_v6, %v21851_v6  ;;  %v4968_v27 = vmul.f32 %v21851_v6, %v21851_v6  ;;  %v6607_v24 = vrot.slane %v14991_v22, 7  ;;  %v14911_v7 = vld [vmem:[%s18758_s9 + $0x294] sm:$0x1]  ;;  %v15069_v40 = vld [vmem:[%s18758_s9 + $0x3d4] sm:$0x8] }
 0x236   : > { %25141 = vst [vmem:[#allocation21_spill] sm:$0xff] %v21855_v8  ;;  %8893 = vmatmul.mubr.bf16.gmra.mrb[240].mxu1 %v15122_v59  ;;  %v16344_v55 = vpack.c.bf16 %v4668_v23, %v4668_v23  ;;  %v4927_v61 = vadd.f32 %v4926_v60, %v4668_v23  ;;  %v4966_v3 = vmul.f32 %v4668_v23, %v4668_v23  ;;  %v15070_v16 = vld [vmem:[%s18758_s9 + $0x3d8] sm:$0xf]  ;;  %v15071_v53 = vld [vmem:[%s18758_s9 + $0x3dc] sm:$0x7]  ;;  %v6606_v14 = vrot.slane %v6604_v17, 4 }
 0x237   : > { %v6605_v50 = vsel %vm20664_vm8, %v15027_v34, %v6604_v17  ;;  %4898 = vst [vmem:[%s19793_s18 + $0xb4] sm:$0xf] %v16346_v30  ;;  %v15187_v18 = vrot.slane %v15149_v46, 9  ;;  %v7181_v19 = vrot.slane %v15150_v0, 5  ;;  %v7184_v4 = vrot.slane %v15151_v21, 5  ;;  %v21883_v34 = vpop.f32.mrb[144].mxu1 }
 0x238   : > { %4896 = vst [vmem:[%s19793_s18 + $0x94] sm:$0xf] %v16344_v55  ;;  %v4928_v44 = vadd.f32 %v4927_v61, %v4673_v58  ;;  %v4997_v25 = vadd.f32 %v4996_v37, %v4966_v3  ;;  %v14947_v22 = vrot.slane %v14909_v49, 9  ;;  %v6316_v42 = vrot.slane %v14910_v12, 5  ;;  %v21885_v30 = vpop.f32.mrb[145].mxu0  ;;  %v21889_v21 = vpop.f32.mrb[145].mxu1 }
 0x239   : > { %v6608_v60 = vsel %vm20664_vm8, %v6606_v14, %v6607_v24  ;;  %v7182_v47 = vsel %vm18773_vm4, %v15187_v18, %v7181_v19  ;;  %v7183_v59 = vrot.slane %v7181_v19, 4  ;;  %v6319_v23 = vrot.slane %v14911_v7, 5  ;;  %v21891_v49 = vpop.f32.mrb[146].mxu0  ;;  %v18358_v37 = vld [vmem:[%s25093_s2 + $0x470] sm:$0xff]  }
 0x23a   : > { %v4998_v46 = vadd.f32 %v4997_v25, %v4967_v63  ;;  %v15043_v0 = vcombine.low %v6605_v50, %v6608_v60  ;;  %v6317_v58 = vsel %vm18773_vm4, %v14947_v22, %v6316_v42  ;;  %v6318_v17 = vrot.slane %v6316_v42, 4  ;;  %v21898_v63 = vpop.f32.mrb[146].mxu1  ;;  %v21900_v61 = vpop.f32.mrb[147].mxu0  ;;  %v18359_v3 = vld [vmem:[%s25093_s2 + $0x4f0] sm:$0xff]   ;;  %17990 = vmatprep.subr.bf16.mxu0 %v18358_v37  ;;  %v14992_v60 = vld [vmem:[%s18758_s9 + $0x2ac] sm:$0x8] }
 0x23b   : > { %v7185_v24 = vsel %vm18773_vm4, %v7183_v59, %v7184_v4  ;;  %v15107_v12 = vrot.slane %v15069_v40, 11  ;;  %v6893_v7 = vrot.slane %v15070_v16, 7  ;;  %v6896_v55 = vrot.slane %v15071_v53, 7  ;;  %v21913_v16 = vpop.f32.mrb[147].mxu1  ;;  %v21915_v53 = vpop.f32.mrb[148].mxu0  ;;  %17413 = vmatprep.subr.bf16.mxu1 %v18359_v3  ;;  %17991 = vmatpush3.bf16.msra.mxu0 %v18358_v37 }
 0x23c   : > { %8739 = vmatprep.mubr.bf16.mxu0 %v15043_v0  ;;  %v15203_v50 = vcombine.low %v7182_v47, %v7185_v24  ;;  %v6320_v14 = vsel %vm18773_vm4, %v6318_v17, %v6319_v23  ;;  %v4528_v18 = vadd.f32 %v21622_v41, %v21280_v33  ;;  %v21911_v40 = vadd.f32 %v21809_v57, %v21798_v35  ;;  %v21921_v33 = vpop.f32.mrb[148].mxu1  ;;  %v14993_v47 = vld [vmem:[%s18758_s9 + $0x2b0] sm:$0xf]  ;;  %v15154_v0 = vld [vmem:[%s18758_s9 + $0x400] sm:$0x1] }
 0x23d   : > { %v14963_v19 = vcombine.low %v6317_v58, %v6320_v14  ;;  %v6894_v4 = vsel %vm20664_vm8, %v15107_v12, %v6893_v7  ;;  %v6895_v25 = vrot.slane %v6893_v7, 4  ;;  %v4681_v22 = vadd.f32 %v21817_v1, %v21570_v2  ;;  %v21939_v58 = vpop.f32.mrb[149].mxu0  ;;  %v21941_v17 = vpop.f32.mrb[149].mxu1  ;;  %v14912_v7 = vld [vmem:[%s18758_s9 + $0x2a8] sm:$0xe] }
 0x23e   : > { %8900 = vmatprep.mubr.bf16.mxu1 %v15203_v50  ;;  %v4689_v57 = vadd.f32 %v21804_v11, %v4528_v18  ;;  %v4929_v41 = vadd.f32 %v4928_v44, %v21851_v6  ;;  %v4999_v35 = vadd.f32 %v4998_v46, %v4968_v27  ;;  %v4531_v42 = vadd.f32 %v21637_v62, %v21292_v36  ;;  %v14994_v11 = vld [vmem:[%s18758_s9 + $0x2b4] sm:$0x7]  ;;  %v15152_v6 = vld [vmem:[%s18758_s9 + $0x3f8] sm:$0xe]  ;;  %v15153_v27 = vld [vmem:[%s18758_s9 + $0x3fc] sm:$0xf] }
 0x23f   : > { %8740 = vmatmul.mubr.bf16.gmra.mrb[244].mxu0 %v14963_v19  ;;  %v6897_v2 = vsel %vm20664_vm8, %v6895_v25, %v6896_v55  ;;  %v16347_v1 = vpack.c.bf16 %v4681_v22, %v4681_v22  ;;  %v4969_v59 = vmul.f32 %v4681_v22, %v4681_v22  ;;  %v21933_v23 = vadd.f32 %v21837_v31, %v21830_v29  ;;  %v21948_v55 = vpop.f32.mrb[150].mxu0  ;;  %v21950_v3 = vpop.f32.mrb[150].mxu1  ;;  %v18360_v50 = vld [vmem:[%s25093_s2 + $0x4b0] sm:$0xff]  }
 0x240   : > { %v15123_v44 = vcombine.low %v6894_v4, %v6897_v2  ;;  %v16349_v46 = vpack.c.bf16 %v4689_v57, %v4689_v57  ;;  %v4971_v36 = vmul.f32 %v4689_v57, %v4689_v57  ;;  %v4930_v62 = vadd.f32 %v4929_v41, %v4681_v22  ;;  %v21958_v18 = vpop.f32.mrb[151].mxu1  ;;  %v14913_v41 = vld [vmem:[%s18758_s9 + $0x2ac] sm:$0xf]  ;;  %17414 = vmatpush3.bf16.msra.mxu1 %v18360_v50 }
 0x241   : > { %4899 = vst [vmem:[%s19793_s18 + $0xc4] sm:$0xf] %v16347_v1  ;;  %v5000_v24 = vadd.f32 %v4999_v35, %v4969_v59  ;;  %v4692_v29 = vadd.f32 %v21832_v45, %v4531_v42  ;;  %v4684_v31 = vadd.f32 %v21839_v10, %v21597_v52  ;;  %v15028_v12 = vrot.slane %v14992_v60, 11  ;;  %v21956_v10 = vpop.f32.mrb[151].mxu0  ;;  %25142 = vst [vmem:[#allocation22_spill] sm:$0xff] %v21958_v18 }
 0x242   : > { %8901 = vmatmul.mubr.bf16.gmra.mrb[244].mxu1 %v15123_v44  ;;  %4901 = vst [vmem:[%s19793_s18 + $0xe4] sm:$0xf] %v16349_v46  ;;  %v6611_v37 = vrot.slane %v14993_v47, 7  ;;  %v6614_v14 = vrot.slane %v14994_v11, 7  ;;  %v15188_v45 = vrot.slane %v15152_v6, 9  ;;  %v7188_v52 = vrot.slane %v15153_v27, 5 }
 0x243   : > { %v16350_v19 = vpack.c.bf16 %v4692_v29, %v4692_v29  ;;  %v4972_v4 = vmul.f32 %v4692_v29, %v4692_v29  ;;  %v16348_v25 = vpack.c.bf16 %v4684_v31, %v4684_v31  ;;  %v4931_v22 = vadd.f32 %v4930_v62, %v4684_v31  ;;  %v14914_v35 = vld [vmem:[%s18758_s9 + $0x2b0] sm:$0x1]  ;;  %v15072_v1 = vld [vmem:[%s18758_s9 + $0x3f0] sm:$0x8]  ;;  %v15073_v59 = vld [vmem:[%s18758_s9 + $0x3f4] sm:$0xf] }
 0x244   : > { %v4970_v42 = vmul.f32 %v4684_v31, %v4684_v31  ;;  %v6612_v60 = vsel %vm20664_vm8, %v15028_v12, %v6611_v37  ;;  %v6613_v47 = vrot.slane %v6611_v37, 4  ;;  %v7189_v2 = vsel %vm18773_vm4, %v15188_v45, %v7188_v52  ;;  %v21968_v11 = vpop.f32.mrb[152].mxu0  ;;  %v21972_v62 = vpop.f32.mrb[152].mxu1  ;;  %v15074_v18 = vld [vmem:[%s18758_s9 + $0x3f8] sm:$0x7] }
 0x245   : > { %25143 = vst [vmem:[#allocation23_spill] sm:$0xff] %v21968_v11  ;;  %4902 = vst [vmem:[%s19793_s18 + $0xf4] sm:$0xf] %v16350_v19  ;;  %v4932_v6 = vadd.f32 %v4931_v22, %v4689_v57  ;;  %v7190_v27 = vrot.slane %v7188_v52, 4  ;;  %v7191_v44 = vrot.slane %v15154_v0, 5  ;;  %v14948_v46 = vrot.slane %v14912_v7, 9 }
 0x246   : > { %4900 = vst [vmem:[%s19793_s18 + $0xd4] sm:$0xf] %v16348_v25  ;;  %v5001_v31 = vadd.f32 %v5000_v24, %v4970_v42  ;;  %v6615_v12 = vsel %vm20664_vm8, %v6613_v47, %v6614_v14  ;;  %v6323_v50 = vrot.slane %v14913_v41, 5  ;;  %v6326_v37 = vrot.slane %v14914_v35, 5  ;;  %v21981_v24 = vpop.f32.mrb[153].mxu0  ;;  %v21996_v47 = vpop.f32.mrb[153].mxu1 }
 0x247   : > { %v15044_v45 = vcombine.low %v6612_v60, %v6615_v12  ;;  %v7192_v8 = vsel %vm18773_vm4, %v7190_v27, %v7191_v44  ;;  %v15108_v11 = vrot.slane %v15072_v1, 11  ;;  %v6900_v19 = vrot.slane %v15073_v59, 7  ;;  %v14995_v60 = vld [vmem:[%s18758_s9 + $0x2c8] sm:$0x8] }
 0x248   : > { %v5002_v57 = vadd.f32 %v5001_v31, %v4971_v36  ;;  %v15204_v52 = vcombine.low %v7189_v2, %v7192_v8  ;;  %v6324_v0 = vsel %vm18773_vm4, %v14948_v46, %v6323_v50  ;;  %v6325_v7 = vrot.slane %v6323_v50, 4 }
 0x249   : > { %8747 = vmatprep.mubr.bf16.mxu0 %v15044_v45  ;;  %v6901_v14 = vsel %vm20664_vm8, %v15108_v11, %v6900_v19  ;;  %v6902_v25 = vrot.slane %v6900_v19, 4  ;;  %v6903_v22 = vrot.slane %v15074_v18, 7  ;;  %v4544_v41 = vadd.f32 %v21746_v56, %v21353_v5  ;;  %v21998_v18 = vpop.f32.mrb[154].mxu0 }
 0x24a   : > { %8908 = vmatprep.mubr.bf16.mxu1 %v15204_v52  ;;  %v6327_v8 = vsel %vm18773_vm4, %v6325_v7, %v6326_v37  ;;  %v21991_v36 = vadd.f32 %v21885_v30, %v21870_v43  ;;  %v4536_v35 = vadd.f32 %v21683_v28, %v21322_v48  ;;  %v4933_v42 = vadd.f32 %v4932_v6, %v4692_v29  ;;  %v14996_v43 = vld [vmem:[%s18758_s9 + $0x2cc] sm:$0xf]  ;;  %v22004_v30 = vpop.f32.mrb[154].mxu1  ;;  %v22006_v48 = vpop.f32.mrb[155].mxu0  ;;  %v14997_v6 = vld [vmem:[%s18758_s9 + $0x2d0] sm:$0x7] }
 0x24b   : > { %v14964_v5 = vcombine.low %v6324_v0, %v6327_v8  ;;  %v6904_v56 = vsel %vm20664_vm8, %v6902_v25, %v6903_v22  ;;  %v4705_v2 = vadd.f32 %v21883_v34, %v4544_v41  ;;  %v5003_v1 = vadd.f32 %v5002_v57, %v4972_v4  ;;  %v15155_v34 = vld [vmem:[%s18758_s9 + $0x414] sm:$0xe]  ;;  %v22017_v4 = vpop.f32.mrb[155].mxu1  ;;  %v22019_v27 = vpop.f32.mrb[156].mxu0  ;;  %v15157_v37 = vld [vmem:[%s18758_s9 + $0x41c] sm:$0x1] }
 0x24c   : > { %v15124_v28 = vcombine.low %v6901_v14, %v6904_v56  ;;  %v4697_v29 = vadd.f32 %v21889_v21, %v4536_v35  ;;  %v4547_v59 = vadd.f32 %v21769_v15, %v21360_v38  ;;  %v22013_v11 = vadd.f32 %v21900_v61, %v21891_v49  ;;  %v15156_v15 = vld [vmem:[%s18758_s9 + $0x418] sm:$0xf]  ;;  %v22024_v49 = vpop.f32.mrb[156].mxu1  ;;  %v14916_v22 = vld [vmem:[%s18758_s9 + $0x2c8] sm:$0xf] }
 0x24d   : > { %8748 = vmatmul.mubr.bf16.gmra.mrb[248].mxu0 %v14964_v5  ;;  %v16353_v44 = vpack.c.bf16 %v4705_v2, %v4705_v2  ;;  %v4975_v46 = vmul.f32 %v4705_v2, %v4705_v2  ;;  %v4539_v21 = vadd.f32 %v21712_v51, %v21330_v20  ;;  %v15029_v38 = vrot.slane %v14995_v60, 11  ;;  %v14915_v20 = vld [vmem:[%s18758_s9 + $0x2c4] sm:$0xe]  ;;  %v22031_v51 = vpop.f32.mrb[157].mxu0  ;;  %v14917_v5 = vld [vmem:[%s18758_s9 + $0x2cc] sm:$0x1] }
 0x24e   : > { %8909 = vmatmul.mubr.bf16.gmra.mrb[248].mxu1 %v15124_v28  ;;  %v16351_v61 = vpack.c.bf16 %v4697_v29, %v4697_v29  ;;  %v4934_v31 = vadd.f32 %v4933_v42, %v4697_v29  ;;  %v4973_v12 = vmul.f32 %v4697_v29, %v4697_v29  ;;  %v4708_v50 = vadd.f32 %v21898_v63, %v4547_v59  ;;  %v22035_v63 = vpop.f32.mrb[157].mxu1  ;;  %v22037_v41 = vpop.f32.mrb[158].mxu0  ;;  %v15075_v56 = vld [vmem:[%s18758_s9 + $0x40c] sm:$0x8] }
 0x24f   : > { %4905 = vst [vmem:[%s19793_s18 + $0x124] sm:$0xf] %v16353_v44  ;;  %v4700_v45 = vadd.f32 %v21913_v16, %v4539_v21  ;;  %v6618_v19 = vrot.slane %v14996_v43, 7  ;;  %v6621_v57 = vrot.slane %v14997_v6, 7  ;;  %v15189_v52 = vrot.slane %v15155_v34, 9  ;;  %v18361_v16 = vld [vmem:[%s25093_s2 + $0x478] sm:$0xff]  }
 0x250   : > { %4903 = vst [vmem:[%s19793_s18 + $0x104] sm:$0xf] %v16351_v61  ;;  %v5004_v0 = vadd.f32 %v5003_v1, %v4973_v12  ;;  %v16354_v7 = vpack.c.bf16 %v4708_v50, %v4708_v50  ;;  %v4976_v14 = vmul.f32 %v4708_v50, %v4708_v50  ;;  %v7195_v25 = vrot.slane %v15156_v15, 5  ;;  %v22046_v1 = vpop.f32.mrb[158].mxu1  ;;  %v22048_v43 = vpop.f32.mrb[159].mxu0  ;;  %17992 = vmatprep.subr.bf16.mxu0 %v18361_v16 }
 0x251   : > { %v16352_v8 = vpack.c.bf16 %v4700_v45, %v4700_v45  ;;  %v4935_v35 = vadd.f32 %v4934_v31, %v4700_v45  ;;  %v4974_v42 = vmul.f32 %v4700_v45, %v4700_v45  ;;  %v6619_v60 = vsel %vm20664_vm8, %v15029_v38, %v6618_v19  ;;  %v22053_v34 = vpop.f32.mrb[159].mxu1  ;;  %v15076_v61 = vld [vmem:[%s18758_s9 + $0x410] sm:$0xf]  ;;  %v15077_v31 = vld [vmem:[%s18758_s9 + $0x414] sm:$0x7]  ;;  %17993 = vmatpush3.bf16.msra.mxu0 %v18361_v16 }
 0x252   : > { %4906 = vst [vmem:[%s19793_s18 + $0x134] sm:$0xf] %v16354_v7  ;;  %v6620_v28 = vrot.slane %v6618_v19, 4  ;;  %v7196_v29 = vsel %vm18773_vm4, %v15189_v52, %v7195_v25  ;;  %v7197_v59 = vrot.slane %v7195_v25, 4  ;;  %v7198_v6 = vrot.slane %v15157_v37, 5 }
 0x253   : > { %4904 = vst [vmem:[%s19793_s18 + $0x114] sm:$0xf] %v16352_v8  ;;  %v4936_v44 = vadd.f32 %v4935_v35, %v4705_v2  ;;  %v5005_v21 = vadd.f32 %v5004_v0, %v4974_v42  ;;  %v14949_v38 = vrot.slane %v14915_v20, 9  ;;  %v6330_v15 = vrot.slane %v14916_v22, 5  ;;  %v22063_v37 = vld [vmem:[%s18758_s9 + $0x2e4] sm:$0x8] }
 0x254   : > { %v6622_v12 = vsel %vm20664_vm8, %v6620_v28, %v6621_v57  ;;  %v7199_v45 = vsel %vm18773_vm4, %v7197_v59, %v7198_v6  ;;  %v6333_v19 = vrot.slane %v14917_v5, 5  ;;  %v15109_v52 = vrot.slane %v15075_v56, 11  ;;  %v22069_v8 = vpop.f32.mrb[160].mxu0  ;;  %v22079_v5 = vld [vmem:[%s18758_s9 + $0x2ec] sm:$0x7]  ;;  %v22082_v28 = vpop.f32.mrb[160].mxu1 }
 0x255   : > { %v5006_v7 = vadd.f32 %v5005_v21, %v4975_v46  ;;  %v15045_v2 = vcombine.low %v6619_v60, %v6622_v12  ;;  %v15205_v0 = vcombine.low %v7196_v29, %v7199_v45  ;;  %v6331_v20 = vsel %vm18773_vm4, %v14949_v38, %v6330_v15  ;;  %v14999_v60 = vld [vmem:[%s18758_s9 + $0x2e8] sm:$0xf] }
 0x256   : > { %v6332_v25 = vrot.slane %v6330_v15, 4  ;;  %v6907_v22 = vrot.slane %v15076_v61, 7  ;;  %v6910_v16 = vrot.slane %v15077_v31, 7  ;;  %v4560_v57 = vadd.f32 %v21911_v40, %v21439_v9  ;;  %v22111_v15 = vpop.f32.mrb[161].mxu1 }
 0x257   : > { %8755 = vmatprep.mubr.bf16.mxu0 %v15045_v2  ;;  %8916 = vmatprep.mubr.bf16.mxu1 %v15205_v0  ;;  %v22073_v35 = vadd.f32 %v21939_v58, %v21915_v53  ;;  %v4552_v46 = vadd.f32 %v21825_v39, %v21398_v54  ;;  %v4937_v42 = vadd.f32 %v4936_v44, %v4708_v50  ;;  %v15030_v56 = vrot.slane %v22063_v37, 11  ;;  %v15158_v54 = vld [vmem:[%s18758_s9 + $0x430] sm:$0xe]  ;;  %v22092_v39 = vpop.f32.mrb[161].mxu0  ;;  %v22115_v45 = vpop.f32.mrb[162].mxu1 }
 0x258   : > { %v6334_v9 = vsel %vm18773_vm4, %v6332_v25, %v6333_v19  ;;  %v6908_v40 = vsel %vm20664_vm8, %v15109_v52, %v6907_v22  ;;  %v6909_v53 = vrot.slane %v6907_v22, 4  ;;  %v22089_v58 = vadd.f32 %v21921_v33, %v4560_v57  ;;  %v25145_v52 = vld [vmem:[#allocation21_spill] sm:$0xff]  ;;  %v14918_v0 = vld [vmem:[%s18758_s9 + $0x2e0] sm:$0xe] }
 0x259   : > { %v14965_v50 = vcombine.low %v6331_v20, %v6334_v9  ;;  %v4713_v29 = vadd.f32 %v21941_v17, %v4552_v46  ;;  %v5007_v59 = vadd.f32 %v5006_v7, %v4976_v14  ;;  %v4563_v6 = vadd.f32 %v21933_v23, %v21444_v13  ;;  %v15159_v17 = vld [vmem:[%s18758_s9 + $0x434] sm:$0xf]  ;;  %v15160_v14 = vld [vmem:[%s18758_s9 + $0x438] sm:$0x1]  ;;  %v22113_v13 = vpop.f32.mrb[162].mxu0  ;;  %v22127_v20 = vpop.f32.mrb[163].mxu1 }
 0x25a   : > { %v6911_v44 = vsel %vm20664_vm8, %v6909_v53, %v6910_v16  ;;  %v16357_v21 = vpack.c.bf16 %v22089_v58, %v22089_v58  ;;  %v22103_v33 = vmul.f32 %v22089_v58, %v22089_v58  ;;  %v22107_v38 = vadd.f32 %v21956_v10, %v21948_v55  ;;  %v22117_v19 = vpop.f32.mrb[163].mxu0  ;;  %v25144_v10 = vld [vmem:[#allocation13_spill] sm:$0xff]  ;;  %v14919_v46 = vld [vmem:[%s18758_s9 + $0x2e4] sm:$0xf]  ;;  %v25146_v9 = vld [vmem:[#allocation22_spill] sm:$0xff] }
 0x25b   : > { %8756 = vmatmul.mubr.bf16.gmra.mrb[252].mxu0 %v14965_v50  ;;  %v15125_v23 = vcombine.low %v6908_v40, %v6911_v44  ;;  %v16355_v61 = vpack.c.bf16 %v4713_v29, %v4713_v29  ;;  %v4938_v31 = vadd.f32 %v4937_v42, %v4713_v29  ;;  %v4977_v12 = vmul.f32 %v4713_v29, %v4713_v29  ;;  %v22129_v25 = vpop.f32.mrb[164].mxu0  ;;  %v22133_v42 = vpop.f32.mrb[164].mxu1  ;;  %v15078_v50 = vld [vmem:[%s18758_s9 + $0x428] sm:$0x8] }
 0x25c   : > { %4909 = vst [vmem:[%s19793_s18 + $0x164] sm:$0xf] %v16357_v21  ;;  %v22121_v55 = vadd.f32 %v21950_v3, %v4563_v6  ;;  %v4555_v37 = vadd.f32 %v25145_v52, %v25144_v10  ;;  %v6625_v7 = vrot.slane %v14999_v60, 7  ;;  %v6628_v2 = vrot.slane %v22079_v5, 7  ;;  %v22146_v21 = vpop.f32.mrb[165].mxu0 }
 0x25d   : > { %8917 = vmatmul.mubr.bf16.gmra.mrb[252].mxu1 %v15125_v23  ;;  %4907 = vst [vmem:[%s19793_s18 + $0x144] sm:$0xf] %v16355_v61  ;;  %v5008_v22 = vadd.f32 %v5007_v59, %v4977_v12  ;;  %v15190_v16 = vrot.slane %v15158_v54, 9  ;;  %v7202_v3 = vrot.slane %v15159_v17, 5  ;;  %v7205_v57 = vrot.slane %v15160_v14, 5 }
 0x25e   : > { %v16358_v60 = vpack.c.bf16 %v22121_v55, %v22121_v55  ;;  %v4980_v5 = vmul.f32 %v22121_v55, %v22121_v55  ;;  %v4716_v40 = vadd.f32 %v25146_v9, %v4555_v37  ;;  %v6626_v53 = vsel %vm20664_vm8, %v15030_v56, %v6625_v7  ;;  %v14920_v54 = vld [vmem:[%s18758_s9 + $0x2e8] sm:$0x1]  ;;  %v15079_v12 = vld [vmem:[%s18758_s9 + $0x42c] sm:$0xf]  ;;  %v15080_v10 = vld [vmem:[%s18758_s9 + $0x430] sm:$0x7] }
 0x25f   : > { %v6627_v29 = vrot.slane %v6625_v7, 4  ;;  %v7203_v59 = vsel %vm18773_vm4, %v15190_v16, %v7202_v3  ;;  %v7204_v6 = vrot.slane %v7202_v3, 4  ;;  %v14950_v44 = vrot.slane %v14918_v0, 9  ;;  %v22151_v56 = vpop.f32.mrb[165].mxu1  ;;  %v22158_v16 = vld [vmem:[%s18758_s9 + $0x300] sm:$0x8] }
 0x260   : > { %4910 = vst [vmem:[%s19793_s18 + $0x174] sm:$0xf] %v16358_v60  ;;  %v16356_v17 = vpack.c.bf16 %v4716_v40, %v4716_v40  ;;  %v4939_v14 = vadd.f32 %v4938_v31, %v4716_v40  ;;  %v4978_v23 = vmul.f32 %v4716_v40, %v4716_v40  ;;  %v6337_v61 = vrot.slane %v14919_v46, 5  ;;  %25147 = vst [vmem:[#allocation13_spill] sm:$0xff] %v22151_v56  ;;  %v22160_v3 = vpop.f32.mrb[166].mxu0  ;;  %v22162_v60 = vpop.f32.mrb[166].mxu1 }
 0x261   : > { %v6629_v52 = vsel %vm20664_vm8, %v6627_v29, %v6628_v2  ;;  %v7206_v37 = vsel %vm18773_vm4, %v7204_v6, %v7205_v57  ;;  %v6340_v7 = vrot.slane %v14920_v54, 5  ;;  %v15110_v0 = vrot.slane %v15078_v50, 11  ;;  %25148 = vst [vmem:[#allocation21_spill] sm:$0xff] %v22162_v60  ;;  %v22166_v56 = vpop.f32.mrb[167].mxu0  ;;  %v22168_v2 = vpop.f32.mrb[167].mxu1 }
 0x262   : > { %4908 = vst [vmem:[%s19793_s18 + $0x154] sm:$0xf] %v16356_v17  ;;  %v4940_v31 = vadd.f32 %v4939_v14, %v22089_v58  ;;  %v5009_v46 = vadd.f32 %v5008_v22, %v4978_v23  ;;  %v15046_v9 = vcombine.low %v6626_v53, %v6629_v52  ;;  %v15206_v40 = vcombine.low %v7203_v59, %v7206_v37  ;;  %v22172_v6 = vpop.f32.mrb[168].mxu0  ;;  %v25149_v58 = vld [vmem:[#allocation14_spill] sm:$0xff]  ;;  %v25150_v53 = vld [vmem:[#allocation23_spill] sm:$0xff]  ;;  %v22182_v17 = vpop.f32.mrb[168].mxu1 }
 0x263   : > { %v6338_v57 = vsel %vm18773_vm4, %v14950_v44, %v6337_v61  ;;  %v6339_v54 = vrot.slane %v6337_v61, 4  ;;  %v6914_v50 = vrot.slane %v15079_v12, 7  ;;  %v6917_v29 = vrot.slane %v15080_v10, 7  ;;  %v25151_v61 = vld [vmem:[#allocation15_spill] sm:$0xff] }
 0x264   : > { %v5010_v60 = vadd.f32 %v5009_v46, %v22103_v33  ;;  %8763 = vmatprep.mubr.bf16.mxu0 %v15046_v9  ;;  %8924 = vmatprep.mubr.bf16.mxu1 %v15206_v40  ;;  %v4576_v22 = vadd.f32 %v22073_v35, %v25149_v58  ;;  %v22179_v59 = vadd.f32 %v21981_v24, %v25150_v53  ;;  %v15031_v44 = vrot.slane %v22158_v16, 11  ;;  %v22190_v35 = vpop.f32.mrb[169].mxu0  ;;  %v15002_v16 = vld [vmem:[%s18758_s9 + $0x304] sm:$0xf]  ;;  %v15003_v46 = vld [vmem:[%s18758_s9 + $0x308] sm:$0x7] }
 0x265   : > { %v6341_v14 = vsel %vm18773_vm4, %v6339_v54, %v6340_v7  ;;  %v6915_v33 = vsel %vm20664_vm8, %v15110_v0, %v6914_v50  ;;  %v6916_v23 = vrot.slane %v6914_v50, 4  ;;  %v4568_v12 = vadd.f32 %v21991_v36, %v25151_v61  ;;  %v15161_v7 = vld [vmem:[%s18758_s9 + $0x44c] sm:$0xe] }
 0x266   : > { %v14966_v10 = vcombine.low %v6338_v57, %v6341_v14  ;;  %v4737_v24 = vadd.f32 %v21972_v62, %v4576_v22  ;;  %v4941_v52 = vadd.f32 %v4940_v31, %v22121_v55  ;;  %v5011_v37 = vadd.f32 %v5010_v60, %v4980_v5  ;;  %v25152_v40 = vld [vmem:[#allocation17_spill] sm:$0xff]  ;;  %v25153_v31 = vld [vmem:[#allocation12_spill] sm:$0xff]  ;;  %v22213_v22 = vpop.f32.mrb[169].mxu1 }
 0x267   : > { %v6918_v9 = vsel %vm20664_vm8, %v6916_v23, %v6917_v29  ;;  %v4729_v0 = vadd.f32 %v21996_v47, %v4568_v12  ;;  %v4579_v36 = vadd.f32 %v22107_v38, %v25152_v40  ;;  %v22204_v57 = vadd.f32 %v22006_v48, %v21998_v18  ;;  %v15162_v62 = vld [vmem:[%s18758_s9 + $0x450] sm:$0xf]  ;;  %v15163_v38 = vld [vmem:[%s18758_s9 + $0x454] sm:$0x1]  ;;  %v22215_v18 = vpop.f32.mrb[170].mxu0  ;;  %v18362_v23 = vld [vmem:[%s25093_s2 + $0x4f8] sm:$0xff]  }
 0x268   : > { %8764 = vmatmul.mubr.bf16.gmra.mrb[0].mxu0 %v14966_v10  ;;  %v15126_v55 = vcombine.low %v6915_v33, %v6918_v9  ;;  %v16361_v5 = vpack.c.bf16 %v4737_v24, %v4737_v24  ;;  %v4983_v60 = vmul.f32 %v4737_v24, %v4737_v24  ;;  %v4571_v54 = vadd.f32 %v22013_v11, %v25153_v31  ;;  %v22219_v33 = vpop.f32.mrb[170].mxu1 }
 0x269   : > { %v16359_v50 = vpack.c.bf16 %v4729_v0, %v4729_v0  ;;  %v4942_v29 = vadd.f32 %v4941_v52, %v4729_v0  ;;  %v4981_v47 = vmul.f32 %v4729_v0, %v4729_v0  ;;  %v22210_v58 = vadd.f32 %v22004_v30, %v4579_v36  ;;  %25154 = vst [vmem:[#allocation22_spill] sm:$0xff] %v22219_v33  ;;  %v22221_v30 = vpop.f32.mrb[171].mxu0  ;;  %v14921_v52 = vld [vmem:[%s18758_s9 + $0x2fc] sm:$0xe]  ;;  %v15081_v36 = vld [vmem:[%s18758_s9 + $0x444] sm:$0x8] }
 0x26a   : > { %8925 = vmatmul.mubr.bf16.gmra.mrb[0].mxu1 %v15126_v55  ;;  %4913 = vst [vmem:[%s19793_s18 + $0x1a4] sm:$0xf] %v16361_v5  ;;  %v4732_v48 = vadd.f32 %v22017_v4, %v4571_v54  ;;  %v6632_v53 = vrot.slane %v15002_v16, 7  ;;  %v6635_v11 = vrot.slane %v15003_v46, 7  ;;  %v15191_v14 = vrot.slane %v15161_v7, 9  ;;  %v22233_v46 = vpop.f32.mrb[171].mxu1  ;;  %17415 = vmatprep.subr.bf16.mxu1 %v18362_v23 }
 0x26b   : > { %4911 = vst [vmem:[%s19793_s18 + $0x184] sm:$0xf] %v16359_v50  ;;  %v5012_v61 = vadd.f32 %v5011_v37, %v4981_v47  ;;  %v16362_v12 = vpack.c.bf16 %v22210_v58, %v22210_v58  ;;  %v4984_v4 = vmul.f32 %v22210_v58, %v22210_v58  ;;  %v7209_v10 = vrot.slane %v15162_v62, 5  ;;  %v14922_v16 = vld [vmem:[%s18758_s9 + $0x300] sm:$0xf]  ;;  %25155 = vst [vmem:[#allocation14_spill] sm:$0xff] %v22233_v46 }
 0x26c   : > { %v16360_v7 = vpack.c.bf16 %v4732_v48, %v4732_v48  ;;  %v4943_v9 = vadd.f32 %v4942_v29, %v4732_v48  ;;  %v4982_v0 = vmul.f32 %v4732_v48, %v4732_v48  ;;  %v6633_v40 = vsel %vm20664_vm8, %v15031_v44, %v6632_v53  ;;  %v14923_v37 = vld [vmem:[%s18758_s9 + $0x304] sm:$0x1]  ;;  %v22242_v54 = vpop.f32.mrb[172].mxu0  ;;  %v15082_v48 = vld [vmem:[%s18758_s9 + $0x448] sm:$0xf] }
 0x26d   : > { %4914 = vst [vmem:[%s19793_s18 + $0x1b4] sm:$0xf] %v16362_v12  ;;  %v6634_v55 = vrot.slane %v6632_v53, 4  ;;  %v7210_v62 = vsel %vm18773_vm4, %v15191_v14, %v7209_v10  ;;  %v7211_v5 = vrot.slane %v7209_v10, 4  ;;  %v7212_v31 = vrot.slane %v15163_v38, 5  ;;  %25156 = vst [vmem:[#allocation23_spill] sm:$0xff] %v22242_v54 }
 0x26e   : > { %4912 = vst [vmem:[%s19793_s18 + $0x194] sm:$0xf] %v16360_v7  ;;  %v4944_v50 = vadd.f32 %v4943_v9, %v4737_v24  ;;  %v5013_v29 = vadd.f32 %v5012_v61, %v4982_v0  ;;  %v14951_v47 = vrot.slane %v14921_v52, 9  ;;  %v6344_v44 = vrot.slane %v14922_v16, 5  ;;  %v15083_v46 = vld [vmem:[%s18758_s9 + $0x44c] sm:$0x7] }
 0x26f   : > { %v6636_v23 = vsel %vm20664_vm8, %v6634_v55, %v6635_v11  ;;  %v7213_v53 = vsel %vm18773_vm4, %v7211_v5, %v7212_v31  ;;  %v6347_v12 = vrot.slane %v14923_v37, 5  ;;  %v15111_v14 = vrot.slane %v15081_v36, 11  ;;  %v15004_v10 = vld [vmem:[%s18758_s9 + $0x31c] sm:$0x8]  ;;  %v15005_v61 = vld [vmem:[%s18758_s9 + $0x320] sm:$0xf] }
 0x270   : > { %v5014_v38 = vadd.f32 %v5013_v29, %v4983_v60  ;;  %v15047_v33 = vcombine.low %v6633_v40, %v6636_v23  ;;  %v15207_v54 = vcombine.low %v7210_v62, %v7213_v53  ;;  %v6345_v24 = vsel %vm18773_vm4, %v14951_v47, %v6344_v44  ;;  %v22255_v52 = vpop.f32.mrb[172].mxu1  ;;  %v22257_v16 = vpop.f32.mrb[173].mxu0  ;;  %v18363_v40 = vld [vmem:[%s25093_s2 + $0x4b8] sm:$0xff]   ;;  %v25157_v36 = vld [vmem:[#allocation16_spill] sm:$0xff] }
 0x271   : > { %v6346_v7 = vrot.slane %v6344_v44, 4  ;;  %v6921_v11 = vrot.slane %v15082_v48, 7  ;;  %v6924_v9 = vrot.slane %v15083_v46, 7  ;;  %v16901_v0 = vadd.f32 %v22031_v51, %v22019_v27  ;;  %v22261_v37 = vpop.f32.mrb[173].mxu1  ;;  %v22263_v60 = vpop.f32.mrb[174].mxu0  ;;  %v25158_v47 = vld [vmem:[#allocation19_spill] sm:$0xff]  ;;  %17416 = vmatpush3.bf16.msra.mxu1 %v18363_v40 }
 0x272   : > { %8771 = vmatprep.mubr.bf16.mxu0 %v15047_v33  ;;  %8932 = vmatprep.mubr.bf16.mxu1 %v15207_v54  ;;  %v4584_v55 = vadd.f32 %v22179_v59, %v25157_v36  ;;  %v4945_v62 = vadd.f32 %v4944_v50, %v22210_v58  ;;  %v5015_v5 = vadd.f32 %v5014_v38, %v4984_v4  ;;  %v15006_v46 = vld [vmem:[%s18758_s9 + $0x324] sm:$0x7]  ;;  %v15032_v31 = vrot.slane %v15004_v10, 11  ;;  %v22272_v29 = vpop.f32.mrb[174].mxu1  ;;  %v22274_v27 = vpop.f32.mrb[175].mxu0  ;;  %v25159_v48 = vld [vmem:[#allocation18_spill] sm:$0xff] }
 0x273   : > { %v6348_v51 = vsel %vm18773_vm4, %v6346_v7, %v6347_v12  ;;  %v6922_v33 = vsel %vm20664_vm8, %v15111_v14, %v6921_v11  ;;  %v6923_v54 = vrot.slane %v6921_v11, 4  ;;  %v4592_v44 = vadd.f32 %v16901_v0, %v25158_v47  ;;  %v22281_v59 = vpop.f32.mrb[175].mxu1  ;;  %v15164_v38 = vld [vmem:[%s18758_s9 + $0x468] sm:$0xe]  ;;  %v14925_v36 = vld [vmem:[%s18758_s9 + $0x31c] sm:$0xf] }
 0x274   : > { %v14967_v58 = vcombine.low %v6345_v24, %v6348_v51  ;;  %v4745_v4 = vadd.f32 %v22035_v63, %v4584_v55  ;;  %v16904_v50 = vadd.f32 %v22048_v43, %v22037_v41  ;;  %v4587_v23 = vadd.f32 %v22204_v57, %v25159_v48  ;;  %v15165_v41 = vld [vmem:[%s18758_s9 + $0x46c] sm:$0xf]  ;;  %v15166_v43 = vld [vmem:[%s18758_s9 + $0x470] sm:$0x1]  ;;  %v14924_v57 = vld [vmem:[%s18758_s9 + $0x318] sm:$0xe] }
 0x275   : > { %v6925_v53 = vsel %vm20664_vm8, %v6923_v54, %v6924_v9  ;;  %v4753_v12 = vadd.f32 %v22024_v49, %v4592_v44  ;;  %v6639_v14 = vrot.slane %v15005_v61, 7  ;;  %v6642_v10 = vrot.slane %v15006_v46, 7  ;;  %v25160_v9 = vld [vmem:[#allocation20_spill] sm:$0xff] }
 0x276   : > { %8772 = vmatmul.mubr.bf16.gmra.mrb[4].mxu0 %v14967_v58  ;;  %v15127_v24 = vcombine.low %v6922_v33, %v6925_v53  ;;  %v16363_v7 = vpack.c.bf16 %v4745_v4, %v4745_v4  ;;  %v4946_v63 = vadd.f32 %v4945_v62, %v4745_v4  ;;  %v4985_v11 = vmul.f32 %v4745_v4, %v4745_v4  ;;  %v14926_v33 = vld [vmem:[%s18758_s9 + $0x320] sm:$0x1]  ;;  %v15084_v4 = vld [vmem:[%s18758_s9 + $0x460] sm:$0x8] }
 0x277   : > { %v16365_v0 = vpack.c.bf16 %v4753_v12, %v4753_v12  ;;  %v4987_v40 = vmul.f32 %v4753_v12, %v4753_v12  ;;  %v4595_v49 = vadd.f32 %v16904_v50, %v25160_v9  ;;  %v4748_v61 = vadd.f32 %v22053_v34, %v4587_v23  ;;  %v22305_v34 = vpop.f32.mrb[176].mxu0  ;;  %v22307_v50 = vpop.f32.mrb[176].mxu1 }
 0x278   : > { %8933 = vmatmul.mubr.bf16.gmra.mrb[4].mxu1 %v15127_v24  ;;  %4915 = vst [vmem:[%s19793_s18 + $0x1c4] sm:$0xf] %v16363_v7  ;;  %v5016_v55 = vadd.f32 %v5015_v5, %v4985_v11  ;;  %v6640_v62 = vsel %vm20664_vm8, %v15032_v31, %v6639_v14  ;;  %v6641_v46 = vrot.slane %v6639_v14, 4  ;;  %v15192_v51 = vrot.slane %v15164_v38, 9  ;;  %v22311_v53 = vpop.f32.mrb[177].mxu0  ;;  %v18365_v14 = vld [vmem:[%s25093_s2 + $0x540] sm:$0xff]  }
 0x279   : > { %4917 = vst [vmem:[%s19793_s18 + $0x1e4] sm:$0xf] %v16365_v0  ;;  %v4756_v54 = vadd.f32 %v22046_v1, %v4595_v49  ;;  %v16364_v47 = vpack.c.bf16 %v4748_v61, %v4748_v61  ;;  %v4947_v44 = vadd.f32 %v4946_v63, %v4748_v61  ;;  %v4986_v58 = vmul.f32 %v4748_v61, %v4748_v61  ;;  %v22313_v1 = vpop.f32.mrb[177].mxu1  ;;  %v15085_v11 = vld [vmem:[%s18758_s9 + $0x464] sm:$0xf] }
 0x27a   : > { %v6643_v5 = vsel %vm20664_vm8, %v6641_v46, %v6642_v10  ;;  %v7216_v31 = vrot.slane %v15165_v41, 5  ;;  %v7219_v48 = vrot.slane %v15166_v43, 5  ;;  %v14952_v23 = vrot.slane %v14924_v57, 9  ;;  %v22320_v10 = vpop.f32.mrb[178].mxu0  ;;  %v22322_v41 = vpop.f32.mrb[178].mxu1  ;;  %17513 = vmatprep.subr.bf16.mxu0 %v18365_v14 }
 0x27b   : > { %v16366_v38 = vpack.c.bf16 %v4756_v54, %v4756_v54  ;;  %v4988_v24 = vmul.f32 %v4756_v54, %v4756_v54  ;;  %4916 = vst [vmem:[%s19793_s18 + $0x1d4] sm:$0xf] %v16364_v47  ;;  %v4948_v7 = vadd.f32 %v4947_v44, %v4753_v12  ;;  %v5017_v63 = vadd.f32 %v5016_v55, %v4986_v58  ;;  %v15086_v49 = vld [vmem:[%s18758_s9 + $0x468] sm:$0x7]  ;;  %v22327_v61 = vpop.f32.mrb[179].mxu0  ;;  %v22329_v46 = vpop.f32.mrb[179].mxu1 }
 0x27c   : > { %v15048_v43 = vcombine.low %v6640_v62, %v6643_v5  ;;  %v7217_v57 = vsel %vm18773_vm4, %v15192_v51, %v7216_v31  ;;  %v7218_v0 = vrot.slane %v7216_v31, 4  ;;  %v6351_v9 = vrot.slane %v14925_v36, 5  ;;  %v15007_v5 = vld [vmem:[%s18758_s9 + $0x338] sm:$0x8]  ;;  %v15008_v31 = vld [vmem:[%s18758_s9 + $0x33c] sm:$0xf] }
 0x27d   : > { %4918 = vst [vmem:[%s19793_s18 + $0x1f4] sm:$0xf] %v16366_v38  ;;  %v4949_v12 = vadd.f32 %v4948_v7, %v4756_v54  ;;  %v5018_v55 = vadd.f32 %v5017_v63, %v4987_v40  ;;  %v6354_v47 = vrot.slane %v14926_v33, 5  ;;  %v15112_v62 = vrot.slane %v15084_v4, 11  ;;  %v15009_v33 = vld [vmem:[%s18758_s9 + $0x340] sm:$0x7] }
 0x27e   : > { %8779 = vmatprep.mubr.bf16.mxu0 %v15048_v43  ;;  %v7220_v51 = vsel %vm18773_vm4, %v7218_v0, %v7219_v48  ;;  %v6352_v36 = vsel %vm18773_vm4, %v14952_v23, %v6351_v9  ;;  %v6353_v44 = vrot.slane %v6351_v9, 4  ;;  %v6928_v58 = vrot.slane %v15085_v11, 7  ;;  %v15167_v4 = vld [vmem:[%s18758_s9 + $0x484] sm:$0xe]  ;;  %v15168_v11 = vld [vmem:[%s18758_s9 + $0x488] sm:$0xf] }
 0x27f   : > { %v4950_v14 = vrot.slane %v4949_v12, 4  ;;  %v5019_v38 = vadd.f32 %v5018_v55, %v4988_v24  ;;  %v15208_v54 = vcombine.low %v7217_v57, %v7220_v51  ;;  %v6931_v40 = vrot.slane %v15086_v49, 7  ;;  %v15169_v43 = vld [vmem:[%s18758_s9 + $0x48c] sm:$0x1]  ;;  %v22350_v24 = vpop.f32.mrb[180].mxu0 }
 0x280   : > { %v6355_v7 = vsel %vm18773_vm4, %v6353_v44, %v6354_v47  ;;  %v6929_v48 = vsel %vm20664_vm8, %v15112_v62, %v6928_v58  ;;  %v6930_v63 = vrot.slane %v6928_v58, 4  ;;  %v22346_v23 = vadd.f32 %v22092_v39, %v22069_v8  ;;  %v14927_v55 = vld [vmem:[%s18758_s9 + $0x334] sm:$0xe]  ;;  %v22357_v47 = vpop.f32.mrb[180].mxu1  ;;  %v22359_v62 = vpop.f32.mrb[181].mxu0  ;;  %v18366_v8 = vld [vmem:[%s25093_s2 + $0x5c0] sm:$0xff]  }
 0x281   : > { %v4951_v57 = vadd.f32 %v4950_v14, %v4949_v12  ;;  %v5020_v0 = vrot.slane %v5019_v38, 4  ;;  %8940 = vmatprep.mubr.bf16.mxu1 %v15208_v54  ;;  %v14968_v9 = vcombine.low %v6352_v36, %v6355_v7  ;;  %v22354_v49 = vadd.f32 %v22111_v15, %v22082_v28  ;;  %v14928_v51 = vld [vmem:[%s18758_s9 + $0x338] sm:$0xf]  ;;  %v22375_v36 = vpop.f32.mrb[181].mxu1  ;;  %v22377_v44 = vpop.f32.mrb[182].mxu0  ;;  %17625 = vmatprep.subr.bf16.mxu1 %v18366_v8 }
 0x282   : > { %25161 = vst [vmem:[#allocation15_spill] sm:$0xff] %v22346_v23  ;;  %v6932_v39 = vsel %vm20664_vm8, %v6930_v63, %v6931_v40  ;;  %v22368_v12 = vadd.f32 %v22117_v19, %v22113_v13  ;;  %v22372_v28 = vadd.f32 %v22127_v20, %v22115_v45  ;;  %v15033_v15 = vrot.slane %v15007_v5, 11  ;;  %v14929_v7 = vld [vmem:[%s18758_s9 + $0x33c] sm:$0x1]  ;;  %v22380_v63 = vpop.f32.mrb[182].mxu1  ;;  %v22382_v13 = vpop.f32.mrb[183].mxu0 }
 0x283   : > { %25162 = vst [vmem:[#allocation17_spill] sm:$0xff] %v22354_v49  ;;  %v4952_v58 = vrot.slane %v4951_v57, 2  ;;  %v5021_v14 = vadd.f32 %v5020_v0, %v5019_v38  ;;  %8780 = vmatmul.mubr.bf16.gmra.mrb[8].mxu0 %v14968_v9  ;;  %v15128_v54 = vcombine.low %v6929_v48, %v6932_v39  ;;  %v6646_v40 = vrot.slane %v15008_v31, 7  ;;  %25165 = vst [vmem:[#allocation19_spill] sm:$0xff] %v22380_v63  ;;  %v15087_v0 = vld [vmem:[%s18758_s9 + $0x47c] sm:$0x8] }
 0x284   : > { %25163 = vst [vmem:[#allocation12_spill] sm:$0xff] %v22368_v12  ;;  %25164 = vst [vmem:[#allocation16_spill] sm:$0xff] %v22372_v28  ;;  %v6649_v45 = vrot.slane %v15009_v33, 7  ;;  %v15193_v19 = vrot.slane %v15167_v4, 9  ;;  %v7223_v20 = vrot.slane %v15168_v11, 5  ;;  %v7226_v5 = vrot.slane %v15169_v43, 5 }
 0x285   : > { %v22384_v28 = vpop.f32.mrb[183].mxu1  ;;  %v4953_v12 = vadd.f32 %v4952_v58, %v4951_v57  ;;  %v5022_v38 = vrot.slane %v5021_v14, 2  ;;  %8941 = vmatmul.mubr.bf16.gmra.mrb[8].mxu1 %v15128_v54  ;;  %v6647_v31 = vsel %vm20664_vm8, %v15033_v15, %v6646_v40  ;;  %v6648_v48 = vrot.slane %v6646_v40, 4  ;;  %v15088_v43 = vld [vmem:[%s18758_s9 + $0x480] sm:$0xf]  ;;  %v22392_v57 = vpop.f32.mrb[184].mxu0 }
 0x286   : > { %25166 = vst [vmem:[#allocation18_spill] sm:$0xff] %v22384_v28  ;;  %v7224_v9 = vsel %vm18773_vm4, %v15193_v19, %v7223_v20  ;;  %v7225_v33 = vrot.slane %v7223_v20, 4  ;;  %v14953_v4 = vrot.slane %v14927_v55, 9  ;;  %v6358_v11 = vrot.slane %v14928_v51, 5  ;;  %25167 = vst [vmem:[#allocation20_spill] sm:$0xff] %v22392_v57  ;;  %v22406_v57 = vpop.f32.mrb[184].mxu1 }
 0x287   : > { %v4954_v8 = vrot.slane %v4953_v12, 1  ;;  %v5023_v39 = vadd.f32 %v5022_v38, %v5021_v14  ;;  %v6650_v15 = vsel %vm20664_vm8, %v6648_v48, %v6649_v45  ;;  %v6361_v58 = vrot.slane %v14929_v7, 5  ;;  %v15089_v54 = vld [vmem:[%s18758_s9 + $0x484] sm:$0x7]  ;;  %v15010_v40 = vld [vmem:[%s18758_s9 + $0x354] sm:$0x8] }
 0x288   : > { %v15049_v19 = vcombine.low %v6647_v31, %v6650_v15  ;;  %v7227_v55 = vsel %vm18773_vm4, %v7225_v33, %v7226_v5  ;;  %v6359_v51 = vsel %vm18773_vm4, %v14953_v4, %v6358_v11  ;;  %v6360_v20 = vrot.slane %v6358_v11, 4  ;;  %v15011_v49 = vld [vmem:[%s18758_s9 + $0x358] sm:$0xf]  ;;  %v15012_v23 = vld [vmem:[%s18758_s9 + $0x35c] sm:$0x7] }
 0x289   : > { %v15170_v14 = vld [vmem:[%s18758_s9 + $0x4a0] sm:$0xe]  ;;  %v15171_v38 = vld [vmem:[%s18758_s9 + $0x4a4] sm:$0xf]  ;;  %v4955_v7 = vadd.f32 %v4954_v8, %v4953_v12  ;;  %v5024_v45 = vrot.slane %v5023_v39, 1  ;;  %v15209_v48 = vcombine.low %v7224_v9, %v7227_v55  ;;  %v15113_v28 = vrot.slane %v15087_v0, 11 }
 0x28a   : > { %v15172_v31 = vld [vmem:[%s18758_s9 + $0x4a8] sm:$0x1]  ;;  %v14930_v15 = vld [vmem:[%s18758_s9 + $0x350] sm:$0xe]  ;;  %v14931_v63 = vld [vmem:[%s18758_s9 + $0x354] sm:$0xf]  ;;  %8787 = vmatprep.mubr.bf16.mxu0 %v15049_v19  ;;  %v6362_v5 = vsel %vm18773_vm4, %v6360_v20, %v6361_v58  ;;  %v22415_v12 = vadd.f32 %v22146_v21, %v22129_v25  ;;  %v22423_v19 = vadd.f32 %v22166_v56, %v22160_v3 }
 0x28b   : > { %v6935_v33 = vrot.slane %v15088_v43, 7  ;;  %v6938_v4 = vrot.slane %v15089_v54, 7  ;;  %v5025_v11 = vadd.f32 %v5024_v45, %v5023_v39  ;;  %8948 = vmatprep.mubr.bf16.mxu1 %v15209_v48  ;;  %v14969_v9 = vcombine.low %v6359_v51, %v6362_v5  ;;  %v25169_v0 = vld [vmem:[#allocation13_spill] sm:$0xff]  ;;  %v14932_v58 = vld [vmem:[%s18758_s9 + $0x358] sm:$0x1]  ;;  %v22436_v48 = vpop.f32.mrb[185].mxu0 }
 0x28c   : > { %25168 = vst [vmem:[#allocation24_spill] sm:$0xff] %v22415_v12  ;;  %v22419_v8 = vadd.f32 %v25169_v0, %v22133_v42  ;;  %25171 = vst [vmem:[#allocation25_spill] sm:$0xff] %v22423_v19  ;;  %v25172_v25 = vld [vmem:[#allocation21_spill] sm:$0xff]  ;;  %v15034_v39 = vrot.slane %v15010_v40, 11  ;;  %v15090_v55 = vld [vmem:[%s18758_s9 + $0x498] sm:$0x8] }
 0x28d   : > { %4956 = vst [vmem:[%s21193_s16 + $0x2] sm:$0x1] %v4955_v7  ;;  %v6936_v43 = vsel %vm20664_vm8, %v15113_v28, %v6935_v33  ;;  %v6937_v54 = vrot.slane %v6935_v33, 4  ;;  %v22431_v21 = vadd.f32 %v22168_v2, %v25172_v25  ;;  %v15091_v51 = vld [vmem:[%s18758_s9 + $0x49c] sm:$0xf]  ;;  %8788 = vmatmul.mubr.bf16.gmra.mrb[12].mxu0 %v14969_v9  ;;  %v6653_v20 = vrot.slane %v15011_v49, 7 }
 0x28e   : > { %25170 = vst [vmem:[#allocation13_spill] sm:$0xff] %v22419_v8  ;;  %v15092_v42 = vld [vmem:[%s18758_s9 + $0x4a0] sm:$0x7]  ;;  %v6656_v45 = vrot.slane %v15012_v23, 7  ;;  %v15194_v56 = vrot.slane %v15170_v14, 9  ;;  %v7230_v3 = vrot.slane %v15171_v38, 5 }
 0x28f   : > { %25173 = vst [vmem:[#allocation21_spill] sm:$0xff] %v22431_v21  ;;  %v22438_v7 = vpop.f32.mrb[185].mxu1  ;;  %5026 = vst [vmem:[%s21193_s16 + $0x3] sm:$0x1] %v5025_v11  ;;  %v6939_v28 = vsel %vm20664_vm8, %v6937_v54, %v6938_v4  ;;  %v7233_v2 = vrot.slane %v15172_v31, 5  ;;  %v14954_v40 = vrot.slane %v14930_v15, 9  ;;  %v6654_v14 = vsel %vm20664_vm8, %v15034_v39, %v6653_v20 }
 0x290   : > { %v6365_v5 = vrot.slane %v14931_v63, 5  ;;  %v22443_v33 = vpop.f32.mrb[186].mxu0  ;;  %v22445_v23 = vpop.f32.mrb[186].mxu1  ;;  %v15129_v49 = vcombine.low %v6936_v43, %v6939_v28  ;;  %v6655_v38 = vrot.slane %v6653_v20, 4  ;;  %v7231_v11 = vsel %vm18773_vm4, %v15194_v56, %v7230_v3  ;;  %v15013_v4 = vld [vmem:[%s18758_s9 + $0x370] sm:$0x8] }
 0x291   : > { %v22452_v31 = vpop.f32.mrb[187].mxu0  ;;  %v22454_v15 = vpop.f32.mrb[187].mxu1  ;;  %v7232_v63 = vrot.slane %v7230_v3, 4  ;;  %v6368_v43 = vrot.slane %v14932_v58, 5  ;;  %v15014_v54 = vld [vmem:[%s18758_s9 + $0x374] sm:$0xf] }
 0x292   : > { %v6366_v9 = vsel %vm18773_vm4, %v14954_v40, %v6365_v5  ;;  %v6367_v0 = vrot.slane %v6365_v5, 4  ;;  %v15015_v25 = vld [vmem:[%s18758_s9 + $0x378] sm:$0x7]  ;;  %v15173_v39 = vld [vmem:[%s18758_s9 + $0x4bc] sm:$0xe]  ;;  %8949 = vmatmul.mubr.bf16.gmra.mrb[12].mxu1 %v15129_v49  ;;  %v6657_v20 = vsel %vm20664_vm8, %v6655_v38, %v6656_v45  ;;  %v15114_v56 = vrot.slane %v15090_v55, 11 }
 0x293   : > { %v6942_v28 = vrot.slane %v15091_v51, 7  ;;  %v6945_v21 = vrot.slane %v15092_v42, 7  ;;  %v15174_v3 = vld [vmem:[%s18758_s9 + $0x4c0] sm:$0xf]  ;;  %v15175_v19 = vld [vmem:[%s18758_s9 + $0x4c4] sm:$0x1]  ;;  %v15050_v58 = vcombine.low %v6654_v14, %v6657_v20  ;;  %v7234_v5 = vsel %vm18773_vm4, %v7232_v63, %v7233_v2 }
 0x294   : > { %v22465_v40 = vpop.f32.mrb[188].mxu0  ;;  %v6369_v8 = vsel %vm18773_vm4, %v6367_v0, %v6368_v43  ;;  %v22473_v49 = vadd.f32 %v22190_v35, %v22172_v6  ;;  %v14933_v55 = vld [vmem:[%s18758_s9 + $0x36c] sm:$0xe]  ;;  %v14934_v51 = vld [vmem:[%s18758_s9 + $0x370] sm:$0xf]  ;;  %v15210_v45 = vcombine.low %v7231_v11, %v7234_v5  ;;  %v22482_v2 = vpop.f32.mrb[188].mxu1  ;;  %v22486_v63 = vadd.f32 %v22213_v22, %v22182_v17 }
 0x295   : > { %25174 = vst [vmem:[#allocation26_spill] sm:$0xff] %v22465_v40  ;;  %v14935_v42 = vld [vmem:[%s18758_s9 + $0x374] sm:$0x1]  ;;  %v14970_v38 = vcombine.low %v6366_v9, %v6369_v8  ;;  %v6943_v12 = vsel %vm20664_vm8, %v15114_v56, %v6942_v28  ;;  %v6944_v14 = vrot.slane %v6942_v28, 4  ;;  %v15093_v20 = vld [vmem:[%s18758_s9 + $0x4b4] sm:$0x8]  ;;  %8795 = vmatprep.mubr.bf16.mxu0 %v15050_v58  ;;  %v22490_v6 = vadd.f32 %v22221_v30, %v22215_v18 }
 0x296   : > { %v15094_v40 = vld [vmem:[%s18758_s9 + $0x4b8] sm:$0xf]  ;;  %v15035_v9 = vrot.slane %v15013_v4, 11  ;;  %v15095_v0 = vld [vmem:[%s18758_s9 + $0x4bc] sm:$0x7]  ;;  %v22497_v43 = vpop.f32.mrb[189].mxu0  ;;  %8956 = vmatprep.mubr.bf16.mxu1 %v15210_v45 }
 0x297   : > { %v25175_v35 = vld [vmem:[#allocation22_spill] sm:$0xff]  ;;  %8796 = vmatmul.mubr.bf16.gmra.mrb[16].mxu0 %v14970_v38  ;;  %v6946_v56 = vsel %vm20664_vm8, %v6944_v14, %v6945_v21  ;;  %v6660_v28 = vrot.slane %v15014_v54, 7  ;;  %v6663_v17 = vrot.slane %v15015_v25, 7  ;;  %v15195_v22 = vrot.slane %v15173_v39, 9  ;;  %v22501_v58 = vpop.f32.mrb[189].mxu1 }
 0x298   : > { %v25176_v11 = vld [vmem:[#allocation14_spill] sm:$0xff]  ;;  %v15130_v18 = vcombine.low %v6943_v12, %v6946_v56  ;;  %v7237_v30 = vrot.slane %v15174_v3, 5  ;;  %v7240_v5 = vrot.slane %v15175_v19, 5  ;;  %v14955_v4 = vrot.slane %v14933_v55, 9  ;;  %v22507_v54 = vpop.f32.mrb[190].mxu1 }
 0x299   : > { %v22494_v8 = vadd.f32 %v25176_v11, %v25175_v35  ;;  %v22503_v35 = vpop.f32.mrb[190].mxu0  ;;  %v6661_v45 = vsel %vm20664_vm8, %v15035_v9, %v6660_v28  ;;  %v6662_v38 = vrot.slane %v6660_v28, 4  ;;  %v6372_v11 = vrot.slane %v14934_v51, 5  ;;  %v15016_v19 = vld [vmem:[%s18758_s9 + $0x38c] sm:$0x8]  ;;  %v22520_v28 = vpop.f32.mrb[191].mxu1 }
 0x29a   : > { %v6375_v21 = vrot.slane %v14935_v42, 5  ;;  %v7238_v25 = vsel %vm18773_vm4, %v15195_v22, %v7237_v30  ;;  %v7239_v39 = vrot.slane %v7237_v30, 4  ;;  %v15115_v14 = vrot.slane %v15093_v20, 11  ;;  %v15017_v3 = vld [vmem:[%s18758_s9 + $0x390] sm:$0xf]  ;;  %v22514_v56 = vpop.f32.mrb[191].mxu0  ;;  %8957 = vmatmul.mubr.bf16.gmra.mrb[16].mxu1 %v15130_v18 }
 0x29b   : > { %25177 = vst [vmem:[#allocation22_spill] sm:$0xff] %v22494_v8  ;;  %v6949_v12 = vrot.slane %v15094_v40, 7  ;;  %v15018_v55 = vld [vmem:[%s18758_s9 + $0x394] sm:$0x7]  ;;  %v6664_v51 = vsel %vm20664_vm8, %v6662_v38, %v6663_v17  ;;  %v6373_v42 = vsel %vm18773_vm4, %v14955_v4, %v6372_v11  ;;  %v6374_v9 = vrot.slane %v6372_v11, 4 }
 0x29c   : > { %v6952_v20 = vrot.slane %v15095_v0, 7  ;;  %v15051_v40 = vcombine.low %v6661_v45, %v6664_v51  ;;  %v7241_v22 = vsel %vm18773_vm4, %v7239_v39, %v7240_v5  ;;  %v15176_v17 = vld [vmem:[%s18758_s9 + $0x4d8] sm:$0xe]  ;;  %v15177_v38 = vld [vmem:[%s18758_s9 + $0x4dc] sm:$0xf]  ;;  %v22536_v5 = vadd.f32 %v22261_v37, %v22255_v52 }
 0x29d   : > { %v6950_v18 = vsel %vm20664_vm8, %v15115_v14, %v6949_v12  ;;  %v6951_v30 = vrot.slane %v6949_v12, 4  ;;  %v15211_v8 = vcombine.low %v7238_v25, %v7241_v22  ;;  %v6376_v4 = vsel %vm18773_vm4, %v6374_v9, %v6375_v21  ;;  %v25178_v0 = vld [vmem:[#allocation23_spill] sm:$0xff]  ;;  %v14936_v39 = vld [vmem:[%s18758_s9 + $0x388] sm:$0xe]  ;;  %v14937_v14 = vld [vmem:[%s18758_s9 + $0x38c] sm:$0xf] }
 0x29e   : > { %v22532_v11 = vadd.f32 %v22257_v16, %v25178_v0  ;;  %v15178_v45 = vld [vmem:[%s18758_s9 + $0x4e0] sm:$0x1]  ;;  %8803 = vmatprep.mubr.bf16.mxu0 %v15051_v40  ;;  %v14971_v12 = vcombine.low %v6373_v42, %v6376_v4  ;;  %v22545_v21 = vadd.f32 %v22274_v27, %v22263_v60  ;;  %v22549_v16 = vadd.f32 %v22281_v59, %v22272_v29  ;;  %v14938_v51 = vld [vmem:[%s18758_s9 + $0x390] sm:$0x1]  ;;  %v15096_v52 = vld [vmem:[%s18758_s9 + $0x4d0] sm:$0x8] }
 0x29f   : > { %v6953_v25 = vsel %vm20664_vm8, %v6951_v30, %v6952_v20  ;;  %v15097_v37 = vld [vmem:[%s18758_s9 + $0x4d4] sm:$0xf]  ;;  %8964 = vmatprep.mubr.bf16.mxu1 %v15211_v8  ;;  %v15036_v22 = vrot.slane %v15016_v19, 11  ;;  %v6667_v0 = vrot.slane %v15017_v3, 7  ;;  %v6670_v42 = vrot.slane %v15018_v55, 7 }
 0x2a0   : > { %25179 = vst [vmem:[#allocation14_spill] sm:$0xff] %v22549_v16  ;;  %v15131_v9 = vcombine.low %v6950_v18, %v6953_v25  ;;  %v15098_v40 = vld [vmem:[%s18758_s9 + $0x4d8] sm:$0x7]  ;;  %8804 = vmatmul.mubr.bf16.gmra.mrb[20].mxu0 %v14971_v12  ;;  %v15196_v20 = vrot.slane %v15176_v17, 9  ;;  %v7244_v60 = vrot.slane %v15177_v38, 5  ;;  %v7247_v27 = vrot.slane %v15178_v45, 5 }
 0x2a1   : > { %v14956_v30 = vrot.slane %v14936_v39, 9  ;;  %v6668_v29 = vsel %vm20664_vm8, %v15036_v22, %v6667_v0  ;;  %v6669_v59 = vrot.slane %v6667_v0, 4  ;;  %v6379_v8 = vrot.slane %v14937_v14, 5  ;;  %v15019_v17 = vld [vmem:[%s18758_s9 + $0x3a8] sm:$0x8] }
 0x2a2   : > { %v6382_v19 = vrot.slane %v14938_v51, 5  ;;  %v7245_v3 = vsel %vm18773_vm4, %v15196_v20, %v7244_v60  ;;  %v7246_v55 = vrot.slane %v7244_v60, 4  ;;  %v15116_v18 = vrot.slane %v15096_v52, 11  ;;  %v15020_v38 = vld [vmem:[%s18758_s9 + $0x3ac] sm:$0xf]  ;;  %8965 = vmatmul.mubr.bf16.gmra.mrb[20].mxu1 %v15131_v9  ;;  %v25204_v32 = vld [vmem:[#allocation22_spill] sm:$0xff] }
 0x2a3   : > { %v6956_v4 = vrot.slane %v15097_v37, 7  ;;  %v15021_v45 = vld [vmem:[%s18758_s9 + $0x3b0] sm:$0x7]  ;;  %v6671_v39 = vsel %vm20664_vm8, %v6669_v59, %v6670_v42  ;;  %v6380_v14 = vsel %vm18773_vm4, %v14956_v30, %v6379_v8  ;;  %v6381_v12 = vrot.slane %v6379_v8, 4  ;;  %v15179_v51 = vld [vmem:[%s18758_s9 + $0x4f4] sm:$0xe] }
 0x2a4   : > { %v6959_v25 = vrot.slane %v15098_v40, 7  ;;  %v15180_v22 = vld [vmem:[%s18758_s9 + $0x4f8] sm:$0xf]  ;;  %v15181_v0 = vld [vmem:[%s18758_s9 + $0x4fc] sm:$0x1]  ;;  %v15052_v37 = vcombine.low %v6668_v29, %v6671_v39  ;;  %v7248_v20 = vsel %vm18773_vm4, %v7246_v55, %v7247_v27  ;;  %v22576_v30 = vpop.f32.mrb[192].mxu0  ;;  %v22582_v29 = vadd.f32 %v22311_v53, %v22305_v34 }
 0x2a5   : > { %v14939_v52 = vld [vmem:[%s18758_s9 + $0x3a4] sm:$0xe]  ;;  %v6957_v9 = vsel %vm20664_vm8, %v15116_v18, %v6956_v4  ;;  %v6958_v42 = vrot.slane %v6956_v4, 4  ;;  %v14940_v60 = vld [vmem:[%s18758_s9 + $0x3a8] sm:$0xf]  ;;  %v15212_v40 = vcombine.low %v7245_v3, %v7248_v20  ;;  %v6383_v8 = vsel %vm18773_vm4, %v6381_v12, %v6382_v19  ;;  %v22601_v39 = vpop.f32.mrb[192].mxu1 }
 0x2a6   : > { %v14941_v59 = vld [vmem:[%s18758_s9 + $0x3ac] sm:$0x1]  ;;  %25180 = vst [vmem:[#allocation23_spill] sm:$0xff] %v22582_v29  ;;  %v22586_v27 = vadd.f32 %v22313_v1, %v22307_v50  ;;  %v15099_v55 = vld [vmem:[%s18758_s9 + $0x4ec] sm:$0x8]  ;;  %8811 = vmatprep.mubr.bf16.mxu0 %v15052_v37  ;;  %v14972_v18 = vcombine.low %v6380_v14, %v6383_v8  ;;  %v22593_v3 = vadd.f32 %v22327_v61, %v22320_v10  ;;  %v22603_v50 = vpop.f32.mrb[193].mxu0 }
 0x2a7   : > { %v6960_v4 = vsel %vm20664_vm8, %v6958_v42, %v6959_v25  ;;  %v22597_v19 = vadd.f32 %v22329_v46, %v22322_v41  ;;  %v15100_v34 = vld [vmem:[%s18758_s9 + $0x4f0] sm:$0xf]  ;;  %v15101_v53 = vld [vmem:[%s18758_s9 + $0x4f4] sm:$0x7]  ;;  %8972 = vmatprep.mubr.bf16.mxu1 %v15212_v40  ;;  %v15037_v14 = vrot.slane %v15019_v17, 11  ;;  %v6674_v12 = vrot.slane %v15020_v38, 7 }
 0x2a8   : > { %25181 = vst [vmem:[#allocation27_spill] sm:$0xff] %v22586_v27  ;;  %25182 = vst [vmem:[#allocation28_spill] sm:$0xff] %v22593_v3  ;;  %v15132_v1 = vcombine.low %v6957_v9, %v6960_v4  ;;  %v6677_v37 = vrot.slane %v15021_v45, 7  ;;  %v22605_v25 = vpop.f32.mrb[193].mxu1  ;;  %v22607_v20 = vpop.f32.mrb[194].mxu0  ;;  %8812 = vmatmul.mubr.bf16.gmra.mrb[24].mxu0 %v14972_v18  ;;  %v15197_v10 = vrot.slane %v15179_v51, 9 }
 0x2a9   : > { %25183 = vst [vmem:[#allocation29_spill] sm:$0xff] %v22597_v19  ;;  %v7251_v41 = vrot.slane %v15180_v22, 5  ;;  %v7254_v61 = vrot.slane %v15181_v0, 5  ;;  %v14957_v46 = vrot.slane %v14939_v52, 9  ;;  %v22609_v42 = vpop.f32.mrb[194].mxu1  ;;  %v22611_v8 = vpop.f32.mrb[195].mxu0  ;;  %v6675_v17 = vsel %vm20664_vm8, %v15037_v14, %v6674_v12 }
 0x2aa   : > { %v6676_v38 = vrot.slane %v6674_v12, 4  ;;  %v6386_v45 = vrot.slane %v14940_v60, 5  ;;  %v6389_v9 = vrot.slane %v14941_v59, 5  ;;  %v22615_v40 = vpop.f32.mrb[195].mxu1  ;;  %v15117_v0 = vrot.slane %v15099_v55, 11  ;;  %8973 = vmatmul.mubr.bf16.gmra.mrb[24].mxu1 %v15132_v1 }
 0x2ab   : > { %v7252_v51 = vsel %vm18773_vm4, %v15197_v10, %v7251_v41  ;;  %v7253_v22 = vrot.slane %v7251_v41, 4  ;;  %v6963_v52 = vrot.slane %v15100_v34, 7  ;;  %v15214_v18 = vld [vmem:[%s18758_s9 + $0x354] sm:$0x8]  ;;  %v15215_v4 = vld [vmem:[%s18758_s9 + $0x358] sm:$0xf] }
 0x2ac   : > { %v15216_v19 = vld [vmem:[%s18758_s9 + $0x35c] sm:$0x7]  ;;  %v6678_v60 = vsel %vm20664_vm8, %v6676_v38, %v6677_v37  ;;  %v6387_v59 = vsel %vm18773_vm4, %v14957_v46, %v6386_v45  ;;  %v6388_v14 = vrot.slane %v6386_v45, 4  ;;  %v6966_v12 = vrot.slane %v15101_v53, 7  ;;  %v9562_v3 = vld [vmem:[%s18758_s9 + $0x8] sm:$0xe] }
 0x2ad   : > { %v9563_v10 = vld [vmem:[%s18758_s9 + $0xc] sm:$0xf]  ;;  %v9564_v41 = vld [vmem:[%s18758_s9 + $0x10] sm:$0x1]  ;;  %v15053_v55 = vcombine.low %v6675_v17, %v6678_v60  ;;  %v7255_v34 = vsel %vm18773_vm4, %v7253_v22, %v7254_v61  ;;  %v6964_v27 = vsel %vm20664_vm8, %v15117_v0, %v6963_v52  ;;  %v6965_v1 = vrot.slane %v6963_v52, 4  ;;  %v25185_v22 = vld [vmem:[#allocation18_spill] sm:$0xff] }
 0x2ae   : > { %v15217_v29 = vld [vmem:[%s18758_s9 + $0x370] sm:$0x8]  ;;  %v15218_v16 = vld [vmem:[%s18758_s9 + $0x374] sm:$0xf]  ;;  %v15213_v37 = vcombine.low %v7252_v51, %v7255_v34  ;;  %v6390_v46 = vsel %vm18773_vm4, %v6388_v14, %v6389_v9  ;;  %v22639_v53 = vadd.f32 %v22359_v62, %v22350_v24  ;;  %v22643_v17 = vadd.f32 %v22375_v36, %v22357_v47  ;;  %v15219_v61 = vld [vmem:[%s18758_s9 + $0x378] sm:$0x7] }
 0x2af   : > { %8819 = vmatprep.mubr.bf16.mxu0 %v15053_v55  ;;  %v14973_v38 = vcombine.low %v6387_v59, %v6390_v46  ;;  %v6967_v45 = vsel %vm20664_vm8, %v6965_v1, %v6966_v12  ;;  %v22650_v51 = vadd.f32 %v22382_v13, %v22377_v44  ;;  %v25184_v9 = vld [vmem:[#allocation19_spill] sm:$0xff]  ;;  %v15262_v47 = vrot.slane %v15214_v18, 11  ;;  %v15220_v52 = vld [vmem:[%s18758_s9 + $0x38c] sm:$0x8]  ;;  %v22657_v60 = vpop.f32.mrb[196].mxu0  ;;  %v22663_v34 = vpop.f32.mrb[196].mxu1 }
 0x2b0   : > { %v22654_v24 = vadd.f32 %v25185_v22, %v25184_v9  ;;  %8980 = vmatprep.mubr.bf16.mxu1 %v15213_v37  ;;  %v15133_v62 = vcombine.low %v6964_v27, %v6967_v45  ;;  %v7434_v36 = vrot.slane %v15215_v4, 7  ;;  %v7437_v0 = vrot.slane %v15216_v19, 7  ;;  %v15221_v44 = vld [vmem:[%s18758_s9 + $0x390] sm:$0xf]  ;;  %v22661_v13 = vld [vmem:[%s18758_s9 + $0x394] sm:$0x7] }
 0x2b1   : > { %8820 = vmatmul.mubr.bf16.gmra.mrb[28].mxu0 %v14973_v38  ;;  %v15558_v59 = vrot.slane %v9562_v3, 9  ;;  %v9660_v14 = vrot.slane %v9563_v10, 5  ;;  %v9663_v12 = vrot.slane %v9564_v41, 5  ;;  %v15263_v55 = vrot.slane %v15217_v29, 11  ;;  %v22665_v1 = vpop.f32.mrb[197].mxu0  ;;  %v22669_v3 = vpop.f32.mrb[197].mxu1 }
 0x2b2   : > { %25186 = vst [vmem:[#allocation19_spill] sm:$0xff] %v22654_v24  ;;  %v7435_v27 = vsel %vm20664_vm8, %v15262_v47, %v7434_v36  ;;  %v7436_v19 = vrot.slane %v7434_v36, 4  ;;  %v7441_v18 = vrot.slane %v15218_v16, 7  ;;  %v7444_v4 = vrot.slane %v15219_v61, 7  ;;  %v22671_v10 = vpop.f32.mrb[198].mxu0  ;;  %v25187_v37 = vld [vmem:[#allocation20_spill] sm:$0xff]  ;;  %8981 = vmatmul.mubr.bf16.gmra.mrb[28].mxu1 %v15133_v62 }
 0x2b3   : > { %v9661_v29 = vsel %vm18773_vm4, %v15558_v59, %v9660_v14  ;;  %v9662_v41 = vrot.slane %v9660_v14, 4  ;;  %v22677_v46 = vadd.f32 %v22436_v48, %v25187_v37  ;;  %v22681_v38 = vadd.f32 %v22438_v7, %v22406_v57  ;;  %v9565_v16 = vld [vmem:[%s18758_s9 + $0x24] sm:$0xe]  ;;  %v22684_v61 = vpop.f32.mrb[198].mxu1  ;;  %v22686_v45 = vpop.f32.mrb[199].mxu0 }
 0x2b4   : > { %v7438_v9 = vsel %vm20664_vm8, %v7436_v19, %v7437_v0  ;;  %v7442_v48 = vsel %vm20664_vm8, %v15263_v55, %v7441_v18  ;;  %v7443_v22 = vrot.slane %v7441_v18, 4  ;;  %v22694_v57 = vadd.f32 %v22452_v31, %v22443_v33  ;;  %v9566_v7 = vld [vmem:[%s18758_s9 + $0x28] sm:$0xf]  ;;  %v9567_v47 = vld [vmem:[%s18758_s9 + $0x2c] sm:$0x1]  ;;  %v22698_v36 = vpop.f32.mrb[199].mxu1 }
 0x2b5   : > { %25188 = vst [vmem:[#allocation18_spill] sm:$0xff] %v22677_v46  ;;  %25189 = vst [vmem:[#allocation20_spill] sm:$0xff] %v22681_v38  ;;  %v15278_v59 = vcombine.low %v7435_v27, %v7438_v9  ;;  %v9664_v62 = vsel %vm18773_vm4, %v9662_v41, %v9663_v12  ;;  %v22704_v0 = vadd.f32 %v22454_v15, %v22445_v23  ;;  %v15264_v14 = vrot.slane %v15220_v52, 11  ;;  %v15223_v55 = vld [vmem:[%s18758_s9 + $0x3a8] sm:$0x8]  ;;  %v18364_v18 = vld [vmem:[%s18758_s9] sm:$0xff]  }
 0x2b6   : > { %25190 = vst [vmem:[#allocation30_spill] sm:$0xff] %v22694_v57  ;;  %v15224_v19 = vld [vmem:[%s18758_s9 + $0x3ac] sm:$0xf]  ;;  %v15574_v33 = vcombine.low %v9661_v29, %v9664_v62  ;;  %v7445_v31 = vsel %vm20664_vm8, %v7443_v22, %v7444_v4  ;;  %v18367_v27 = vld [vmem:[%s25093_s2 + $0x500] sm:$0xff]   ;;  %v7448_v37 = vrot.slane %v15221_v44, 7  ;;  %v7451_v12 = vrot.slane %v22661_v13, 7 }
 0x2b7   : > { %25191 = vst [vmem:[#allocation31_spill] sm:$0xff] %v22704_v0  ;;  %v15225_v41 = vld [vmem:[%s18758_s9 + $0x3b0] sm:$0x7]  ;;  %17994 = vmatprep.mubr.bf16.mxu0 %v15278_v59  ;;  %v15279_v23 = vcombine.low %v7442_v48, %v7445_v31  ;;  %v18368_v15 = vld [vmem:[%s25093_s2 + $0x580] sm:$0xff]   ;;  %v15559_v52 = vrot.slane %v9565_v16, 9  ;;  %v9667_v4 = vrot.slane %v9566_v7, 5 }
 0x2b8   : > { %v9670_v29 = vrot.slane %v9567_v47, 5  ;;  %v18370_v9 = vld [vmem:[%s25093_s2 + $0x548] sm:$0xff]   ;;  %v15226_v44 = vld [vmem:[%s18758_s9 + $0x3c4] sm:$0x8]  ;;  %12332 = vmatprep.mubr.bf16.mxu1 %v15574_v33  ;;  %v7449_v48 = vsel %vm20664_vm8, %v15264_v14, %v7448_v37  ;;  %v7450_v22 = vrot.slane %v7448_v37, 4  ;;  %v15265_v59 = vrot.slane %v15223_v55, 11 }
 0x2b9   : > { %v15227_v13 = vld [vmem:[%s18758_s9 + $0x3c8] sm:$0xf]  ;;  %v7455_v62 = vrot.slane %v15224_v19, 7  ;;  %v22730_v7 = vld [vmem:[%s18758_s9 + $0x3cc] sm:$0x7]  ;;  %17995 = vmatmul.mubr.bf16.vlgmr.msra.gmra.mrb[32].mxu0 %v15279_v23  ;;  %v9668_v33 = vsel %vm18773_vm4, %v15559_v52, %v9667_v4  ;;  %v9669_v0 = vrot.slane %v9667_v4, 4  ;;  %v22758_v4 = vadd.f32 %v22501_v58, %v22482_v2 }
 0x2ba   : > { %v18371_v16 = vld [vmem:[%s25093_s2 + $0x508] sm:$0xff]   ;;  %v9568_v47 = vld [vmem:[%s18758_s9 + $0x40] sm:$0xe]  ;;  %v9569_v31 = vld [vmem:[%s18758_s9 + $0x44] sm:$0xf]  ;;  %v7458_v57 = vrot.slane %v15225_v41, 7  ;;  %17514 = vmatpush3.bf16.msra.mxu0 %v18367_v27  ;;  %v7452_v41 = vsel %vm20664_vm8, %v7450_v22, %v7451_v12  ;;  %v22770_v12 = vadd.f32 %v22514_v56, %v22503_v35  ;;  %v22774_v22 = vadd.f32 %v22520_v28, %v22507_v54  ;;  %12333 = vmatmul.mubr.bf16.vlgmr.msra.gmra.mrb[32].mxu1 %v18364_v18 }
 0x2bb   : > { %v25192_v14 = vld [vmem:[#allocation26_spill] sm:$0xff]  ;;  %v22741_v19 = vld [vmem:[%s18758_s9 + $0x48] sm:$0x1]  ;;  %v22744_v37 = vld [vmem:[%s18758_s9 + $0x3e0] sm:$0x8]  ;;  %v7457_v52 = vrot.slane %v7455_v62, 4  ;;  %v15280_v24 = vcombine.low %v7449_v48, %v7452_v41  ;;  %v9671_v27 = vsel %vm18773_vm4, %v9669_v0, %v9670_v29  ;;  %17515 = vmatprep.subr.bf16.mxu0 %v18370_v9  ;;  %17626 = vmatpush3.bf16.msra.mxu1 %v18368_v15 }
 0x2bc   : > { %v22738_v55 = vadd.f32 %v22497_v43, %v25192_v14  ;;  %v18373_v38 = vld [vmem:[%s25093_s2 + $0x550] sm:$0xff]   ;;  %v18374_v23 = vld [vmem:[%s25093_s2 + $0x5c8] sm:$0xff]   ;;  %v7456_v43 = vsel %vm20664_vm8, %v15265_v59, %v7455_v62  ;;  %v15230_v14 = vld [vmem:[%s18758_s9 + $0x3e4] sm:$0xf]  ;;  %v22764_v46 = vpop.f32.mrb[200].mxu0  ;;  %v15575_v58 = vcombine.low %v9668_v33, %v9671_v27  ;;  %v15266_v29 = vrot.slane %v15226_v44, 11 }
 0x2bd   : > { %v18376_v2 = vld [vmem:[%s25093_s2 + $0x588] sm:$0xff]   ;;  %v7459_v0 = vsel %vm20664_vm8, %v7457_v52, %v7458_v57  ;;  %v7462_v9 = vrot.slane %v15227_v13, 7  ;;  %v18375_v35 = vld [vmem:[%s25093_s2 + $0x510] sm:$0xff]   ;;  %17998 = vmatprep.mubr.bf16.mxu0 %v15280_v24  ;;  %v7465_v56 = vrot.slane %v22730_v7, 7  ;;  %v15560_v28 = vrot.slane %v9568_v47, 9  ;;  %v22788_v59 = vpop.f32.mrb[200].mxu1  ;;  %17627 = vmatprep.subr.bf16.mxu1 %v18374_v23 }
 0x2be   : > { %25193 = vst [vmem:[#allocation26_spill] sm:$0xff] %v22738_v55  ;;  %v22762_v55 = vld [vmem:[%s18758_s9 + $0x3e8] sm:$0x7]  ;;  %v15281_v54 = vcombine.low %v7456_v43, %v7459_v0  ;;  %v9674_v18 = vrot.slane %v9569_v31, 5  ;;  %v22786_v48 = vld [vmem:[%s18758_s9 + $0x3fc] sm:$0x8]  ;;  %12340 = vmatprep.mubr.bf16.mxu1 %v15575_v58  ;;  %17516 = vmatpush3.bf16.msra.mxu0 %v18371_v16 }
 0x2bf   : > { %v18369_v57 = vld [vmem:[%s18758_s9 + $0x1c] sm:$0xff]   ;;  %v7463_v44 = vsel %vm20664_vm8, %v15266_v29, %v7462_v9  ;;  %v7464_v13 = vrot.slane %v7462_v9, 4  ;;  %v9677_v15 = vrot.slane %v22741_v19, 5  ;;  %v15267_v24 = vrot.slane %v22744_v37, 11  ;;  %v22797_v33 = vld [vmem:[%s18758_s9 + $0x404] sm:$0x7]  ;;  %17517 = vmatprep.subr.bf16.mxu0 %v18373_v38  ;;  %17628 = vmatpush3.bf16.msra.mxu1 %v18376_v2 }
 0x2c0   : > { %v15233_v62 = vld [vmem:[%s18758_s9 + $0x400] sm:$0xf]  ;;  %v22800_v7 = vld [vmem:[%s18758_s9 + $0x5c] sm:$0xe]  ;;  %v18382_v47 = vld [vmem:[%s25093_s2 + $0x5d0] sm:$0xff]   ;;  %v22805_v31 = vpop.f32.mrb[201].mxu0  ;;  %v9675_v19 = vsel %vm18773_vm4, %v15560_v28, %v9674_v18  ;;  %v17107_v38 = vadd.f32 %v22605_v25, %v22601_v39 }
 0x2c1   : > { %v22807_v16 = vpop.f32.mrb[201].mxu1  ;;  %v9676_v41 = vrot.slane %v9674_v18, 4  ;;  %v7469_v37 = vrot.slane %v15230_v14, 7  ;;  %v7472_v43 = vrot.slane %v22762_v55, 7  ;;  %v18378_v52 = vld [vmem:[%s25093_s2 + $0x558] sm:$0xff]   ;;  %v22815_v27 = vpop.f32.mrb[202].mxu0  ;;  %v7466_v0 = vsel %vm20664_vm8, %v7464_v13, %v7465_v56  ;;  %17999 = vmatmul.mubr.bf16.gmra.mrb[36].mxu0 %v15281_v54  ;;  %17629 = vmatprep.subr.bf16.mxu1 %v18382_v47 }
 0x2c2   : > { %v22817_v58 = vpop.f32.mrb[202].mxu1  ;;  %v16995_v14 = vadd.f32 %v22603_v50, %v22576_v30  ;;  %v16998_v55 = vadd.f32 %v22611_v8, %v22607_v20  ;;  %v9572_v23 = vld [vmem:[%s18758_s9 + $0x60] sm:$0xf]  ;;  %v22829_v29 = vld [vmem:[%s18758_s9 + $0x64] sm:$0x1]  ;;  %v22831_v9 = vpop.f32.mrb[203].mxu0  ;;  %v15282_v18 = vcombine.low %v7463_v44, %v7466_v0  ;;  %17518 = vmatpush3.bf16.msra.mxu0 %v18375_v35  ;;  %v17110_v54 = vadd.f32 %v22615_v40, %v22609_v42 }
 0x2c3   : > { %v22833_v28 = vpop.f32.mrb[203].mxu1  ;;  %v9678_v56 = vsel %vm18773_vm4, %v9676_v41, %v9677_v15  ;;  %v7470_v30 = vsel %vm20664_vm8, %v15267_v24, %v7469_v37  ;;  %v7471_v39 = vrot.slane %v7469_v37, 4  ;;  %v22840_v50 = vld [vmem:[%s18758_s9 + $0x418] sm:$0x8]  ;;  %v15236_v25 = vld [vmem:[%s18758_s9 + $0x41c] sm:$0xf]  ;;  %17519 = vmatprep.subr.bf16.mxu0 %v18378_v52  ;;  %12341 = vmatmul.mubr.bf16.gmra.mrb[36].mxu1 %v18369_v57 }
 0x2c4   : > { %v18384_v20 = vld [vmem:[%s25093_s2 + $0x590] sm:$0xff]   ;;  %v15576_v8 = vcombine.low %v9675_v19, %v9678_v56  ;;  %v22846_v13 = vadd.f32 %v17107_v38, %v16995_v14  ;;  %v15268_v44 = vrot.slane %v22786_v48, 11  ;;  %v15237_v15 = vld [vmem:[%s18758_s9 + $0x420] sm:$0x7]  ;;  %v18379_v2 = vld [vmem:[%s25093_s2 + $0x518] sm:$0xff]   ;;  %v22855_v24 = vpop.f32.mrb[204].mxu0  ;;  %18002 = vmatprep.mubr.bf16.mxu0 %v15282_v18  ;;  %v22866_v37 = vadd.f32 %v17110_v54, %v16998_v55 }
 0x2c5   : > { %v7473_v35 = vsel %vm20664_vm8, %v7471_v39, %v7472_v43  ;;  %v7476_v19 = vrot.slane %v15233_v62, 7  ;;  %v7479_v41 = vrot.slane %v22797_v33, 7  ;;  %v15561_v42 = vrot.slane %v22800_v7, 9  ;;  %v18381_v40 = vld [vmem:[%s25093_s2 + $0x560] sm:$0xff]   ;;  %v22864_v48 = vpop.f32.mrb[204].mxu1  ;;  %17630 = vmatpush3.bf16.msra.mxu1 %v18384_v20  ;;  %v18372_v18 = vld [vmem:[%s18758_s9 + $0x38] sm:$0xff]  }
 0x2c6   : > { %v15283_v47 = vcombine.low %v7470_v30, %v7473_v35  ;;  %v9681_v43 = vrot.slane %v9572_v23, 5  ;;  %v9684_v62 = vrot.slane %v22829_v29, 5  ;;  %v15238_v33 = vld [vmem:[%s18758_s9 + $0x434] sm:$0x8]  ;;  %v18383_v7 = vld [vmem:[%s25093_s2 + $0x520] sm:$0xff]   ;;  %12348 = vmatprep.mubr.bf16.mxu1 %v15576_v8  ;;  %v15269_v57 = vrot.slane %v22840_v50, 11  ;;  %17520 = vmatpush3.bf16.msra.mxu0 %v18379_v2 }
 0x2c7   : > { %v7477_v52 = vsel %vm20664_vm8, %v15268_v44, %v7476_v19  ;;  %v7478_v0 = vrot.slane %v7476_v19, 4  ;;  %v7483_v14 = vrot.slane %v15236_v25, 7  ;;  %v15239_v38 = vld [vmem:[%s18758_s9 + $0x438] sm:$0xf]  ;;  %v22878_v55 = vld [vmem:[%s18758_s9 + $0x43c] sm:$0x7]  ;;  %v17001_v50 = vadd.f32 %v22665_v1, %v22657_v60  ;;  %17521 = vmatprep.subr.bf16.mxu0 %v18381_v40 }
 0x2c8   : > { %v18386_v23 = vld [vmem:[%s25093_s2 + $0x568] sm:$0xff]   ;;  %v22883_v29 = vpop.f32.mrb[205].mxu0  ;;  %v9682_v56 = vsel %vm18773_vm4, %v15561_v42, %v9681_v43  ;;  %v9683_v30 = vrot.slane %v9681_v43, 4  ;;  %v7486_v39 = vrot.slane %v15237_v15, 7  ;;  %v9574_v25 = vld [vmem:[%s18758_s9 + $0x78] sm:$0xe]  ;;  %v17113_v19 = vadd.f32 %v22669_v3, %v22663_v34 }
 0x2c9   : > { %v9575_v8 = vld [vmem:[%s18758_s9 + $0x7c] sm:$0xf]  ;;  %v22893_v20 = vld [vmem:[%s18758_s9 + $0x80] sm:$0x1]  ;;  %v22896_v54 = vld [vmem:[%s18758_s9 + $0x450] sm:$0x8]  ;;  %v7480_v44 = vsel %vm20664_vm8, %v7478_v0, %v7479_v41  ;;  %v17004_v1 = vadd.f32 %v22686_v45, %v22671_v10  ;;  %v17116_v42 = vadd.f32 %v22698_v36, %v22684_v61  ;;  %18003 = vmatmul.mubr.bf16.gmra.mrb[40].mxu0 %v15283_v47  ;;  %v7484_v3 = vsel %vm20664_vm8, %v15269_v57, %v7483_v14 }
 0x2ca   : > { %v7485_v35 = vrot.slane %v7483_v14, 4  ;;  %v22902_v15 = vpop.f32.mrb[205].mxu1  ;;  %v15284_v2 = vcombine.low %v7477_v52, %v7480_v44  ;;  %v9685_v60 = vsel %vm18773_vm4, %v9683_v30, %v9684_v62  ;;  %v15242_v43 = vld [vmem:[%s18758_s9 + $0x454] sm:$0xf]  ;;  %v22911_v41 = vpop.f32.mrb[206].mxu0  ;;  %v22917_v40 = vadd.f32 %v17113_v19, %v17001_v50  ;;  %17522 = vmatpush3.bf16.msra.mxu0 %v18383_v7 }
 0x2cb   : > { %v22913_v0 = vpop.f32.mrb[206].mxu1  ;;  %v15577_v34 = vcombine.low %v9682_v56, %v9685_v60  ;;  %v15270_v62 = vrot.slane %v15238_v33, 11  ;;  %v15243_v52 = vld [vmem:[%s18758_s9 + $0x458] sm:$0x7]  ;;  %v22920_v10 = vpop.f32.mrb[207].mxu0  ;;  %v22926_v36 = vadd.f32 %v17116_v42, %v17004_v1  ;;  %v7490_v47 = vrot.slane %v15239_v38, 7  ;;  %17523 = vmatprep.subr.bf16.mxu0 %v18386_v23  ;;  %12349 = vmatmul.mubr.bf16.gmra.mrb[40].mxu1 %v18372_v18 }
 0x2cc   : > { %v22922_v45 = vpop.f32.mrb[207].mxu1  ;;  %18006 = vmatprep.mubr.bf16.mxu0 %v15284_v2  ;;  %v7487_v61 = vsel %vm20664_vm8, %v7485_v35, %v7486_v39  ;;  %v7493_v57 = vrot.slane %v22878_v55, 7  ;;  %v18387_v33 = vld [vmem:[%s25093_s2 + $0x528] sm:$0xff]   ;;  %v15562_v14 = vrot.slane %v9574_v25, 9  ;;  %v9688_v56 = vrot.slane %v9575_v8, 5  ;;  %v18389_v8 = vld [vmem:[%s25093_s2 + $0x570] sm:$0xff]  }
 0x2cd   : > { %v9691_v30 = vrot.slane %v22893_v20, 5  ;;  %v15271_v50 = vrot.slane %v22896_v54, 11  ;;  %v15244_v44 = vld [vmem:[%s18758_s9 + $0x46c] sm:$0x8]  ;;  %v15245_v39 = vld [vmem:[%s18758_s9 + $0x470] sm:$0xf]  ;;  %v7491_v7 = vsel %vm20664_vm8, %v15270_v62, %v7490_v47  ;;  %12356 = vmatprep.mubr.bf16.mxu1 %v15577_v34  ;;  %v15285_v20 = vcombine.low %v7484_v3, %v7487_v61 }
 0x2ce   : > { %v7492_v38 = vrot.slane %v7490_v47, 4  ;;  %v7497_v55 = vrot.slane %v15242_v43, 7  ;;  %v7500_v35 = vrot.slane %v15243_v52, 7  ;;  %v15246_v19 = vld [vmem:[%s18758_s9 + $0x474] sm:$0x7]  ;;  %v9690_v54 = vrot.slane %v9688_v56, 4  ;;  %17524 = vmatpush3.bf16.msra.mxu0 %v18387_v33 }
 0x2cf   : > { %v9577_v25 = vld [vmem:[%s18758_s9 + $0x94] sm:$0xe]  ;;  %v17007_v23 = vadd.f32 %v22805_v31, %v22764_v46  ;;  %v17119_v18 = vadd.f32 %v22807_v16, %v22788_v59  ;;  %v9578_v2 = vld [vmem:[%s18758_s9 + $0x98] sm:$0xf]  ;;  %v22949_v60 = vld [vmem:[%s18758_s9 + $0x9c] sm:$0x1]  ;;  %v9689_v34 = vsel %vm18773_vm4, %v15562_v14, %v9688_v56  ;;  %v17010_v46 = vadd.f32 %v22831_v9, %v22815_v27  ;;  %17525 = vmatprep.subr.bf16.mxu0 %v18389_v8 }
 0x2d0   : > { %v18390_v1 = vld [vmem:[%s25093_s2 + $0x5d8] sm:$0xff]   ;;  %v7494_v43 = vsel %vm20664_vm8, %v7492_v38, %v7493_v57  ;;  %v7499_v3 = vrot.slane %v7497_v55, 4  ;;  %v22962_v59 = vld [vmem:[%s18758_s9 + $0x488] sm:$0x8]  ;;  %v22965_v31 = vld [vmem:[%s18758_s9 + $0x48c] sm:$0xf]  ;;  %v9692_v52 = vsel %vm18773_vm4, %v9690_v54, %v9691_v30  ;;  %v17122_v47 = vadd.f32 %v22833_v28, %v22817_v58 }
 0x2d1   : > { %v18377_v42 = vld [vmem:[%s18758_s9 + $0x54] sm:$0xff]   ;;  %v15286_v62 = vcombine.low %v7491_v7, %v7494_v43  ;;  %v22972_v61 = vadd.f32 %v17119_v18, %v17007_v23  ;;  %v22977_v27 = vld [vmem:[%s18758_s9 + $0x490] sm:$0x7]  ;;  %v22981_v9 = vsel %vm20664_vm8, %v15271_v50, %v7497_v55  ;;  %v15272_v33 = vrot.slane %v15244_v44, 11  ;;  %17631 = vmatprep.subr.bf16.mxu1 %v18390_v1  ;;  %18007 = vmatmul.mubr.bf16.gmra.mrb[44].mxu0 %v15285_v20  ;;  %v22990_v7 = vld [vmem:[%s18758_s9 + $0x4a4] sm:$0x8] }
 0x2d2   : > { %v18391_v16 = vld [vmem:[%s25093_s2 + $0x530] sm:$0xff]   ;;  %v22985_v57 = vsel %vm20664_vm8, %v7499_v3, %v7500_v35  ;;  %v7504_v14 = vrot.slane %v15245_v39, 7  ;;  %v15578_v56 = vcombine.low %v9689_v34, %v9692_v52  ;;  %v22987_v30 = vadd.f32 %v17122_v47, %v17010_v46  ;;  %v15251_v44 = vld [vmem:[%s18758_s9 + $0x4a8] sm:$0xf]  ;;  %v22997_v39 = vld [vmem:[%s18758_s9 + $0x4ac] sm:$0x7] }
 0x2d3   : > { %v7507_v58 = vrot.slane %v15246_v19, 7  ;;  %v15563_v28 = vrot.slane %v9577_v25, 9  ;;  %18010 = vmatprep.mubr.bf16.mxu0 %v15286_v62  ;;  %v9695_v55 = vrot.slane %v9578_v2, 5  ;;  %v9698_v35 = vrot.slane %v22949_v60, 5  ;;  %17526 = vmatpush3.bf16.msra.mxu0 %v18391_v16  ;;  %v18392_v19 = vld [vmem:[%s25093_s2 + $0x598] sm:$0xff]   ;;  %v17017_v23 = vpop.f32.mrb[208].mxu0 }
 0x2d4   : > { %v7505_v50 = vsel %vm20664_vm8, %v15272_v33, %v7504_v14  ;;  %v7506_v38 = vrot.slane %v7504_v14, 4  ;;  %v15287_v25 = vcombine.low %v22981_v9, %v22985_v57  ;;  %v15273_v8 = vrot.slane %v22962_v59, 11  ;;  %12357 = vmatmul.mubr.bf16.gmra.mrb[44].mxu1 %v18377_v42  ;;  %v9580_v43 = vld [vmem:[%s18758_s9 + $0xb0] sm:$0xe]  ;;  %v17129_v34 = vpop.f32.mrb[208].mxu1  ;;  %v17018_v3 = vpop.f32.mrb[209].mxu0 }
 0x2d5   : > { %v7511_v20 = vrot.slane %v22965_v31, 7  ;;  %v17013_v54 = vadd.f32 %v22883_v29, %v22855_v24  ;;  %v9697_v2 = vrot.slane %v9695_v55, 4  ;;  %v7514_v60 = vrot.slane %v22977_v27, 7  ;;  %12364 = vmatprep.mubr.bf16.mxu1 %v15578_v56  ;;  %v9581_v59 = vld [vmem:[%s18758_s9 + $0xb4] sm:$0xf]  ;;  %17632 = vmatpush3.bf16.msra.mxu1 %v18392_v19  ;;  %v17130_v31 = vpop.f32.mrb[209].mxu1 }
 0x2d6   : > { %v7508_v18 = vsel %vm20664_vm8, %v7506_v38, %v7507_v58  ;;  %v17125_v1 = vadd.f32 %v22902_v15, %v22864_v48  ;;  %v9696_v24 = vsel %vm18773_vm4, %v15563_v28, %v9695_v55  ;;  %v17016_v42 = vadd.f32 %v22920_v10, %v22911_v41  ;;  %v17020_v16 = vpop.f32.mrb[210].mxu0  ;;  %v18394_v48 = vld [vmem:[%s25093_s2 + $0x578] sm:$0xff]   ;;  %v18380_v15 = vld [vmem:[%s18758_s9 + $0x70] sm:$0xff]   ;;  %v17132_v27 = vpop.f32.mrb[210].mxu1  ;;  %v23036_v56 = vld [vmem:[%s18758_s9 + $0x4c4] sm:$0xf] }
 0x2d7   : > { %v15288_v46 = vcombine.low %v7505_v50, %v7508_v18  ;;  %v7513_v29 = vrot.slane %v7511_v20, 4  ;;  %v9699_v62 = vsel %vm18773_vm4, %v9697_v2, %v9698_v35  ;;  %v17128_v47 = vadd.f32 %v22922_v45, %v22913_v0  ;;  %v9582_v10 = vld [vmem:[%s18758_s9 + $0xb8] sm:$0x1]  ;;  %v17021_v9 = vpop.f32.mrb[211].mxu0  ;;  %v17133_v58 = vpop.f32.mrb[211].mxu1  ;;  %17527 = vmatprep.subr.bf16.mxu0 %v18394_v48 }
 0x2d8   : > { %v23025_v52 = vadd.f32 %v17125_v1, %v17013_v54  ;;  %v15274_v41 = vrot.slane %v22990_v7, 11  ;;  %v18395_v57 = vld [vmem:[%s25093_s2 + $0x538] sm:$0xff]   ;;  %v7518_v33 = vrot.slane %v15251_v44, 7  ;;  %v7521_v14 = vrot.slane %v22997_v39, 7  ;;  %v23038_v0 = vpop.f32.mrb[212].mxu0  ;;  %v17135_v18 = vpop.f32.mrb[212].mxu1 }
 0x2d9   : > { %v23040_v45 = vadd.f32 %v17128_v47, %v17016_v42  ;;  %v15564_v28 = vrot.slane %v9580_v43, 9  ;;  %v9702_v7 = vrot.slane %v9581_v59, 5  ;;  %v15253_v50 = vld [vmem:[%s18758_s9 + $0x4c0] sm:$0x8]  ;;  %v23044_v38 = vld [vmem:[%s18758_s9 + $0x4c8] sm:$0x7]  ;;  %17528 = vmatpush3.bf16.msra.mxu0 %v18395_v57  ;;  %v15579_v55 = vcombine.low %v9696_v24, %v9699_v62 }
 0x2da   : > { %18011 = vmatmul.mubr.bf16.gmra.mrb[48].mxu0 %v15287_v25  ;;  %v7512_v35 = vsel %vm20664_vm8, %v15273_v8, %v7511_v20  ;;  %v7515_v44 = vsel %vm20664_vm8, %v7513_v29, %v7514_v60  ;;  %v7520_v39 = vrot.slane %v7518_v33, 4  ;;  %v15256_v19 = vld [vmem:[%s18758_s9 + $0x4dc] sm:$0x8]  ;;  %v15257_v54 = vld [vmem:[%s18758_s9 + $0x4e0] sm:$0xf]  ;;  %v7519_v2 = vsel %vm20664_vm8, %v15274_v41, %v7518_v33  ;;  %v17024_v20 = vpop.f32.mrb[213].mxu0 }
 0x2db   : > { %18014 = vmatprep.mubr.bf16.mxu0 %v15288_v46  ;;  %v9704_v1 = vrot.slane %v9702_v7, 4  ;;  %v9705_v25 = vrot.slane %v9582_v10, 5  ;;  %v7525_v43 = vrot.slane %v23036_v56, 7  ;;  %v15258_v24 = vld [vmem:[%s18758_s9 + $0x4e4] sm:$0x7]  ;;  %v17019_v29 = vadd.f32 %v17018_v3, %v17017_v23  ;;  %v17136_v57 = vpop.f32.mrb[213].mxu1 }
 0x2dc   : > { %v9584_v8 = vld [vmem:[%s18758_s9 + $0xd0] sm:$0xf]  ;;  %v7522_v60 = vsel %vm20664_vm8, %v7520_v39, %v7521_v14  ;;  %v17131_v42 = vadd.f32 %v17130_v31, %v17129_v34  ;;  %v17022_v59 = vadd.f32 %v17021_v9, %v17020_v16  ;;  %v9583_v48 = vld [vmem:[%s18758_s9 + $0xcc] sm:$0xe]  ;;  %v9585_v62 = vld [vmem:[%s18758_s9 + $0xd4] sm:$0x1]  ;;  %12365 = vmatmul.mubr.bf16.gmra.mrb[48].mxu1 %v18380_v15  ;;  %v15289_v47 = vcombine.low %v7512_v35, %v7515_v44 }
 0x2dd   : > { %v23062_v46 = vld [vmem:[%s18758_s9 + $0x4fc] sm:$0xf]  ;;  %v9703_v41 = vsel %vm18773_vm4, %v15564_v28, %v9702_v7  ;;  %v15275_v10 = vrot.slane %v15253_v50, 11  ;;  %12372 = vmatprep.mubr.bf16.mxu1 %v15579_v55  ;;  %v15290_v33 = vcombine.low %v7519_v2, %v7522_v60  ;;  %v7528_v14 = vrot.slane %v23044_v38, 7  ;;  %v15259_v3 = vld [vmem:[%s18758_s9 + $0x4f8] sm:$0x8] }
 0x2de   : > { %v23067_v23 = vadd.f32 %v17131_v42, %v17019_v29  ;;  %v17134_v34 = vadd.f32 %v17133_v58, %v17132_v27  ;;  %v17026_v31 = vpop.f32.mrb[214].mxu0  ;;  %v9706_v16 = vsel %vm18773_vm4, %v9704_v1, %v9705_v25  ;;  %v7527_v15 = vrot.slane %v7525_v43, 4  ;;  %v17138_v28 = vpop.f32.mrb[214].mxu1  ;;  %v15261_v35 = vld [vmem:[%s18758_s9 + $0x500] sm:$0x7]  ;;  %v18385_v39 = vld [vmem:[%s18758_s9 + $0x8c] sm:$0xff]  }
 0x2df   : > { %v15276_v9 = vrot.slane %v15256_v19, 11  ;;  %v7532_v56 = vrot.slane %v15257_v54, 7  ;;  %v17027_v7 = vpop.f32.mrb[215].mxu0  ;;  %v7535_v55 = vrot.slane %v15258_v24, 7  ;;  %v9709_v38 = vrot.slane %v9584_v8, 5  ;;  %v17139_v44 = vpop.f32.mrb[215].mxu1 }
 0x2e0   : > { %v23072_v50 = vadd.f32 %v17134_v34, %v17022_v59  ;;  %v15565_v58 = vrot.slane %v9583_v48, 9  ;;  %v9712_v2 = vrot.slane %v9585_v62, 5  ;;  %v7539_v60 = vrot.slane %v23062_v46, 7  ;;  %v18398_v19 = vld [vmem:[%s25093_s2 + $0x5e0] sm:$0xff]   ;;  %v23084_v8 = vld [vmem:[%s18758_s9 + $0xe8] sm:$0xe] }
 0x2e1   : > { %v7534_v27 = vrot.slane %v7532_v56, 4  ;;  %v15580_v54 = vcombine.low %v9703_v41, %v9706_v16  ;;  %v7526_v1 = vsel %vm20664_vm8, %v15275_v10, %v7525_v43  ;;  %v9711_v25 = vrot.slane %v9709_v38, 4  ;;  %v23087_v29 = vld [vmem:[%s18758_s9 + $0xec] sm:$0xf]  ;;  %17633 = vmatprep.subr.bf16.mxu1 %v18398_v19  ;;  %v18399_v43 = vld [vmem:[%s25093_s2 + $0x640] sm:$0xff]  }
 0x2e2   : > { %18015 = vmatmul.mubr.bf16.gmra.mrb[52].mxu0 %v15289_v47  ;;  %v17025_v24 = vadd.f32 %v17024_v20, %v23038_v0  ;;  %v7529_v42 = vsel %vm20664_vm8, %v7527_v15, %v7528_v14  ;;  %v7533_v59 = vsel %vm20664_vm8, %v15276_v9, %v7532_v56  ;;  %v15277_v48 = vrot.slane %v15259_v3, 11  ;;  %v9588_v41 = vld [vmem:[%s18758_s9 + $0xf0] sm:$0x1]  ;;  %v23106_v14 = vld [vmem:[%s18758_s9 + $0x10] sm:$0xc]  ;;  %17737 = vmatprep.subr.bf16.mxu0 %v18399_v43  ;;  %v18400_v34 = vld [vmem:[%s25093_s2 + $0x5a0] sm:$0xff]  }
 0x2e3   : > { %18018 = vmatprep.mubr.bf16.mxu0 %v15290_v33  ;;  %v17137_v62 = vadd.f32 %v17136_v57, %v17135_v18  ;;  %v7536_v0 = vsel %vm20664_vm8, %v7534_v27, %v7535_v55  ;;  %v7542_v20 = vrot.slane %v15261_v35, 7  ;;  %v17028_v46 = vadd.f32 %v17027_v7, %v17026_v31  ;;  %v23115_v15 = vld [vmem:[%s18758_s9 + $0x14] sm:$0xf]  ;;  %v18388_v9 = vld [vmem:[%s18758_s9 + $0xa8] sm:$0xff]   ;;  %v23124_v55 = vld [vmem:[%s18758_s9 + $0x18] sm:$0x3]  ;;  %17634 = vmatpush3.bf16.msra.mxu1 %v18400_v34 }
 0x2e4   : > { %v17140_v47 = vadd.f32 %v17139_v44, %v17138_v28  ;;  %12373 = vmatmul.mubr.bf16.gmra.mrb[52].mxu1 %v18385_v39  ;;  %v9710_v10 = vsel %vm18773_vm4, %v15565_v58, %v9709_v38  ;;  %v9713_v18 = vsel %vm18773_vm4, %v9711_v25, %v9712_v2  ;;  %v7541_v57 = vrot.slane %v7539_v60, 4  ;;  %v25196_v38 = vld [vmem:[#allocation15_spill] sm:$0xff]  ;;  %v25197_v35 = vld [vmem:[#allocation17_spill] sm:$0xff]  ;;  %v17029_v58 = vpop.f32.mrb[216].mxu0  ;;  %v25198_v2 = vld [vmem:[#allocation12_spill] sm:$0xff] }
 0x2e5   : > { %v23103_v33 = vadd.f32 %v17137_v62, %v17025_v24  ;;  %12380 = vmatprep.mubr.bf16.mxu1 %v15580_v54  ;;  %v15291_v3 = vcombine.low %v7526_v1, %v7529_v42  ;;  %v9716_v16 = vrot.slane %v23087_v29, 5  ;;  %v15292_v56 = vcombine.low %v7533_v59, %v7536_v0  ;;  %v25199_v19 = vld [vmem:[#allocation16_spill] sm:$0xff]  ;;  %v25201_v25 = vld [vmem:[#allocation13_spill] sm:$0xff]  ;;  %v17141_v29 = vpop.f32.mrb[216].mxu1  ;;  %v17030_v0 = vpop.f32.mrb[217].mxu0 }
 0x2e6   : > { %v23111_v31 = vadd.f32 %v17140_v47, %v17028_v46  ;;  %v23120_v28 = vsel %vm20664_vm8, %v15277_v48, %v7539_v60  ;;  %v15566_v7 = vrot.slane %v23084_v8, 9  ;;  %v23128_v44 = vadd.f32 %v25197_v35, %v25196_v38  ;;  %v25200_v1 = vld [vmem:[#allocation24_spill] sm:$0xff]  ;;  %v25202_v42 = vld [vmem:[#allocation25_spill] sm:$0xff]  ;;  %v17142_v46 = vpop.f32.mrb[217].mxu1  ;;  %v25207_v38 = vld [vmem:[#allocation23_spill] sm:$0xff] }
 0x2e7   : > { %25194 = vst [vmem:[#allocation32_spill] sm:$0xff] %v23103_v33  ;;  %v15581_v39 = vcombine.low %v9710_v10, %v9713_v18  ;;  %v9719_v27 = vrot.slane %v9588_v41, 5  ;;  %v23132_v54 = vadd.f32 %v25199_v19, %v25198_v2  ;;  %v23136_v60 = vadd.f32 %v25201_v25, %v25200_v1  ;;  %v25203_v59 = vld [vmem:[#allocation21_spill] sm:$0xff]  ;;  %v25205_v41 = vld [vmem:[#allocation14_spill] sm:$0xff]  ;;  %v25208_v35 = vld [vmem:[#allocation27_spill] sm:$0xff] }
 0x2e8   : > { %25195 = vst [vmem:[#allocation33_spill] sm:$0xff] %v23111_v31  ;;  %v7543_v24 = vsel %vm20664_vm8, %v7541_v57, %v7542_v20  ;;  %v15590_v8 = vrot.slane %v23106_v14, 10  ;;  %v23143_v48 = vadd.f32 %v25203_v59, %v25202_v42  ;;  %v23147_v62 = vadd.f32 %v22486_v63, %v22473_v49  ;;  %v17032_v14 = vpop.f32.mrb[218].mxu0  ;;  %v18396_v19 = vld [vmem:[%s18758_s9 + $0x1f8] sm:$0xff]   ;;  %v9591_v1 = vld [vmem:[%s18758_s9 + $0x10c] sm:$0x1] }
 0x2e9   : > { %v9718_v43 = vrot.slane %v9716_v16, 4  ;;  %v23151_v20 = vadd.f32 %v25204_v32, %v22490_v6  ;;  %v23155_v47 = vadd.f32 %v22536_v5, %v22532_v11  ;;  %v23159_v10 = vadd.f32 %v25205_v41, %v22545_v21  ;;  %v17144_v6 = vpop.f32.mrb[218].mxu1  ;;  %v17033_v11 = vpop.f32.mrb[219].mxu0  ;;  %v23168_v21 = vld [vmem:[%s18758_s9 + $0x108] sm:$0xf]  ;;  %v25218_v33 = vld [vmem:[#allocation26_spill] sm:$0xff] }
 0x2ea   : > { %18019 = vmatmul.mubr.bf16.gmra.mrb[56].mxu0 %v15291_v3  ;;  %v9948_v49 = vrot.slane %v23115_v15, 6  ;;  %v9951_v63 = vrot.slane %v23124_v55, 6  ;;  %v17031_v18 = vadd.f32 %v17030_v0, %v17029_v58  ;;  %v17143_v57 = vadd.f32 %v17142_v46, %v17141_v29  ;;  %v17145_v5 = vpop.f32.mrb[219].mxu1  ;;  %v23165_v3 = vld [vmem:[%s18758_s9 + $0x104] sm:$0xe]  ;;  %v25212_v46 = vld [vmem:[#allocation19_spill] sm:$0xff] }
 0x2eb   : > { %18022 = vmatprep.mubr.bf16.mxu0 %v15292_v56  ;;  %v15293_v34 = vcombine.low %v23120_v28, %v7543_v24  ;;  %v17034_v56 = vadd.f32 %v17033_v11, %v17032_v14  ;;  %v17146_v55 = vadd.f32 %v17145_v5, %v17144_v6  ;;  %v23174_v58 = vadd.f32 %v25208_v35, %v25207_v38  ;;  %v25209_v25 = vld [vmem:[#allocation28_spill] sm:$0xff]  ;;  %v25210_v24 = vld [vmem:[#allocation29_spill] sm:$0xff]  ;;  %v25213_v14 = vld [vmem:[#allocation18_spill] sm:$0xff] }
 0x2ec   : > { %12381 = vmatmul.mubr.bf16.gmra.mrb[56].mxu1 %v18388_v9  ;;  %v23170_v15 = vadd.f32 %v17143_v57, %v17031_v18  ;;  %v9717_v28 = vsel %vm18773_vm4, %v15566_v7, %v9716_v16  ;;  %v9720_v2 = vsel %vm18773_vm4, %v9718_v43, %v9719_v27  ;;  %v23183_v9 = vld [vmem:[%s18758_s9 + $0x30] sm:$0xf]  ;;  %v23187_v29 = vadd.f32 %v25210_v24, %v25209_v25  ;;  %v9853_v7 = vld [vmem:[%s18758_s9 + $0x2c] sm:$0xc]  ;;  %v17035_v27 = vpop.f32.mrb[220].mxu0  ;;  %v17147_v43 = vpop.f32.mrb[220].mxu1 }
 0x2ed   : > { %12388 = vmatprep.mubr.bf16.mxu1 %v15581_v39  ;;  %v23191_v42 = vadd.f32 %v22643_v17, %v22639_v53  ;;  %v18393_v39 = vld [vmem:[%s18758_s9 + $0xc4] sm:$0xff]   ;;  %v9950_v59 = vrot.slane %v9948_v49, 4  ;;  %v23194_v0 = vadd.f32 %v17146_v55, %v17034_v56  ;;  %v9723_v16 = vrot.slane %v23168_v21, 5  ;;  %v9855_v18 = vld [vmem:[%s18758_s9 + $0x34] sm:$0x3]  ;;  %v17036_v17 = vpop.f32.mrb[221].mxu0 }
 0x2ee   : > { %25206 = vst [vmem:[#allocation15_spill] sm:$0xff] %v23170_v15  ;;  %v23200_v32 = vadd.f32 %v25212_v46, %v22650_v51  ;;  %v15567_v41 = vrot.slane %v23165_v3, 9  ;;  %v9955_v53 = vrot.slane %v23183_v9, 6  ;;  %v17148_v57 = vpop.f32.mrb[221].mxu1  ;;  %v25214_v6 = vld [vmem:[#allocation20_spill] sm:$0xff]  ;;  %v25215_v5 = vld [vmem:[#allocation30_spill] sm:$0xff]  ;;  %v15582_v55 = vcombine.low %v9717_v28, %v9720_v2 }
 0x2ef   : > { %25211 = vst [vmem:[#allocation17_spill] sm:$0xff] %v23194_v0  ;;  %v23207_v11 = vadd.f32 %v25214_v6, %v25213_v14  ;;  %v25216_v21 = vld [vmem:[#allocation31_spill] sm:$0xff]  ;;  %v9949_v51 = vsel %vm18803_vm5, %v15590_v8, %v9948_v49  ;;  %v17037_v35 = vadd.f32 %v17036_v17, %v17035_v27  ;;  %v17038_v3 = vpop.f32.mrb[222].mxu0  ;;  %v17150_v25 = vpop.f32.mrb[222].mxu1  ;;  %v9593_v9 = vld [vmem:[%s18758_s9 + $0x124] sm:$0xf]  ;;  %v17149_v0 = vadd.f32 %v17148_v57, %v17147_v43 }
 0x2f0   : > { %v23211_v56 = vadd.f32 %v25216_v21, %v25215_v5  ;;  %v9592_v24 = vld [vmem:[%s18758_s9 + $0x120] sm:$0xe]  ;;  %v9726_v46 = vrot.slane %v9591_v1, 5  ;;  %v17039_v15 = vpop.f32.mrb[223].mxu0  ;;  %v17151_v14 = vpop.f32.mrb[223].mxu1  ;;  %v9730_v31 = vrot.slane %v9593_v9, 5  ;;  %v23220_v5 = vadd.f32 %v22758_v4, %v25218_v33 }
 0x2f1   : > { %v9594_v6 = vld [vmem:[%s18758_s9 + $0x128] sm:$0x1]  ;;  %v9952_v8 = vsel %vm18803_vm5, %v9950_v59, %v9951_v63  ;;  %v9725_v49 = vrot.slane %v9723_v16, 4  ;;  %v17040_v28 = vadd.f32 %v17039_v15, %v17038_v3  ;;  %v17152_v2 = vadd.f32 %v17151_v14, %v17150_v25  ;;  %v18401_v4 = vld [vmem:[%s25093_s2 + $0x600] sm:$0xff]   ;;  %v18402_v33 = vld [vmem:[%s18758_s9 + $0x214] sm:$0xff]  }
 0x2f2   : > { %18023 = vmatmul.mubr.bf16.gmra.mrb[60].mxu0 %v15293_v34  ;;  %v18406_v34 = vld [vmem:[%s25093_s2 + $0x5e8] sm:$0xff]   ;;  %v15591_v1 = vrot.slane %v9853_v7, 10  ;;  %v9958_v27 = vrot.slane %v9855_v18, 6  ;;  %v23227_v43 = vadd.f32 %v17149_v0, %v17037_v35  ;;  %v9957_v63 = vrot.slane %v9955_v53, 4  ;;  %v18397_v57 = vld [vmem:[%s18758_s9 + $0xe0] sm:$0xff]   ;;  %v17281_v35 = vpop.f32.mrb[224].mxu1 }
 0x2f3   : > { %12493 = vmatprep.mubr.bf16.mxu0 %v18396_v19  ;;  %v23233_v15 = vadd.f32 %v17152_v2, %v17040_v28  ;;  %v15568_v19 = vrot.slane %v9592_v24, 9  ;;  %17635 = vmatprep.subr.bf16.mxu1 %v18406_v34  ;;  %v23237_v59 = vadd.f32 %v22774_v22, %v22770_v12  ;;  %v15606_v0 = vcombine.low %v9949_v51, %v9952_v8  ;;  %v18407_v18 = vld [vmem:[%s25093_s2 + $0x648] sm:$0xff]   ;;  %v17169_v51 = vpop.f32.mrb[224].mxu0  ;;  %v9858_v24 = vld [vmem:[%s18758_s9 + $0x50] sm:$0x3]  ;;  %v17282_v14 = vpop.f32.mrb[225].mxu1 }
 0x2f4   : > { %12389 = vmatmul.mubr.bf16.gmra.mrb[60].mxu1 %v18393_v39  ;;  %v9732_v39 = vrot.slane %v9730_v31, 4  ;;  %v9733_v7 = vrot.slane %v9594_v6, 5  ;;  %v18408_v17 = vld [vmem:[%s25093_s2 + $0x5a8] sm:$0xff]   ;;  %v9724_v21 = vsel %vm18773_vm4, %v15567_v41, %v9723_v16  ;;  %v9727_v12 = vsel %vm18773_vm4, %v9725_v49, %v9726_v46  ;;  %v17170_v9 = vpop.f32.mrb[225].mxu0  ;;  %v17284_v28 = vpop.f32.mrb[226].mxu1 }
 0x2f5   : > { %12396 = vmatprep.mubr.bf16.mxu1 %v15582_v55  ;;  %v9856_v22 = vld [vmem:[%s18758_s9 + $0x48] sm:$0xc]  ;;  %v9857_v55 = vld [vmem:[%s18758_s9 + $0x4c] sm:$0xf]  ;;  %17636 = vmatpush3.bf16.msra.mxu1 %v18408_v17  ;;  %v15583_v3 = vcombine.low %v9724_v21, %v9727_v12  ;;  %v9956_v25 = vsel %vm18803_vm5, %v15591_v1, %v9955_v53  ;;  %v9959_v16 = vsel %vm18803_vm5, %v9957_v63, %v9958_v27  ;;  %v17172_v49 = vpop.f32.mrb[226].mxu0  ;;  %v17285_v27 = vpop.f32.mrb[227].mxu1 }
 0x2f6   : > { %v9962_v41 = vrot.slane %v9857_v55, 6  ;;  %v18409_v46 = vld [vmem:[%s25093_s2 + $0x608] sm:$0xff]   ;;  %v17171_v6 = vadd.f32 %v17170_v9, %v17169_v51  ;;  %v17283_v8 = vadd.f32 %v17282_v14, %v17281_v35  ;;  %v23261_v53 = vld [vmem:[%s18758_s9 + $0x140] sm:$0xf]  ;;  %v9731_v2 = vsel %vm18773_vm4, %v15568_v19, %v9730_v31  ;;  %v17173_v1 = vpop.f32.mrb[227].mxu0  ;;  %v18404_v21 = vld [vmem:[%s18758_s9 + $0x230] sm:$0xff]  }
 0x2f7   : > { %v15592_v34 = vrot.slane %v9856_v22, 10  ;;  %v17174_v63 = vadd.f32 %v17173_v1, %v17172_v49  ;;  %v15607_v17 = vcombine.low %v9956_v25, %v9959_v16  ;;  %v9595_v31 = vld [vmem:[%s18758_s9 + $0x13c] sm:$0xe]  ;;  %v9737_v19 = vrot.slane %v23261_v53, 5  ;;  %v17287_v55 = vpop.f32.mrb[228].mxu1 }
 0x2f8   : > { %v18403_v12 = vld [vmem:[%s18758_s9 + $0xfc] sm:$0xff]   ;;  %v9965_v22 = vrot.slane %v9858_v24, 6  ;;  %v9861_v25 = vld [vmem:[%s18758_s9 + $0x6c] sm:$0x3]  ;;  %v17288_v14 = vpop.f32.mrb[229].mxu1 }
 0x2f9   : > { %v9963_v16 = vsel %vm18803_vm5, %v15592_v34, %v9962_v41  ;;  %v17290_v49 = vpop.f32.mrb[230].mxu1 }
 0x2fa   : > { %12494 = vmatmul.mubr.bf16.vlgmr.msra.gmra.mrb[64].mxu0 %v15606_v0  ;;  %v17286_v0 = vadd.f32 %v17285_v27, %v17284_v28  ;;  %v23285_v28 = vld [vmem:[%s18758_s9 + $0x15c] sm:$0xf]  ;;  %v17291_v27 = vpop.f32.mrb[231].mxu1 }
 0x2fb   : > { %17738 = vmatpush3.bf16.msra.mxu0 %v18401_v4  ;;  %12501 = vmatprep.mubr.bf16.mxu0 %v18402_v33  ;;  %v9734_v4 = vsel %vm18773_vm4, %v9732_v39, %v9733_v7  ;;  %v8702_v33 = vadd.f32 %v17171_v6, %v23128_v44  ;;  %v8705_v39 = vadd.f32 %v17174_v63, %v23132_v54  ;;  %v9597_v44 = vld [vmem:[%s18758_s9 + $0x144] sm:$0x1]  ;;  %v17175_v7 = vpop.f32.mrb[228].mxu0  ;;  %v15569_v6 = vrot.slane %v9595_v31, 9 }
 0x2fc   : > { %17739 = vmatprep.subr.bf16.mxu0 %v18407_v18  ;;  %12397 = vmatmul.mubr.bf16.gmra.mrb[64].mxu1 %v18397_v57  ;;  %v23272_v18 = vld [vmem:[%s18758_s9 + $0x68] sm:$0xf]  ;;  %v9964_v57 = vrot.slane %v9962_v41, 4  ;;  %v15584_v35 = vcombine.low %v9731_v2, %v9734_v4  ;;  %v17176_v9 = vpop.f32.mrb[229].mxu0  ;;  %v9740_v53 = vrot.slane %v9597_v44, 5  ;;  %v17289_v2 = vadd.f32 %v17288_v14, %v17287_v55 }
 0x2fd   : > { %12404 = vmatprep.mubr.bf16.mxu1 %v15583_v3  ;;  %v23277_v51 = vadd.f32 %v17283_v8, %v8702_v33  ;;  %v9859_v3 = vld [vmem:[%s18758_s9 + $0x64] sm:$0xc]  ;;  %v9969_v24 = vrot.slane %v23272_v18, 6  ;;  %v17178_v54 = vpop.f32.mrb[230].mxu0  ;;  %v9739_v8 = vrot.slane %v9737_v19, 4  ;;  %v23290_v33 = vadd.f32 %v17286_v0, %v8705_v39  ;;  %v18410_v0 = vld [vmem:[%s18758_s9 + $0x24c] sm:$0xff]  }
 0x2fe   : > { %v17179_v1 = vpop.f32.mrb[231].mxu0  ;;  %v23288_v4 = vld [vmem:[%s18758_s9 + $0x158] sm:$0xe]  ;;  %v9966_v41 = vsel %vm18803_vm5, %v9964_v57, %v9965_v22  ;;  %v17292_v31 = vadd.f32 %v17291_v27, %v17290_v49  ;;  %v15593_v44 = vrot.slane %v9859_v3, 10  ;;  %v9744_v55 = vrot.slane %v23285_v28, 5 }
 0x2ff   : > { %17740 = vmatpush3.bf16.msra.mxu0 %v18409_v46  ;;  %v17177_v46 = vadd.f32 %v17176_v9, %v17175_v7  ;;  %v17180_v63 = vadd.f32 %v17179_v1, %v17178_v54  ;;  %v9972_v7 = vrot.slane %v9861_v25, 6  ;;  %v9971_v39 = vrot.slane %v9969_v24, 4  ;;  %v9600_v9 = vld [vmem:[%s18758_s9 + $0x160] sm:$0x1]  ;;  %v23311_v14 = vld [vmem:[%s18758_s9 + $0x84] sm:$0xf] }
 0x300   : > { %v15570_v57 = vrot.slane %v23288_v4, 9  ;;  %v15608_v3 = vcombine.low %v9963_v16, %v9966_v41  ;;  %v9738_v25 = vsel %vm18773_vm4, %v15569_v6, %v9737_v19  ;;  %v18415_v54 = vld [vmem:[%s25093_s2 + $0x650] sm:$0xff]   ;;  %v17181_v49 = vpop.f32.mrb[232].mxu0  ;;  %v23324_v6 = vld [vmem:[%s18758_s9 + $0x88] sm:$0x3]  ;;  %v9747_v27 = vrot.slane %v9600_v9, 5 }
 0x301   : > { %v8710_v34 = vadd.f32 %v17177_v46, %v23136_v60  ;;  %v18414_v60 = vld [vmem:[%s25093_s2 + $0x5f0] sm:$0xff]   ;;  %v9862_v46 = vld [vmem:[%s18758_s9 + $0x80] sm:$0xc]  ;;  %17741 = vmatprep.subr.bf16.mxu0 %v18415_v54  ;;  %v9973_v1 = vsel %vm18803_vm5, %v9971_v39, %v9972_v7  ;;  %v9976_v4 = vrot.slane %v23311_v14, 6  ;;  %v17182_v41 = vpop.f32.mrb[233].mxu0 }
 0x302   : > { %12502 = vmatmul.mubr.bf16.gmra.mrb[68].mxu0 %v15607_v17  ;;  %v25219_v17 = vld [vmem:[#allocation11_spill] sm:$0xff]  ;;  %17637 = vmatprep.subr.bf16.mxu1 %v18414_v60  ;;  %v18416_v19 = vld [vmem:[%s25093_s2 + $0x5b0] sm:$0xff]   ;;  %v17184_v60 = vpop.f32.mrb[234].mxu0 }
 0x303   : > { %12509 = vmatprep.mubr.bf16.mxu0 %v18404_v21  ;;  %v8713_v21 = vadd.f32 %v17180_v63, %v23143_v48  ;;  %v23304_v22 = vadd.f32 %v17289_v2, %v8710_v34  ;;  %v18405_v48 = vld [vmem:[%s18758_s9 + $0x118] sm:$0xff]   ;;  %v9970_v2 = vsel %vm18803_vm5, %v15593_v44, %v9969_v24  ;;  %17638 = vmatpush3.bf16.msra.mxu1 %v18416_v19  ;;  %v15594_v44 = vrot.slane %v9862_v46, 10  ;;  %v17185_v7 = vpop.f32.mrb[235].mxu0  ;;  %v18412_v19 = vld [vmem:[%s18758_s9 + $0x268] sm:$0xff]  }
 0x304   : > { %12405 = vmatmul.mubr.bf16.gmra.mrb[68].mxu1 %v18403_v12  ;;  %v9741_v12 = vsel %vm18773_vm4, %v9739_v8, %v9740_v53  ;;  %v18417_v8 = vld [vmem:[%s25093_s2 + $0x610] sm:$0xff]   ;;  %v17293_v53 = vpop.f32.mrb[232].mxu1  ;;  %v23335_v63 = vld [vmem:[%s18758_s9 + $0x178] sm:$0xf]  ;;  %v23341_v24 = vld [vmem:[%s18758_s9 + $0x17c] sm:$0x1]  ;;  %v17186_v14 = vadd.f32 %v17185_v7, %v17184_v60 }
 0x305   : > { %12412 = vmatprep.mubr.bf16.mxu1 %v15584_v35  ;;  %v23318_v28 = vadd.f32 %v17292_v31, %v8713_v21  ;;  %v9746_v35 = vrot.slane %v9744_v55, 4  ;;  %v15585_v16 = vcombine.low %v9738_v25, %v9741_v12  ;;  %v17294_v34 = vpop.f32.mrb[233].mxu1  ;;  %17742 = vmatpush3.bf16.msra.mxu0 %v18417_v8  ;;  %v17183_v31 = vadd.f32 %v17182_v41, %v17181_v49  ;;  %v23338_v25 = vld [vmem:[%s18758_s9 + $0x174] sm:$0xe]  ;;  %v23352_v41 = vld [vmem:[%s18758_s9 + $0xa0] sm:$0xf] }
 0x306   : > { %v17295_v21 = vadd.f32 %v17294_v34, %v17293_v53  ;;  %v25101_v9 = vrot.slane %v23335_v63, 5  ;;  %v9745_v49 = vsel %vm18773_vm4, %v15570_v57, %v9744_v55  ;;  %v9978_v8 = vrot.slane %v9976_v4, 4  ;;  %v17187_v55 = vpop.f32.mrb[236].mxu0 }
 0x307   : > { %v8718_v12 = vadd.f32 %v17183_v31, %v23147_v62  ;;  %v9748_v46 = vsel %vm18773_vm4, %v9746_v35, %v9747_v27  ;;  %v9979_v53 = vrot.slane %v23324_v6, 6  ;;  %v15571_v62 = vrot.slane %v23338_v25, 9  ;;  %v23364_v6 = vld [vmem:[%s18758_s9 + $0xa4] sm:$0x3] }
 0x308   : > { %v9753_v35 = vrot.slane %v25101_v9, 4  ;;  %v9983_v27 = vrot.slane %v23352_v41, 6  ;;  %v15586_v60 = vcombine.low %v9745_v49, %v9748_v46  ;;  %v23376_v41 = vld [vmem:[%s18758_s9 + $0x198] sm:$0x1] }
 0x309   : > { %v23359_v34 = vadd.f32 %v17295_v21, %v8718_v12  ;;  %v23373_v21 = vld [vmem:[%s18758_s9 + $0x194] sm:$0xf] }
 0x30a   : > { %12510 = vmatmul.mubr.bf16.gmra.mrb[72].mxu0 %v15608_v3  ;;  %v17296_v3 = vpop.f32.mrb[234].mxu1  ;;  %v9758_v49 = vrot.slane %v23373_v21, 5 }
 0x30b   : > { %12517 = vmatprep.mubr.bf16.mxu0 %v18410_v0  ;;  %v17297_v39 = vpop.f32.mrb[235].mxu1  ;;  %v15609_v0 = vcombine.low %v9970_v2, %v9973_v1  ;;  %v8721_v2 = vadd.f32 %v17186_v14, %v23151_v20  ;;  %v9865_v1 = vld [vmem:[%s18758_s9 + $0x9c] sm:$0xc]  ;;  %v17188_v20 = vpop.f32.mrb[237].mxu0 }
 0x30c   : > { %12413 = vmatmul.mubr.bf16.gmra.mrb[72].mxu1 %v18405_v48  ;;  %v17298_v54 = vadd.f32 %v17297_v39, %v17296_v3  ;;  %v18411_v48 = vld [vmem:[%s18758_s9 + $0x134] sm:$0xff]   ;;  %v17299_v57 = vpop.f32.mrb[236].mxu1  ;;  %v9977_v3 = vsel %vm18803_vm5, %v15594_v44, %v9976_v4  ;;  %v17189_v25 = vadd.f32 %v17188_v20, %v17187_v55  ;;  %v23370_v39 = vld [vmem:[%s18758_s9 + $0x190] sm:$0xe]  ;;  %v15595_v12 = vrot.slane %v9865_v1, 10 }
 0x30d   : > { %12420 = vmatprep.mubr.bf16.mxu1 %v15585_v16  ;;  %v9754_v16 = vrot.slane %v23341_v24, 5  ;;  %v17300_v31 = vpop.f32.mrb[237].mxu1  ;;  %v17190_v24 = vpop.f32.mrb[238].mxu0  ;;  %v9980_v44 = vsel %vm18803_vm5, %v9978_v8, %v9979_v53  ;;  %v9985_v55 = vrot.slane %v9983_v27, 4  ;;  %v15572_v20 = vrot.slane %v23370_v39, 9 }
 0x30e   : > { %v17302_v7 = vpop.f32.mrb[238].mxu1  ;;  %v17301_v14 = vadd.f32 %v17300_v31, %v17299_v57  ;;  %v17191_v18 = vpop.f32.mrb[239].mxu0  ;;  %v23379_v4 = vadd.f32 %v17298_v54, %v8721_v2  ;;  %v8726_v46 = vadd.f32 %v17189_v25, %v23155_v47  ;;  %v9986_v57 = vrot.slane %v23364_v6, 6  ;;  %v18418_v54 = vld [vmem:[%s18758_s9 + $0x284] sm:$0xff]   ;;  %v23392_v53 = vld [vmem:[%s18758_s9 + $0xb8] sm:$0xc] }
 0x30f   : > { %v17303_v9 = vpop.f32.mrb[239].mxu1  ;;  %v9760_v31 = vrot.slane %v9758_v49, 4  ;;  %v9761_v8 = vrot.slane %v23376_v41, 5  ;;  %v23395_v47 = vld [vmem:[%s18758_s9 + $0xbc] sm:$0xf]  ;;  %v15610_v2 = vcombine.low %v9977_v3, %v9980_v44  ;;  %v18413_v25 = vld [vmem:[%s18758_s9 + $0x150] sm:$0xff]   ;;  %v9984_v3 = vsel %vm18803_vm5, %v15595_v12, %v9983_v27 }
 0x310   : > { %v17304_v1 = vadd.f32 %v17303_v9, %v17302_v7  ;;  %v23400_v9 = vadd.f32 %v17301_v14, %v8726_v46  ;;  %v9870_v6 = vld [vmem:[%s18758_s9 + $0xc0] sm:$0x3]  ;;  %v18423_v7 = vld [vmem:[%s25093_s2 + $0x658] sm:$0xff]   ;;  %v17193_v39 = vpop.f32.mrb[240].mxu0  ;;  %v15596_v41 = vrot.slane %v23392_v53, 10 }
 0x311   : > { %17743 = vmatprep.subr.bf16.mxu0 %v18423_v7  ;;  %v9993_v44 = vrot.slane %v9870_v6, 6  ;;  %v17194_v46 = vpop.f32.mrb[241].mxu0  ;;  %v23434_v27 = vld [vmem:[%s18758_s9 + $0x1b4] sm:$0x1] }
 0x312   : > { %12518 = vmatmul.mubr.bf16.gmra.mrb[76].mxu0 %v15609_v0  ;;  %v17192_v0 = vadd.f32 %v17191_v18, %v17190_v24  ;;  %v18422_v18 = vld [vmem:[%s25093_s2 + $0x5f8] sm:$0xff]   ;;  %v9755_v24 = vsel %vm18773_vm4, %v9753_v35, %v9754_v16  ;;  %v17305_v16 = vpop.f32.mrb[240].mxu1 }
 0x313   : > { %12525 = vmatprep.mubr.bf16.mxu0 %v18412_v19  ;;  %17639 = vmatprep.subr.bf16.mxu1 %v18422_v18 }
 0x314   : > { %12421 = vmatmul.mubr.bf16.gmra.mrb[76].mxu1 %v18411_v48  ;;  %v8729_v19 = vadd.f32 %v17192_v0, %v23159_v10  ;;  %v25220_v48 = vrot.slane %v23335_v63, 5  ;;  %v18424_v63 = vld [vmem:[%s25093_s2 + $0x5b8] sm:$0xff]   ;;  %v17306_v0 = vpop.f32.mrb[241].mxu1 }
 0x315   : > { %12428 = vmatprep.mubr.bf16.mxu1 %v15586_v60  ;;  %v9990_v60 = vrot.slane %v23395_v47, 6  ;;  %17640 = vmatpush3.bf16.msra.mxu1 %v18424_v63  ;;  %v17195_v47 = vadd.f32 %v17194_v46, %v17193_v39  ;;  %v17307_v18 = vadd.f32 %v17306_v0, %v17305_v16  ;;  %v9759_v39 = vsel %vm18773_vm4, %v15572_v20, %v9758_v49  ;;  %v23446_v16 = vld [vmem:[%s18758_s9 + $0xd8] sm:$0xf]  ;;  %v18420_v46 = vld [vmem:[%s18758_s9 + $0x2a0] sm:$0xff]  }
 0x316   : > { %v9752_v10 = vsel %vm18773_vm4, %v15571_v62, %v25220_v48  ;;  %v23413_v14 = vadd.f32 %v17304_v1, %v8729_v19  ;;  %v18425_v62 = vld [vmem:[%s25093_s2 + $0x618] sm:$0xff]   ;;  %v23426_v1 = vld [vmem:[%s18758_s9 + $0x1b0] sm:$0xf]  ;;  %v9987_v19 = vsel %vm18803_vm5, %v9985_v55, %v9986_v57  ;;  %v17308_v48 = vpop.f32.mrb[242].mxu1  ;;  %v9762_v63 = vsel %vm18773_vm4, %v9760_v31, %v9761_v8  ;;  %v9871_v8 = vld [vmem:[%s18758_s9 + $0xd4] sm:$0xc] }
 0x317   : > { %v15587_v35 = vcombine.low %v9752_v10, %v9755_v24  ;;  %17744 = vmatpush3.bf16.msra.mxu0 %v18425_v62  ;;  %v23431_v10 = vld [vmem:[%s18758_s9 + $0x1ac] sm:$0xe]  ;;  %v9992_v12 = vrot.slane %v9990_v60, 4  ;;  %v17309_v6 = vpop.f32.mrb[243].mxu1  ;;  %v8734_v55 = vadd.f32 %v17195_v47, %v23174_v58  ;;  %v15611_v7 = vcombine.low %v9984_v3, %v9987_v19 }
 0x318   : > { %v17310_v24 = vadd.f32 %v17309_v6, %v17308_v48  ;;  %v15573_v62 = vrot.slane %v23431_v10, 9  ;;  %v9768_v3 = vrot.slane %v23434_v27, 5  ;;  %v17311_v0 = vpop.f32.mrb[244].mxu1  ;;  %v25221_v20 = vrot.slane %v25219_v17, 4  ;;  %v9873_v6 = vld [vmem:[%s18758_s9 + $0xdc] sm:$0x3] }
 0x319   : > { %v23454_v49 = vadd.f32 %v17307_v18, %v8734_v55  ;;  %v17312_v47 = vpop.f32.mrb[245].mxu1  ;;  %v9997_v48 = vrot.slane %v23446_v16, 6 }
 0x31a   : > { %12526 = vmatmul.mubr.bf16.gmra.mrb[80].mxu0 %v15610_v2  ;;  %v17196_v2 = vpop.f32.mrb[242].mxu0  ;;  %v23459_v31 = vadd.f32 %v25221_v20, %v25219_v17  ;;  %v17314_v27 = vpop.f32.mrb[246].mxu1  ;;  %v18429_v17 = vld [vmem:[%s25093_s2 + $0x660] sm:$0xff]   ;;  %v23478_v20 = vld [vmem:[%s18758_s9 + $0x208] sm:$0xc] }
 0x31b   : > { %12533 = vmatprep.mubr.bf16.mxu0 %v18418_v54  ;;  %v17197_v53 = vpop.f32.mrb[243].mxu0  ;;  %v9765_v54 = vrot.slane %v23426_v1, 5  ;;  %v17315_v55 = vpop.f32.mrb[247].mxu1  ;;  %17745 = vmatprep.subr.bf16.mxu0 %v18429_v17  ;;  %v18421_v17 = vld [vmem:[%s18758_s9 + $0x188] sm:$0xff]  }
 0x31c   : > { %12429 = vmatmul.mubr.bf16.gmra.mrb[80].mxu1 %v18413_v25  ;;  %v17198_v57 = vadd.f32 %v17197_v53, %v17196_v2  ;;  %v18419_v25 = vld [vmem:[%s18758_s9 + $0x16c] sm:$0xff]   ;;  %v17199_v21 = vpop.f32.mrb[244].mxu0  ;;  %v9994_v2 = vsel %vm18803_vm5, %v9992_v12, %v9993_v44  ;;  %v15588_v53 = vcombine.low %v9759_v39, %v9762_v63 }
 0x31d   : > { %12436 = vmatprep.mubr.bf16.mxu1 %v15587_v35  ;;  %v9767_v35 = vrot.slane %v9765_v54, 4  ;;  %v17200_v19 = vpop.f32.mrb[245].mxu0  ;;  %v23472_v44 = vld [vmem:[%s18758_s9 + $0x20c] sm:$0xf] }
 0x31e   : > { %v8737_v58 = vadd.f32 %v17198_v57, %v23187_v29  ;;  %v9991_v29 = vsel %vm18803_vm5, %v15596_v41, %v9990_v60  ;;  %v17201_v10 = vadd.f32 %v17200_v19, %v17199_v21  ;;  %v17202_v18 = vpop.f32.mrb[246].mxu0  ;;  %v17313_v60 = vadd.f32 %v17312_v47, %v17311_v0  ;;  %v23481_v19 = vld [vmem:[%s18758_s9 + $0x210] sm:$0x3]  ;;  %v23488_v47 = vld [vmem:[%s18758_s9 + $0xf4] sm:$0xf] }
 0x31f   : > { %v17203_v41 = vpop.f32.mrb[247].mxu0  ;;  %v17316_v21 = vadd.f32 %v17315_v55, %v17314_v27  ;;  %v15612_v63 = vcombine.low %v9991_v29, %v9994_v2  ;;  %v15597_v0 = vrot.slane %v9871_v8, 10  ;;  %v18431_v8 = vld [vmem:[%s25093_s2 + $0x620] sm:$0xff]   ;;  %v15798_v2 = vrot.slane %v23478_v20, 10  ;;  %v23523_v20 = vld [vmem:[%s18758_s9 + $0x208] sm:$0x1] }
 0x320   : > { %v23474_v12 = vadd.f32 %v17310_v24, %v8737_v58  ;;  %v8742_v57 = vadd.f32 %v17201_v10, %v23191_v42  ;;  %v17204_v16 = vadd.f32 %v17203_v41, %v17202_v18  ;;  %v23493_v42 = vld [vmem:[%s25093_s2 + $0x680] sm:$0xff]   ;;  %v9999_v24 = vrot.slane %v9997_v48, 4  ;;  %17746 = vmatpush3.bf16.msra.mxu0 %v18431_v8 }
 0x321   : > { %v10668_v10 = vrot.slane %v23472_v44, 6  ;;  %v18426_v29 = vld [vmem:[%s18758_s9 + $0x2bc] sm:$0xff]   ;;  %v10671_v18 = vrot.slane %v23481_v19, 6  ;;  %18026 = vmatprep.subr.bf16.mxu1 %v23493_v42  ;;  %v10004_v41 = vrot.slane %v23488_v47, 6  ;;  %v23520_v44 = vld [vmem:[%s18758_s9 + $0x204] sm:$0xf] }
 0x322   : > { %12534 = vmatmul.mubr.bf16.gmra.mrb[84].mxu0 %v15611_v7  ;;  %25222 = vst [vmem:[#allocation12_spill] sm:$0xff] %v23474_v12  ;;  %v23484_v7 = vld [vmem:[%s18758_s9 + $0xf0] sm:$0xc]  ;;  %v8745_v58 = vadd.f32 %v17204_v16, %v23200_v32  ;;  %v23506_v32 = vadd.f32 %v17313_v60, %v8742_v57  ;;  %v23517_v55 = vld [vmem:[%s18758_s9 + $0x200] sm:$0xe]  ;;  %v17205_v16 = vpop.f32.mrb[248].mxu0 }
 0x323   : > { %12541 = vmatprep.mubr.bf16.mxu0 %v18420_v46  ;;  %v10000_v46 = vrot.slane %v9873_v6, 6  ;;  %v15598_v27 = vrot.slane %v23484_v7, 10  ;;  %v9766_v6 = vsel %vm18773_vm4, %v15573_v62, %v9765_v54  ;;  %v10670_v57 = vrot.slane %v10668_v10, 4  ;;  %v17317_v1 = vpop.f32.mrb[248].mxu1 }
 0x324   : > { %12437 = vmatmul.mubr.bf16.gmra.mrb[84].mxu1 %v18419_v25  ;;  %v9876_v25 = vld [vmem:[%s18758_s9 + $0xf8] sm:$0x3]  ;;  %v23525_v60 = vadd.f32 %v17316_v21, %v8745_v58  ;;  %v9998_v54 = vsel %vm18803_vm5, %v15597_v0, %v9997_v48  ;;  %v10380_v47 = vrot.slane %v23520_v44, 5  ;;  %v18434_v44 = vld [vmem:[%s25093_s2 + $0x668] sm:$0xff]  }
 0x325   : > { %12444 = vmatprep.mubr.bf16.mxu1 %v15588_v53  ;;  %v9769_v53 = vsel %vm18773_vm4, %v9767_v35, %v9768_v3  ;;  %v10001_v62 = vsel %vm18803_vm5, %v9999_v24, %v10000_v46  ;;  %v17206_v35 = vpop.f32.mrb[249].mxu0  ;;  %v17318_v3 = vpop.f32.mrb[249].mxu1  ;;  %v10007_v7 = vrot.slane %v9876_v25, 6  ;;  %v15754_v24 = vld [vmem:[%s18758_s9 + $0x228] sm:$0xf]  ;;  %v10383_v46 = vrot.slane %v23523_v20, 5  ;;  %17747 = vmatprep.subr.bf16.mxu0 %v18434_v44 }
 0x326   : > { %v15589_v19 = vcombine.low %v9766_v6, %v9769_v53  ;;  %v17207_v8 = vadd.f32 %v17206_v35, %v17205_v16  ;;  %v17319_v21 = vadd.f32 %v17318_v3, %v17317_v1  ;;  %v17208_v58 = vpop.f32.mrb[250].mxu0  ;;  %v17320_v39 = vpop.f32.mrb[250].mxu1  ;;  %v15718_v6 = vrot.slane %v23517_v55, 9  ;;  %v15753_v20 = vld [vmem:[%s18758_s9 + $0x224] sm:$0xc] }
 0x327   : > { %v17209_v48 = vpop.f32.mrb[251].mxu0  ;;  %v17321_v0 = vpop.f32.mrb[251].mxu1  ;;  %v15613_v55 = vcombine.low %v9998_v54, %v10001_v62  ;;  %v10669_v16 = vsel %vm18803_vm5, %v15798_v2, %v10668_v10  ;;  %v15755_v1 = vld [vmem:[%s18758_s9 + $0x22c] sm:$0x3]  ;;  %v18427_v35 = vld [vmem:[%s18758_s9 + $0x1a4] sm:$0xff]   ;;  %v10382_v3 = vrot.slane %v10380_v47, 4  ;;  %v10005_v2 = vsel %vm18803_vm5, %v15598_v27, %v10004_v41 }
 0x328   : > { %v17210_v25 = vadd.f32 %v17209_v48, %v17208_v58  ;;  %v17322_v53 = vadd.f32 %v17321_v0, %v17320_v39  ;;  %v18428_v39 = vld [vmem:[%s18758_s9 + $0x2d8] sm:$0xff]   ;;  %v10675_v58 = vrot.slane %v15754_v24, 6  ;;  %v23564_v54 = vld [vmem:[%s18758_s9 + $0x220] sm:$0xf]  ;;  %v10678_v62 = vrot.slane %v15755_v1, 6 }
 0x329   : > { %v23575_v24 = vld [vmem:[%s18758_s9 + $0x244] sm:$0xf]  ;;  %v15758_v48 = vld [vmem:[%s18758_s9 + $0x248] sm:$0x3] }
 0x32a   : > { %12542 = vmatmul.mubr.bf16.gmra.mrb[88].mxu0 %v15612_v63  ;;  %v10006_v63 = vrot.slane %v10004_v41, 4  ;;  %v15675_v44 = vld [vmem:[%s18758_s9 + $0x224] sm:$0x1] }
 0x32b   : > { %12549 = vmatprep.mubr.bf16.mxu0 %v18426_v29  ;;  %v8750_v29 = vadd.f32 %v17207_v8, %v23207_v11  ;;  %v23546_v11 = vld [vmem:[%s18758_s9 + $0x110] sm:$0xf]  ;;  %v8753_v8 = vadd.f32 %v17210_v25, %v23211_v56  ;;  %v15799_v56 = vrot.slane %v15753_v20, 10  ;;  %v10387_v20 = vrot.slane %v23564_v54, 5 }
 0x32c   : > { %12445 = vmatmul.mubr.bf16.gmra.mrb[88].mxu1 %v18421_v17  ;;  %v10672_v17 = vsel %vm18803_vm5, %v10670_v57, %v10671_v18  ;;  %v10008_v18 = vsel %vm18803_vm5, %v10006_v63, %v10007_v7  ;;  %v23561_v57 = vld [vmem:[%s18758_s9 + $0x114] sm:$0x3]  ;;  %v15673_v7 = vld [vmem:[%s18758_s9 + $0x21c] sm:$0xe]  ;;  %v25225_v54 = vrot.slane %v23546_v11, 6 }
 0x32d   : > { %12452 = vmatprep.mubr.bf16.mxu1 %v15589_v19  ;;  %v23552_v19 = vld [vmem:[%s18758_s9 + $0x10c] sm:$0xc]  ;;  %v23554_v10 = vadd.f32 %v17319_v21, %v8750_v29  ;;  %v23570_v0 = vadd.f32 %v17322_v53, %v8753_v8  ;;  %v15814_v27 = vcombine.low %v10669_v16, %v10672_v17  ;;  %v10677_v29 = vrot.slane %v10675_v58, 4 }
 0x32e   : > { %v18436_v21 = vld [vmem:[%s25093_s2 + $0x628] sm:$0xff]   ;;  %v15599_v41 = vrot.slane %v23552_v19, 10  ;;  %v17211_v63 = vpop.f32.mrb[252].mxu0  ;;  %v10014_v25 = vrot.slane %v23561_v57, 6  ;;  %v15614_v53 = vcombine.low %v10005_v2, %v10008_v18  ;;  %v10384_v16 = vsel %vm18773_vm4, %v10382_v3, %v10383_v46 }
 0x32f   : > { %25223 = vst [vmem:[#allocation16_spill] sm:$0xff] %v23554_v10  ;;  %25224 = vst [vmem:[#allocation24_spill] sm:$0xff] %v23570_v0  ;;  %v17212_v1 = vpop.f32.mrb[253].mxu0  ;;  %17748 = vmatpush3.bf16.msra.mxu0 %v18436_v21  ;;  %v10676_v57 = vsel %vm18803_vm5, %v15799_v56, %v10675_v58  ;;  %v10013_v2 = vrot.slane %v25225_v54, 4  ;;  %v15719_v18 = vrot.slane %v15673_v7, 9  ;;  %v10390_v46 = vrot.slane %v15675_v44, 5 }
 0x330   : > { %v17323_v17 = vpop.f32.mrb[252].mxu1  ;;  %v17213_v8 = vadd.f32 %v17212_v1, %v17211_v63  ;;  %v17214_v19 = vpop.f32.mrb[254].mxu0  ;;  %v23593_v0 = vld [vmem:[%s18758_s9 + $0x12c] sm:$0xf]  ;;  %v18439_v58 = vld [vmem:[%s25093_s2 + $0x670] sm:$0xff]   ;;  %v10389_v7 = vrot.slane %v10387_v20, 4 }
 0x331   : > { %v17324_v21 = vpop.f32.mrb[253].mxu1  ;;  %v18432_v56 = vld [vmem:[%s18758_s9 + $0x2f4] sm:$0xff]   ;;  %v9882_v54 = vld [vmem:[%s18758_s9 + $0x130] sm:$0x3]  ;;  %17749 = vmatprep.subr.bf16.mxu0 %v18439_v58  ;;  %v10018_v12 = vrot.slane %v23593_v0, 6 }
 0x332   : > { %12550 = vmatmul.mubr.bf16.gmra.mrb[92].mxu0 %v15613_v55  ;;  %v10381_v55 = vsel %vm18773_vm4, %v15718_v6, %v10380_v47  ;;  %v17215_v47 = vpop.f32.mrb[255].mxu0  ;;  %v10682_v6 = vrot.slane %v23575_v24, 6  ;;  %v8758_v3 = vadd.f32 %v17213_v8, %v23220_v5  ;;  %v17325_v63 = vadd.f32 %v17324_v21, %v17323_v17  ;;  %v23605_v21 = vld [vmem:[%s18758_s9 + $0x23c] sm:$0xf] }
 0x333   : > { %12557 = vmatprep.mubr.bf16.mxu0 %v18428_v39  ;;  %v15756_v39 = vld [vmem:[%s18758_s9 + $0x240] sm:$0xc]  ;;  %v17216_v1 = vadd.f32 %v17215_v47, %v17214_v19  ;;  %v10685_v5 = vrot.slane %v15758_v48, 6  ;;  %v9880_v19 = vld [vmem:[%s18758_s9 + $0x128] sm:$0xc]  ;;  %v15734_v47 = vcombine.low %v10381_v55, %v10384_v16  ;;  %v25226_v55 = vrot.slane %v23546_v11, 6 }
 0x334   : > { %12453 = vmatmul.mubr.bf16.gmra.mrb[92].mxu1 %v18427_v35  ;;  %v17326_v35 = vpop.f32.mrb[254].mxu1  ;;  %v15800_v44 = vrot.slane %v15756_v39, 10  ;;  %v10684_v10 = vrot.slane %v10682_v6, 4  ;;  %v18435_v48 = vld [vmem:[%s25093_s2 + $0x688] sm:$0xff]   ;;  %v23615_v39 = vadd.f32 %v17325_v63, %v8758_v3  ;;  %v10015_v16 = vsel %vm18803_vm5, %v10013_v2, %v10014_v25  ;;  %v15759_v3 = vld [vmem:[%s18758_s9 + $0x25c] sm:$0xc] }
 0x335   : > { %12654 = vmatprep.mubr.bf16.mxu1 %v15814_v27  ;;  %v10679_v27 = vsel %vm18803_vm5, %v10677_v29, %v10678_v62  ;;  %v17327_v24 = vpop.f32.mrb[255].mxu1  ;;  %v8761_v17 = vadd.f32 %v17216_v1, %v23237_v59  ;;  %v15676_v62 = vld [vmem:[%s18758_s9 + $0x238] sm:$0xe]  ;;  %v23613_v29 = vld [vmem:[%s18758_s9 + $0x240] sm:$0x1]  ;;  %v10012_v0 = vsel %vm18803_vm5, %v15599_v41, %v25226_v55  ;;  %v10394_v1 = vrot.slane %v23605_v21, 5 }
 0x336   : > { %v17328_v8 = vadd.f32 %v17327_v24, %v17326_v35  ;;  %v15815_v59 = vcombine.low %v10676_v57, %v10679_v27  ;;  %v23631_v57 = vsel %vm18773_vm4, %v15719_v18, %v10387_v20  ;;  %v23635_v11 = vsel %vm18773_vm4, %v10389_v7, %v10390_v46  ;;  %v15760_v41 = vld [vmem:[%s18758_s9 + $0x260] sm:$0xf]  ;;  %v23640_v63 = vld [vmem:[%s18758_s9 + $0x264] sm:$0x3]  ;;  %v23643_v27 = vld [vmem:[%s18758_s9 + $0x144] sm:$0xc] }
 0x337   : > { %v15600_v25 = vrot.slane %v9880_v19, 10  ;;  %v10020_v2 = vrot.slane %v10018_v12, 4  ;;  %v10021_v58 = vrot.slane %v9882_v54, 6  ;;  %v15615_v20 = vcombine.low %v10012_v0, %v10015_v16  ;;  %v18433_v18 = vld [vmem:[%s18758_s9 + $0x310] sm:$0xff]  }
 0x338   : > { %v23617_v35 = vadd.f32 %v17328_v8, %v8761_v17  ;;  %v10683_v46 = vsel %vm18803_vm5, %v15800_v44, %v10682_v6  ;;  %v10686_v7 = vsel %vm18803_vm5, %v10684_v10, %v10685_v5  ;;  %v15720_v24 = vrot.slane %v15676_v62, 9  ;;  %v23652_v17 = vld [vmem:[%s18758_s9 + $0x148] sm:$0xf]  ;;  %v23655_v8 = vld [vmem:[%s18758_s9 + $0x14c] sm:$0x3]  ;;  %v18440_v6 = vld [vmem:[%s25093_s2 + $0x690] sm:$0xff]  }
 0x339   : > { %v10396_v19 = vrot.slane %v10394_v1, 4  ;;  %v10397_v54 = vrot.slane %v23613_v29, 5  ;;  %v15801_v21 = vrot.slane %v15759_v3, 10  ;;  %v15735_v10 = vcombine.low %v23631_v57, %v23635_v11  ;;  %v23667_v29 = vld [vmem:[%s18758_s9 + $0x258] sm:$0xf] }
 0x33a   : > { %12558 = vmatmul.mubr.bf16.gmra.mrb[96].mxu0 %v15614_v53  ;;  %v18441_v53 = vld [vmem:[%s25093_s2 + $0x630] sm:$0xff]   ;;  %v15601_v62 = vrot.slane %v23643_v27, 10  ;;  %v23671_v55 = vsel %vm18803_vm5, %v15600_v25, %v10018_v12  ;;  %v23675_v0 = vsel %vm18803_vm5, %v10020_v2, %v10021_v58  ;;  %v10028_v11 = vrot.slane %v23655_v8, 6 }
 0x33b   : > { %12565 = vmatprep.mubr.bf16.mxu0 %v18432_v56  ;;  %v10689_v56 = vrot.slane %v15760_v41, 6  ;;  %17750 = vmatpush3.bf16.msra.mxu0 %v18441_v53  ;;  %v23679_v3 = vld [vmem:[%s18758_s9 + $0x254] sm:$0xe]  ;;  %v18444_v41 = vld [vmem:[%s25093_s2 + $0x678] sm:$0xff]   ;;  %v25227_v12 = vrot.slane %v23459_v31, 2  ;;  %v15816_v25 = vcombine.low %v10683_v46, %v10686_v7  ;;  %v23691_v2 = vsel %vm18773_vm4, %v15720_v24, %v10394_v1 }
 0x33c   : > { %12655 = vmatmul.mubr.bf16.vlgmr.msra.gmra.mrb[96].mxu1 %v15734_v47  ;;  %v10692_v47 = vrot.slane %v23640_v63, 6  ;;  %v23699_v46 = vld [vmem:[%s18758_s9 + $0x27c] sm:$0xf]  ;;  %v15616_v1 = vcombine.low %v23671_v55, %v23675_v0  ;;  %v15762_v24 = vld [vmem:[%s18758_s9 + $0x278] sm:$0xc]  ;;  %17751 = vmatprep.subr.bf16.mxu0 %v18444_v41  ;;  %v15721_v41 = vrot.slane %v23679_v3, 9 }
 0x33d   : > { %18027 = vmatpush3.bf16.msra.mxu1 %v23493_v42  ;;  %12662 = vmatprep.mubr.bf16.mxu1 %v15815_v59  ;;  %v17217_v42 = vpop.f32.mrb[0].mxu0  ;;  %v10691_v5 = vrot.slane %v10689_v56, 4  ;;  %v10025_v59 = vrot.slane %v23652_v17, 6  ;;  %v17329_v16 = vpop.f32.mrb[0].mxu1  ;;  %v23687_v63 = vadd.f32 %v25227_v12, %v23459_v31  ;;  %v23694_v17 = vld [vmem:[%s18758_s9 + $0x25c] sm:$0x1]  ;;  %v10690_v7 = vsel %vm18803_vm5, %v15801_v21, %v10689_v56 }
 0x33e   : > { %18028 = vmatprep.subr.bf16.mxu1 %v18435_v48  ;;  %v17218_v44 = vpop.f32.mrb[1].mxu0  ;;  %v17330_v58 = vpop.f32.mrb[1].mxu1  ;;  %v9887_v56 = vld [vmem:[%s18758_s9 + $0x164] sm:$0xf]  ;;  %v18437_v21 = vld [vmem:[%s18758_s9 + $0x32c] sm:$0xff]  }
 0x33f   : > { %v17219_v53 = vadd.f32 %v17218_v44, %v17217_v42  ;;  %v17220_v57 = vpop.f32.mrb[2].mxu0  ;;  %25228 = vst [vmem:[#allocation13_spill] sm:$0xff] %v23687_v63  ;;  %v17331_v42 = vadd.f32 %v17330_v58, %v17329_v16  ;;  %v17332_v44 = vpop.f32.mrb[2].mxu1  ;;  %v18446_v16 = vld [vmem:[%s25093_s2 + $0x638] sm:$0xff]   ;;  %v9888_v12 = vld [vmem:[%s18758_s9 + $0x168] sm:$0x3] }
 0x340   : > { %v17221_v27 = vpop.f32.mrb[3].mxu0  ;;  %v10032_v58 = vrot.slane %v9887_v56, 6  ;;  %17752 = vmatpush3.bf16.msra.mxu0 %v18446_v16  ;;  %v15766_v16 = vld [vmem:[%s18758_s9 + $0x298] sm:$0xf] }
 0x341   : > { %18029 = vmatpush3.bf16.msra.mxu1 %v18435_v48  ;;  %v8766_v8 = vadd.f32 %v17219_v53, %v22846_v13  ;;  %v17222_v31 = vadd.f32 %v17221_v27, %v17220_v57  ;;  %v18445_v48 = vld [vmem:[%s25093_s2 + $0x698] sm:$0xff]   ;;  %v17333_v13 = vpop.f32.mrb[3].mxu1  ;;  %v9886_v53 = vld [vmem:[%s18758_s9 + $0x160] sm:$0xc]  ;;  %v10693_v57 = vsel %vm18803_vm5, %v10691_v5, %v10692_v47  ;;  %v10404_v27 = vrot.slane %v23694_v17, 5 }
 0x342   : > { %12566 = vmatmul.mubr.bf16.gmra.mrb[100].mxu0 %v15615_v20  ;;  %v10401_v20 = vrot.slane %v23667_v29, 5  ;;  %v23712_v29 = vld [vmem:[%s18758_s9 + $0x280] sm:$0x3]  ;;  %18030 = vmatprep.subr.bf16.mxu1 %v18440_v6  ;;  %v17334_v0 = vadd.f32 %v17333_v13, %v17332_v44  ;;  %v15802_v44 = vrot.slane %v15762_v24, 10  ;;  %v10026_v5 = vsel %vm18803_vm5, %v15601_v62, %v10025_v59  ;;  %v23740_v13 = vld [vmem:[%s18758_s9 + $0x278] sm:$0x1] }
 0x343   : > { %12573 = vmatprep.mubr.bf16.mxu0 %v18433_v18  ;;  %v10398_v18 = vsel %vm18773_vm4, %v10396_v19, %v10397_v54  ;;  %v8769_v55 = vadd.f32 %v17222_v31, %v22866_v37  ;;  %v10027_v19 = vrot.slane %v10025_v59, 4  ;;  %v10696_v54 = vrot.slane %v23699_v46, 6  ;;  %v18449_v59 = vld [vmem:[%s25093_s2 + $0x6a0] sm:$0xff]  }
 0x344   : > { %12663 = vmatmul.mubr.bf16.gmra.mrb[100].mxu1 %v15735_v10  ;;  %v23726_v10 = vadd.f32 %v17331_v42, %v8766_v8  ;;  %v10403_v37 = vrot.slane %v10401_v20, 4  ;;  %v10699_v31 = vrot.slane %v23712_v29, 6  ;;  %v15736_v47 = vcombine.low %v23691_v2, %v10398_v18  ;;  %v15682_v8 = vld [vmem:[%s18758_s9 + $0x270] sm:$0xe]  ;;  %v15765_v29 = vld [vmem:[%s18758_s9 + $0x294] sm:$0xc] }
 0x345   : > { %12670 = vmatprep.mubr.bf16.mxu1 %v15816_v25  ;;  %18031 = vmatpush3.bf16.msra.mxu1 %v18440_v6  ;;  %v23731_v25 = vld [vmem:[%s18758_s9 + $0x274] sm:$0xf]  ;;  %v10698_v3 = vrot.slane %v10696_v54, 4  ;;  %v15602_v6 = vrot.slane %v9886_v53, 10  ;;  %v10029_v17 = vsel %vm18803_vm5, %v10027_v19, %v10028_v11  ;;  %v10034_v42 = vrot.slane %v10032_v58, 4 }
 0x346   : > { %18032 = vmatprep.subr.bf16.mxu1 %v18445_v48  ;;  %v10035_v46 = vrot.slane %v9888_v12, 6  ;;  %v23742_v24 = vadd.f32 %v17334_v0, %v8769_v55  ;;  %v15817_v2 = vcombine.low %v10690_v7, %v10693_v57  ;;  %v10408_v62 = vrot.slane %v23731_v25, 5  ;;  %v18438_v55 = vld [vmem:[%s18758_s9 + $0x348] sm:$0xff]   ;;  %v15767_v19 = vld [vmem:[%s18758_s9 + $0x29c] sm:$0x3] }
 0x347   : > { %v15617_v18 = vcombine.low %v10026_v5, %v10029_v17  ;;  %v10405_v7 = vsel %vm18773_vm4, %v10403_v37, %v10404_v27  ;;  %v15722_v0 = vrot.slane %v15682_v8, 9  ;;  %v10703_v53 = vrot.slane %v15766_v16, 6  ;;  %v9891_v8 = vld [vmem:[%s18758_s9 + $0x184] sm:$0x3]  ;;  %v23774_v16 = vld [vmem:[%s18758_s9 + $0x290] sm:$0xf] }
 0x348   : > { %v10410_v57 = vrot.slane %v10408_v62, 4  ;;  %v10411_v12 = vrot.slane %v23740_v13, 5  ;;  %v15803_v25 = vrot.slane %v15765_v29, 10  ;;  %v23767_v5 = vsel %vm18803_vm5, %v15602_v6, %v10032_v58 }
 0x349   : > { %18033 = vmatpush3.bf16.msra.mxu1 %v18445_v48  ;;  %v17223_v48 = vpop.f32.mrb[4].mxu0  ;;  %v10706_v29 = vrot.slane %v15767_v19, 6  ;;  %v10409_v19 = vsel %vm18773_vm4, %v15722_v0, %v10408_v62  ;;  %v10042_v62 = vrot.slane %v9891_v8, 6 }
 0x34a   : > { %12574 = vmatmul.mubr.bf16.gmra.mrb[104].mxu0 %v15616_v1  ;;  %18034 = vmatprep.subr.bf16.mxu1 %v18449_v59  ;;  %v10402_v1 = vsel %vm18773_vm4, %v15721_v41, %v10401_v20  ;;  %v17224_v56 = vpop.f32.mrb[5].mxu0  ;;  %v23761_v20 = vld [vmem:[%s18758_s9 + $0x180] sm:$0xf] }
 0x34b   : > { %12581 = vmatprep.mubr.bf16.mxu0 %v18437_v21  ;;  %v10697_v21 = vsel %vm18803_vm5, %v15802_v44, %v10696_v54  ;;  %v17335_v41 = vpop.f32.mrb[4].mxu1  ;;  %v17225_v37 = vadd.f32 %v17224_v56, %v17223_v48  ;;  %v17226_v27 = vpop.f32.mrb[6].mxu0  ;;  %v10036_v54 = vsel %vm18803_vm5, %v10034_v42, %v10035_v46  ;;  %v9889_v44 = vld [vmem:[%s18758_s9 + $0x17c] sm:$0xc]  ;;  %v15737_v17 = vcombine.low %v10402_v1, %v10405_v7  ;;  %v15685_v42 = vld [vmem:[%s18758_s9 + $0x28c] sm:$0xe] }
 0x34c   : > { %12671 = vmatmul.mubr.bf16.gmra.mrb[104].mxu1 %v15736_v47  ;;  %v10700_v47 = vsel %vm18803_vm5, %v10698_v3, %v10699_v31  ;;  %v17336_v13 = vpop.f32.mrb[5].mxu1  ;;  %v10039_v6 = vrot.slane %v23761_v20, 6  ;;  %v15618_v7 = vcombine.low %v23767_v5, %v10036_v54  ;;  %v15687_v56 = vld [vmem:[%s18758_s9 + $0x294] sm:$0x1]  ;;  %v15603_v20 = vrot.slane %v9889_v44, 10 }
 0x34d   : > { %12678 = vmatprep.mubr.bf16.mxu1 %v15817_v2  ;;  %18035 = vmatpush3.bf16.msra.mxu1 %v18449_v59  ;;  %v17227_v2 = vpop.f32.mrb[7].mxu0  ;;  %v10705_v59 = vrot.slane %v10703_v53, 4  ;;  %v8774_v31 = vadd.f32 %v17225_v37, %v22917_v40  ;;  %v17337_v3 = vadd.f32 %v17336_v13, %v17335_v41  ;;  %v17338_v48 = vpop.f32.mrb[6].mxu1  ;;  %v15818_v1 = vcombine.low %v10697_v21, %v10700_v47  ;;  %v15770_v5 = vld [vmem:[%s18758_s9 + $0x2b8] sm:$0x3] }
 0x34e   : > { %v17228_v58 = vadd.f32 %v17227_v2, %v17226_v27  ;;  %v17339_v46 = vpop.f32.mrb[7].mxu1  ;;  %v10415_v40 = vrot.slane %v23774_v16, 5  ;;  %v15769_v27 = vld [vmem:[%s18758_s9 + $0x2b4] sm:$0xf]  ;;  %v10412_v21 = vsel %vm18773_vm4, %v10410_v57, %v10411_v12  ;;  %v23791_v47 = vsel %vm18803_vm5, %v15803_v25, %v10703_v53  ;;  %v9892_v54 = vld [vmem:[%s18758_s9 + $0x198] sm:$0xc] }
 0x34f   : > { %v17340_v37 = vadd.f32 %v17339_v46, %v17338_v48  ;;  %v15723_v0 = vrot.slane %v15685_v42, 9  ;;  %v10707_v44 = vsel %vm18803_vm5, %v10705_v59, %v10706_v29  ;;  %v10041_v13 = vrot.slane %v10039_v6, 4  ;;  %v9893_v12 = vld [vmem:[%s18758_s9 + $0x19c] sm:$0xf]  ;;  %v9894_v53 = vld [vmem:[%s18758_s9 + $0x1a0] sm:$0x3] }
 0x350   : > { %v8777_v41 = vadd.f32 %v17228_v58, %v22926_v36  ;;  %v25102_v36 = vmov 0.0   ;;  %v10710_v57 = vrot.slane %v15769_v27, 6  ;;  %v23801_v25 = vadd.f32 %v17337_v3, %v8774_v31  ;;  %v23804_v58 = vld [vmem:[%s18758_s9 + $0x2a8] sm:$0xe]  ;;  %v23807_v59 = vld [vmem:[%s18758_s9 + $0x2ac] sm:$0xf] }
 0x351   : > { %18074 = vmatprep.subr.bf16.mxu0 %v25102_v36  ;;  %v10417_v8 = vrot.slane %v10415_v40, 4  ;;  %v10418_v2 = vrot.slane %v15687_v56, 5  ;;  %v10713_v48 = vrot.slane %v15770_v5, 6  ;;  %v15604_v42 = vrot.slane %v9892_v54, 10  ;;  %v23810_v29 = vld [vmem:[%s18758_s9 + $0x2b0] sm:$0x1] }
 0x352   : > { %12582 = vmatmul.mubr.bf16.gmra.mrb[108].mxu0 %v15617_v18  ;;  %v15768_v18 = vld [vmem:[%s18758_s9 + $0x2b0] sm:$0xc]  ;;  %v10046_v46 = vrot.slane %v9893_v12, 6  ;;  %v10049_v11 = vrot.slane %v9894_v53, 6  ;;  %v15724_v27 = vrot.slane %v23804_v58, 9  ;;  %v18453_v31 = vld [vmem:[%s25093_s2 + $0x6a8] sm:$0xff]   ;;  %v15738_v3 = vcombine.low %v10409_v19, %v10412_v21 }
 0x353   : > { %12589 = vmatprep.mubr.bf16.mxu0 %v18438_v55  ;;  %v18442_v55 = vld [vmem:[%s18758_s9 + $0x364] sm:$0xff]   ;;  %v15804_v16 = vrot.slane %v15768_v18, 10  ;;  %v10043_v56 = vsel %vm18803_vm5, %v10041_v13, %v10042_v62  ;;  %v23820_v18 = vadd.f32 %v17340_v37, %v8777_v41  ;;  %v15819_v54 = vcombine.low %v23791_v47, %v10707_v44  ;;  %18036 = vmatprep.subr.bf16.mxu1 %v18453_v31  ;;  %v15771_v62 = vld [vmem:[%s18758_s9 + $0x2cc] sm:$0xc] }
 0x354   : > { %12679 = vmatmul.mubr.bf16.gmra.mrb[108].mxu1 %v15737_v17  ;;  %v10712_v17 = vrot.slane %v10710_v57, 4  ;;  %v10422_v12 = vrot.slane %v23807_v59, 5  ;;  %v10048_v19 = vrot.slane %v10046_v46, 4  ;;  %v10419_v21 = vsel %vm18773_vm4, %v10417_v8, %v10418_v2  ;;  %v18443_v44 = vld [vmem:[%s18758_s9 + $0x380] sm:$0xff]  }
 0x355   : > { %12686 = vmatprep.mubr.bf16.mxu1 %v15818_v1  ;;  %v10040_v1 = vsel %vm18803_vm5, %v15603_v20, %v10039_v6  ;;  %v23826_v6 = vsel %vm18773_vm4, %v15723_v0, %v10415_v40  ;;  %18037 = vmatpush3.bf16.msra.mxu1 %v18453_v31  ;;  %v23832_v47 = vsel %vm18803_vm5, %v15804_v16, %v10710_v57  ;;  %v10425_v8 = vrot.slane %v23810_v29, 5  ;;  %v15773_v57 = vld [vmem:[%s18758_s9 + $0x2d4] sm:$0x3] }
 0x356   : > { %v17229_v5 = vpop.f32.mrb[8].mxu0  ;;  %v15619_v20 = vcombine.low %v10040_v1, %v10043_v56  ;;  %v10714_v13 = vsel %vm18803_vm5, %v10712_v17, %v10713_v48  ;;  %v23841_v58 = vsel %vm18803_vm5, %v15604_v42, %v10046_v46  ;;  %v10424_v1 = vrot.slane %v10422_v12, 4  ;;  %v9895_v56 = vld [vmem:[%s18758_s9 + $0x1b4] sm:$0xc]  ;;  %v9896_v48 = vld [vmem:[%s18758_s9 + $0x1b8] sm:$0xf] }
 0x357   : > { %v17230_v53 = vpop.f32.mrb[9].mxu0  ;;  %v23850_v42 = vsel %vm18803_vm5, %v10048_v19, %v10049_v11  ;;  %v15805_v46 = vrot.slane %v15771_v62, 10  ;;  %v10720_v29 = vrot.slane %v15773_v57, 6  ;;  %v15820_v11 = vcombine.low %v23832_v47, %v10714_v13  ;;  %v15774_v57 = vld [vmem:[%s18758_s9 + $0x2e8] sm:$0xc] }
 0x358   : > { %v17341_v41 = vpop.f32.mrb[8].mxu1  ;;  %v17232_v37 = vpop.f32.mrb[10].mxu0  ;;  %v15605_v19 = vrot.slane %v9895_v56, 10  ;;  %v15878_v13 = vld [vmem:[%s18758_s9 + $0x3f8] sm:$0xe] }
 0x359   : > { %v17342_v40 = vpop.f32.mrb[9].mxu1  ;;  %v17233_v0 = vpop.f32.mrb[11].mxu0 }
 0x35a   : > { %12590 = vmatmul.mubr.bf16.gmra.mrb[112].mxu0 %v15618_v7  ;;  %v17231_v7 = vadd.f32 %v17230_v53, %v17229_v5  ;;  %v17343_v59 = vadd.f32 %v17342_v40, %v17341_v41  ;;  %v17344_v31 = vpop.f32.mrb[10].mxu1  ;;  %v9897_v5 = vld [vmem:[%s18758_s9 + $0x1bc] sm:$0x3]  ;;  %v15739_v40 = vcombine.low %v23826_v6, %v10419_v21  ;;  %v15620_v6 = vcombine.low %v23841_v58, %v23850_v42  ;;  %v15880_v58 = vld [vmem:[%s18758_s9 + $0x400] sm:$0x1] }
 0x35b   : > { %12597 = vmatprep.mubr.bf16.mxu0 %v18442_v55  ;;  %v15772_v55 = vld [vmem:[%s18758_s9 + $0x2d0] sm:$0xf]  ;;  %v17345_v17 = vpop.f32.mrb[11].mxu1  ;;  %v10056_v62 = vrot.slane %v9897_v5, 6  ;;  %v15879_v5 = vld [vmem:[%s18758_s9 + $0x3fc] sm:$0xf] }
 0x35c   : > { %12687 = vmatmul.mubr.bf16.gmra.mrb[112].mxu1 %v15738_v3  ;;  %v10717_v2 = vrot.slane %v15772_v55, 6  ;;  %v8782_v16 = vadd.f32 %v17231_v7, %v22972_v61  ;;  %v17234_v3 = vadd.f32 %v17233_v0, %v17232_v37  ;;  %v10053_v61 = vrot.slane %v9896_v48, 6  ;;  %v15691_v7 = vld [vmem:[%s18758_s9 + $0x2c4] sm:$0xe]  ;;  %v15692_v37 = vld [vmem:[%s18758_s9 + $0x2c8] sm:$0xf] }
 0x35d   : > { %12694 = vmatprep.mubr.bf16.mxu1 %v15819_v54  ;;  %v17346_v41 = vadd.f32 %v17345_v17, %v17344_v31  ;;  %v15693_v0 = vld [vmem:[%s18758_s9 + $0x2cc] sm:$0x1]  ;;  %v15725_v21 = vrot.slane %v15691_v7, 9 }
 0x35e   : > { %v8785_v53 = vadd.f32 %v17234_v3, %v22987_v30  ;;  %v10719_v54 = vrot.slane %v10717_v2, 4  ;;  %v23856_v55 = vadd.f32 %v17343_v59, %v8782_v16  ;;  %v23864_v30 = vsel %vm18773_vm4, %v15724_v27, %v10422_v12  ;;  %v15775_v16 = vld [vmem:[%s18758_s9 + $0x2ec] sm:$0xf]  ;;  %v15776_v59 = vld [vmem:[%s18758_s9 + $0x2f0] sm:$0x3] }
 0x35f   : > { %v10055_v31 = vrot.slane %v10053_v61, 4  ;;  %v10429_v3 = vrot.slane %v15692_v37, 5  ;;  %v10432_v47 = vrot.slane %v15693_v0, 5  ;;  %v10426_v27 = vsel %vm18773_vm4, %v10424_v1, %v10425_v8  ;;  %v23898_v0 = vld [vmem:[%s18758_s9 + $0x2e4] sm:$0xf] }
 0x360   : > { %v23868_v48 = vadd.f32 %v17346_v41, %v8785_v53  ;;  %v17235_v56 = vpop.f32.mrb[12].mxu0  ;;  %v23877_v12 = vsel %vm18803_vm5, %v15805_v46, %v10717_v2  ;;  %v23881_v17 = vsel %vm18803_vm5, %v10719_v54, %v10720_v29  ;;  %v18447_v53 = vld [vmem:[%s18758_s9 + $0x39c] sm:$0xff]   ;;  %v10727_v8 = vrot.slane %v15776_v59, 6  ;;  %v23901_v59 = vld [vmem:[%s18758_s9 + $0x2e8] sm:$0x1] }
 0x361   : > { %v17236_v42 = vpop.f32.mrb[13].mxu0  ;;  %v10431_v41 = vrot.slane %v10429_v3, 4  ;;  %v11101_v1 = vrot.slane %v15879_v5, 5  ;;  %v23888_v46 = vsel %vm18803_vm5, %v15605_v19, %v10053_v61  ;;  %v23892_v29 = vsel %vm18803_vm5, %v10055_v31, %v10056_v62 }
 0x362   : > { %12598 = vmatmul.mubr.bf16.gmra.mrb[116].mxu0 %v15619_v20  ;;  %v10724_v20 = vrot.slane %v15775_v16, 6  ;;  %v17237_v37 = vadd.f32 %v17236_v42, %v17235_v56  ;;  %v17238_v2 = vpop.f32.mrb[14].mxu0  ;;  %v15926_v54 = vrot.slane %v15878_v13, 9  ;;  %v11104_v16 = vrot.slane %v15880_v58, 5 }
 0x363   : > { %12605 = vmatprep.mubr.bf16.mxu0 %v18443_v44  ;;  %v15806_v44 = vrot.slane %v15774_v57, 10  ;;  %v17239_v57 = vpop.f32.mrb[15].mxu0  ;;  %v15740_v61 = vcombine.low %v23864_v30, %v10426_v27  ;;  %v11103_v19 = vrot.slane %v11101_v1, 4  ;;  %v15821_v31 = vcombine.low %v23877_v12, %v23881_v17  ;;  %v18457_v30 = vld [vmem:[%s25093_s2 + $0x6b0] sm:$0xff]  }
 0x364   : > { %12695 = vmatmul.mubr.bf16.gmra.mrb[116].mxu1 %v15739_v40  ;;  %v10726_v7 = vrot.slane %v10724_v20, 4  ;;  %v23895_v40 = vld [vmem:[%s18758_s9 + $0x2e0] sm:$0xe]  ;;  %v17240_v5 = vadd.f32 %v17239_v57, %v17238_v2  ;;  %v15621_v13 = vcombine.low %v23888_v46, %v23892_v29  ;;  %v23911_v58 = vsel %vm18773_vm4, %v15725_v21, %v10429_v3  ;;  %v15778_v21 = vld [vmem:[%s18758_s9 + $0x308] sm:$0xf]  ;;  %18038 = vmatprep.subr.bf16.mxu1 %v18457_v30 }
 0x365   : > { %12702 = vmatprep.mubr.bf16.mxu1 %v15820_v11  ;;  %v17347_v56 = vpop.f32.mrb[12].mxu1  ;;  %v8790_v11 = vadd.f32 %v17237_v37, %v23025_v52  ;;  %v10436_v42 = vrot.slane %v23898_v0, 5  ;;  %v23915_v52 = vld [vmem:[%s18758_s9 + $0x304] sm:$0xc]  ;;  %v23923_v17 = vsel %vm18773_vm4, %v10431_v41, %v10432_v47  ;;  %v23927_v3 = vsel %vm18803_vm5, %v15806_v44, %v10724_v20  ;;  %v23931_v2 = vld [vmem:[%s18758_s9 + $0x30c] sm:$0x3]  ;;  %18039 = vmatpush3.bf16.msra.mxu1 %v18457_v30 }
 0x366   : > { %v17348_v62 = vpop.f32.mrb[13].mxu1  ;;  %v8793_v12 = vadd.f32 %v17240_v5, %v23040_v45  ;;  %v23935_v29 = vsel %vm18803_vm5, %v10726_v7, %v10727_v8  ;;  %v11102_v45 = vsel %vm18773_vm4, %v15926_v54, %v11101_v1  ;;  %v10731_v47 = vrot.slane %v15778_v21, 6  ;;  %v15881_v41 = vld [vmem:[%s18758_s9 + $0x414] sm:$0xe]  ;;  %v23956_v21 = vld [vmem:[%s18758_s9 + $0x2fc] sm:$0xe] }
 0x367   : > { %v17349_v27 = vadd.f32 %v17348_v62, %v17347_v56  ;;  %v17350_v37 = vpop.f32.mrb[14].mxu1  ;;  %v11105_v0 = vsel %vm18773_vm4, %v11103_v19, %v11104_v16  ;;  %v10439_v57 = vrot.slane %v23901_v59, 5  ;;  %v15883_v56 = vld [vmem:[%s18758_s9 + $0x41c] sm:$0x1]  ;;  %v10438_v1 = vrot.slane %v10436_v42, 4 }
 0x368   : > { %v17351_v46 = vpop.f32.mrb[15].mxu1  ;;  %v15807_v54 = vrot.slane %v23915_v52, 10  ;;  %v10733_v59 = vrot.slane %v10731_v47, 4  ;;  %v15927_v19 = vrot.slane %v15881_v41, 9  ;;  %v15942_v30 = vcombine.low %v11102_v45, %v11105_v0  ;;  %v15781_v0 = vld [vmem:[%s18758_s9 + $0x324] sm:$0xf] }
 0x369   : > { %v17352_v20 = vadd.f32 %v17351_v46, %v17350_v37  ;;  %v23946_v7 = vadd.f32 %v17349_v27, %v8790_v11  ;;  %v23951_v37 = vld [vmem:[%s18758_s9 + $0x300] sm:$0xf]  ;;  %v11111_v27 = vrot.slane %v15883_v56, 5 }
 0x36a   : > { %12606 = vmatmul.mubr.bf16.gmra.mrb[120].mxu0 %v15620_v6  ;;  %v15726_v6 = vrot.slane %v23895_v40, 9  ;;  %v17241_v44 = vpop.f32.mrb[16].mxu0  ;;  %v10734_v40 = vrot.slane %v23931_v2, 6  ;;  %v10443_v45 = vrot.slane %v23951_v37, 5  ;;  %v10738_v37 = vrot.slane %v15781_v0, 6 }
 0x36b   : > { %12613 = vmatprep.mubr.bf16.mxu0 %v18447_v53  ;;  %v15882_v53 = vld [vmem:[%s18758_s9 + $0x418] sm:$0xf]  ;;  %v17242_v8 = vpop.f32.mrb[17].mxu0  ;;  %v23953_v11 = vadd.f32 %v17352_v20, %v8793_v12  ;;  %v15822_v12 = vcombine.low %v23927_v3, %v23935_v29  ;;  %v23968_v20 = vld [vmem:[%s18758_s9 + $0x320] sm:$0xc] }
 0x36c   : > { %12703 = vmatmul.mubr.bf16.gmra.mrb[120].mxu1 %v15740_v61  ;;  %v11108_v5 = vrot.slane %v15882_v53, 5  ;;  %v17243_v62 = vadd.f32 %v17242_v8, %v17241_v44  ;;  %v17244_v16 = vpop.f32.mrb[18].mxu0  ;;  %v23960_v44 = vld [vmem:[%s18758_s9 + $0x304] sm:$0x1]  ;;  %v15741_v53 = vcombine.low %v23911_v58, %v23923_v17  ;;  %v23978_v58 = vsel %vm18773_vm4, %v10438_v1, %v10439_v57  ;;  %v15782_v17 = vld [vmem:[%s18758_s9 + $0x328] sm:$0x3] }
 0x36d   : > { %12710 = vmatprep.mubr.bf16.mxu1 %v15821_v31  ;;  %v17245_v61 = vpop.f32.mrb[19].mxu0  ;;  %v17353_v52 = vpop.f32.mrb[16].mxu1  ;;  %v15885_v3 = vld [vmem:[%s18758_s9 + $0x434] sm:$0xf]  ;;  %v24007_v0 = vld [vmem:[%s18758_s9 + $0x31c] sm:$0xf] }
 0x36e   : > { %v8798_v2 = vadd.f32 %v17243_v62, %v23067_v23  ;;  %v17246_v46 = vadd.f32 %v17245_v61, %v17244_v16  ;;  %v11110_v31 = vrot.slane %v11108_v5, 4  ;;  %v17354_v41 = vpop.f32.mrb[17].mxu1  ;;  %v23974_v62 = vsel %vm18773_vm4, %v15726_v6, %v10436_v42  ;;  %v15884_v42 = vld [vmem:[%s18758_s9 + $0x430] sm:$0xe]  ;;  %v18461_v6 = vld [vmem:[%s25093_s2 + $0x6b8] sm:$0xff]  }
 0x36f   : > { %v17355_v23 = vadd.f32 %v17354_v41, %v17353_v52  ;;  %v17356_v56 = vpop.f32.mrb[18].mxu1  ;;  %v23984_v16 = vsel %vm18803_vm5, %v15807_v54, %v10731_v47  ;;  %v18448_v1 = vld [vmem:[%s18758_s9 + $0x3f0] sm:$0xff]   ;;  %v11115_v47 = vrot.slane %v15885_v3, 5  ;;  %v10446_v52 = vrot.slane %v23960_v44, 5  ;;  %18040 = vmatprep.subr.bf16.mxu1 %v18461_v6  ;;  %v24015_v3 = vld [vmem:[%s18758_s9 + $0x320] sm:$0x1] }
 0x370   : > { %v8801_v8 = vadd.f32 %v17246_v46, %v23072_v50  ;;  %v17357_v29 = vpop.f32.mrb[19].mxu1  ;;  %v11109_v50 = vsel %vm18773_vm4, %v15927_v19, %v11108_v5  ;;  %v11112_v61 = vsel %vm18773_vm4, %v11110_v31, %v11111_v27  ;;  %v10735_v19 = vsel %vm18803_vm5, %v10733_v59, %v10734_v40  ;;  %v18451_v27 = vld [vmem:[%s25094_s3] sm:$0xff]   ;;  %18041 = vmatpush3.bf16.msra.mxu1 %v18461_v6 }
 0x371   : > { %v17358_v57 = vadd.f32 %v17357_v29, %v17356_v56  ;;  %v23997_v54 = vadd.f32 %v17355_v23, %v8798_v2  ;;  %v15808_v46 = vrot.slane %v23968_v20, 10  ;;  %v10740_v2 = vrot.slane %v10738_v37, 4  ;;  %v24012_v56 = vld [vmem:[%s18758_s9 + $0x318] sm:$0xe]  ;;  %v25229_v6 = vld [vmem:[#allocation32_spill] sm:$0xff] }
 0x372   : > { %12614 = vmatmul.mubr.bf16.gmra.mrb[124].mxu0 %v15621_v13  ;;  %v15727_v13 = vrot.slane %v23956_v21, 9  ;;  %v10445_v21 = vrot.slane %v10443_v45, 4  ;;  %v10741_v41 = vrot.slane %v15782_v17, 6  ;;  %v15943_v23 = vcombine.low %v11109_v50, %v11112_v61 }
 0x373   : > { %12815 = vmatprep.mubr.bf16.mxu0 %v15942_v30  ;;  %v15886_v30 = vld [vmem:[%s18758_s9 + $0x438] sm:$0x1]  ;;  %v17247_v5 = vpop.f32.mrb[20].mxu0  ;;  %v24009_v40 = vadd.f32 %v17358_v57, %v8801_v8  ;;  %v11117_v17 = vrot.slane %v11115_v47, 4  ;;  %v15823_v50 = vcombine.low %v23984_v16, %v10735_v19  ;;  %v15783_v16 = vld [vmem:[%s18758_s9 + $0x33c] sm:$0xc] }
 0x374   : > { %12711 = vmatmul.mubr.bf16.gmra.mrb[124].mxu1 %v15741_v53  ;;  %v17248_v31 = vpop.f32.mrb[21].mxu0  ;;  %v15928_v53 = vrot.slane %v15884_v42, 9  ;;  %v11118_v20 = vrot.slane %v15886_v30, 5  ;;  %v10450_v42 = vrot.slane %v24007_v0, 5  ;;  %v24024_v61 = vsel %vm18773_vm4, %v15727_v13, %v10443_v45  ;;  %v18455_v30 = vld [vmem:[%s25094_s3 + $0x8] sm:$0xff]  }
 0x375   : > { %12718 = vmatprep.mubr.bf16.mxu1 %v15822_v12  ;;  %v17249_v59 = vadd.f32 %v17248_v31, %v17247_v5  ;;  %v17250_v44 = vpop.f32.mrb[22].mxu0  ;;  %v17359_v29 = vpop.f32.mrb[20].mxu1  ;;  %v15742_v12 = vcombine.low %v23974_v62, %v23978_v58  ;;  %v24031_v31 = vsel %vm18773_vm4, %v10445_v21, %v10446_v52  ;;  %v15728_v45 = vrot.slane %v24012_v56, 9  ;;  %v25230_v13 = vld [vmem:[#allocation33_spill] sm:$0xff]  ;;  %v15784_v52 = vld [vmem:[%s18758_s9 + $0x340] sm:$0xf] }
 0x376   : > { %v17251_v36 = vpop.f32.mrb[23].mxu0  ;;  %v17360_v57 = vpop.f32.mrb[21].mxu1  ;;  %v11116_v21 = vsel %vm18773_vm4, %v15928_v53, %v11115_v47  ;;  %v10452_v56 = vrot.slane %v10450_v42, 4  ;;  %v15809_v47 = vrot.slane %v15783_v16, 10 }
 0x377   : > { %v8806_v8 = vadd.f32 %v17249_v59, %v25229_v6  ;;  %v17252_v5 = vadd.f32 %v17251_v36, %v17250_v44  ;;  %v17361_v62 = vadd.f32 %v17360_v57, %v17359_v29  ;;  %v17362_v58 = vpop.f32.mrb[22].mxu1  ;;  %v24035_v36 = vsel %vm18803_vm5, %v15808_v46, %v10738_v37  ;;  %v15785_v46 = vld [vmem:[%s18758_s9 + $0x344] sm:$0x3]  ;;  %v15887_v29 = vld [vmem:[%s18758_s9 + $0x44c] sm:$0xe] }
 0x378   : > { %v17363_v0 = vpop.f32.mrb[23].mxu1  ;;  %v10453_v37 = vrot.slane %v24015_v3, 5  ;;  %v11119_v44 = vsel %vm18773_vm4, %v11117_v17, %v11118_v20  ;;  %v15888_v6 = vld [vmem:[%s18758_s9 + $0x450] sm:$0xf]  ;;  %v10748_v53 = vrot.slane %v15785_v46, 6  ;;  %v15929_v17 = vrot.slane %v15887_v29, 9 }
 0x379   : > { %v8809_v19 = vadd.f32 %v17252_v5, %v25230_v13  ;;  %v17364_v59 = vadd.f32 %v17363_v0, %v17362_v58  ;;  %v11122_v3 = vrot.slane %v15888_v6, 5  ;;  %v24055_v57 = vadd.f32 %v17361_v62, %v8806_v8  ;;  %v18450_v58 = vld [vmem:[%s18758_s9 + $0x40c] sm:$0xff]   ;;  %v15703_v6 = vld [vmem:[%s18758_s9 + $0x334] sm:$0xe]  ;;  %v15704_v8 = vld [vmem:[%s18758_s9 + $0x338] sm:$0xf] }
 0x37a   : > { %12816 = vmatmul.mubr.bf16.vlgmr.msra.gmra.mrb[128].mxu0 %v18448_v1  ;;  %v24042_v1 = vsel %vm18803_vm5, %v10740_v2, %v10741_v41  ;;  %v25231_v2 = vmov 0.0   ;;  %v15944_v46 = vcombine.low %v11116_v21, %v11119_v44  ;;  %v15743_v29 = vcombine.low %v24024_v61, %v24031_v31  ;;  %v25232_v44 = vld [vmem:[#allocation15_spill] sm:$0xff] }
 0x37b   : > { %12823 = vmatprep.mubr.bf16.mxu0 %v15943_v23  ;;  %18075 = vmatpush3.bf16.msra.mxu0 %v18451_v27  ;;  %v10745_v23 = vrot.slane %v15784_v52, 6  ;;  %v17253_v41 = vpop.f32.mrb[24].mxu0  ;;  %v15889_v27 = vld [vmem:[%s18758_s9 + $0x454] sm:$0x1]  ;;  %v24061_v0 = vadd.f32 %v17364_v59, %v8809_v19  ;;  %v11124_v63 = vrot.slane %v11122_v3, 4  ;;  %v24071_v19 = vsel %vm18773_vm4, %v15728_v45, %v10450_v42 }
 0x37c   : > { %18076 = vmatprep.subr.bf16.mxu0 %v25231_v2  ;;  %12719 = vmatmul.mubr.bf16.gmra.mrb[128].mxu1 %v15742_v12  ;;  %v17254_v5 = vpop.f32.mrb[25].mxu0  ;;  %v11125_v13 = vrot.slane %v15889_v27, 5  ;;  %v18459_v12 = vld [vmem:[%s25094_s3 + $0x10] sm:$0xff]   ;;  %v15824_v27 = vcombine.low %v24035_v36, %v24042_v1  ;;  %v15705_v59 = vld [vmem:[%s18758_s9 + $0x33c] sm:$0x1]  ;;  %v10457_v21 = vrot.slane %v15704_v8, 5  ;;  %v24078_v61 = vsel %vm18773_vm4, %v10452_v56, %v10453_v37 }
 0x37d   : > { %12726 = vmatprep.mubr.bf16.mxu1 %v15823_v50  ;;  %v10747_v20 = vrot.slane %v10745_v23, 4  ;;  %v17255_v16 = vadd.f32 %v17254_v5, %v17253_v41  ;;  %v17256_v52 = vpop.f32.mrb[26].mxu0  ;;  %v17365_v62 = vpop.f32.mrb[24].mxu1  ;;  %v24082_v31 = vsel %vm18803_vm5, %v15809_v47, %v10745_v23  ;;  %v24090_v1 = vsel %vm18773_vm4, %v15929_v17, %v11122_v3  ;;  %v15786_v37 = vld [vmem:[%s18758_s9 + $0x358] sm:$0xc] }
 0x37e   : > { %v17257_v50 = vpop.f32.mrb[27].mxu0  ;;  %v17366_v41 = vpop.f32.mrb[25].mxu1  ;;  %v15787_v56 = vld [vmem:[%s18758_s9 + $0x35c] sm:$0xf]  ;;  %v11126_v47 = vsel %vm18773_vm4, %v11124_v63, %v11125_v13  ;;  %v15744_v13 = vcombine.low %v24071_v19, %v24078_v61 }
 0x37f   : > { %18077 = vmatpush3.bf16.msra.mxu0 %v18455_v30  ;;  %v8814_v30 = vadd.f32 %v17255_v16, %v25232_v44  ;;  %v17258_v5 = vadd.f32 %v17257_v50, %v17256_v52  ;;  %v17367_v42 = vadd.f32 %v17366_v41, %v17365_v62  ;;  %v17368_v36 = vpop.f32.mrb[26].mxu1  ;;  %v24086_v45 = vsel %vm18803_vm5, %v10747_v20, %v10748_v53  ;;  %v25233_v52 = vld [vmem:[#allocation17_spill] sm:$0xff]  ;;  %v15788_v53 = vld [vmem:[%s18758_s9 + $0x360] sm:$0x3]  ;;  %v18463_v3 = vld [vmem:[%s25094_s3 + $0x18] sm:$0xff]  }
 0x380   : > { %18078 = vmatprep.subr.bf16.mxu0 %v25231_v2  ;;  %v15729_v16 = vrot.slane %v15703_v6, 9  ;;  %v17369_v23 = vpop.f32.mrb[27].mxu1  ;;  %v10752_v20 = vrot.slane %v15787_v56, 6  ;;  %v10459_v6 = vrot.slane %v10457_v21, 4  ;;  %v15810_v62 = vrot.slane %v15786_v37, 10 }
 0x381   : > { %v8817_v8 = vadd.f32 %v17258_v5, %v25233_v52  ;;  %v17370_v17 = vadd.f32 %v17369_v23, %v17368_v36  ;;  %v15890_v50 = vld [vmem:[%s18758_s9 + $0x468] sm:$0xe]  ;;  %v15891_v44 = vld [vmem:[%s18758_s9 + $0x46c] sm:$0xf]  ;;  %v10755_v41 = vrot.slane %v15788_v53, 6  ;;  %v15945_v19 = vcombine.low %v24090_v1, %v11126_v47 }
 0x382   : > { %12824 = vmatmul.mubr.bf16.gmra.mrb[132].mxu0 %v18450_v58  ;;  %v10460_v58 = vrot.slane %v15705_v59, 5  ;;  %v10754_v59 = vrot.slane %v10752_v20, 4  ;;  %v15892_v5 = vld [vmem:[%s18758_s9 + $0x470] sm:$0x1]  ;;  %v15930_v36 = vrot.slane %v15890_v50, 9  ;;  %v11129_v37 = vrot.slane %v15891_v44, 5 }
 0x383   : > { %12831 = vmatprep.mubr.bf16.mxu0 %v15944_v46  ;;  %18079 = vmatpush3.bf16.msra.mxu0 %v18459_v12  ;;  %v24104_v46 = vadd.f32 %v17367_v42, %v8814_v30  ;;  %v18452_v12 = vld [vmem:[%s18758_s9 + $0x428] sm:$0xff]   ;;  %v11132_v52 = vrot.slane %v15892_v5, 5  ;;  %v24110_v23 = vadd.f32 %v17370_v17, %v8817_v8  ;;  %v24117_v61 = vsel %vm18773_vm4, %v15729_v16, %v10457_v21  ;;  %v15706_v53 = vld [vmem:[%s18758_s9 + $0x350] sm:$0xe]  ;;  %v15707_v21 = vld [vmem:[%s18758_s9 + $0x354] sm:$0xf] }
 0x384   : > { %18080 = vmatprep.subr.bf16.mxu0 %v25231_v2  ;;  %12727 = vmatmul.mubr.bf16.gmra.mrb[132].mxu1 %v15743_v29  ;;  %v17259_v63 = vpop.f32.mrb[28].mxu0  ;;  %v15825_v29 = vcombine.low %v24082_v31, %v24086_v45  ;;  %v24125_v50 = vsel %vm18773_vm4, %v10459_v6, %v10460_v58  ;;  %v24129_v31 = vsel %vm18803_vm5, %v15810_v62, %v10752_v20  ;;  %v11131_v45 = vrot.slane %v11129_v37, 4  ;;  %v15708_v58 = vld [vmem:[%s18758_s9 + $0x358] sm:$0x1]  ;;  %v18469_v20 = vld [vmem:[%s25094_s3 + $0x28] sm:$0xff]  }
 0x385   : > { %v17260_v56 = vpop.f32.mrb[29].mxu0  ;;  %12734 = vmatprep.mubr.bf16.mxu1 %v15824_v27  ;;  %25234 = vst [vmem:[#allocation25_spill] sm:$0xff] %v24110_v23  ;;  %v18466_v27 = vld [vmem:[%s25094_s3 + $0x20] sm:$0xff]   ;;  %v17371_v8 = vpop.f32.mrb[28].mxu1  ;;  %v15730_v1 = vrot.slane %v15706_v53, 9  ;;  %v24136_v44 = vsel %vm18803_vm5, %v10754_v59, %v10755_v41  ;;  %v10464_v6 = vrot.slane %v15707_v21, 5 }
 0x386   : > { %v17261_v30 = vadd.f32 %v17260_v56, %v17259_v63  ;;  %v17262_v42 = vpop.f32.mrb[30].mxu0  ;;  %v17372_v47 = vpop.f32.mrb[29].mxu1  ;;  %v24148_v59 = vsel %vm18773_vm4, %v11131_v45, %v11132_v52  ;;  %v10467_v41 = vrot.slane %v15708_v58, 5  ;;  %v15790_v53 = vld [vmem:[%s18758_s9 + $0x378] sm:$0xf]  ;;  %v18454_v45 = vld [vmem:[%s18758_s9 + $0x444] sm:$0xff]  }
 0x387   : > { %18081 = vmatpush3.bf16.msra.mxu0 %v18463_v3  ;;  %v17263_v17 = vpop.f32.mrb[31].mxu0  ;;  %v17373_v62 = vadd.f32 %v17372_v47, %v17371_v8  ;;  %v17374_v63 = vpop.f32.mrb[30].mxu1  ;;  %v24204_v23 = vld [vmem:[%s18758_s9 + $0x390] sm:$0xc] }
 0x388   : > { %18082 = vmatprep.subr.bf16.mxu0 %v25231_v2  ;;  %v8822_v16 = vadd.f32 %v17261_v30, %v23227_v43  ;;  %v17264_v3 = vadd.f32 %v17263_v17, %v17262_v42  ;;  %v24144_v43 = vsel %vm18773_vm4, %v15930_v36, %v11129_v37  ;;  %v17375_v56 = vpop.f32.mrb[31].mxu1  ;;  %v10466_v42 = vrot.slane %v10464_v6, 4  ;;  %v15789_v36 = vld [vmem:[%s18758_s9 + $0x374] sm:$0xc] }
 0x389   : > { %v17376_v37 = vadd.f32 %v17375_v56, %v17374_v63  ;;  %v15811_v8 = vrot.slane %v15789_v36, 10  ;;  %v15946_v21 = vcombine.low %v24144_v43, %v24148_v59  ;;  %v15709_v36 = vld [vmem:[%s18758_s9 + $0x36c] sm:$0xe] }
 0x38a   : > { %12832 = vmatmul.mubr.bf16.gmra.mrb[136].mxu0 %v18452_v12  ;;  %v8825_v5 = vadd.f32 %v17264_v3, %v23233_v15  ;;  %v24155_v12 = vsel %vm18773_vm4, %v15730_v1, %v10464_v6  ;;  %v15791_v15 = vld [vmem:[%s18758_s9 + $0x37c] sm:$0x3]  ;;  %v10759_v1 = vrot.slane %v15790_v53, 6  ;;  %v15893_v3 = vld [vmem:[%s18758_s9 + $0x484] sm:$0xe] }
 0x38b   : > { %12839 = vmatprep.mubr.bf16.mxu0 %v15945_v19  ;;  %18083 = vmatpush3.bf16.msra.mxu0 %v18466_v27  ;;  %v24162_v19 = vadd.f32 %v17373_v62, %v8822_v16  ;;  %v24170_v27 = vsel %vm18773_vm4, %v10466_v42, %v10467_v41  ;;  %v10762_v47 = vrot.slane %v15791_v15, 6  ;;  %v15894_v6 = vld [vmem:[%s18758_s9 + $0x488] sm:$0xf]  ;;  %v15895_v62 = vld [vmem:[%s18758_s9 + $0x48c] sm:$0x1]  ;;  %v15931_v63 = vrot.slane %v15893_v3, 9 }
 0x38c   : > { %18084 = vmatprep.subr.bf16.mxu0 %v25231_v2  ;;  %12735 = vmatmul.mubr.bf16.gmra.mrb[136].mxu1 %v15744_v13  ;;  %v17996_v17 = vpop.f32.mrb[32].mxu0  ;;  %v24178_v43 = vadd.f32 %v17376_v37, %v8825_v5  ;;  %v24183_v56 = vsel %vm18803_vm5, %v15811_v8, %v10759_v1  ;;  %v10761_v42 = vrot.slane %v10759_v1, 4  ;;  %v11139_v37 = vrot.slane %v15895_v62, 5  ;;  %v15710_v3 = vld [vmem:[%s18758_s9 + $0x370] sm:$0xf] }
 0x38d   : > { %v9032_v58 = vadd.f32 %v17996_v17, %v23304_v22  ;;  %v9023_v16 = vpop.f32.mrb[33].mxu0  ;;  %12742 = vmatprep.mubr.bf16.mxu1 %v15825_v29  ;;  %v11136_v22 = vrot.slane %v15894_v6, 5  ;;  %v17417_v15 = vpop.f32.mrb[32].mxu1 }
 0x38e   : > { %v9024_v59 = vadd.f32 %v9023_v16, %v23277_v51  ;;  %v17997_v41 = vpop.f32.mrb[34].mxu0  ;;  %v18472_v51 = vld [vmem:[%s25094_s3 + $0x30] sm:$0xff]   ;;  %v24195_v6 = vsel %vm18803_vm5, %v10761_v42, %v10762_v47 }
 0x38f   : > { %18085 = vmatpush3.bf16.msra.mxu0 %v18469_v20  ;;  %v16369_v29 = vpack.c.bf16 %v9032_v58, %v9032_v58  ;;  %v9350_v53 = vmul.f32 %v9032_v58, %v9032_v58  ;;  %v9035_v17 = vadd.f32 %v17997_v41, %v23318_v28  ;;  %v9026_v5 = vpop.f32.mrb[35].mxu0  ;;  %v17418_v20 = vpop.f32.mrb[33].mxu1  ;;  %v15711_v28 = vld [vmem:[%s18758_s9 + $0x374] sm:$0x1]  ;;  %v15827_v30 = vcombine.low %v24183_v56, %v24195_v6 }
 0x390   : > { %18086 = vmatprep.subr.bf16.mxu0 %v25231_v2  ;;  %v16367_v8 = vpack.c.bf16 %v9024_v59, %v9024_v59  ;;  %v9348_v1 = vmul.f32 %v9024_v59, %v9024_v59  ;;  %v9027_v16 = vadd.f32 %v9026_v5, %v23290_v33  ;;  %v24199_v62 = vadd.f32 %v17418_v20, %v17417_v15  ;;  %v17420_v52 = vpop.f32.mrb[34].mxu1 }
 0x391   : > { %9280 = vst [vmem:[%s19793_s18 + $0x28] sm:$0xf] %v16369_v29  ;;  %v16370_v41 = vpack.c.bf16 %v9035_v17, %v9035_v17  ;;  %v9351_v13 = vmul.f32 %v9035_v17, %v9035_v17  ;;  %v17421_v42 = vpop.f32.mrb[35].mxu1  ;;  %v11137_v29 = vsel %vm18773_vm4, %v15931_v63, %v11136_v22  ;;  %v15731_v20 = vrot.slane %v15709_v36, 9 }
 0x392   : > { %25235 = vst [vmem:[#allocation21_spill] sm:$0xff] %v24199_v62  ;;  %12840 = vmatmul.mubr.bf16.gmra.mrb[140].mxu0 %v18454_v45  ;;  %9278 = vst [vmem:[%s19793_s18 + $0x8] sm:$0xf] %v16367_v8  ;;  %v16368_v33 = vpack.c.bf16 %v9027_v16, %v9027_v16  ;;  %v9310_v5 = vadd.f32 %v9027_v16, %v9024_v59  ;;  %v9349_v47 = vmul.f32 %v9027_v16, %v9027_v16  ;;  %v18475_v8 = vld [vmem:[%s25094_s3 + $0x38] sm:$0xff]  }
 0x393   : > { %12847 = vmatprep.mubr.bf16.mxu0 %v15946_v21  ;;  %9281 = vst [vmem:[%s19793_s18 + $0x38] sm:$0xf] %v16370_v41  ;;  %v24210_v15 = vadd.f32 %v17421_v42, %v17420_v52  ;;  %v11138_v45 = vrot.slane %v11136_v22, 4  ;;  %v10471_v62 = vrot.slane %v15710_v3, 5  ;;  %18087 = vmatpush3.bf16.msra.mxu0 %v18472_v51  ;;  %v25236_v21 = vcombine.low %v24117_v61, %v24125_v50  ;;  %v18456_v41 = vld [vmem:[%s18758_s9 + $0x460] sm:$0xff]  }
 0x394   : > { %9279 = vst [vmem:[%s19793_s18 + $0x18] sm:$0xf] %v16368_v33  ;;  %v9311_v59 = vadd.f32 %v9310_v5, %v9032_v58  ;;  %v9380_v16 = vadd.f32 %v9349_v47, %v9348_v1  ;;  %v18000_v63 = vpop.f32.mrb[36].mxu0  ;;  %v10474_v52 = vrot.slane %v15711_v28, 5  ;;  %v15812_v22 = vrot.slane %v24204_v23, 10  ;;  %18088 = vmatprep.subr.bf16.mxu0 %v25231_v2 }
 0x395   : > { %12743 = vmatmul.mubr.bf16.gmra.mrb[140].mxu1 %v25236_v21  ;;  %v9048_v36 = vadd.f32 %v18000_v63, %v23400_v9  ;;  %v9039_v3 = vpop.f32.mrb[37].mxu0  ;;  %v25237_v51 = vcombine.low %v24129_v31, %v24136_v44  ;;  %v11140_v58 = vsel %vm18773_vm4, %v11138_v45, %v11139_v37  ;;  %v24230_v61 = vsel %vm18773_vm4, %v15731_v20, %v10471_v62  ;;  %v15793_v23 = vld [vmem:[%s18758_s9 + $0x394] sm:$0xf]  ;;  %v15794_v31 = vld [vmem:[%s18758_s9 + $0x398] sm:$0x3] }
 0x396   : > { %v10473_v50 = vrot.slane %v10471_v62, 4  ;;  %v9381_v1 = vadd.f32 %v9380_v16, %v9350_v53  ;;  %v9040_v28 = vadd.f32 %v9039_v3, %v23359_v34  ;;  %v9312_v9 = vadd.f32 %v9311_v59, %v9035_v17  ;;  %v18001_v33 = vpop.f32.mrb[38].mxu0  ;;  %v17423_v42 = vpop.f32.mrb[36].mxu1  ;;  %v15896_v62 = vld [vmem:[%s18758_s9 + $0x4a0] sm:$0xe] }
 0x397   : > { %12750 = vmatprep.mubr.bf16.mxu1 %v25237_v51  ;;  %v15947_v5 = vcombine.low %v11137_v29, %v11140_v58  ;;  %v16373_v44 = vpack.c.bf16 %v9048_v36, %v9048_v36  ;;  %v9354_v47 = vmul.f32 %v9048_v36, %v9048_v36  ;;  %v9051_v37 = vadd.f32 %v18001_v33, %v23413_v14  ;;  %v9042_v45 = vpop.f32.mrb[39].mxu0  ;;  %v15897_v53 = vld [vmem:[%s18758_s9 + $0x4a4] sm:$0xf]  ;;  %v17424_v16 = vpop.f32.mrb[37].mxu1 }
 0x398   : > { %v24238_v20 = vsel %vm18773_vm4, %v10473_v50, %v10474_v52  ;;  %18089 = vmatpush3.bf16.msra.mxu0 %v18475_v8  ;;  %v16371_v34 = vpack.c.bf16 %v9040_v28, %v9040_v28  ;;  %v9313_v17 = vadd.f32 %v9312_v9, %v9040_v28  ;;  %v9352_v59 = vmul.f32 %v9040_v28, %v9040_v28  ;;  %v17426_v3 = vpop.f32.mrb[38].mxu1 }
 0x399   : > { %v9382_v29 = vadd.f32 %v9381_v1, %v9351_v13  ;;  %9284 = vst [vmem:[%s19793_s18 + $0x68] sm:$0xf] %v16373_v44  ;;  %v24243_v21 = vadd.f32 %v17424_v16, %v17423_v42  ;;  %v16374_v14 = vpack.c.bf16 %v9051_v37, %v9051_v37  ;;  %v9355_v63 = vmul.f32 %v9051_v37, %v9051_v37  ;;  %v17427_v58 = vpop.f32.mrb[39].mxu1  ;;  %v15898_v1 = vld [vmem:[%s18758_s9 + $0x4a8] sm:$0x1] }
 0x39a   : > { %v9043_v52 = vadd.f32 %v9042_v45, %v23379_v4  ;;  %12848 = vmatmul.mubr.bf16.gmra.mrb[144].mxu0 %v18456_v41  ;;  %9282 = vst [vmem:[%s19793_s18 + $0x48] sm:$0xf] %v16371_v34  ;;  %v15747_v13 = vcombine.low %v24230_v61, %v24238_v20  ;;  %v10766_v8 = vrot.slane %v15793_v23, 6  ;;  %v10769_v50 = vrot.slane %v15794_v31, 6 }
 0x39b   : > { %v9383_v51 = vadd.f32 %v9382_v29, %v9352_v59  ;;  %12855 = vmatprep.mubr.bf16.mxu0 %v15947_v5  ;;  %9285 = vst [vmem:[%s19793_s18 + $0x78] sm:$0xf] %v16374_v14  ;;  %v24251_v44 = vadd.f32 %v17427_v58, %v17426_v3  ;;  %v25238_v4 = vcombine.low %v24155_v12, %v24170_v27  ;;  %v15932_v61 = vrot.slane %v15896_v62, 9  ;;  %v15712_v58 = vld [vmem:[%s18758_s9 + $0x388] sm:$0xe] }
 0x39c   : > { %v16372_v28 = vpack.c.bf16 %v9043_v52, %v9043_v52  ;;  %v9314_v9 = vadd.f32 %v9313_v17, %v9043_v52  ;;  %v9353_v33 = vmul.f32 %v9043_v52, %v9043_v52  ;;  %v18004_v41 = vpop.f32.mrb[40].mxu0  ;;  %v10767_v5 = vsel %vm18803_vm5, %v15812_v22, %v10766_v8  ;;  %v18458_v17 = vld [vmem:[%s18758_s9 + $0x47c] sm:$0xff]  }
 0x39d   : > { %12751 = vmatmul.mubr.bf16.gmra.mrb[144].mxu1 %v25238_v4  ;;  %v10768_v42 = vrot.slane %v10766_v8, 4  ;;  %v11143_v23 = vrot.slane %v15897_v53, 5  ;;  %v9064_v20 = vadd.f32 %v18004_v41, %v23506_v32  ;;  %v9055_v34 = vpop.f32.mrb[41].mxu0  ;;  %v11146_v12 = vrot.slane %v15898_v1, 5  ;;  %v25239_v52 = vld [vmem:[#allocation12_spill] sm:$0xff] }
 0x39e   : > { %9283 = vst [vmem:[%s19793_s18 + $0x58] sm:$0xf] %v16372_v28  ;;  %v9315_v31 = vadd.f32 %v9314_v9, %v9048_v36  ;;  %v9384_v45 = vadd.f32 %v9383_v51, %v9353_v33  ;;  %12758 = vmatprep.mubr.bf16.mxu1 %v15827_v30  ;;  %v9056_v27 = vadd.f32 %v9055_v34, %v23454_v49  ;;  %v18005_v59 = vpop.f32.mrb[42].mxu0  ;;  %v17429_v16 = vpop.f32.mrb[40].mxu1  ;;  %v15713_v28 = vld [vmem:[%s18758_s9 + $0x38c] sm:$0xf] }
 0x39f   : > { %v10770_v22 = vsel %vm18803_vm5, %v10768_v42, %v10769_v50  ;;  %v11144_v36 = vsel %vm18773_vm4, %v15932_v61, %v11143_v23  ;;  %v11145_v62 = vrot.slane %v11143_v23, 4  ;;  %v16377_v53 = vpack.c.bf16 %v9064_v20, %v9064_v20  ;;  %v9058_v56 = vpop.f32.mrb[43].mxu0  ;;  %v17430_v14 = vpop.f32.mrb[41].mxu1  ;;  %v15714_v9 = vld [vmem:[%s18758_s9 + $0x390] sm:$0x1] }
 0x3a0   : > { %v9385_v32 = vadd.f32 %v9384_v45, %v9354_v47  ;;  %v9358_v29 = vmul.f32 %v9064_v20, %v9064_v20  ;;  %v9316_v30 = vadd.f32 %v9315_v31, %v9051_v37  ;;  %v16375_v49 = vpack.c.bf16 %v9056_v27, %v9056_v27  ;;  %v17432_v1 = vpop.f32.mrb[42].mxu1  ;;  %v24279_v61 = vld [vmem:[%s18758_s9 + $0x3ac] sm:$0xc]  ;;  %v24282_v23 = vld [vmem:[%s18758_s9 + $0x3b0] sm:$0xf] }
 0x3a1   : > { %v9356_v6 = vmul.f32 %v9056_v27, %v9056_v27  ;;  %v9067_v3 = vadd.f32 %v18005_v59, %v23525_v60  ;;  %v9059_v51 = vadd.f32 %v9058_v56, %v25239_v52  ;;  %9288 = vst [vmem:[%s19793_s18 + $0xa8] sm:$0xf] %v16377_v53  ;;  %v24273_v50 = vadd.f32 %v17430_v14, %v17429_v16  ;;  %v17433_v42 = vpop.f32.mrb[43].mxu1  ;;  %v18460_v56 = vld [vmem:[%s18758_s9 + $0x498] sm:$0xff]  }
 0x3a2   : > { %v9317_v47 = vadd.f32 %v9316_v30, %v9056_v27  ;;  %v9386_v8 = vadd.f32 %v9385_v32, %v9355_v63  ;;  %12856 = vmatmul.mubr.bf16.gmra.mrb[148].mxu0 %v18458_v17  ;;  %v15828_v37 = vcombine.low %v10767_v5, %v10770_v22  ;;  %9286 = vst [vmem:[%s19793_s18 + $0x88] sm:$0xf] %v16375_v49  ;;  %v15732_v27 = vrot.slane %v15712_v58, 9 }
 0x3a3   : > { %v16378_v33 = vpack.c.bf16 %v9067_v3, %v9067_v3  ;;  %v9359_v60 = vmul.f32 %v9067_v3, %v9067_v3  ;;  %v16376_v4 = vpack.c.bf16 %v9059_v51, %v9059_v51  ;;  %v9357_v41 = vmul.f32 %v9059_v51, %v9059_v51 }
 0x3a4   : > { %v9387_v63 = vadd.f32 %v9386_v8, %v9356_v6  ;;  %v9318_v31 = vadd.f32 %v9317_v47, %v9059_v51  ;;  %v24284_v45 = vadd.f32 %v17433_v42, %v17432_v1  ;;  %v11147_v5 = vsel %vm18773_vm4, %v11145_v62, %v11146_v12  ;;  %v18008_v34 = vpop.f32.mrb[44].mxu0  ;;  %v25240_v6 = vld [vmem:[#allocation16_spill] sm:$0xff] }
 0x3a5   : > { %9289 = vst [vmem:[%s19793_s18 + $0xb8] sm:$0xf] %v16378_v33  ;;  %9287 = vst [vmem:[%s19793_s18 + $0x98] sm:$0xf] %v16376_v4  ;;  %12759 = vmatmul.mubr.bf16.gmra.mrb[148].mxu1 %v15747_v13  ;;  %v15948_v17 = vcombine.low %v11144_v36, %v11147_v5  ;;  %v10478_v59 = vrot.slane %v15713_v28, 5  ;;  %v10481_v22 = vrot.slane %v15714_v9, 5  ;;  %v9080_v16 = vadd.f32 %v18008_v34, %v23615_v39 }
 0x3a6   : > { %v9319_v32 = vadd.f32 %v9318_v31, %v9064_v20  ;;  %v9388_v53 = vadd.f32 %v9387_v63, %v9357_v41  ;;  %v9071_v30 = vpop.f32.mrb[45].mxu0  ;;  %12766 = vmatprep.mubr.bf16.mxu1 %v15828_v37  ;;  %v15813_v49 = vrot.slane %v24279_v61, 10  ;;  %v10773_v20 = vrot.slane %v24282_v23, 6  ;;  %v25241_v9 = vld [vmem:[#allocation24_spill] sm:$0xff]  ;;  %v15797_v4 = vld [vmem:[%s18758_s9 + $0x3b4] sm:$0x3] }
 0x3a7   : > { %v9072_v14 = vadd.f32 %v9071_v30, %v25240_v6  ;;  %v18009_v12 = vpop.f32.mrb[46].mxu0  ;;  %12863 = vmatprep.mubr.bf16.mxu0 %v15948_v17  ;;  %v10479_v13 = vsel %vm18773_vm4, %v15732_v27, %v10478_v59  ;;  %v10480_v36 = vrot.slane %v10478_v59, 4  ;;  %v16381_v52 = vpack.c.bf16 %v9080_v16, %v9080_v16  ;;  %v17435_v51 = vpop.f32.mrb[44].mxu1  ;;  %v24306_v23 = vld [vmem:[%s18758_s9 + $0x4bc] sm:$0xe] }
 0x3a8   : > { %v9389_v62 = vadd.f32 %v9388_v53, %v9358_v29  ;;  %v9362_v39 = vmul.f32 %v9080_v16, %v9080_v16  ;;  %v9320_v58 = vadd.f32 %v9319_v32, %v9067_v3  ;;  %v9074_v47 = vpop.f32.mrb[47].mxu0  ;;  %v17436_v37 = vpop.f32.mrb[45].mxu1  ;;  %v9083_v28 = vadd.f32 %v18009_v12, %v23617_v35  ;;  %v24309_v35 = vld [vmem:[%s18758_s9 + $0x4c0] sm:$0xf]  ;;  %v24315_v53 = vld [vmem:[%s18758_s9 + $0x4c4] sm:$0x1] }
 0x3a9   : > { %v16379_v8 = vpack.c.bf16 %v9072_v14, %v9072_v14  ;;  %v9360_v1 = vmul.f32 %v9072_v14, %v9072_v14  ;;  %v9075_v33 = vadd.f32 %v9074_v47, %v25241_v9  ;;  %9292 = vst [vmem:[%s19793_s18 + $0xe8] sm:$0xf] %v16381_v52  ;;  %v24301_v29 = vadd.f32 %v17436_v37, %v17435_v51  ;;  %v17438_v61 = vpop.f32.mrb[46].mxu1 }
 0x3aa   : > { %v9321_v41 = vadd.f32 %v9320_v58, %v9072_v14  ;;  %v9390_v42 = vadd.f32 %v9389_v62, %v9359_v60  ;;  %v10482_v3 = vsel %vm18773_vm4, %v10480_v36, %v10481_v22  ;;  %12864 = vmatmul.mubr.bf16.gmra.mrb[152].mxu0 %v18460_v56  ;;  %v16382_v63 = vpack.c.bf16 %v9083_v28, %v9083_v28  ;;  %v17439_v34 = vpop.f32.mrb[47].mxu1  ;;  %v24318_v22 = vld [vmem:[%s18758_s9 + $0x3a4] sm:$0xe] }
 0x3ab   : > { %9290 = vst [vmem:[%s19793_s18 + $0xc8] sm:$0xf] %v16379_v8  ;;  %v9363_v31 = vmul.f32 %v9083_v28, %v9083_v28  ;;  %v16380_v5 = vpack.c.bf16 %v9075_v33, %v9075_v33  ;;  %v9361_v60 = vmul.f32 %v9075_v33, %v9075_v33  ;;  %v24312_v59 = vadd.f32 %v17439_v34, %v17438_v61 }
 0x3ac   : > { %v9391_v17 = vadd.f32 %v9390_v42, %v9360_v1  ;;  %v9322_v27 = vadd.f32 %v9321_v41, %v9075_v33  ;;  %v15748_v32 = vcombine.low %v10479_v13, %v10482_v3  ;;  %9293 = vst [vmem:[%s19793_s18 + $0xf8] sm:$0xf] %v16382_v63  ;;  %v10774_v56 = vsel %vm18803_vm5, %v15813_v49, %v10773_v20  ;;  %v15717_v41 = vld [vmem:[%s18758_s9 + $0x3ac] sm:$0x1]  ;;  %v24335_v42 = vld [vmem:[%s18758_s9 + $0x4d8] sm:$0xe] }
 0x3ad   : > { %9291 = vst [vmem:[%s19793_s18 + $0xd8] sm:$0xf] %v16380_v5  ;;  %v18012_v30 = vpop.f32.mrb[48].mxu0  ;;  %v10775_v6 = vrot.slane %v10773_v20, 4  ;;  %v10776_v14 = vrot.slane %v15797_v4, 6  ;;  %v15933_v12 = vrot.slane %v24306_v23, 9 }
 0x3ae   : > { %v9323_v36 = vadd.f32 %v9322_v27, %v9080_v16  ;;  %v9392_v62 = vadd.f32 %v9391_v17, %v9361_v60  ;;  %12767 = vmatmul.mubr.bf16.gmra.mrb[152].mxu1 %v15748_v32  ;;  %v9096_v13 = vadd.f32 %v18012_v30, %v23801_v25  ;;  %v9087_v52 = vpop.f32.mrb[49].mxu0  ;;  %v11150_v51 = vrot.slane %v24309_v35, 5  ;;  %v15716_v4 = vld [vmem:[%s18758_s9 + $0x3a8] sm:$0xf] }
 0x3af   : > { %v9088_v58 = vadd.f32 %v9087_v52, %v23726_v10  ;;  %v18013_v47 = vpop.f32.mrb[50].mxu0  ;;  %v10777_v49 = vsel %vm18803_vm5, %v10775_v6, %v10776_v14  ;;  %v11153_v20 = vrot.slane %v24315_v53, 5  ;;  %v15733_v16 = vrot.slane %v24318_v22, 9  ;;  %v17441_v9 = vpop.f32.mrb[48].mxu1  ;;  %v15903_v22 = vld [vmem:[%s18758_s9 + $0x4dc] sm:$0xf] }
 0x3b0   : > { %v9393_v8 = vadd.f32 %v9392_v62, %v9362_v39  ;;  %v16385_v1 = vpack.c.bf16 %v9096_v13, %v9096_v13  ;;  %v9366_v37 = vmul.f32 %v9096_v13, %v9096_v13  ;;  %v9324_v25 = vadd.f32 %v9323_v36, %v9083_v28  ;;  %v9090_v33 = vpop.f32.mrb[51].mxu0  ;;  %v17442_v3 = vpop.f32.mrb[49].mxu1 }
 0x3b1   : > { %v16383_v10 = vpack.c.bf16 %v9088_v58, %v9088_v58  ;;  %v9364_v61 = vmul.f32 %v9088_v58, %v9088_v58  ;;  %v9099_v23 = vadd.f32 %v18013_v47, %v23820_v18  ;;  %v9091_v35 = vadd.f32 %v9090_v33, %v23742_v24  ;;  %v17444_v28 = vpop.f32.mrb[50].mxu1 }
 0x3b2   : > { %9296 = vst [vmem:[%s19793_s18 + $0x128] sm:$0xf] %v16385_v1  ;;  %v9325_v39 = vadd.f32 %v9324_v25, %v9088_v58  ;;  %v9394_v63 = vadd.f32 %v9393_v8, %v9363_v31  ;;  %v24340_v5 = vadd.f32 %v17442_v3, %v17441_v9  ;;  %v15829_v60 = vcombine.low %v10774_v56, %v10777_v49  ;;  %v17445_v53 = vpop.f32.mrb[51].mxu1 }
 0x3b3   : > { %9294 = vst [vmem:[%s19793_s18 + $0x108] sm:$0xf] %v16383_v10  ;;  %v16386_v34 = vpack.c.bf16 %v9099_v23, %v9099_v23  ;;  %v9367_v17 = vmul.f32 %v9099_v23, %v9099_v23  ;;  %v16384_v27 = vpack.c.bf16 %v9091_v35, %v9091_v35  ;;  %v9365_v32 = vmul.f32 %v9091_v35, %v9091_v35 }
 0x3b4   : > { %v9395_v30 = vadd.f32 %v9394_v63, %v9364_v61  ;;  %v9326_v18 = vadd.f32 %v9325_v39, %v9091_v35  ;;  %v24344_v6 = vadd.f32 %v17445_v53, %v17444_v28  ;;  %12774 = vmatprep.mubr.bf16.mxu1 %v15829_v60  ;;  %v11151_v24 = vsel %vm18773_vm4, %v15933_v12, %v11150_v51  ;;  %v15904_v39 = vld [vmem:[%s18758_s9 + $0x4e0] sm:$0x1] }
 0x3b5   : > { %9297 = vst [vmem:[%s19793_s18 + $0x138] sm:$0xf] %v16386_v34  ;;  %9295 = vst [vmem:[%s19793_s18 + $0x118] sm:$0xf] %v16384_v27  ;;  %v11152_v31 = vrot.slane %v11150_v51, 4  ;;  %v10485_v56 = vrot.slane %v15716_v4, 5 }
 0x3b6   : > { %v10488_v14 = vrot.slane %v15717_v41, 5  ;;  %v18016_v36 = vpop.f32.mrb[52].mxu0  ;;  %v15934_v62 = vrot.slane %v24335_v42, 9  ;;  %v9327_v52 = vadd.f32 %v9326_v18, %v9096_v13  ;;  %v9396_v58 = vadd.f32 %v9395_v30, %v9365_v32  ;;  %v18462_v51 = vld [vmem:[%s18758_s9 + $0x4b4] sm:$0xff]   ;;  %v15958_v34 = vld [vmem:[%s18758_s9 + $0x400] sm:$0xc] }
 0x3b7   : > { %v9112_v47 = vadd.f32 %v18016_v36, %v23946_v7  ;;  %v9103_v49 = vpop.f32.mrb[53].mxu0  ;;  %v11157_v8 = vrot.slane %v15903_v22, 5  ;;  %v11154_v1 = vsel %vm18773_vm4, %v11152_v31, %v11153_v20  ;;  %v10486_v12 = vsel %vm18773_vm4, %v15733_v16, %v10485_v56  ;;  %v17447_v7 = vpop.f32.mrb[52].mxu1  ;;  %v15959_v27 = vld [vmem:[%s18758_s9 + $0x404] sm:$0xf] }
 0x3b8   : > { %v10487_v9 = vrot.slane %v10485_v56, 4  ;;  %v9104_v25 = vadd.f32 %v9103_v49, %v23856_v55  ;;  %v18017_v33 = vpop.f32.mrb[54].mxu0  ;;  %v9397_v4 = vadd.f32 %v9396_v58, %v9366_v37  ;;  %v15949_v13 = vcombine.low %v11151_v24, %v11154_v1  ;;  %v17448_v35 = vpop.f32.mrb[53].mxu1  ;;  %v15960_v30 = vld [vmem:[%s18758_s9 + $0x408] sm:$0x3] }
 0x3b9   : > { %v16389_v41 = vpack.c.bf16 %v9112_v47, %v9112_v47  ;;  %v9370_v42 = vmul.f32 %v9112_v47, %v9112_v47  ;;  %v9106_v10 = vpop.f32.mrb[55].mxu0  ;;  %v9328_v61 = vadd.f32 %v9327_v52, %v9099_v23  ;;  %v24362_v63 = vadd.f32 %v17448_v35, %v17447_v7  ;;  %v17450_v60 = vpop.f32.mrb[54].mxu1  ;;  %v15961_v18 = vld [vmem:[%s18758_s9 + $0x41c] sm:$0xc]  ;;  %v15963_v36 = vld [vmem:[%s18758_s9 + $0x424] sm:$0x3] }
 0x3ba   : > { %v10489_v20 = vsel %vm18773_vm4, %v10487_v9, %v10488_v14  ;;  %v16387_v16 = vpack.c.bf16 %v9104_v25, %v9104_v25  ;;  %v9368_v3 = vmul.f32 %v9104_v25, %v9104_v25  ;;  %12871 = vmatprep.mubr.bf16.mxu0 %v15949_v13  ;;  %v9398_v37 = vadd.f32 %v9397_v4, %v9367_v17  ;;  %v17451_v53 = vpop.f32.mrb[55].mxu1  ;;  %v15962_v14 = vld [vmem:[%s18758_s9 + $0x420] sm:$0xf]  ;;  %v18464_v9 = vld [vmem:[%s18758_s9 + $0x4d0] sm:$0xff]  }
 0x3bb   : > { %v15749_v55 = vcombine.low %v10486_v12, %v10489_v20  ;;  %9300 = vst [vmem:[%s19793_s18 + $0x168] sm:$0xf] %v16389_v41  ;;  %v9115_v28 = vadd.f32 %v18017_v33, %v23953_v11  ;;  %12872 = vmatmul.mubr.bf16.gmra.mrb[156].mxu0 %v18462_v51  ;;  %v9329_v23 = vadd.f32 %v9328_v61, %v9104_v25  ;;  %v11159_v17 = vrot.slane %v11157_v8, 4 }
 0x3bc   : > { %9298 = vst [vmem:[%s19793_s18 + $0x148] sm:$0xf] %v16387_v16  ;;  %v9107_v32 = vadd.f32 %v9106_v10, %v23868_v48  ;;  %v11158_v22 = vsel %vm18773_vm4, %v15934_v62, %v11157_v8  ;;  %v9399_v11 = vadd.f32 %v9398_v37, %v9368_v3  ;;  %v24373_v56 = vadd.f32 %v17451_v53, %v17450_v60  ;;  %v15905_v53 = vld [vmem:[%s18758_s9 + $0x4f4] sm:$0xe] }
 0x3bd   : > { %12775 = vmatmul.mubr.bf16.gmra.mrb[156].mxu1 %v15749_v55  ;;  %v16390_v24 = vpack.c.bf16 %v9115_v28, %v9115_v28  ;;  %v9371_v31 = vmul.f32 %v9115_v28, %v9115_v28  ;;  %v11160_v49 = vrot.slane %v15904_v39, 5  ;;  %v18020_v1 = vpop.f32.mrb[56].mxu0  ;;  %v16006_v62 = vrot.slane %v15958_v34, 10 }
 0x3be   : > { %v16388_v52 = vpack.c.bf16 %v9107_v32, %v9107_v32  ;;  %v9330_v48 = vadd.f32 %v9329_v23, %v9107_v32  ;;  %v9369_v58 = vmul.f32 %v9107_v32, %v9107_v32  ;;  %v11389_v8 = vrot.slane %v15959_v27, 6  ;;  %v9119_v25 = vpop.f32.mrb[57].mxu0 }
 0x3bf   : > { %9301 = vst [vmem:[%s19793_s18 + $0x178] sm:$0xf] %v16390_v24  ;;  %v11392_v12 = vrot.slane %v15960_v30, 6  ;;  %v16007_v51 = vrot.slane %v15961_v18, 10  ;;  %v11161_v13 = vsel %vm18773_vm4, %v11159_v17, %v11160_v49  ;;  %v11396_v41 = vrot.slane %v15962_v14, 6  ;;  %v18021_v7 = vpop.f32.mrb[58].mxu0 }
 0x3c0   : > { %9299 = vst [vmem:[%s19793_s18 + $0x158] sm:$0xf] %v16388_v52  ;;  %v9331_v33 = vadd.f32 %v9330_v48, %v9112_v47  ;;  %v9400_v4 = vadd.f32 %v9399_v11, %v9369_v58  ;;  %v15950_v10 = vcombine.low %v11158_v22, %v11161_v13  ;;  %v11390_v20 = vsel %vm18803_vm5, %v16006_v62, %v11389_v8  ;;  %v17453_v3 = vpop.f32.mrb[56].mxu1  ;;  %v9122_v35 = vpop.f32.mrb[59].mxu0  ;;  %v15906_v22 = vld [vmem:[%s18758_s9 + $0x4f8] sm:$0xf] }
 0x3c1   : > { %v11391_v16 = vrot.slane %v11389_v8, 4  ;;  %v11399_v61 = vrot.slane %v15963_v36, 6  ;;  %v11397_v47 = vsel %vm18803_vm5, %v16007_v51, %v11396_v41  ;;  %v11398_v55 = vrot.slane %v11396_v41, 4  ;;  %v17454_v60 = vpop.f32.mrb[57].mxu1  ;;  %v15965_v48 = vld [vmem:[%s18758_s9 + $0x43c] sm:$0xf] }
 0x3c2   : > { %v9401_v39 = vadd.f32 %v9400_v4, %v9370_v42  ;;  %v9128_v37 = vadd.f32 %v18020_v1, %v24055_v57  ;;  %12879 = vmatprep.mubr.bf16.mxu0 %v15950_v10  ;;  %v9120_v27 = vadd.f32 %v9119_v25, %v23997_v54  ;;  %v9332_v23 = vadd.f32 %v9331_v33, %v9115_v28  ;;  %v17456_v42 = vpop.f32.mrb[58].mxu1  ;;  %v15907_v54 = vld [vmem:[%s18758_s9 + $0x4fc] sm:$0x1]  ;;  %v15964_v28 = vld [vmem:[%s18758_s9 + $0x438] sm:$0xc] }
 0x3c3   : > { %v11393_v34 = vsel %vm18803_vm5, %v11391_v16, %v11392_v12  ;;  %v24390_v32 = vadd.f32 %v17454_v60, %v17453_v3  ;;  %12880 = vmatmul.mubr.bf16.gmra.mrb[160].mxu0 %v18464_v9  ;;  %v11400_v57 = vsel %vm18803_vm5, %v11398_v55, %v11399_v61  ;;  %v17457_v11 = vpop.f32.mrb[59].mxu1  ;;  %v15966_v58 = vld [vmem:[%s18758_s9 + $0x440] sm:$0x3]  ;;  %v15967_v49 = vld [vmem:[%s18758_s9 + $0x454] sm:$0xc]  ;;  %v9131_v62 = vadd.f32 %v18021_v7, %v24061_v0 }
 0x3c4   : > { %v16022_v17 = vcombine.low %v11390_v20, %v11393_v34  ;;  %v16393_v30 = vpack.c.bf16 %v9128_v37, %v9128_v37  ;;  %v9374_v18 = vmul.f32 %v9128_v37, %v9128_v37  ;;  %v16023_v24 = vcombine.low %v11397_v47, %v11400_v57  ;;  %v15968_v9 = vld [vmem:[%s18758_s9 + $0x458] sm:$0xf]  ;;  %v15969_v7 = vld [vmem:[%s18758_s9 + $0x45c] sm:$0x3] }
 0x3c5   : > { %v16391_v14 = vpack.c.bf16 %v9120_v27, %v9120_v27  ;;  %v9333_v36 = vadd.f32 %v9332_v23, %v9120_v27  ;;  %v9372_v52 = vmul.f32 %v9120_v27, %v9120_v27  ;;  %v9402_v1 = vadd.f32 %v9401_v39, %v9371_v31  ;;  %v18024_v51 = vpop.f32.mrb[60].mxu0 }
 0x3c6   : > { %18042 = vmatprep.mubr.bf16.mxu1 %v16022_v17  ;;  %9304 = vst [vmem:[%s19793_s18 + $0x1a8] sm:$0xf] %v16393_v30  ;;  %v9123_v8 = vadd.f32 %v9122_v35, %v24009_v40  ;;  %v24404_v12 = vadd.f32 %v17457_v11, %v17456_v42  ;;  %v15935_v25 = vrot.slane %v15905_v53, 9  ;;  %v11164_v33 = vrot.slane %v15906_v22, 5  ;;  %v9135_v41 = vpop.f32.mrb[61].mxu0  ;;  %v18465_v17 = vld [vmem:[%s18758_s9 + $0x4ec] sm:$0xff]  }
 0x3c7   : > { %18043 = vmatmul.mubr.bf16.vlgmr.msra.gmra.mrb[160].mxu1 %v16023_v24  ;;  %9302 = vst [vmem:[%s19793_s18 + $0x188] sm:$0xf] %v16391_v14  ;;  %v11167_v4 = vrot.slane %v15907_v54, 5  ;;  %v16008_v13 = vrot.slane %v15964_v28, 10  ;;  %v9403_v10 = vadd.f32 %v9402_v1, %v9372_v52  ;;  %v16394_v31 = vpack.c.bf16 %v9131_v62, %v9131_v62  ;;  %v18025_v16 = vpop.f32.mrb[62].mxu0  ;;  %v17459_v39 = vpop.f32.mrb[60].mxu1 }
 0x3c8   : > { %v9375_v20 = vmul.f32 %v9131_v62, %v9131_v62  ;;  %v16392_v0 = vpack.c.bf16 %v9123_v8, %v9123_v8  ;;  %v9334_v40 = vadd.f32 %v9333_v36, %v9123_v8  ;;  %v9373_v61 = vmul.f32 %v9123_v8, %v9123_v8  ;;  %v9138_v47 = vpop.f32.mrb[63].mxu0  ;;  %v17460_v23 = vpop.f32.mrb[61].mxu1 }
 0x3c9   : > { %v11165_v3 = vsel %vm18773_vm4, %v15935_v25, %v11164_v33  ;;  %v11166_v35 = vrot.slane %v11164_v33, 4  ;;  %9305 = vst [vmem:[%s19793_s18 + $0x1b8] sm:$0xf] %v16394_v31  ;;  %v11403_v55 = vrot.slane %v15965_v48, 6  ;;  %v11406_v60 = vrot.slane %v15966_v58, 6  ;;  %v17462_v30 = vpop.f32.mrb[62].mxu1 }
 0x3ca   : > { %9303 = vst [vmem:[%s19793_s18 + $0x198] sm:$0xf] %v16392_v0  ;;  %v16009_v34 = vrot.slane %v15967_v49, 10  ;;  %v11410_v27 = vrot.slane %v15968_v9, 6  ;;  %v9335_v42 = vadd.f32 %v9334_v40, %v9128_v37  ;;  %v9404_v53 = vadd.f32 %v9403_v10, %v9373_v61  ;;  %v17463_v14 = vpop.f32.mrb[63].mxu1  ;;  %v25242_v61 = vld [vmem:[#allocation25_spill] sm:$0xff] }
 0x3cb   : > { %v11168_v22 = vsel %vm18773_vm4, %v11166_v35, %v11167_v4  ;;  %v11413_v57 = vrot.slane %v15969_v7, 6  ;;  %v11404_v54 = vsel %vm18803_vm5, %v16008_v13, %v11403_v55  ;;  %v11405_v28 = vrot.slane %v11403_v55, 4  ;;  %v15908_v58 = vld [vmem:[%s18758_s9 + $0x510] sm:$0xe]  ;;  %v15909_v49 = vld [vmem:[%s18758_s9 + $0x514] sm:$0xf] }
 0x3cc   : > { %v15951_v11 = vcombine.low %v11165_v3, %v11168_v22  ;;  %v11411_v24 = vsel %vm18803_vm5, %v16009_v34, %v11410_v27  ;;  %v9405_v36 = vadd.f32 %v9404_v53, %v9374_v18  ;;  %v11412_v52 = vrot.slane %v11410_v27, 4  ;;  %v15910_v4 = vld [vmem:[%s18758_s9 + $0x518] sm:$0x1]  ;;  %v15970_v31 = vld [vmem:[%s18758_s9 + $0x470] sm:$0xc] }
 0x3cd   : > { %v9144_v37 = vadd.f32 %v18024_v51, %v24162_v19  ;;  %v9136_v48 = vadd.f32 %v9135_v41, %v24104_v46  ;;  %v11407_v1 = vsel %vm18803_vm5, %v11405_v28, %v11406_v60  ;;  %v9336_v8 = vadd.f32 %v9335_v42, %v9131_v62  ;;  %v24429_v18 = vpop.f32.mrb[64].mxu0  ;;  %v15971_v35 = vld [vmem:[%s18758_s9 + $0x474] sm:$0xf] }
 0x3ce   : > { %12887 = vmatprep.mubr.bf16.mxu0 %v15951_v11  ;;  %v24426_v9 = vadd.f32 %v17460_v23, %v17459_v39  ;;  %v9147_v25 = vadd.f32 %v18025_v16, %v24178_v43  ;;  %v16024_v33 = vcombine.low %v11404_v54, %v11407_v1  ;;  %v11414_v46 = vsel %vm18803_vm5, %v11412_v52, %v11413_v57  ;;  %v24434_v13 = vpop.f32.mrb[65].mxu0  ;;  %v15972_v39 = vld [vmem:[%s18758_s9 + $0x478] sm:$0x3]  ;;  %v15974_v11 = vld [vmem:[%s18758_s9 + $0x490] sm:$0xf] }
 0x3cf   : > { %12888 = vmatmul.mubr.bf16.gmra.mrb[164].mxu0 %v18465_v17  ;;  %v16397_v19 = vpack.c.bf16 %v9144_v37, %v9144_v37  ;;  %v9378_v51 = vmul.f32 %v9144_v37, %v9144_v37  ;;  %v16025_v62 = vcombine.low %v11411_v24, %v11414_v46  ;;  %v16395_v41 = vpack.c.bf16 %v9136_v48, %v9136_v48  ;;  %v24437_v0 = vpop.f32.mrb[66].mxu0  ;;  %v17465_v55 = vpop.f32.mrb[64].mxu1 }
 0x3d0   : > { %v9337_v10 = vadd.f32 %v9336_v8, %v9136_v48  ;;  %v9376_v43 = vmul.f32 %v9136_v48, %v9136_v48  ;;  %18046 = vmatprep.mubr.bf16.mxu1 %v16024_v33  ;;  %v9406_v7 = vadd.f32 %v9405_v36, %v9375_v20  ;;  %v16398_v16 = vpack.c.bf16 %v9147_v25, %v9147_v25  ;;  %v17533_v60 = vpop.f32.mrb[67].mxu0  ;;  %v15973_v20 = vld [vmem:[%s18758_s9 + $0x48c] sm:$0xc]  ;;  %v17466_v53 = vpop.f32.mrb[65].mxu1  ;;  %v15975_v36 = vld [vmem:[%s18758_s9 + $0x494] sm:$0x3] }
 0x3d1   : > { %9308 = vst [vmem:[%s19793_s18 + $0x1e8] sm:$0xf] %v16397_v19  ;;  %v9379_v40 = vmul.f32 %v9147_v25, %v9147_v25  ;;  %v9139_v3 = vadd.f32 %v9138_v47, %v25242_v61  ;;  %18047 = vmatmul.mubr.bf16.gmra.mrb[164].mxu1 %v16025_v62  ;;  %9306 = vst [vmem:[%s19793_s18 + $0x1c8] sm:$0xf] %v16395_v41  ;;  %v24444_v34 = vadd.f32 %v17463_v14, %v17462_v30  ;;  %v17468_v54 = vpop.f32.mrb[66].mxu1  ;;  %v18467_v19 = vld [vmem:[%s18758_s9 + $0x508] sm:$0xff]  }
 0x3d2   : > { %v15936_v27 = vrot.slane %v15908_v58, 9  ;;  %v11171_v23 = vrot.slane %v15909_v49, 5  ;;  %v11174_v42 = vrot.slane %v15910_v4, 5  ;;  %v9407_v22 = vadd.f32 %v9406_v7, %v9376_v43  ;;  %9309 = vst [vmem:[%s19793_s18 + $0x1f8] sm:$0xf] %v16398_v16  ;;  %v17469_v52 = vpop.f32.mrb[67].mxu1 }
 0x3d3   : > { %v16396_v17 = vpack.c.bf16 %v9139_v3, %v9139_v3  ;;  %v9338_v47 = vadd.f32 %v9337_v10, %v9139_v3  ;;  %v9377_v57 = vmul.f32 %v9139_v3, %v9139_v3  ;;  %v16010_v24 = vrot.slane %v15970_v31, 10  ;;  %v15911_v62 = vld [vmem:[%s18758_s9 + $0x52c] sm:$0xe]  ;;  %v15912_v7 = vld [vmem:[%s18758_s9 + $0x530] sm:$0xf] }
 0x3d4   : > { %v11172_v28 = vsel %vm18773_vm4, %v15936_v27, %v11171_v23  ;;  %v11173_v30 = vrot.slane %v11171_v23, 4  ;;  %v11417_v14 = vrot.slane %v15971_v35, 6  ;;  %v11420_v49 = vrot.slane %v15972_v39, 6  ;;  %v15913_v16 = vld [vmem:[%s18758_s9 + $0x534] sm:$0x1] }
 0x3d5   : > { %9307 = vst [vmem:[%s19793_s18 + $0x1d8] sm:$0xf] %v16396_v17  ;;  %v9339_v48 = vadd.f32 %v9338_v47, %v9144_v37  ;;  %v9408_v58 = vadd.f32 %v9407_v22, %v9377_v57  ;;  %v16011_v1 = vrot.slane %v15973_v20, 10  ;;  %v11424_v4 = vrot.slane %v15974_v11, 6  ;;  %v24459_v41 = vpop.f32.mrb[68].mxu0 }
 0x3d6   : > { %v11175_v8 = vsel %vm18773_vm4, %v11173_v30, %v11174_v42  ;;  %v11418_v33 = vsel %vm18803_vm5, %v16010_v24, %v11417_v14  ;;  %v11419_v46 = vrot.slane %v11417_v14, 4  ;;  %v11427_v31 = vrot.slane %v15975_v36, 6  ;;  %v24463_v61 = vpop.f32.mrb[69].mxu0  ;;  %v15976_v22 = vld [vmem:[%s18758_s9 + $0x4a8] sm:$0xc] }
 0x3d7   : > { %v9340_v10 = vadd.f32 %v9339_v48, %v9147_v25  ;;  %v9409_v43 = vadd.f32 %v9408_v58, %v9378_v51  ;;  %v15952_v37 = vcombine.low %v11172_v28, %v11175_v8  ;;  %v11425_v35 = vsel %vm18803_vm5, %v16011_v1, %v11424_v4  ;;  %v24471_v25 = vpop.f32.mrb[70].mxu0  ;;  %v17471_v17 = vpop.f32.mrb[68].mxu1  ;;  %v15977_v11 = vld [vmem:[%s18758_s9 + $0x4ac] sm:$0xf]  ;;  %v15978_v28 = vld [vmem:[%s18758_s9 + $0x4b0] sm:$0x3] }
 0x3d8   : > { %v11421_v3 = vsel %vm18803_vm5, %v11419_v46, %v11420_v49  ;;  %v11426_v39 = vrot.slane %v11424_v4, 4  ;;  %v24469_v27 = vadd.f32 %v17466_v53, %v17465_v55  ;;  %v17531_v20 = vadd.f32 %v24434_v13, %v24429_v18  ;;  %v24476_v47 = vpop.f32.mrb[71].mxu0  ;;  %v17472_v30 = vpop.f32.mrb[69].mxu1  ;;  %v25243_v14 = vld [vmem:[#allocation21_spill] sm:$0xff]  ;;  %v15979_v48 = vld [vmem:[%s18758_s9 + $0x4c4] sm:$0xc] }
 0x3d9   : > { %v9341_v51 = vrot.slane %v9340_v10, 4  ;;  %v9410_v23 = vadd.f32 %v9409_v43, %v9379_v40  ;;  %12895 = vmatprep.mubr.bf16.mxu0 %v15952_v37  ;;  %v16026_v42 = vcombine.low %v11418_v33, %v11421_v3  ;;  %v24480_v53 = vadd.f32 %v17469_v52, %v17468_v54  ;;  %v15980_v58 = vld [vmem:[%s18758_s9 + $0x4c8] sm:$0xf]  ;;  %v17474_v49 = vpop.f32.mrb[70].mxu1  ;;  %v15981_v4 = vld [vmem:[%s18758_s9 + $0x4cc] sm:$0x3] }
 0x3da   : > { %12896 = vmatmul.mubr.bf16.gmra.mrb[168].mxu0 %v18467_v19  ;;  %v11428_v55 = vsel %vm18803_vm5, %v11426_v39, %v11427_v31  ;;  %v17534_v57 = vadd.f32 %v17533_v60, %v24437_v0  ;;  %v15937_v40 = vrot.slane %v15911_v62, 9  ;;  %v24486_v36 = vadd.f32 %v17531_v20, %v25243_v14  ;;  %v17475_v1 = vpop.f32.mrb[71].mxu1 }
 0x3db   : > { %v9342_v24 = vadd.f32 %v9341_v51, %v9340_v10  ;;  %v9411_v18 = vrot.slane %v9410_v23, 4  ;;  %18050 = vmatprep.mubr.bf16.mxu1 %v16026_v42  ;;  %v16027_v13 = vcombine.low %v11425_v35, %v11428_v55  ;;  %v11178_v52 = vrot.slane %v15912_v7, 5  ;;  %v15914_v35 = vld [vmem:[%s18758_s9 + $0x548] sm:$0xe]  ;;  %v15915_v55 = vld [vmem:[%s18758_s9 + $0x54c] sm:$0xf] }
 0x3dc   : > { %v24491_v54 = vadd.f32 %v17534_v57, %v24210_v15  ;;  %v11181_v0 = vrot.slane %v15913_v16, 5  ;;  %v16012_v60 = vrot.slane %v15976_v22, 10  ;;  %v11431_v46 = vrot.slane %v15977_v11, 6 }
 0x3dd   : > { %v9343_v8 = vrot.slane %v9342_v24, 2  ;;  %v9412_v33 = vadd.f32 %v9411_v18, %v9410_v23  ;;  %18051 = vmatmul.mubr.bf16.gmra.mrb[168].mxu1 %v16027_v13  ;;  %v11434_v19 = vrot.slane %v15978_v28, 6  ;;  %v11179_v62 = vsel %vm18773_vm4, %v15937_v40, %v11178_v52  ;;  %v24496_v37 = vpop.f32.mrb[72].mxu0  ;;  %v18468_v23 = vld [vmem:[%s18758_s9 + $0x524] sm:$0xff]   ;;  %v15916_v18 = vld [vmem:[%s18758_s9 + $0x550] sm:$0x1] }
 0x3de   : > { %v11180_v10 = vrot.slane %v11178_v52, 4  ;;  %v16013_v43 = vrot.slane %v15979_v48, 10  ;;  %v11438_v15 = vrot.slane %v15980_v58, 6  ;;  %v11432_v16 = vsel %vm18803_vm5, %v16012_v60, %v11431_v46  ;;  %v24501_v39 = vpop.f32.mrb[73].mxu0  ;;  %v15982_v60 = vld [vmem:[%s18758_s9 + $0x4e0] sm:$0xc] }
 0x3df   : > { %v9344_v31 = vadd.f32 %v9343_v8, %v9342_v24  ;;  %v9413_v7 = vrot.slane %v9412_v33, 2  ;;  %v11433_v3 = vrot.slane %v11431_v46, 4  ;;  %v11441_v22 = vrot.slane %v15981_v4, 6  ;;  %v24509_v57 = vpop.f32.mrb[74].mxu0  ;;  %v17477_v13 = vpop.f32.mrb[72].mxu1 }
 0x3e0   : > { %v11182_v51 = vsel %vm18773_vm4, %v11180_v10, %v11181_v0  ;;  %v11439_v42 = vsel %vm18803_vm5, %v16013_v43, %v11438_v15  ;;  %v11440_v20 = vrot.slane %v11438_v15, 4  ;;  %v24514_v14 = vpop.f32.mrb[75].mxu0  ;;  %v24518_v52 = vadd.f32 %v17472_v30, %v17471_v17  ;;  %v15983_v8 = vld [vmem:[%s18758_s9 + $0x4e4] sm:$0xf]  ;;  %v15984_v10 = vld [vmem:[%s18758_s9 + $0x4e8] sm:$0x3] }
 0x3e1   : > { %v9345_v40 = vrot.slane %v9344_v31, 1  ;;  %v9414_v11 = vadd.f32 %v9413_v7, %v9412_v33  ;;  %v15953_v28 = vcombine.low %v11179_v62, %v11182_v51  ;;  %v11435_v24 = vsel %vm18803_vm5, %v11433_v3, %v11434_v19  ;;  %v17478_v33 = vpop.f32.mrb[73].mxu1  ;;  %v15985_v43 = vld [vmem:[%s18758_s9 + $0x4fc] sm:$0xc]  ;;  %v15987_v51 = vld [vmem:[%s18758_s9 + $0x504] sm:$0x3] }
 0x3e2   : > { %v16028_v48 = vcombine.low %v11432_v16, %v11435_v24  ;;  %v11442_v58 = vsel %vm18803_vm5, %v11440_v20, %v11441_v22  ;;  %v17537_v0 = vadd.f32 %v24463_v61, %v24459_v41  ;;  %v24524_v62 = vadd.f32 %v17475_v1, %v17474_v49  ;;  %v17480_v15 = vpop.f32.mrb[74].mxu1  ;;  %v15986_v49 = vld [vmem:[%s18758_s9 + $0x500] sm:$0xf]  ;;  %v15918_v20 = vld [vmem:[%s18758_s9 + $0x568] sm:$0xf] }
 0x3e3   : > { %v9346_v46 = vadd.f32 %v9345_v40, %v9344_v31  ;;  %v9415_v19 = vrot.slane %v9414_v11, 1  ;;  %12903 = vmatprep.mubr.bf16.mxu0 %v15953_v28  ;;  %v16029_v4 = vcombine.low %v11439_v42, %v11442_v58  ;;  %v17540_v41 = vadd.f32 %v24476_v47, %v24471_v25  ;;  %v17481_v1 = vpop.f32.mrb[75].mxu1  ;;  %v15917_v42 = vld [vmem:[%s18758_s9 + $0x564] sm:$0xe] }
 0x3e4   : > { %18054 = vmatprep.mubr.bf16.mxu1 %v16028_v48  ;;  %12904 = vmatmul.mubr.bf16.gmra.mrb[172].mxu0 %v18468_v23  ;;  %v24529_v17 = vadd.f32 %v17537_v0, %v24243_v21  ;;  %v15938_v61 = vrot.slane %v15914_v35, 9  ;;  %v11185_v30 = vrot.slane %v15915_v55, 5  ;;  %v11188_v7 = vrot.slane %v15916_v18, 5  ;;  %v18470_v23 = vld [vmem:[%s18758_s9 + $0x540] sm:$0xff]  }
 0x3e5   : > { %v9416_v31 = vadd.f32 %v9415_v19, %v9414_v11  ;;  %18055 = vmatmul.mubr.bf16.gmra.mrb[172].mxu1 %v16029_v4  ;;  %v16014_v16 = vrot.slane %v15982_v60, 10  ;;  %v11445_v3 = vrot.slane %v15983_v8, 6  ;;  %9347 = vst [vmem:[%s21193_s16 + $0x4] sm:$0x1] %v9346_v46  ;;  %v24537_v21 = vadd.f32 %v17540_v41, %v24251_v44  ;;  %v17547_v22 = vpop.f32.mrb[76].mxu0 }
 0x3e6   : > { %v11186_v25 = vsel %vm18773_vm4, %v15938_v61, %v11185_v30  ;;  %v11187_v47 = vrot.slane %v11185_v30, 4  ;;  %v11448_v35 = vrot.slane %v15984_v10, 6  ;;  %v16015_v11 = vrot.slane %v15985_v43, 10  ;;  %v15919_v44 = vld [vmem:[%s18758_s9 + $0x56c] sm:$0x1]  ;;  %v17548_v24 = vpop.f32.mrb[77].mxu0 }
 0x3e7   : > { %v11446_v55 = vsel %vm18803_vm5, %v16014_v16, %v11445_v3  ;;  %v11447_v40 = vrot.slane %v11445_v3, 4  ;;  %v11452_v28 = vrot.slane %v15986_v49, 6  ;;  %9417 = vst [vmem:[%s21193_s16 + $0x5] sm:$0x1] %v9416_v31  ;;  %v11455_v48 = vrot.slane %v15987_v51, 6  ;;  %v17550_v46 = vpop.f32.mrb[78].mxu0 }
 0x3e8   : > { %v11189_v18 = vsel %vm18773_vm4, %v11187_v47, %v11188_v7  ;;  %v24550_v58 = vadd.f32 %v17478_v33, %v17477_v13  ;;  %v17543_v0 = vadd.f32 %v24501_v39, %v24496_v37  ;;  %v15988_v60 = vld [vmem:[%s18758_s9 + $0x518] sm:$0xc]  ;;  %v15989_v8 = vld [vmem:[%s18758_s9 + $0x51c] sm:$0xf]  ;;  %v15990_v41 = vld [vmem:[%s18758_s9 + $0x520] sm:$0x3]  ;;  %v24564_v37 = vadd.f32 %v17481_v1, %v17480_v15 }
 0x3e9   : > { %v15954_v19 = vcombine.low %v11186_v25, %v11189_v18  ;;  %v11449_v4 = vsel %vm18803_vm5, %v11447_v40, %v11448_v35  ;;  %v11453_v10 = vsel %vm18803_vm5, %v16015_v11, %v11452_v28  ;;  %v11454_v43 = vrot.slane %v11452_v28, 4  ;;  %v17483_v13 = vpop.f32.mrb[76].mxu1  ;;  %v17551_v33 = vpop.f32.mrb[79].mxu0  ;;  %v15991_v49 = vld [vmem:[%s18758_s9 + $0x534] sm:$0xc] }
 0x3ea   : > { %v16030_v61 = vcombine.low %v11446_v55, %v11449_v4  ;;  %v24562_v30 = vadd.f32 %v17543_v0, %v24273_v50  ;;  %v17546_v39 = vadd.f32 %v24514_v14, %v24509_v57  ;;  %v15992_v31 = vld [vmem:[%s18758_s9 + $0x538] sm:$0xf]  ;;  %v17484_v7 = vpop.f32.mrb[77].mxu1  ;;  %v15939_v3 = vrot.slane %v15917_v42, 9  ;;  %v15993_v47 = vld [vmem:[%s18758_s9 + $0x53c] sm:$0x3] }
 0x3eb   : > { %12911 = vmatprep.mubr.bf16.mxu0 %v15954_v19  ;;  %v11456_v16 = vsel %vm18803_vm5, %v11454_v43, %v11455_v48  ;;  %v11192_v51 = vrot.slane %v15918_v20, 5  ;;  %v11195_v25 = vrot.slane %v15919_v44, 5  ;;  %v17486_v50 = vpop.f32.mrb[78].mxu1  ;;  %v16016_v14 = vrot.slane %v15988_v60, 10  ;;  %v15920_v55 = vld [vmem:[%s18758_s9 + $0x580] sm:$0xe] }
 0x3ec   : > { %18058 = vmatprep.mubr.bf16.mxu1 %v16030_v61  ;;  %12912 = vmatmul.mubr.bf16.gmra.mrb[176].mxu0 %v18470_v23  ;;  %v16031_v15 = vcombine.low %v11453_v10, %v11456_v16  ;;  %v24574_v57 = vadd.f32 %v17546_v39, %v24284_v45  ;;  %v11459_v1 = vrot.slane %v15989_v8, 6  ;;  %v17487_v35 = vpop.f32.mrb[79].mxu1  ;;  %v11462_v40 = vrot.slane %v15990_v41, 6  ;;  %v15921_v28 = vld [vmem:[%s18758_s9 + $0x584] sm:$0xf]  ;;  %v18471_v8 = vld [vmem:[%s18758_s9 + $0x55c] sm:$0xff]  }
 0x3ed   : > { %v11193_v42 = vsel %vm18773_vm4, %v15939_v3, %v11192_v51  ;;  %v11194_v20 = vrot.slane %v11192_v51, 4  ;;  %v16017_v11 = vrot.slane %v15991_v49, 10  ;;  %v11466_v44 = vrot.slane %v15992_v31, 6  ;;  %v15922_v48 = vld [vmem:[%s18758_s9 + $0x588] sm:$0x1]  ;;  %v17553_v0 = vpop.f32.mrb[80].mxu0 }
 0x3ee   : > { %18059 = vmatmul.mubr.bf16.gmra.mrb[176].mxu1 %v16031_v15  ;;  %v11460_v23 = vsel %vm18803_vm5, %v16016_v14, %v11459_v1  ;;  %v11461_v45 = vrot.slane %v11459_v1, 4  ;;  %v11469_v18 = vrot.slane %v15993_v47, 6  ;;  %v24586_v19 = vadd.f32 %v17484_v7, %v17483_v13  ;;  %v15994_v43 = vld [vmem:[%s18758_s9 + $0x550] sm:$0xc]  ;;  %v15995_v41 = vld [vmem:[%s18758_s9 + $0x554] sm:$0xf] }
 0x3ef   : > { %v11196_v60 = vsel %vm18773_vm4, %v11194_v20, %v11195_v25  ;;  %v17549_v4 = vadd.f32 %v17548_v24, %v17547_v22  ;;  %v24588_v10 = vadd.f32 %v17487_v35, %v17486_v50  ;;  %v17554_v61 = vpop.f32.mrb[81].mxu0  ;;  %v11467_v31 = vsel %vm18803_vm5, %v16017_v11, %v11466_v44  ;;  %v15996_v3 = vld [vmem:[%s18758_s9 + $0x558] sm:$0x3]  ;;  %v15997_v51 = vld [vmem:[%s18758_s9 + $0x56c] sm:$0xc]  ;;  %v17489_v50 = vpop.f32.mrb[80].mxu1 }
 0x3f0   : > { %v15955_v39 = vcombine.low %v11193_v42, %v11196_v60  ;;  %v11463_v49 = vsel %vm18803_vm5, %v11461_v45, %v11462_v40  ;;  %v11468_v16 = vrot.slane %v11466_v44, 4  ;;  %v17556_v13 = vpop.f32.mrb[82].mxu0  ;;  %v17552_v24 = vadd.f32 %v17551_v33, %v17550_v46  ;;  %v15998_v47 = vld [vmem:[%s18758_s9 + $0x570] sm:$0xf]  ;;  %v15999_v20 = vld [vmem:[%s18758_s9 + $0x574] sm:$0x3] }
 0x3f1   : > { %v16032_v7 = vcombine.low %v11460_v23, %v11463_v49  ;;  %v24599_v22 = vadd.f32 %v17549_v4, %v24301_v29  ;;  %v15940_v25 = vrot.slane %v15920_v55, 9  ;;  %v17557_v15 = vpop.f32.mrb[83].mxu0  ;;  %v11199_v1 = vrot.slane %v15921_v28, 5  ;;  %v17490_v40 = vpop.f32.mrb[81].mxu1 }
 0x3f2   : > { %12919 = vmatprep.mubr.bf16.mxu0 %v15955_v39  ;;  %v11470_v14 = vsel %vm18803_vm5, %v11468_v16, %v11469_v18  ;;  %v11202_v35 = vrot.slane %v15922_v48, 5  ;;  %v16018_v42 = vrot.slane %v15994_v43, 10  ;;  %v24606_v29 = vadd.f32 %v17552_v24, %v24312_v59  ;;  %v17492_v55 = vpop.f32.mrb[82].mxu1  ;;  %v15923_v48 = vld [vmem:[%s18758_s9 + $0x59c] sm:$0xe] }
 0x3f3   : > { %18062 = vmatprep.mubr.bf16.mxu1 %v16032_v7  ;;  %v16033_v11 = vcombine.low %v11467_v31, %v11470_v14  ;;  %v11473_v46 = vrot.slane %v15995_v41, 6  ;;  %v11476_v33 = vrot.slane %v15996_v3, 6  ;;  %v11200_v23 = vsel %vm18773_vm4, %v15940_v25, %v11199_v1  ;;  %v17493_v18 = vpop.f32.mrb[83].mxu1  ;;  %v15925_v41 = vld [vmem:[%s18758_s9 + $0x5a4] sm:$0x1] }
 0x3f4   : > { %12920 = vmatmul.mubr.bf16.gmra.mrb[180].mxu0 %v18471_v8  ;;  %v11201_v28 = vrot.slane %v11199_v1, 4  ;;  %v16019_v45 = vrot.slane %v15997_v51, 10  ;;  %v11480_v44 = vrot.slane %v15998_v47, 6  ;;  %v11483_v4 = vrot.slane %v15999_v20, 6  ;;  %v15924_v8 = vld [vmem:[%s18758_s9 + $0x5a0] sm:$0xf] }
 0x3f5   : > { %v11474_v60 = vsel %vm18803_vm5, %v16018_v42, %v11473_v46  ;;  %v11475_v59 = vrot.slane %v11473_v46, 4  ;;  %v24613_v43 = vadd.f32 %v17490_v40, %v17489_v50  ;;  %v17555_v16 = vadd.f32 %v17554_v61, %v17553_v0  ;;  %v16000_v3 = vld [vmem:[%s18758_s9 + $0x588] sm:$0xc]  ;;  %v16001_v51 = vld [vmem:[%s18758_s9 + $0x58c] sm:$0xf]  ;;  %v17559_v7 = vpop.f32.mrb[84].mxu0 }
 0x3f6   : > { %18063 = vmatmul.mubr.bf16.gmra.mrb[180].mxu1 %v16033_v11  ;;  %v11203_v39 = vsel %vm18773_vm4, %v11201_v28, %v11202_v35  ;;  %v11481_v49 = vsel %vm18803_vm5, %v16019_v45, %v11480_v44  ;;  %v11482_v31 = vrot.slane %v11480_v44, 4  ;;  %v18473_v47 = vld [vmem:[%s18758_s9 + $0x578] sm:$0xff]   ;;  %v24626_v50 = vadd.f32 %v17493_v18, %v17492_v55  ;;  %v16002_v1 = vld [vmem:[%s18758_s9 + $0x590] sm:$0x3]  ;;  %v16003_v35 = vld [vmem:[%s18758_s9 + $0x5a4] sm:$0xc] }
 0x3f7   : > { %v15956_v24 = vcombine.low %v11200_v23, %v11203_v39  ;;  %v11477_v25 = vsel %vm18803_vm5, %v11475_v59, %v11476_v33  ;;  %v17558_v14 = vadd.f32 %v17557_v15, %v17556_v13  ;;  %v17560_v42 = vpop.f32.mrb[85].mxu0  ;;  %v24633_v61 = vadd.f32 %v17555_v16, %v24340_v5  ;;  %v16004_v11 = vld [vmem:[%s18758_s9 + $0x5a8] sm:$0xf]  ;;  %v16005_v46 = vld [vmem:[%s18758_s9 + $0x5ac] sm:$0x3]  ;;  %v17495_v28 = vpop.f32.mrb[84].mxu1 }
 0x3f8   : > { %v16034_v20 = vcombine.low %v11474_v60, %v11477_v25  ;;  %v11484_v0 = vsel %vm18803_vm5, %v11482_v31, %v11483_v4  ;;  %v15941_v40 = vrot.slane %v15923_v48, 9  ;;  %v17562_v23 = vpop.f32.mrb[86].mxu0  ;;  %v11206_v13 = vrot.slane %v15924_v8, 5  ;;  %v17496_v5 = vpop.f32.mrb[85].mxu1 }
 0x3f9   : > { %12927 = vmatprep.mubr.bf16.mxu0 %v15956_v24  ;;  %v16035_v33 = vcombine.low %v11481_v49, %v11484_v0  ;;  %v24638_v55 = vadd.f32 %v17558_v14, %v24344_v6  ;;  %v11209_v15 = vrot.slane %v15925_v41, 5  ;;  %v17563_v45 = vpop.f32.mrb[87].mxu0  ;;  %v16020_v44 = vrot.slane %v16000_v3, 10  ;;  %v17498_v49 = vpop.f32.mrb[86].mxu1 }
 0x3fa   : > { %18066 = vmatprep.mubr.bf16.mxu1 %v16034_v20  ;;  %v11487_v18 = vrot.slane %v16001_v51, 6  ;;  %v11490_v60 = vrot.slane %v16002_v1, 6  ;;  %v16021_v59 = vrot.slane %v16003_v35, 10  ;;  %v11207_v48 = vsel %vm18773_vm4, %v15941_v40, %v11206_v13  ;;  %v17499_v3 = vpop.f32.mrb[87].mxu1  ;;  %v25244_v40 = vld [vmem:[#allocation13_spill] sm:$0xff] }
 0x3fb   : > { %v11208_v4 = vrot.slane %v11206_v13, 4  ;;  %v11494_v39 = vrot.slane %v16004_v11, 6  ;;  %v11497_v31 = vrot.slane %v16005_v46, 6  ;;  %v24644_v41 = vadd.f32 %v17496_v5, %v17495_v28 }
 0x3fc   : > { %12928 = vmatmul.mubr.bf16.gmra.mrb[184].mxu0 %v18473_v47  ;;  %v11488_v6 = vsel %vm18803_vm5, %v16020_v44, %v11487_v18  ;;  %v11489_v8 = vrot.slane %v11487_v18, 4  ;;  %v17561_v16 = vadd.f32 %v17560_v42, %v17559_v7  ;;  %v24648_v25 = vadd.f32 %v17499_v3, %v17498_v49 }
 0x3fd   : > { %v11210_v51 = vsel %vm18773_vm4, %v11208_v4, %v11209_v15  ;;  %v11496_v24 = vrot.slane %v11494_v39, 4  ;;  %v17564_v35 = vadd.f32 %v17563_v45, %v17562_v23  ;;  %v17565_v20 = vpop.f32.mrb[88].mxu0  ;;  %v11495_v7 = vsel %vm18803_vm5, %v16021_v59, %v11494_v39 }
 0x3fe   : > { %18067 = vmatmul.mubr.bf16.gmra.mrb[184].mxu1 %v16035_v33  ;;  %v15957_v14 = vcombine.low %v11207_v48, %v11210_v51  ;;  %v11491_v47 = vsel %vm18803_vm5, %v11489_v8, %v11490_v60  ;;  %v24653_v1 = vadd.f32 %v17561_v16, %v24362_v63  ;;  %v17566_v42 = vpop.f32.mrb[89].mxu0  ;;  %v25245_v11 = vrot.slane %v25244_v40, 1  ;;  %v18474_v33 = vld [vmem:[%s18758_s9 + $0x594] sm:$0xff]   ;;  %s13555_s9 = sand.u32 1, %s18664_s25  }
 0x3ff   : > { %v16036_v0 = vcombine.low %v11488_v6, %v11491_v47  ;;  %v11498_v26 = vsel %vm18803_vm5, %v11496_v24, %v11497_v31  ;;  %v24664_v13 = vadd.f32 %v17564_v35, %v24373_v56  ;;  %v17567_v63 = vadd.f32 %v17566_v42, %v17565_v20  ;;  %v17568_v23 = vpop.f32.mrb[90].mxu0  ;;  %v17501_v15 = vpop.f32.mrb[88].mxu1  ;;  %s24997_s10 = scalar_lea.sflag [#allocation6], %s13555_s9 }
 0x400   : > { %v13441_v46 = vadd.f32 %v25245_v11, %v25244_v40  ;;  %12935 = vmatprep.mubr.bf16.mxu0 %v15957_v14  ;;  %v17569_v28 = vpop.f32.mrb[91].mxu0  ;;  %v16037_v45 = vcombine.low %v11495_v7, %v11498_v26  ;;  %v17502_v44 = vpop.f32.mrb[89].mxu1 }
 0x401   : > { %18070 = vmatprep.mubr.bf16.mxu1 %v16036_v0  ;;  %v24667_v38 = vadd.f32 %v17567_v63, %v24390_v32  ;;  %v17570_v18 = vadd.f32 %v17569_v28, %v17568_v23  ;;  %v24669_v60 = vadd.f32 %v17502_v44, %v17501_v15  ;;  %v17504_v59 = vpop.f32.mrb[90].mxu1 }
 0x402   : > { %v13442_v5 = vmul.f32 0.00390625, %v13441_v46  ;;  %v17505_v48 = vpop.f32.mrb[91].mxu1 }
 0x403   : > { %v24672_v56 = vadd.f32 %v17570_v18, %v24404_v12  ;;  %v24674_v4 = vadd.f32 %v17505_v48, %v17504_v59 }
 0x404   : > { %12936 = vmatmul.mubr.bf16.gmra.mrb[188].mxu0 %v18474_v33  ;;  %v13443_v32 = vpack.c.bf16 %v13442_v5, %v13442_v5 }
 0x405   : > { %18090 = vmatprep.mubr.msk.bf16.mxu0 %vm18602_vm9, %v25231_v2  ;;  %v17571_v39 = vpop.f32.mrb[92].mxu0 }
 0x406   : > { %18071 = vmatmul.mubr.bf16.gmra.mrb[188].mxu1 %v16037_v45  ;;  %v17572_v31 = vpop.f32.mrb[93].mxu0 }
 0x407   : > { %v17573_v49 = vadd.f32 %v17572_v31, %v17571_v39  ;;  %v17574_v6 = vpop.f32.mrb[94].mxu0  ;;  %v17507_v8 = vpop.f32.mrb[92].mxu1 }
 0x408   : > { %v17575_v16 = vpop.f32.mrb[95].mxu0  ;;  %v17508_v3 = vpop.f32.mrb[93].mxu1 }
 0x409   : > { %v24678_v51 = vadd.f32 %v17573_v49, %v24426_v9  ;;  %v17576_v24 = vadd.f32 %v17575_v16, %v17574_v6  ;;  %v24680_v12 = vadd.f32 %v17508_v3, %v17507_v8  ;;  %v17510_v14 = vpop.f32.mrb[94].mxu1 }
 0x40a   : > { %v17511_v47 = vpop.f32.mrb[95].mxu1 }
 0x40b   : > { %v24683_v2 = vadd.f32 %v17576_v24, %v24444_v34  ;;  %v24685_v35 = vadd.f32 %v17511_v47, %v17510_v14 }
 0x40c   : > { %18091 = vmatmul.mubr.bf16.vlgmr.msra.gmra.mrb[192].mxu0 %v13443_v32 }
 0x40d   : > { %v17577_v20 = vpop.f32.mrb[96].mxu0 }
 0x40e   : > { %v17578_v0 = vpop.f32.mrb[97].mxu0 }
 0x40f   : > { %v17579_v7 = vadd.f32 %v17578_v0, %v17577_v20  ;;  %v17580_v26 = vpop.f32.mrb[98].mxu0  ;;  %v17641_v42 = vpop.f32.mrb[96].mxu1 }
 0x410   : > { %v17581_v40 = vpop.f32.mrb[99].mxu0  ;;  %v17642_v11 = vpop.f32.mrb[97].mxu1 }
 0x411   : > { %v24688_v9 = vadd.f32 %v17579_v7, %v24469_v27  ;;  %v17582_v46 = vadd.f32 %v17581_v40, %v17580_v26  ;;  %v17643_v33 = vadd.f32 %v17642_v11, %v17641_v42  ;;  %v17644_v63 = vpop.f32.mrb[98].mxu1 }
 0x412   : > { %v17645_v34 = vpop.f32.mrb[99].mxu1 }
 0x413   : > { %v24691_v23 = vadd.f32 %v17582_v46, %v24480_v53  ;;  %v24694_v15 = vadd.f32 %v17643_v33, %v24486_v36  ;;  %v17646_v28 = vadd.f32 %v17645_v34, %v17644_v63 }
 0x415   : > { %v17583_v45 = vpop.f32.mrb[100].mxu0  ;;  %v24697_v44 = vadd.f32 %v17646_v28, %v24491_v54 }
 0x416   : > { %v17584_v18 = vpop.f32.mrb[101].mxu0 }
 0x417   : > { %v17585_v59 = vadd.f32 %v17584_v18, %v17583_v45  ;;  %v17586_v27 = vpop.f32.mrb[102].mxu0  ;;  %v17647_v5 = vpop.f32.mrb[100].mxu1 }
 0x418   : > { %v17587_v48 = vpop.f32.mrb[103].mxu0  ;;  %v17648_v31 = vpop.f32.mrb[101].mxu1 }
 0x419   : > { %v24700_v39 = vadd.f32 %v17585_v59, %v24518_v52  ;;  %v17588_v53 = vadd.f32 %v17587_v48, %v17586_v27  ;;  %v17649_v32 = vadd.f32 %v17648_v31, %v17647_v5  ;;  %v17650_v49 = vpop.f32.mrb[102].mxu1 }
 0x41a   : > { %v17651_v6 = vpop.f32.mrb[103].mxu1 }
 0x41b   : > { %v24703_v36 = vadd.f32 %v17588_v53, %v24524_v62  ;;  %v24706_v8 = vadd.f32 %v17649_v32, %v24529_v17  ;;  %v17652_v54 = vadd.f32 %v17651_v6, %v17650_v49 }
 0x41d   : > { %v17589_v16 = vpop.f32.mrb[104].mxu0  ;;  %v24709_v3 = vadd.f32 %v17652_v54, %v24537_v21 }
 0x41e   : > { %v17590_v24 = vpop.f32.mrb[105].mxu0 }
 0x41f   : > { %v17591_v14 = vadd.f32 %v17590_v24, %v17589_v16  ;;  %v17592_v52 = vpop.f32.mrb[106].mxu0  ;;  %v17653_v47 = vpop.f32.mrb[104].mxu1 }
 0x420   : > { %v17593_v20 = vpop.f32.mrb[107].mxu0  ;;  %v17654_v7 = vpop.f32.mrb[105].mxu1 }
 0x421   : > { %v24712_v0 = vadd.f32 %v17591_v14, %v24550_v58  ;;  %v17594_v62 = vadd.f32 %v17593_v20, %v17592_v52  ;;  %v17655_v26 = vadd.f32 %v17654_v7, %v17653_v47  ;;  %v17656_v42 = vpop.f32.mrb[106].mxu1 }
 0x422   : > { %v17657_v40 = vpop.f32.mrb[107].mxu1 }
 0x423   : > { %v24715_v17 = vadd.f32 %v17594_v62, %v24564_v37  ;;  %v24718_v11 = vadd.f32 %v17655_v26, %v24562_v30  ;;  %v17658_v21 = vadd.f32 %v17657_v40, %v17656_v42 }
 0x425   : > { %v17595_v46 = vpop.f32.mrb[108].mxu0  ;;  %v24721_v33 = vadd.f32 %v17658_v21, %v24574_v57 }
 0x426   : > { %v17596_v63 = vpop.f32.mrb[109].mxu0 }
 0x427   : > { %v17597_v34 = vadd.f32 %v17596_v63, %v17595_v46  ;;  %v17598_v58 = vpop.f32.mrb[110].mxu0  ;;  %v17659_v28 = vpop.f32.mrb[108].mxu1 }
 0x428   : > { %v17599_v45 = vpop.f32.mrb[111].mxu0  ;;  %v17660_v59 = vpop.f32.mrb[109].mxu1 }
 0x429   : > { %v24724_v18 = vadd.f32 %v17597_v34, %v24586_v19  ;;  %v17600_v37 = vadd.f32 %v17599_v45, %v17598_v58  ;;  %v17661_v27 = vadd.f32 %v17660_v59, %v17659_v28  ;;  %v17662_v5 = vpop.f32.mrb[110].mxu1 }
 0x42a   : > { %v17663_v48 = vpop.f32.mrb[111].mxu1 }
 0x42b   : > { %v24727_v30 = vadd.f32 %v17600_v37, %v24588_v10  ;;  %v24730_v31 = vadd.f32 %v17661_v27, %v24599_v22  ;;  %v17664_v57 = vadd.f32 %v17663_v48, %v17662_v5 }
 0x42d   : > { %v17601_v53 = vpop.f32.mrb[112].mxu0  ;;  %v24733_v32 = vadd.f32 %v17664_v57, %v24606_v29 }
 0x42e   : > { %v17602_v49 = vpop.f32.mrb[113].mxu0 }
 0x42f   : > { %v17603_v6 = vadd.f32 %v17602_v49, %v17601_v53  ;;  %v17604_v19 = vpop.f32.mrb[114].mxu0  ;;  %v17665_v54 = vpop.f32.mrb[112].mxu1 }
 0x430   : > { %v17605_v16 = vpop.f32.mrb[115].mxu0  ;;  %v17666_v14 = vpop.f32.mrb[113].mxu1 }
 0x431   : > { %v24736_v24 = vadd.f32 %v17603_v6, %v24613_v43  ;;  %v17606_v10 = vadd.f32 %v17605_v16, %v17604_v19  ;;  %v17667_v52 = vadd.f32 %v17666_v14, %v17665_v54  ;;  %v17668_v47 = vpop.f32.mrb[114].mxu1 }
 0x432   : > { %v17669_v20 = vpop.f32.mrb[115].mxu1 }
 0x433   : > { %v24739_v22 = vadd.f32 %v17606_v10, %v24626_v50  ;;  %v24742_v7 = vadd.f32 %v17667_v52, %v24633_v61  ;;  %v17670_v29 = vadd.f32 %v17669_v20, %v17668_v47 }
 0x435   : > { %v17607_v62 = vpop.f32.mrb[116].mxu0  ;;  %v24745_v26 = vadd.f32 %v17670_v29, %v24638_v55 }
 0x436   : > { %v17608_v42 = vpop.f32.mrb[117].mxu0 }
 0x437   : > { %v17609_v40 = vadd.f32 %v17608_v42, %v17607_v62  ;;  %v17610_v43 = vpop.f32.mrb[118].mxu0  ;;  %v17671_v21 = vpop.f32.mrb[116].mxu1 }
 0x438   : > { %v17611_v46 = vpop.f32.mrb[119].mxu0  ;;  %v17672_v34 = vpop.f32.mrb[117].mxu1 }
 0x439   : > { %v24748_v63 = vadd.f32 %v17609_v40, %v24644_v41  ;;  %v17612_v50 = vadd.f32 %v17611_v46, %v17610_v43  ;;  %v17673_v58 = vadd.f32 %v17672_v34, %v17671_v21  ;;  %v17674_v28 = vpop.f32.mrb[118].mxu1 }
 0x43a   : > { %v17675_v45 = vpop.f32.mrb[119].mxu1 }
 0x43b   : > { %v24751_v61 = vadd.f32 %v17612_v50, %v24648_v25  ;;  %v24754_v59 = vadd.f32 %v17673_v58, %v24653_v1  ;;  %v17676_v55 = vadd.f32 %v17675_v45, %v17674_v28 }
 0x43d   : > { %v17613_v37 = vpop.f32.mrb[120].mxu0  ;;  %v24757_v27 = vadd.f32 %v17676_v55, %v24664_v13 }
 0x43e   : > { %v17614_v5 = vpop.f32.mrb[121].mxu0 }
 0x43f   : > { %v17615_v48 = vadd.f32 %v17614_v5, %v17613_v37  ;;  %v17616_v41 = vpop.f32.mrb[122].mxu0  ;;  %v17677_v57 = vpop.f32.mrb[120].mxu1 }
 0x440   : > { %v17617_v53 = vpop.f32.mrb[123].mxu0  ;;  %v17678_v6 = vpop.f32.mrb[121].mxu1 }
 0x441   : > { %v24760_v49 = vadd.f32 %v17615_v48, %v24669_v60  ;;  %v17618_v25 = vadd.f32 %v17617_v53, %v17616_v41  ;;  %v17679_v19 = vadd.f32 %v17678_v6, %v17677_v57  ;;  %v17680_v54 = vpop.f32.mrb[122].mxu1 }
 0x442   : > { %v17681_v16 = vpop.f32.mrb[123].mxu1 }
 0x443   : > { %v24763_v1 = vadd.f32 %v17618_v25, %v24674_v4  ;;  %v24766_v14 = vadd.f32 %v17679_v19, %v24667_v38  ;;  %v17682_v13 = vadd.f32 %v17681_v16, %v17680_v54 }
 0x445   : > { %v17619_v10 = vpop.f32.mrb[124].mxu0  ;;  %v24769_v52 = vadd.f32 %v17682_v13, %v24672_v56 }
 0x446   : > { %v17620_v47 = vpop.f32.mrb[125].mxu0 }
 0x447   : > { %v17621_v20 = vadd.f32 %v17620_v47, %v17619_v10  ;;  %v17622_v60 = vpop.f32.mrb[126].mxu0  ;;  %v17683_v29 = vpop.f32.mrb[124].mxu1 }
 0x448   : > { %v17623_v62 = vpop.f32.mrb[127].mxu0  ;;  %v17684_v40 = vpop.f32.mrb[125].mxu1 }
 0x449   : > { %v24772_v42 = vadd.f32 %v17621_v20, %v24680_v12  ;;  %v17624_v4 = vadd.f32 %v17623_v62, %v17622_v60  ;;  %v17685_v43 = vadd.f32 %v17684_v40, %v17683_v29  ;;  %v17686_v21 = vpop.f32.mrb[126].mxu1 }
 0x44a   : > { %v17687_v46 = vpop.f32.mrb[127].mxu1 }
 0x44b   : > { %v24775_v38 = vadd.f32 %v17624_v4, %v24685_v35  ;;  %v24778_v34 = vadd.f32 %v17685_v43, %v24678_v51  ;;  %v17688_v56 = vadd.f32 %v17687_v46, %v17686_v21 }
 0x44d   : > { %v17753_v50 = vpop.f32.mrb[128].mxu0  ;;  %v24781_v58 = vadd.f32 %v17688_v56, %v24683_v2 }
 0x44e   : > { %v17754_v28 = vpop.f32.mrb[129].mxu0 }
 0x44f   : > { %v17755_v45 = vadd.f32 %v17754_v28, %v17753_v50  ;;  %v17756_v12 = vpop.f32.mrb[130].mxu0  ;;  %v17689_v55 = vpop.f32.mrb[128].mxu1 }
 0x450   : > { %v17757_v37 = vpop.f32.mrb[131].mxu0  ;;  %v17690_v5 = vpop.f32.mrb[129].mxu1 }
 0x451   : > { %v17758_v48 = vadd.f32 %v17757_v37, %v17756_v12  ;;  %v24784_v41 = vadd.f32 %v17755_v45, %v24694_v15  ;;  %v17691_v35 = vadd.f32 %v17690_v5, %v17689_v55  ;;  %v17692_v57 = vpop.f32.mrb[130].mxu1 }
 0x452   : > { %v17693_v53 = vpop.f32.mrb[131].mxu1 }
 0x453   : > { %v24787_v51 = vadd.f32 %v17758_v48, %v24697_v44  ;;  %v24790_v6 = vadd.f32 %v17691_v35, %v24688_v9  ;;  %v17694_v2 = vadd.f32 %v17693_v53, %v17692_v57 }
 0x455   : > { %v17759_v25 = vpop.f32.mrb[132].mxu0  ;;  %v24793_v19 = vadd.f32 %v17694_v2, %v24691_v23 }
 0x456   : > { %v17760_v54 = vpop.f32.mrb[133].mxu0 }
 0x457   : > { %v17761_v16 = vadd.f32 %v17760_v54, %v17759_v25  ;;  %v17762_v13 = vpop.f32.mrb[134].mxu0  ;;  %v17695_v10 = vpop.f32.mrb[132].mxu1 }
 0x458   : > { %v17763_v15 = vpop.f32.mrb[135].mxu0  ;;  %v17696_v47 = vpop.f32.mrb[133].mxu1 }
 0x459   : > { %v17764_v20 = vadd.f32 %v17763_v15, %v17762_v13  ;;  %v24796_v60 = vadd.f32 %v17761_v16, %v24706_v8  ;;  %v17697_v44 = vadd.f32 %v17696_v47, %v17695_v10  ;;  %v17698_v29 = vpop.f32.mrb[134].mxu1 }
 0x45a   : > { %v17699_v62 = vpop.f32.mrb[135].mxu1 }
 0x45b   : > { %v24799_v9 = vadd.f32 %v17764_v20, %v24709_v3  ;;  %v24802_v40 = vadd.f32 %v17697_v44, %v24700_v39  ;;  %v17700_v23 = vadd.f32 %v17699_v62, %v17698_v29 }
 0x45d   : > { %v17765_v4 = vpop.f32.mrb[136].mxu0  ;;  %v24805_v43 = vadd.f32 %v17700_v23, %v24703_v36 }
 0x45e   : > { %v17766_v21 = vpop.f32.mrb[137].mxu0 }
 0x45f   : > { %v17767_v46 = vadd.f32 %v17766_v21, %v17765_v4  ;;  %v17768_v56 = vpop.f32.mrb[138].mxu0  ;;  %v17701_v50 = vpop.f32.mrb[136].mxu1 }
 0x460   : > { %v17769_v8 = vpop.f32.mrb[139].mxu0  ;;  %v17702_v28 = vpop.f32.mrb[137].mxu1 }
 0x461   : > { %v17770_v45 = vadd.f32 %v17769_v8, %v17768_v56  ;;  %v24808_v12 = vadd.f32 %v17767_v46, %v24718_v11  ;;  %v17703_v3 = vadd.f32 %v17702_v28, %v17701_v50  ;;  %v17704_v55 = vpop.f32.mrb[138].mxu1 }
 0x462   : > { %v17705_v37 = vpop.f32.mrb[139].mxu1 }
 0x463   : > { %v24811_v39 = vadd.f32 %v17770_v45, %v24721_v33  ;;  %v24814_v5 = vadd.f32 %v17703_v3, %v24712_v0  ;;  %v17706_v36 = vadd.f32 %v17705_v37, %v17704_v55 }
 0x465   : > { %v17771_v48 = vpop.f32.mrb[140].mxu0  ;;  %v24817_v35 = vadd.f32 %v17706_v36, %v24715_v17 }
 0x466   : > { %v17772_v57 = vpop.f32.mrb[141].mxu0 }
 0x467   : > { %v17773_v53 = vadd.f32 %v17772_v57, %v17771_v48  ;;  %v17774_v2 = vpop.f32.mrb[142].mxu0 }
 0x468   : > { %v17707_v25 = vpop.f32.mrb[140].mxu1  ;;  %v17775_v11 = vpop.f32.mrb[143].mxu0 }
 0x469   : > { %v17708_v54 = vpop.f32.mrb[141].mxu1  ;;  %v17776_v16 = vadd.f32 %v17775_v11, %v17774_v2  ;;  %v24820_v13 = vadd.f32 %v17773_v53, %v24730_v31 }
 0x46a   : > { %v17709_v33 = vadd.f32 %v17708_v54, %v17707_v25  ;;  %v17710_v10 = vpop.f32.mrb[142].mxu1 }
 0x46b   : > { %v17711_v15 = vpop.f32.mrb[143].mxu1  ;;  %v24823_v0 = vadd.f32 %v17776_v16, %v24733_v32 }
 0x46c   : > { %v24826_v47 = vadd.f32 %v17709_v33, %v24724_v18  ;;  %v17712_v17 = vadd.f32 %v17711_v15, %v17710_v10 }
 0x46d   : > { %v17777_v20 = vpop.f32.mrb[144].mxu0 }
 0x46e   : > { %v24829_v44 = vadd.f32 %v17712_v17, %v24727_v30  ;;  %v17778_v29 = vpop.f32.mrb[145].mxu0 }
 0x46f   : > { %v17779_v62 = vadd.f32 %v17778_v29, %v17777_v20  ;;  %v17780_v23 = vpop.f32.mrb[146].mxu0 }
 0x470   : > { %v17713_v4 = vpop.f32.mrb[144].mxu1  ;;  %v17781_v31 = vpop.f32.mrb[147].mxu0 }
 0x471   : > { %v17714_v21 = vpop.f32.mrb[145].mxu1  ;;  %v17782_v46 = vadd.f32 %v17781_v31, %v17780_v23  ;;  %v24832_v56 = vadd.f32 %v17779_v62, %v24742_v7 }
 0x472   : > { %v17715_v32 = vadd.f32 %v17714_v21, %v17713_v4  ;;  %v17716_v50 = vpop.f32.mrb[146].mxu1 }
 0x473   : > { %v17717_v8 = vpop.f32.mrb[147].mxu1  ;;  %v24835_v18 = vadd.f32 %v17782_v46, %v24745_v26 }
 0x474   : > { %v24838_v28 = vadd.f32 %v17715_v32, %v24736_v24  ;;  %v17718_v30 = vadd.f32 %v17717_v8, %v17716_v50 }
 0x475   : > { %v17783_v45 = vpop.f32.mrb[148].mxu0 }
 0x476   : > { %v24841_v3 = vadd.f32 %v17718_v30, %v24739_v22  ;;  %v17784_v55 = vpop.f32.mrb[149].mxu0 }
 0x477   : > { %v17785_v37 = vadd.f32 %v17784_v55, %v17783_v45  ;;  %v17786_v36 = vpop.f32.mrb[150].mxu0 }
 0x478   : > { %v17719_v48 = vpop.f32.mrb[148].mxu1  ;;  %v17787_v7 = vpop.f32.mrb[151].mxu0 }
 0x479   : > { %v17720_v57 = vpop.f32.mrb[149].mxu1  ;;  %v17788_v53 = vadd.f32 %v17787_v7, %v17786_v36  ;;  %v24844_v2 = vadd.f32 %v17785_v37, %v24754_v59 }
 0x47a   : > { %v17721_v26 = vadd.f32 %v17720_v57, %v17719_v48  ;;  %v17722_v25 = vpop.f32.mrb[150].mxu1 }
 0x47b   : > { %v17723_v11 = vpop.f32.mrb[151].mxu1  ;;  %v24847_v24 = vadd.f32 %v17788_v53, %v24757_v27 }
 0x47c   : > { %v24850_v54 = vadd.f32 %v17721_v26, %v24748_v63  ;;  %v17724_v22 = vadd.f32 %v17723_v11, %v17722_v25 }
 0x47d   : > { %v17789_v16 = vpop.f32.mrb[152].mxu0 }
 0x47e   : > { %v24853_v33 = vadd.f32 %v17724_v22, %v24751_v61  ;;  %v17790_v10 = vpop.f32.mrb[153].mxu0 }
 0x47f   : > { %v17791_v15 = vadd.f32 %v17790_v10, %v17789_v16  ;;  %v17792_v17 = vpop.f32.mrb[154].mxu0 }
 0x480   : > { %v17793_v20 = vpop.f32.mrb[155].mxu0 }
 0x481   : > { %v17725_v59 = vpop.f32.mrb[152].mxu1  ;;  %v17794_v29 = vadd.f32 %v17793_v20, %v17792_v17  ;;  %v24856_v62 = vadd.f32 %v17791_v15, %v24766_v14 }
 0x482   : > { %v17726_v23 = vpop.f32.mrb[153].mxu1 }
 0x483   : > { %v17727_v27 = vadd.f32 %v17726_v23, %v17725_v59  ;;  %v17728_v4 = vpop.f32.mrb[154].mxu1  ;;  %v24859_v63 = vadd.f32 %v17794_v29, %v24769_v52 }
 0x484   : > { %v17729_v31 = vpop.f32.mrb[155].mxu1 }
 0x485   : > { %v24862_v21 = vadd.f32 %v17727_v27, %v24760_v49  ;;  %v17730_v61 = vadd.f32 %v17729_v31, %v17728_v4 }
 0x487   : > { %v24865_v46 = vadd.f32 %v17730_v61, %v24763_v1 }
 0x48e   : > { %v17795_v32 = vpop.f32.mrb[156].mxu0 }
 0x48f   : > { %v17796_v8 = vpop.f32.mrb[157].mxu0 }
 0x490   : > { %v17731_v50 = vpop.f32.mrb[156].mxu1  ;;  %v17797_v14 = vadd.f32 %v17796_v8, %v17795_v32  ;;  %v17798_v45 = vpop.f32.mrb[158].mxu0 }
 0x491   : > { %v17732_v30 = vpop.f32.mrb[157].mxu1  ;;  %v17799_v36 = vpop.f32.mrb[159].mxu0 }
 0x492   : > { %v17733_v55 = vadd.f32 %v17732_v30, %v17731_v50  ;;  %v17734_v37 = vpop.f32.mrb[158].mxu1  ;;  %v17800_v52 = vadd.f32 %v17799_v36, %v17798_v45  ;;  %v24868_v7 = vadd.f32 %v17797_v14, %v24778_v34 }
 0x493   : > { %v17735_v48 = vpop.f32.mrb[159].mxu1 }
 0x494   : > { %v24871_v49 = vadd.f32 %v17733_v55, %v24772_v42  ;;  %v17736_v57 = vadd.f32 %v17735_v48, %v17734_v37  ;;  %v24874_v1 = vadd.f32 %v17800_v52, %v24781_v58 }
 0x496   : > { %v24877_v53 = vadd.f32 %v17736_v57, %v24775_v38  ;;  %v17801_v26 = vpop.f32.mrb[160].mxu0 }
 0x497   : > { %v17802_v25 = vpop.f32.mrb[161].mxu0 }
 0x498   : > { %v17803_v11 = vadd.f32 %v17802_v25, %v17801_v26  ;;  %v17804_v22 = vpop.f32.mrb[162].mxu0 }
 0x499   : > { %v17805_v10 = vpop.f32.mrb[163].mxu0 }
 0x49a   : > { %v18044_v16 = vpop.f32.mrb[160].mxu1  ;;  %v17806_v42 = vadd.f32 %v17805_v10, %v17804_v22  ;;  %v24881_v17 = vadd.f32 %v17803_v11, %v24790_v6 }
 0x49b   : > { %v12987_v34 = vadd.f32 %v18044_v16, %v24796_v60  ;;  %v12978_v15 = vpop.f32.mrb[161].mxu1 }
 0x49c   : > { %v12979_v58 = vadd.f32 %v12978_v15, %v24784_v41  ;;  %v18045_v38 = vpop.f32.mrb[162].mxu1  ;;  %v24886_v23 = vadd.f32 %v17806_v42, %v24793_v19 }
 0x49d   : > { %v16401_v20 = vpack.c.bf16 %v12987_v34, %v12987_v34  ;;  %v12990_v59 = vadd.f32 %v18045_v38, %v24799_v9  ;;  %v12981_v29 = vpop.f32.mrb[163].mxu1  ;;  %v13305_v41 = vmul.f32 %v12987_v34, %v12987_v34 }
 0x49e   : > { %v16399_v27 = vpack.c.bf16 %v12979_v58, %v12979_v58  ;;  %v12982_v60 = vadd.f32 %v12981_v29, %v24787_v51  ;;  %v13303_v6 = vmul.f32 %v12979_v58, %v12979_v58 }
 0x49f   : > { %13235 = vst [vmem:[%s19793_s18 + $0x2c] sm:$0xf] %v16401_v20  ;;  %v16402_v4 = vpack.c.bf16 %v12990_v59, %v12990_v59  ;;  %v13306_v14 = vmul.f32 %v12990_v59, %v12990_v59 }
 0x4a0   : > { %13233 = vst [vmem:[%s19793_s18 + $0xc] sm:$0xf] %v16399_v27  ;;  %v16400_v31 = vpack.c.bf16 %v12982_v60, %v12982_v60  ;;  %v13265_v61 = vadd.f32 %v12982_v60, %v12979_v58  ;;  %v13304_v32 = vmul.f32 %v12982_v60, %v12982_v60 }
 0x4a1   : > { %13236 = vst [vmem:[%s19793_s18 + $0x3c] sm:$0xf] %v16402_v4 }
 0x4a2   : > { %13234 = vst [vmem:[%s19793_s18 + $0x1c] sm:$0xf] %v16400_v31  ;;  %v13266_v50 = vadd.f32 %v13265_v61, %v12987_v34  ;;  %v13335_v8 = vadd.f32 %v13304_v32, %v13303_v6  ;;  %v17807_v9 = vpop.f32.mrb[164].mxu0 }
 0x4a3   : > { %v17808_v30 = vpop.f32.mrb[165].mxu0 }
 0x4a4   : > { %v13336_v19 = vadd.f32 %v13335_v8, %v13305_v41  ;;  %v17809_v45 = vadd.f32 %v17808_v30, %v17807_v9  ;;  %v13267_v55 = vadd.f32 %v13266_v50, %v12990_v59  ;;  %v17810_v37 = vpop.f32.mrb[166].mxu0  ;;  %v18048_v51 = vpop.f32.mrb[164].mxu1 }
 0x4a5   : > { %v17811_v36 = vpop.f32.mrb[167].mxu0  ;;  %v13003_v48 = vadd.f32 %v18048_v51, %v24820_v13  ;;  %v12994_v52 = vpop.f32.mrb[165].mxu1 }
 0x4a6   : > { %v13337_v57 = vadd.f32 %v13336_v19, %v13306_v14  ;;  %v17812_v26 = vadd.f32 %v17811_v36, %v17810_v37  ;;  %v24895_v25 = vadd.f32 %v17809_v45, %v24802_v40  ;;  %v12995_v11 = vadd.f32 %v12994_v52, %v24808_v12  ;;  %v18049_v22 = vpop.f32.mrb[166].mxu1 }
 0x4a7   : > { %v16405_v16 = vpack.c.bf16 %v13003_v48, %v13003_v48  ;;  %v13006_v10 = vadd.f32 %v18049_v22, %v24823_v0  ;;  %v12997_v34 = vpop.f32.mrb[167].mxu1  ;;  %v13309_v27 = vmul.f32 %v13003_v48, %v13003_v48 }
 0x4a8   : > { %v24900_v15 = vadd.f32 %v17812_v26, %v24805_v43  ;;  %v16403_v13 = vpack.c.bf16 %v12995_v11, %v12995_v11  ;;  %v13268_v42 = vadd.f32 %v13267_v55, %v12995_v11  ;;  %v13307_v58 = vmul.f32 %v12995_v11, %v12995_v11 }
 0x4a9   : > { %v12998_v38 = vadd.f32 %v12997_v34, %v24811_v39  ;;  %13239 = vst [vmem:[%s19793_s18 + $0x6c] sm:$0xf] %v16405_v16  ;;  %v16406_v40 = vpack.c.bf16 %v13006_v10, %v13006_v10  ;;  %v13310_v6 = vmul.f32 %v13006_v10, %v13006_v10 }
 0x4aa   : > { %13237 = vst [vmem:[%s19793_s18 + $0x4c] sm:$0xf] %v16403_v13  ;;  %v13338_v20 = vadd.f32 %v13337_v57, %v13307_v58 }
 0x4ab   : > { %v16404_v12 = vpack.c.bf16 %v12998_v38, %v12998_v38  ;;  %v13269_v59 = vadd.f32 %v13268_v42, %v12998_v38  ;;  %v13308_v29 = vmul.f32 %v12998_v38, %v12998_v38  ;;  %13240 = vst [vmem:[%s19793_s18 + $0x7c] sm:$0xf] %v16406_v40 }
 0x4ad   : > { %13238 = vst [vmem:[%s19793_s18 + $0x5c] sm:$0xf] %v16404_v12  ;;  %v13270_v0 = vadd.f32 %v13269_v59, %v13003_v48  ;;  %v13339_v60 = vadd.f32 %v13338_v20, %v13308_v29  ;;  %v17813_v4 = vpop.f32.mrb[168].mxu0 }
 0x4ae   : > { %v17814_v43 = vpop.f32.mrb[169].mxu0 }
 0x4af   : > { %v13340_v31 = vadd.f32 %v13339_v60, %v13309_v27  ;;  %v17815_v61 = vadd.f32 %v17814_v43, %v17813_v4  ;;  %v13271_v32 = vadd.f32 %v13270_v0, %v13006_v10  ;;  %v17816_v41 = vpop.f32.mrb[170].mxu0 }
 0x4b0   : > { %v18052_v39 = vpop.f32.mrb[168].mxu1  ;;  %v17817_v50 = vpop.f32.mrb[171].mxu0 }
 0x4b1   : > { %v13019_v8 = vadd.f32 %v18052_v39, %v24844_v2  ;;  %v13010_v9 = vpop.f32.mrb[169].mxu1  ;;  %v13341_v30 = vadd.f32 %v13340_v31, %v13310_v6  ;;  %v17818_v14 = vadd.f32 %v17817_v50, %v17816_v41  ;;  %v24909_v19 = vadd.f32 %v17815_v61, %v24814_v5 }
 0x4b2   : > { %v13011_v45 = vadd.f32 %v13010_v9, %v24832_v56  ;;  %v18053_v55 = vpop.f32.mrb[170].mxu1 }
 0x4b3   : > { %v16409_v37 = vpack.c.bf16 %v13019_v8, %v13019_v8  ;;  %v13022_v51 = vadd.f32 %v18053_v55, %v24847_v24  ;;  %v13013_v36 = vpop.f32.mrb[171].mxu1  ;;  %v24914_v48 = vadd.f32 %v17818_v14, %v24817_v35  ;;  %v13313_v24 = vmul.f32 %v13019_v8, %v13019_v8 }
 0x4b4   : > { %v16407_v2 = vpack.c.bf16 %v13011_v45, %v13011_v45  ;;  %v13272_v52 = vadd.f32 %v13271_v32, %v13011_v45  ;;  %v13311_v57 = vmul.f32 %v13011_v45, %v13011_v45  ;;  %v13014_v26 = vadd.f32 %v13013_v36, %v24835_v18 }
 0x4b5   : > { %13243 = vst [vmem:[%s19793_s18 + $0xac] sm:$0xf] %v16409_v37  ;;  %v16410_v5 = vpack.c.bf16 %v13022_v51, %v13022_v51  ;;  %v13314_v20 = vmul.f32 %v13022_v51, %v13022_v51 }
 0x4b6   : > { %13241 = vst [vmem:[%s19793_s18 + $0x8c] sm:$0xf] %v16407_v2  ;;  %v13342_v11 = vadd.f32 %v13341_v30, %v13311_v57  ;;  %v16408_v56 = vpack.c.bf16 %v13014_v26, %v13014_v26  ;;  %v13273_v22 = vadd.f32 %v13272_v52, %v13014_v26  ;;  %v13312_v16 = vmul.f32 %v13014_v26, %v13014_v26 }
 0x4b7   : > { %13244 = vst [vmem:[%s19793_s18 + $0xbc] sm:$0xf] %v16410_v5  ;;  %v17819_v10 = vpop.f32.mrb[172].mxu0 }
 0x4b8   : > { %13242 = vst [vmem:[%s19793_s18 + $0x9c] sm:$0xf] %v16408_v56  ;;  %v13274_v34 = vadd.f32 %v13273_v22, %v13019_v8  ;;  %v13343_v13 = vadd.f32 %v13342_v11, %v13312_v16  ;;  %v18056_v35 = vpop.f32.mrb[172].mxu1  ;;  %v17820_v42 = vpop.f32.mrb[173].mxu0 }
 0x4b9   : > { %v13035_v58 = vadd.f32 %v18056_v35, %v24868_v7  ;;  %v17821_v38 = vadd.f32 %v17820_v42, %v17819_v10  ;;  %v13026_v40 = vpop.f32.mrb[173].mxu1  ;;  %v17822_v18 = vpop.f32.mrb[174].mxu0 }
 0x4ba   : > { %v13344_v12 = vadd.f32 %v13343_v13, %v13313_v24  ;;  %v13027_v59 = vadd.f32 %v13026_v40, %v24856_v62  ;;  %v13275_v29 = vadd.f32 %v13274_v34, %v13022_v51  ;;  %v18057_v27 = vpop.f32.mrb[174].mxu1  ;;  %v17823_v0 = vpop.f32.mrb[175].mxu0 }
 0x4bb   : > { %v16413_v60 = vpack.c.bf16 %v13035_v58, %v13035_v58  ;;  %v13038_v4 = vadd.f32 %v18057_v27, %v24874_v1  ;;  %v17824_v43 = vadd.f32 %v17823_v0, %v17822_v18  ;;  %v13029_v6 = vpop.f32.mrb[175].mxu1  ;;  %v12906_v62 = vadd.f32 %v17821_v38, %v24826_v47 }
 0x4bc   : > { %v16411_v31 = vpack.c.bf16 %v13027_v59, %v13027_v59  ;;  %v13276_v7 = vadd.f32 %v13275_v29, %v13027_v59  ;;  %v13315_v61 = vmul.f32 %v13027_v59, %v13027_v59  ;;  %v13345_v32 = vadd.f32 %v13344_v12, %v13314_v20 }
 0x4bd   : > { %13247 = vst [vmem:[%s19793_s18 + $0xec] sm:$0xf] %v16413_v60  ;;  %v16414_v41 = vpack.c.bf16 %v13038_v4, %v13038_v4  ;;  %v13030_v39 = vadd.f32 %v13029_v6, %v24859_v63  ;;  %v24929_v8 = vadd.f32 %v17824_v43, %v24829_v44  ;;  %v13317_v55 = vmul.f32 %v13035_v58, %v13035_v58 }
 0x4be   : > { %13245 = vst [vmem:[%s19793_s18 + $0xcc] sm:$0xf] %v16411_v31  ;;  %v13346_v50 = vadd.f32 %v13345_v32, %v13315_v61  ;;  %v13318_v52 = vmul.f32 %v13038_v4, %v13038_v4 }
 0x4bf   : > { %13248 = vst [vmem:[%s19793_s18 + $0xfc] sm:$0xf] %v16414_v41  ;;  %v16412_v1 = vpack.c.bf16 %v13030_v39, %v13030_v39  ;;  %v13277_v9 = vadd.f32 %v13276_v7, %v13030_v39  ;;  %v13316_v30 = vmul.f32 %v13030_v39, %v13030_v39  ;;  %v17825_v14 = vpop.f32.mrb[176].mxu0 }
 0x4c0   : > { %v17826_v45 = vpop.f32.mrb[177].mxu0 }
 0x4c1   : > { %13246 = vst [vmem:[%s19793_s18 + $0xdc] sm:$0xf] %v16412_v1  ;;  %v13278_v37 = vadd.f32 %v13277_v9, %v13035_v58  ;;  %v13347_v51 = vadd.f32 %v13346_v50, %v13316_v30  ;;  %v18060_v36 = vpop.f32.mrb[176].mxu1  ;;  %v17827_v2 = vadd.f32 %v17826_v45, %v17825_v14  ;;  %v17828_v63 = vpop.f32.mrb[178].mxu0 }
 0x4c2   : > { %v13051_v47 = vadd.f32 %v18060_v36, %v24895_v25  ;;  %v13042_v57 = vpop.f32.mrb[177].mxu1  ;;  %v17829_v44 = vpop.f32.mrb[179].mxu0 }
 0x4c3   : > { %v13348_v26 = vadd.f32 %v13347_v51, %v13317_v55  ;;  %v13043_v5 = vadd.f32 %v13042_v57, %v24881_v17  ;;  %v13279_v11 = vadd.f32 %v13278_v37, %v13038_v4  ;;  %v18061_v56 = vpop.f32.mrb[178].mxu1  ;;  %v17830_v22 = vadd.f32 %v17829_v44, %v17828_v63 }
 0x4c4   : > { %v16417_v16 = vpack.c.bf16 %v13051_v47, %v13051_v47  ;;  %v13054_v10 = vadd.f32 %v18061_v56, %v24900_v15  ;;  %v13045_v24 = vpop.f32.mrb[179].mxu1  ;;  %v24937_v34 = vadd.f32 %v17827_v2, %v24838_v28  ;;  %v13321_v0 = vmul.f32 %v13051_v47, %v13051_v47 }
 0x4c5   : > { %v16415_v13 = vpack.c.bf16 %v13043_v5, %v13043_v5  ;;  %v13280_v25 = vadd.f32 %v13279_v11, %v13043_v5  ;;  %v13319_v35 = vmul.f32 %v13043_v5, %v13043_v5  ;;  %v13349_v42 = vadd.f32 %v13348_v26, %v13318_v52 }
 0x4c6   : > { %13251 = vst [vmem:[%s19793_s18 + $0x12c] sm:$0xf] %v16417_v16  ;;  %v16418_v58 = vpack.c.bf16 %v13054_v10, %v13054_v10  ;;  %v13046_v17 = vadd.f32 %v13045_v24, %v24886_v23  ;;  %v24942_v38 = vadd.f32 %v17830_v22, %v24841_v3  ;;  %v13322_v32 = vmul.f32 %v13054_v10, %v13054_v10 }
 0x4c7   : > { %13249 = vst [vmem:[%s19793_s18 + $0x10c] sm:$0xf] %v16415_v13  ;;  %v13350_v40 = vadd.f32 %v13349_v42, %v13319_v35  ;;  %v17831_v18 = vpop.f32.mrb[180].mxu0 }
 0x4c8   : > { %13252 = vst [vmem:[%s19793_s18 + $0x13c] sm:$0xf] %v16418_v58  ;;  %v16416_v15 = vpack.c.bf16 %v13046_v17, %v13046_v17  ;;  %v13281_v20 = vadd.f32 %v13280_v25, %v13046_v17  ;;  %v13320_v28 = vmul.f32 %v13046_v17, %v13046_v17  ;;  %v17832_v12 = vpop.f32.mrb[181].mxu0 }
 0x4c9   : > { %v18064_v59 = vpop.f32.mrb[180].mxu1  ;;  %v17833_v29 = vadd.f32 %v17832_v12, %v17831_v18  ;;  %v17834_v27 = vpop.f32.mrb[182].mxu0 }
 0x4ca   : > { %13250 = vst [vmem:[%s19793_s18 + $0x11c] sm:$0xf] %v16416_v15  ;;  %v13282_v60 = vadd.f32 %v13281_v20, %v13051_v47  ;;  %v13351_v4 = vadd.f32 %v13350_v40, %v13320_v28  ;;  %v13067_v43 = vadd.f32 %v18064_v59, %v12906_v62  ;;  %v13058_v23 = vpop.f32.mrb[181].mxu1  ;;  %v17835_v3 = vpop.f32.mrb[183].mxu0 }
 0x4cb   : > { %v13059_v6 = vadd.f32 %v13058_v23, %v24909_v19  ;;  %v18065_v31 = vpop.f32.mrb[182].mxu1  ;;  %v17836_v7 = vadd.f32 %v17835_v3, %v17834_v27  ;;  %v12922_v61 = vadd.f32 %v17833_v29, %v24850_v54 }
 0x4cc   : > { %v13352_v41 = vadd.f32 %v13351_v4, %v13321_v0  ;;  %v16421_v39 = vpack.c.bf16 %v13067_v43, %v13067_v43  ;;  %v13283_v50 = vadd.f32 %v13282_v60, %v13054_v10  ;;  %v13061_v1 = vpop.f32.mrb[183].mxu1  ;;  %v13070_v62 = vadd.f32 %v18065_v31, %v24929_v8 }
 0x4cd   : > { %v16419_v9 = vpack.c.bf16 %v13059_v6, %v13059_v6  ;;  %v13323_v30 = vmul.f32 %v13059_v6, %v13059_v6  ;;  %v13062_v14 = vadd.f32 %v13061_v1, %v24914_v48  ;;  %v12925_v55 = vadd.f32 %v17836_v7, %v24853_v33 }
 0x4ce   : > { %13255 = vst [vmem:[%s19793_s18 + $0x16c] sm:$0xf] %v16421_v39  ;;  %v13284_v19 = vadd.f32 %v13283_v50, %v13059_v6  ;;  %v13353_v45 = vadd.f32 %v13352_v41, %v13322_v32  ;;  %v16422_v54 = vpack.c.bf16 %v13070_v62, %v13070_v62  ;;  %v13325_v44 = vmul.f32 %v13067_v43, %v13067_v43 }
 0x4cf   : > { %13253 = vst [vmem:[%s19793_s18 + $0x14c] sm:$0xf] %v16419_v9  ;;  %v16420_v37 = vpack.c.bf16 %v13062_v14, %v13062_v14  ;;  %v13324_v51 = vmul.f32 %v13062_v14, %v13062_v14  ;;  %v17837_v36 = vpop.f32.mrb[184].mxu0  ;;  %v13326_v24 = vmul.f32 %v13070_v62, %v13070_v62 }
 0x4d0   : > { %v13354_v2 = vadd.f32 %v13353_v45, %v13323_v30  ;;  %v13285_v63 = vadd.f32 %v13284_v19, %v13062_v14  ;;  %v17838_v52 = vpop.f32.mrb[185].mxu0  ;;  %13256 = vst [vmem:[%s19793_s18 + $0x17c] sm:$0xf] %v16422_v54 }
 0x4d1   : > { %13254 = vst [vmem:[%s19793_s18 + $0x15c] sm:$0xf] %v16420_v37  ;;  %v18068_v47 = vpop.f32.mrb[184].mxu1  ;;  %v17839_v57 = vadd.f32 %v17838_v52, %v17837_v36  ;;  %v17840_v8 = vpop.f32.mrb[186].mxu0 }
 0x4d2   : > { %v13286_v48 = vadd.f32 %v13285_v63, %v13067_v43  ;;  %v13355_v26 = vadd.f32 %v13354_v2, %v13324_v51  ;;  %v13083_v5 = vadd.f32 %v18068_v47, %v12922_v61  ;;  %v13074_v11 = vpop.f32.mrb[185].mxu1  ;;  %v17841_v33 = vpop.f32.mrb[187].mxu0 }
 0x4d3   : > { %v13075_v56 = vadd.f32 %v13074_v11, %v24937_v34  ;;  %v18069_v22 = vpop.f32.mrb[186].mxu1  ;;  %v17842_v16 = vadd.f32 %v17841_v33, %v17840_v8  ;;  %v12930_v10 = vadd.f32 %v17839_v57, %v24862_v21 }
 0x4d4   : > { %v13356_v13 = vadd.f32 %v13355_v26, %v13325_v44  ;;  %v16425_v25 = vpack.c.bf16 %v13083_v5, %v13083_v5  ;;  %v13287_v35 = vadd.f32 %v13286_v48, %v13070_v62  ;;  %v13077_v42 = vpop.f32.mrb[187].mxu1  ;;  %v13086_v40 = vadd.f32 %v18069_v22, %v12925_v55 }
 0x4d5   : > { %v16423_v58 = vpack.c.bf16 %v13075_v56, %v13075_v56  ;;  %v13327_v17 = vmul.f32 %v13075_v56, %v13075_v56  ;;  %v13078_v18 = vadd.f32 %v13077_v42, %v24942_v38  ;;  %v12933_v20 = vadd.f32 %v17842_v16, %v24865_v46 }
 0x4d6   : > { %13259 = vst [vmem:[%s19793_s18 + $0x1ac] sm:$0xf] %v16425_v25  ;;  %v13288_v15 = vadd.f32 %v13287_v35, %v13075_v56  ;;  %v13357_v34 = vadd.f32 %v13356_v13, %v13326_v24  ;;  %v16426_v28 = vpack.c.bf16 %v13086_v40, %v13086_v40  ;;  %v13329_v38 = vmul.f32 %v13083_v5, %v13083_v5 }
 0x4d7   : > { %13257 = vst [vmem:[%s19793_s18 + $0x18c] sm:$0xf] %v16423_v58  ;;  %v16424_v21 = vpack.c.bf16 %v13078_v18, %v13078_v18  ;;  %v13328_v12 = vmul.f32 %v13078_v18, %v13078_v18  ;;  %v17843_v59 = vpop.f32.mrb[188].mxu0  ;;  %v13330_v41 = vmul.f32 %v13086_v40, %v13086_v40 }
 0x4d8   : > { %v13358_v29 = vadd.f32 %v13357_v34, %v13327_v17  ;;  %v13289_v27 = vadd.f32 %v13288_v15, %v13078_v18  ;;  %v17844_v0 = vpop.f32.mrb[189].mxu0  ;;  %13260 = vst [vmem:[%s19793_s18 + $0x1bc] sm:$0xf] %v16426_v28 }
 0x4d9   : > { %13258 = vst [vmem:[%s19793_s18 + $0x19c] sm:$0xf] %v16424_v21  ;;  %v18072_v60 = vpop.f32.mrb[188].mxu1  ;;  %v17845_v4 = vadd.f32 %v17844_v0, %v17843_v59  ;;  %v17846_v43 = vpop.f32.mrb[190].mxu0 }
 0x4da   : > { %v13290_v23 = vadd.f32 %v13289_v27, %v13083_v5  ;;  %v13359_v3 = vadd.f32 %v13358_v29, %v13328_v12  ;;  %v13090_v6 = vpop.f32.mrb[189].mxu1  ;;  %v17847_v46 = vpop.f32.mrb[191].mxu0 }
 0x4db   : > { %v12938_v31 = vadd.f32 %v17845_v4, %v24871_v49  ;;  %v13091_v7 = vadd.f32 %v13090_v6, %v12930_v10  ;;  %v18073_v61 = vpop.f32.mrb[190].mxu1  ;;  %v17848_v32 = vadd.f32 %v17847_v46, %v17846_v43 }
 0x4dc   : > { %v13360_v39 = vadd.f32 %v13359_v3, %v13329_v38  ;;  %v13291_v50 = vadd.f32 %v13290_v23, %v13086_v40  ;;  %v13093_v1 = vpop.f32.mrb[191].mxu1 }
 0x4dd   : > { %v13099_v9 = vadd.f32 %v18072_v60, %v12938_v31  ;;  %v16427_v30 = vpack.c.bf16 %v13091_v7, %v13091_v7  ;;  %v13331_v62 = vmul.f32 %v13091_v7, %v13091_v7  ;;  %v12941_v14 = vadd.f32 %v17848_v32, %v24877_v53 }
 0x4de   : > { %v13292_v49 = vadd.f32 %v13291_v50, %v13091_v7  ;;  %v13361_v19 = vadd.f32 %v13360_v39, %v13330_v41  ;;  %v13094_v45 = vadd.f32 %v13093_v1, %v12933_v20 }
 0x4df   : > { %v16429_v55 = vpack.c.bf16 %v13099_v9, %v13099_v9  ;;  %v13333_v54 = vmul.f32 %v13099_v9, %v13099_v9  ;;  %13261 = vst [vmem:[%s19793_s18 + $0x1cc] sm:$0xf] %v16427_v30  ;;  %v13102_v37 = vadd.f32 %v18073_v61, %v12941_v14  ;;  %v13542_v51 = vpop.f32.mrb[192].mxu0 }
 0x4e0   : > { %v13362_v36 = vadd.f32 %v13361_v19, %v13331_v62  ;;  %v16428_v2 = vpack.c.bf16 %v13094_v45, %v13094_v45  ;;  %v13293_v63 = vadd.f32 %v13292_v49, %v13094_v45  ;;  %v13332_v53 = vmul.f32 %v13094_v45, %v13094_v45  ;;  %v18092_v52 = vpop.f32.mrb[193].mxu0 }
 0x4e1   : > { %13263 = vst [vmem:[%s19793_s18 + $0x1ec] sm:$0xf] %v16429_v55  ;;  %v16430_v47 = vpack.c.bf16 %v13102_v37, %v13102_v37  ;;  %v13548_v57 = vmax.f32 %v13542_v51, 0.0  ;;  %v13545_v8 = vpop.f32.mrb[194].mxu0  ;;  %v24989_v44 = vmul.f32 %v13102_v37, %v13102_v37 }
 0x4e2   : > { %13262 = vst [vmem:[%s19793_s18 + $0x1dc] sm:$0xf] %v16428_v2  ;;  %v13294_v48 = vadd.f32 %v13293_v63, %v13099_v9  ;;  %v13363_v26 = vadd.f32 %v13362_v36, %v13332_v53  ;;  %v18093_v5 = vpop.f32.mrb[195].mxu0 }
 0x4e3   : > { %13264 = vst [vmem:[%s19793_s18 + $0x1fc] sm:$0xf] %v16430_v47  ;;  %13549 = vst [vmem:[%s254_s11] sm:$0x1] %v13548_v57 }
 0x4e4   : > { %v13295_v11 = vadd.f32 %v13294_v48, %v13102_v37  ;;  %v13364_v33 = vadd.f32 %v13363_v26, %v13333_v54 }
 0x4e5   : > { %18490 = shalt.err (!%p18487_p3)
}
 0x4e6   : > { %s18491_s18 = scalar_lea.hbm %s24977_s20, 16  ;;  %s18495_s29 = scalar_lea.hbm %s25096_s5, 32 }
 0x4e7   : > { %p18492_p4 = scmp.ne.s32.totalorder %s24977_s20, %s18491_s18  ;;  %p18496_p9 = scmp.lt.u32.totalorder %s24977_s20, %s25096_s5 }
 0x4e8   : > { %p18497_p10 = scmp.lt.u32.totalorder %s18495_s29, %s18491_s18  ;;  %p18499_p12 = scmp.lt.u32.totalorder %s18491_s18, %s24977_s20 }
 0x4e9   : > { %p18493_p7 = pnand %p18492_p4, %p18683_p5 }
 0x4ea   : > { %p18498_p11 = por %p18497_p10, %p18496_p9 }
 0x4eb   : > { %p18494_p8 = pneg %p18493_p7 }
 0x4ec   : > { %p18500_p13 = por %p18499_p12, %p18498_p11 }
 0x4ee   : > { %p18501_p0 = pnand %p18500_p13, %p18494_p8 }
 0x4f0   : > { %18504 = shalt.err (!%p18501_p0)
}
 0x4f1   : > { %18096 = dma.vmem_to_hbm [thread:$0]  (%p18683_p5), %s24979_s12, 16, %s24977_s20, %s24997_s10  }
 0x4f2   : > { %s13551_s15 = scalar_lea.sflag [#allocation4], %s19655_s19  ;;  %s18505_s28 = scalar_lea.vmem %s24987_s14, 8192 }
 0x4f3   : > { %p18506_p1 = scmp.ne.s32.totalorder %s24987_s14, %s18505_s28  ;;  %s18604_s18 = smov [#allocation3]  }
 0x4f4   : > { %s18509_s9 = sshll.u32 %s18604_s18, 4  ;;  %s18510_s9 = int_to_ptr.vmem [resolvable:$false] %s18509_s9 }
 0x4f5   : > { %p18507_p2 = pnand %p18506_p1, %p18683_p5  ;;  %s18511_s11 = scalar_lea.vmem %s18510_s9, 16384 }
 0x4f6   : > { %p18512_p4 = scmp.lt.s32.totalorder %s24987_s14, %s18510_s9  ;;  %p18513_p7 = scmp.lt.s32.totalorder %s18511_s11, %s18505_s28 }
 0x4f7   : > { %p18508_p3 = pneg %p18507_p2 }
 0x4f8   : > { %p18514_p8 = por %p18513_p7, %p18512_p4 }
 0x4fa   : > { %p18515_p9 = pnand %p18514_p8, %p18508_p3 }
 0x4fc   : > { %18518 = shalt.err (!%p18515_p9)
}
 0x4fd   : > { %s18519_s12 = scalar_lea.hbm %s24985_s26, 8192  ;;  %s18523_s13 = scalar_lea.hbm %s25095_s4, 16384 }
 0x4fe   : > { %p18520_p10 = scmp.ne.s32.totalorder %s24985_s26, %s18519_s12  ;;  %p18524_p13 = scmp.lt.u32.totalorder %s24985_s26, %s25095_s4 }
 0x4ff   : > { %p18525_p0 = scmp.lt.u32.totalorder %s18523_s13, %s18519_s12  ;;  %p18527_p2 = scmp.lt.u32.totalorder %s18519_s12, %s24985_s26 }
 0x500   : > { %p18521_p11 = pnand %p18520_p10, %p18683_p5 }
 0x501   : > { %p18526_p1 = por %p18525_p0, %p18524_p13 }
 0x502   : > { %p18522_p12 = pneg %p18521_p11 }
 0x503   : > { %p18528_p3 = por %p18527_p2, %p18526_p1 }
 0x505   : > { %p18529_p4 = pnand %p18528_p3, %p18522_p12 }
 0x507   : > { %18532 = shalt.err (!%p18529_p4)
}
 0x508   : > { %s18605_s28 = smov 256   ;;  %s18606_s9 = smov 16   ;;  %v13296_v56 = vrot.slane %v13295_v11, 4  ;;  %v13365_v22 = vadd.f32 %v13364_v33, %v24989_v44 }
 0x509   : > { %18095 = dma.vmem_to_hbm [thread:$0]  (%p18683_p5), %s24987_s14, 8192, %s24985_s26, %s13551_s15, %s18605_s28, %s18605_s28, %s18606_s9  }
 0x50a   : > { %v13297_v16 = vadd.f32 %v13296_v56, %v13295_v11  ;;  %v13366_v10 = vrot.slane %v13365_v22, 4  ;;  %s13603_s11 = sshll.u32 %s21193_s16, 4  ;;  %s16432_s12 = sshll.u32 %s18664_s25, 7  ;;  %s25049_s11 = int_to_ptr.vmem [resolvable:$true] %s13603_s11 }
 0x50b   : > { %s13601_s14 = scalar_lea.hbm %s25097_s6, %s16432_s12  ;;  %s18533_s15 = scalar_lea.vmem %s25049_s11, 128 }
 0x50c   : > { %v13298_v24 = vrot.slane %v13297_v16, 2  ;;  %v13367_v13 = vadd.f32 %v13366_v10, %v13365_v22  ;;  %p18534_p7 = scmp.ne.s32.totalorder %s25049_s11, %s18533_s15  ;;  %s18607_s25 = smov [#allocation7]  }
 0x50d   : > { %s18537_s20 = sshll.u32 %s18607_s25, 4  ;;  %s18538_s20 = int_to_ptr.vmem [resolvable:$false] %s18537_s20 }
 0x50e   : > { %v13299_v25 = vadd.f32 %v13298_v24, %v13297_v16  ;;  %v13368_v35 = vrot.slane %v13367_v13, 2  ;;  %p18535_p8 = pnand %p18534_p7, %p18683_p5  ;;  %s18539_s29 = scalar_lea.vmem %s18538_s20, 256 }
 0x50f   : > { %p18540_p10 = scmp.lt.s32.totalorder %s25049_s11, %s18538_s20  ;;  %p18541_p11 = scmp.lt.s32.totalorder %s18539_s29, %s18533_s15 }
 0x510   : > { %v13300_v42 = vrot.slane %v13299_v25, 1  ;;  %v13369_v58 = vadd.f32 %v13368_v35, %v13367_v13  ;;  %p18536_p9 = pneg %p18535_p8 }
 0x511   : > { %p18542_p12 = por %p18541_p11, %p18540_p10 }
 0x512   : > { %v13301_v17 = vadd.f32 %v13300_v42, %v13299_v25  ;;  %v13370_v40 = vrot.slane %v13369_v58, 1 }
 0x513   : > { %p18543_p13 = pnand %p18542_p12, %p18536_p9 }
 0x514   : > { %v13371_v18 = vadd.f32 %v13370_v40, %v13369_v58  ;;  %13302 = vst [vmem:[%s21193_s16 + $0x6] sm:$0x1] %v13301_v17 }
 0x516   : > { %13372 = vst [vmem:[%s21193_s16 + $0x7] sm:$0x1] %v13371_v18 }
 0x517   : > { %18546 = shalt.err (!%p18543_p13)
}
 0x518   : > { %s18547_s13 = scalar_lea.hbm %s13601_s14, 128  ;;  %s18551_s18 = scalar_lea.hbm %s25097_s6, 256 }
 0x519   : > { %p18548_p0 = scmp.ne.s32.totalorder %s13601_s14, %s18547_s13  ;;  %p18552_p3 = scmp.lt.u32.totalorder %s13601_s14, %s25097_s6 }
 0x51a   : > { %p18553_p4 = scmp.lt.u32.totalorder %s18551_s18, %s18547_s13  ;;  %p18555_p8 = scmp.lt.u32.totalorder %s18547_s13, %s13601_s14 }
 0x51b   : > { %p18549_p1 = pnand %p18548_p0, %p18683_p5 }
 0x51c   : > { %p18554_p7 = por %p18553_p4, %p18552_p3 }
 0x51d   : > { %p18550_p2 = pneg %p18549_p1 }
 0x51e   : > { %p18556_p10 = por %p18555_p8, %p18554_p7 }
 0x520   : > { %p18557_p9 = pnand %p18556_p10, %p18550_p2 }
 0x522   : > { %18560 = shalt.err (!%p18557_p9)
}
 0x523   : > { %18097 = dma.vmem_to_hbm [thread:$0]  (%p18683_p5), %s25049_s11, 128, %s13601_s14, %s24997_s10  }
 0x524 PF: > { %p18111_p11 = scmp.ge.s32.totalorder %s18599_s24, 2  ;;  %s13615_s12 = sand.u32 1, %s18587_s21  }
 0x525   : > { %s13616_s26 = scalar_lea.sflag [#allocation4], %s13615_s12 }
 0x526   : > { %p18102_p12 = pnand %p18111_p11, %p18687_p6 }
 0x528   : > { %18578 = dma.done.wait (!%p18102_p12), %s13616_s26, 8192  }
 0x529   : > { %18580 = vsyncadd (!%p18102_p12), %s13616_s26, 4294959104  ;;  %s25246_s19 = sadd.s32 4294967294, %s18599_s24  }
 0x52a   : > { %s13624_s15 = sand.u32 1, %s25246_s19  }
 0x52b   : > { %s13625_s25 = scalar_lea.sflag [#allocation6], %s13624_s15 }
 0x52c   : > { %18582 = dma.done.wait (!%p18102_p12), %s13625_s25, 144  }
 0x52d   : > { %18584 = vsyncadd (!%p18102_p12), %s13625_s25, 4294967152  ;;  %p20_p5 = scmp.ge.s32.totalorder %s18668_s27, 4   ;;  %s25247_s21 = smov %s18591_s22 }
 0x52e   : > { %s25248_s22 = smov %s18595_s23  ;;  %s25249_s23 = smov %s18681_s30 }
 0x52f   : > { %s25250_s24 = smov %s18668_s27  ;;  %22 = sbr.rel (!%p20_p5) target bundleno = 5 (0x5), region = 111 }
 0x536   :  { %13638 = vsyncpa [#allocation4], 1 }
 0x537   :  { %13640 = vsyncpa [#allocation4 + $0x1], 1 }
 0x538   :  { %13641 = vsyncpa [#allocation6], 1 }
 0x539   :  { %13643 = vsyncpa [#allocation6 + $0x1], 1 }

</bundles_post_ra>
